<compile_context>
chip_gen: v5e
topology: v5e:2x2
jax: 0.10.0
libtpu: 0.0.40
codegen_flags: <defaults>
</compile_context>

<pallas_src>
import functools

import numpy as np
import jax
import jax.numpy as jnp
from jax import lax
from jax.experimental import pallas as pl
from jax.experimental.pallas import tpu as pltpu


def _round_up(x, m):
    return ((x + m - 1) // m) * m


def _vmem_capacity_bytes(default=64 << 20):
    try:
        info = pltpu.get_tpu_info()
        cap = int(getattr(info, "vmem_capacity_bytes", 0) or 0)
        if cap > 0:
            return cap
    except Exception:
        pass
    return default


# ----------------------------------------------------------------------------
# Pallas kernel: whole forward pass for one batch tile.
# ----------------------------------------------------------------------------
def _dcdisc_kernel(x_ref, scal_ref, m2_ref, b2_ref, wf1_ref, bfc1_ref, wf2_ref,
                   out_ref, *, c1, k1, chunk1, n2):
    f32 = jnp.float32
    bf16 = jnp.bfloat16
    kk = k1 + 1

    # ---- Stage 1: conv1 + max_pool(2) + leaky_relu(0.01) ---------------------
    # x_ref: (n_slab, bt, chunk1) f32.  Slab t = u*(k1+1)+v holds
    # x[b, 2*ph+u, 2*pw+v] flattened over pooled positions (ph, pw).
    n_slab = x_ref.shape[0]
    slabs = [x_ref[t] for t in range(n_slab)]          # each (bt, chunk1) f32

    pooled = []
    for oc in range(c1):
        w_oc = [scal_ref[(oc * k1 + a) * k1 + c]        # conv1 weights from SMEM
                for a in range(k1) for c in range(k1)]
        qmax = None
        for qh in (0, 1):                               # pooling quadrants
            for qw in (0, 1):
                acc = None
                for a in range(k1):
                    for c in range(k1):
                        term = w_oc[a * k1 + c] * slabs[(qh + a) * kk + (qw + c)]
                        acc = term if acc is None else acc + term
                qmax = acc if qmax is None else jnp.maximum(qmax, acc)
        # bias is constant across the pooling window -> add after the max;
        # leaky_relu is monotone -> apply once on the pooled (4x smaller) map.
        v = qmax + scal_ref[c1 * k1 * k1 + oc]
        pooled.append(jnp.where(v >= 0.0, v, 0.01 * v))  # default slope 0.01

    # ---- Stage 2: conv2 as per-input-channel Toeplitz matmuls (bf16 MXU) -----
    y2 = None
    for ic in range(c1):
        blk = m2_ref[ic * chunk1:(ic + 1) * chunk1, :]   # (chunk1, 4*n2) bf16
        part = jnp.dot(pooled[ic].astype(bf16), blk, preferred_element_type=f32)
        y2 = part if y2 is None else y2 + part
    y2 = y2 + b2_ref[...]
    # max_pool(2): quadrant-blocked columns -> max of four 128-aligned slices
    p2 = jnp.maximum(jnp.maximum(y2[:, 0:n2], y2[:, n2:2 * n2]),
                     jnp.maximum(y2[:, 2 * n2:3 * n2], y2[:, 3 * n2:4 * n2]))
    p2 = jnp.where(p2 >= 0.0, p2, 0.2 * p2)

    # ---- fc1 + leaky_relu(0.2) (bf16 MXU, f32 accumulate / elementwise) ------
    h = jnp.dot(p2.astype(bf16), wf1_ref[...], preferred_element_type=f32) + bfc1_ref[...]
    h = jnp.where(h >= 0.0, h, 0.2 * h)

    # ---- fc2 folded into a lane reduction (single logit) ---------------------
    logit = jnp.sum(h * wf2_ref[...], axis=-1, keepdims=True) \
        + scal_ref[c1 * k1 * k1 + c1]
    # Lane-dense (bt, 128) store; wrapper keeps column 0.
    out_ref[...] = jnp.broadcast_to(logit, out_ref.shape)


# ----------------------------------------------------------------------------
# Host-side (one-time) dense Toeplitz matrix for conv2, columns quadrant-blocked
# so max_pool2d(2) is the max of four aligned slices.  Rows follow the stage-1
# pooled layout: row = ic*chunk_in + ih*win + iw.
# ----------------------------------------------------------------------------
def conv2_pool_dense(W, b, hin, win, chunk_in, n2):
    W = np.asarray(W, np.float32)
    b = np.asarray(b, np.float32)
    cout, cin, kh, kw = W.shape
    hout, wout = hin - kh + 1, win - kw + 1
    hp, wp = hout // 2, wout // 2                       # floor-mode pooling

    M = np.zeros((cin * chunk_in, 4 * n2), np.float32)
    bias = np.zeros((1, 4 * n2), np.float32)

    oh = np.arange(2 * hp)
    ow = np.arange(2 * wp)
    OH, OW = np.meshgrid(oh, ow, indexing="ij")
    q = (OH % 2) * 2 + (OW % 2)
    PH, PW = OH // 2, OW // 2

    for oc in range(cout):
        cols = (q * n2 + (oc * hp + PH) * wp + PW).ravel()
        bias[0, cols] = b[oc]
        for ic in range(cin):
            for a in range(kh):
                for c in range(kw):
                    rows = (ic * chunk_in + (OH + a) * win + OW + c).ravel()
                    M[rows, cols] += W[oc, ic, a, c]
    return M, bias, hp, wp


# ----------------------------------------------------------------------------
# Builder: all weight-table glue hoisted here (runs once); returns a jitted fn.
# ----------------------------------------------------------------------------
def make_discriminator_fn(params, cfg, *, max_batch_tile=256):
    img, k1, c1 = cfg["img_dim"], cfg["size_conv1"], cfg["num_conv1"]
    k2, c2 = cfg["size_conv2"], cfg["num_conv2"]

    hout1 = img - k1 + 1
    hp1 = wp1 = hout1 // 2
    chunk1 = _round_up(hp1 * wp1, 8)                    # per-channel stage-1 chunk
    n_slab = (k1 + 1) ** 2

    hout2 = hp1 - k2 + 1
    hp2 = wp2 = hout2 // 2
    fc1_in = c2 * hp2 * wp2
    assert fc1_in == int(np.asarray(params["Wfc1"]).shape[1])
    n2 = _round_up(fc1_in, 128)                         # conv2 quadrant block width
    nf = _round_up(fc1_in, 128)                         # fc width (lane padded)

    # conv2 Toeplitz (bf16), fc tables, bias rows.
    M2, b2row, hp2_, wp2_ = conv2_pool_dense(params["Wc2"], params["bc2"],
                                             hp1, wp1, chunk1, n2)
    assert (hp2_, wp2_) == (hp2, wp2)

    Wf1 = np.zeros((n2, nf), np.float32)
    Wf1[:fc1_in, :fc1_in] = np.asarray(params["Wfc1"], np.float32).T
    bfc1row = np.zeros((1, nf), np.float32)
    bfc1row[0, :fc1_in] = np.asarray(params["bfc1"], np.float32)
    wf2row = np.zeros((1, nf), np.float32)
    wf2row[0, :fc1_in] = np.asarray(params["Wfc2"], np.float32)[0]

    # conv1 weights + conv1 bias + fc2 bias packed into one SMEM scalar table.
    n_scal = c1 * k1 * k1 + c1 + 1
    scal = np.zeros((n_scal,), np.float32)
    scal[:c1 * k1 * k1] = np.asarray(params["Wc1"], np.float32).reshape(-1)
    scal[c1 * k1 * k1:c1 * k1 * k1 + c1] = np.asarray(params["bc1"], np.float32)
    scal[-1] = float(np.asarray(params["bfc2"]).reshape(-1)[0])

    m2_bf = jnp.asarray(M2, jnp.bfloat16)               # bf16 MXU operands
    wf1_bf = jnp.asarray(Wf1, jnp.bfloat16)
    b2_d = jnp.asarray(b2row)
    bfc1_d = jnp.asarray(bfc1row)
    wf2_d = jnp.asarray(wf2row)
    scal_d = jnp.asarray(scal)

    table_bytes = (m2_bf.size + wf1_bf.size) * 2 + \
                  (b2_d.size + bfc1_d.size + wf2_d.size + scal_d.size) * 4
    vmem_cap = _vmem_capacity_bytes()

    kernel = functools.partial(_dcdisc_kernel, c1=c1, k1=k1, chunk1=chunk1, n2=n2)

    @jax.jit
    def forward(x):
        B = x.shape[0]
        bt = min(max_batch_tile, _round_up(B, 8))       # batch tile (rows)
        B_pad = _round_up(B, bt)

        # Polyphase slab extraction (XLA, on a tiny input): slab[u,v][b, ph*wp1+pw]
        # = x[b, 2*ph+u, 2*pw+v].  This replaces the 9.2 MB conv1 Toeplitz DMA.
        ximg = x.reshape(x.shape[0], img, img).astype(jnp.float32)
        slabs = []
        for u in range(k1 + 1):
            for v in range(k1 + 1):
                s = ximg[:, u:u + 2 * hp1:2, v:v + 2 * wp1:2].reshape(B, hp1 * wp1)
                if chunk1 > hp1 * wp1:
                    s = jnp.pad(s, ((0, 0), (0, chunk1 - hp1 * wp1)))
                slabs.append(s)
        xslab = jnp.stack(slabs, axis=0)                # (n_slab, B, chunk1)
        if B_pad > B:
            xslab = jnp.pad(xslab, ((0, 0), (0, B_pad - B), (0, 0)))

        grid = (B_pad // bt,)

        slab_tile_bytes = n_slab * bt * chunk1 * 4
        out_tile_bytes = bt * nf * 4
        flops = 2 * B_pad * (4 * c1 * k1 * k1 * chunk1 + c1 * chunk1 * 4 * n2
                             + n2 * nf + nf)
        cost = pl.CostEstimate(
            flops=int(flops), transcendentals=0,
            bytes_accessed=int(table_bytes + B_pad * (n_slab * chunk1 + nf) * 4))
        vmem_limit = int(min(vmem_cap * 3 // 4,
                             max(16 << 20,
                                 2 * (table_bytes + slab_tile_bytes + out_tile_bytes)
                                 + (4 << 20))))

        out = pl.pallas_call(
            kernel,
            out_shape=jax.ShapeDtypeStruct((B_pad, nf), jnp.float32),
            grid=grid,
            in_specs=[
                # batch-tiled polyphase slabs
                pl.BlockSpec((n_slab, bt, chunk1), lambda i: (0, i, 0)),
                # conv1 weights / biases + fc2 bias: SMEM scalar table
                pl.BlockSpec(memory_space=pltpu.MemorySpace.SMEM),
                # weight tables: constant index_map -> stay resident per core
                pl.BlockSpec((c1 * chunk1, 4 * n2), lambda i: (0, 0)),
                pl.BlockSpec((1, 4 * n2), lambda i: (0, 0)),
                pl.BlockSpec((n2, nf), lambda i: (0, 0)),
                pl.BlockSpec((1, nf), lambda i: (0, 0)),
                pl.BlockSpec((1, nf), lambda i: (0, 0)),
            ],
            out_specs=pl.BlockSpec((bt, nf), lambda i: (i, 0)),
            compiler_params=pltpu.CompilerParams(
                dimension_semantics=("parallel",),      # v7x: split batch over 2 TCs
                vmem_limit_bytes=vmem_limit),
            cost_estimate=cost,
        )(xslab, scal_d, m2_bf, b2_d, wf1_bf, bfc1_d, wf2_d)
        return out[:B, :1]                              # (B, 1) logits

    return forward


# ----------------------------------------------------------------------------
# Pure-JAX reference (spec: PyTorch DCDiscriminator.forward), f32 everywhere.
# ----------------------------------------------------------------------------
def reference_forward(params, x):
    hp = lax.Precision.HIGHEST

    def leaky(v, s):
        return jnp.where(v >= 0, v, s * v)

    def pool(v):
        return lax.reduce_window(v, -jnp.inf, lax.max,
                                 (1, 1, 2, 2), (1, 1, 2, 2), "VALID")

    y = lax.conv_general_dilated(x, params["Wc1"], (1, 1), "VALID",
                                 dimension_numbers=("NCHW", "OIHW", "NCHW"),
                                 precision=hp)
    y = pool(leaky(y + params["bc1"][None, :, None, None], 0.01))
    y = lax.conv_general_dilated(y, params["Wc2"], (1, 1), "VALID",
                                 dimension_numbers=("NCHW", "OIHW", "NCHW"),
                                 precision=hp)
    y = pool(leaky(y + params["bc2"][None, :, None, None], 0.2))
    h = y.reshape(y.shape[0], -1)
    h = leaky(jnp.dot(h, params["Wfc1"].T, precision=hp) + params["bfc1"], 0.2)
    return jnp.dot(h, params["Wfc2"].T, precision=hp) + params["bfc2"]


# ----------------------------------------------------------------------------
# Deterministic synthetic parameters (PyTorch layout conventions)
# ----------------------------------------------------------------------------
def make_params(key, cfg):
    ks = jax.random.split(key, 8)
    c1, k1 = cfg["num_conv1"], cfg["size_conv1"]
    c2, k2 = cfg["num_conv2"], cfg["size_conv2"]
    conv2_out_w = (1 + ((1 + (cfg["img_dim"] - k1)) // 2 - k2)) // 2
    fc1_in = conv2_out_w * conv2_out_w * c2
    p = {}
    p["Wc1"] = 0.2 * jax.random.normal(ks[0], (c1, 1, k1, k1), jnp.float32)
    p["bc1"] = 0.05 * jax.random.normal(ks[1], (c1,), jnp.float32)
    p["Wc2"] = 0.2 * jax.random.normal(ks[2], (c2, c1, k2, k2), jnp.float32)
    p["bc2"] = 0.05 * jax.random.normal(ks[3], (c2,), jnp.float32)
    p["Wfc1"] = 0.1 * jax.random.normal(ks[4], (fc1_in, fc1_in), jnp.float32)
    p["bfc1"] = 0.05 * jax.random.normal(ks[5], (fc1_in,), jnp.float32)
    p["Wfc2"] = 0.1 * jax.random.normal(ks[6], (1, fc1_in), jnp.float32)
    p["bfc2"] = 0.05 * jax.random.normal(ks[7], (1,), jnp.float32)
    return p


if __name__ == "__main__":
    # img_dim=28, k=5 -> conv1: 24x24 -> pool 12x12 -> conv2: 8x8 -> pool 4x4
    # fc1_in = 8*4*4 = 128 (lane-aligned by construction)
    cfg = dict(img_dim=28, num_conv1=4, size_conv1=5, num_conv2=8, size_conv2=5)
    B = 8

    key = jax.random.PRNGKey(0)
    k_param, k_x = jax.random.split(key)
    params = make_params(k_param, cfg)
    x = jax.random.normal(k_x, (B, 1, cfg["img_dim"], cfg["img_dim"]), jnp.float32)

    forward = make_discriminator_fn(params, cfg)   # one-time table build + jit
    out = jax.block_until_ready(forward(x))

    ref = jax.block_until_ready(reference_forward(params, x))
    assert out.shape == (B, 1), out.shape
    # conv2 / fc1 weight tables + their matmul operands are bf16 (per perf
    # review); accumulation is f32, so ~1% relative error vs. the f32 reference.
    np.testing.assert_allclose(np.asarray(out), np.asarray(ref), rtol=2e-2, atol=2e-2)

    print("KERNEL_OK")
</pallas_src>

<mosaic_0001>
module attributes {stable_mosaic.version = 11 : i64} {
  func.func @_dcdisc_kernel(%arg0: i32, %arg1: memref<36x8x144xf32, #tpu.memory_space<vmem>>, %arg2: memref<105xf32, #tpu.memory_space<smem>>, %arg3: memref<576x512xbf16, #tpu.memory_space<vmem>>, %arg4: memref<1x512xf32, #tpu.memory_space<vmem>>, %arg5: memref<128x128xbf16, #tpu.memory_space<vmem>>, %arg6: memref<1x128xf32, #tpu.memory_space<vmem>>, %arg7: memref<1x128xf32, #tpu.memory_space<vmem>>, %arg8: memref<8x128xf32, #tpu.memory_space<vmem>>) attributes {dimension_semantics = [#tpu.dimension_semantics<parallel>], iteration_bounds = array<i64: 1>, scalar_prefetch = 0 : i64, scratch_operands = 0 : i64, tpu.core_type = #tpu.core_type<tc>, window_params = [{transform_indices = @transform_0, window_bounds = array<i64: 36, 8, 144>}, {transform_indices = @transform_1, window_bounds = array<i64: 105>}, {pipeline_mode = #tpu.pipeline_mode<synchronous>, transform_indices = @transform_2, window_bounds = array<i64: 576, 512>}, {pipeline_mode = #tpu.pipeline_mode<synchronous>, transform_indices = @transform_3, window_bounds = array<i64: 1, 512>}, {pipeline_mode = #tpu.pipeline_mode<synchronous>, transform_indices = @transform_4, window_bounds = array<i64: 128, 128>}, {pipeline_mode = #tpu.pipeline_mode<synchronous>, transform_indices = @transform_5, window_bounds = array<i64: 1, 128>}, {pipeline_mode = #tpu.pipeline_mode<synchronous>, transform_indices = @transform_6, window_bounds = array<i64: 1, 128>}, {transform_indices = @transform_7, window_bounds = array<i64: 8, 128>}]} {
    %c0 = arith.constant 0 : index
    %c0_0 = arith.constant 0 : index
    %c0_1 = arith.constant 0 : index
    %0 = vector.load %arg1[%c0, %c0_0, %c0_1] : memref<36x8x144xf32, #tpu.memory_space<vmem>>, vector<1x8x144xf32>
    %1 = vector.shape_cast %0 : vector<1x8x144xf32> to vector<8x144xf32>
    %c1 = arith.constant 1 : index
    %c0_2 = arith.constant 0 : index
    %c0_3 = arith.constant 0 : index
    %2 = vector.load %arg1[%c1, %c0_2, %c0_3] : memref<36x8x144xf32, #tpu.memory_space<vmem>>, vector<1x8x144xf32>
    %3 = vector.shape_cast %2 : vector<1x8x144xf32> to vector<8x144xf32>
    %c2 = arith.constant 2 : index
    %c0_4 = arith.constant 0 : index
    %c0_5 = arith.constant 0 : index
    %4 = vector.load %arg1[%c2, %c0_4, %c0_5] : memref<36x8x144xf32, #tpu.memory_space<vmem>>, vector<1x8x144xf32>
    %5 = vector.shape_cast %4 : vector<1x8x144xf32> to vector<8x144xf32>
    %c3 = arith.constant 3 : index
    %c0_6 = arith.constant 0 : index
    %c0_7 = arith.constant 0 : index
    %6 = vector.load %arg1[%c3, %c0_6, %c0_7] : memref<36x8x144xf32, #tpu.memory_space<vmem>>, vector<1x8x144xf32>
    %7 = vector.shape_cast %6 : vector<1x8x144xf32> to vector<8x144xf32>
    %c4 = arith.constant 4 : index
    %c0_8 = arith.constant 0 : index
    %c0_9 = arith.constant 0 : index
    %8 = vector.load %arg1[%c4, %c0_8, %c0_9] : memref<36x8x144xf32, #tpu.memory_space<vmem>>, vector<1x8x144xf32>
    %9 = vector.shape_cast %8 : vector<1x8x144xf32> to vector<8x144xf32>
    %c5 = arith.constant 5 : index
    %c0_10 = arith.constant 0 : index
    %c0_11 = arith.constant 0 : index
    %10 = vector.load %arg1[%c5, %c0_10, %c0_11] : memref<36x8x144xf32, #tpu.memory_space<vmem>>, vector<1x8x144xf32>
    %11 = vector.shape_cast %10 : vector<1x8x144xf32> to vector<8x144xf32>
    %c6 = arith.constant 6 : index
    %c0_12 = arith.constant 0 : index
    %c0_13 = arith.constant 0 : index
    %12 = vector.load %arg1[%c6, %c0_12, %c0_13] : memref<36x8x144xf32, #tpu.memory_space<vmem>>, vector<1x8x144xf32>
    %13 = vector.shape_cast %12 : vector<1x8x144xf32> to vector<8x144xf32>
    %c7 = arith.constant 7 : index
    %c0_14 = arith.constant 0 : index
    %c0_15 = arith.constant 0 : index
    %14 = vector.load %arg1[%c7, %c0_14, %c0_15] : memref<36x8x144xf32, #tpu.memory_space<vmem>>, vector<1x8x144xf32>
    %15 = vector.shape_cast %14 : vector<1x8x144xf32> to vector<8x144xf32>
    %c8 = arith.constant 8 : index
    %c0_16 = arith.constant 0 : index
    %c0_17 = arith.constant 0 : index
    %16 = vector.load %arg1[%c8, %c0_16, %c0_17] : memref<36x8x144xf32, #tpu.memory_space<vmem>>, vector<1x8x144xf32>
    %17 = vector.shape_cast %16 : vector<1x8x144xf32> to vector<8x144xf32>
    %c9 = arith.constant 9 : index
    %c0_18 = arith.constant 0 : index
    %c0_19 = arith.constant 0 : index
    %18 = vector.load %arg1[%c9, %c0_18, %c0_19] : memref<36x8x144xf32, #tpu.memory_space<vmem>>, vector<1x8x144xf32>
    %19 = vector.shape_cast %18 : vector<1x8x144xf32> to vector<8x144xf32>
    %c10 = arith.constant 10 : index
    %c0_20 = arith.constant 0 : index
    %c0_21 = arith.constant 0 : index
    %20 = vector.load %arg1[%c10, %c0_20, %c0_21] : memref<36x8x144xf32, #tpu.memory_space<vmem>>, vector<1x8x144xf32>
    %21 = vector.shape_cast %20 : vector<1x8x144xf32> to vector<8x144xf32>
    %c11 = arith.constant 11 : index
    %c0_22 = arith.constant 0 : index
    %c0_23 = arith.constant 0 : index
    %22 = vector.load %arg1[%c11, %c0_22, %c0_23] : memref<36x8x144xf32, #tpu.memory_space<vmem>>, vector<1x8x144xf32>
    %23 = vector.shape_cast %22 : vector<1x8x144xf32> to vector<8x144xf32>
    %c12 = arith.constant 12 : index
    %c0_24 = arith.constant 0 : index
    %c0_25 = arith.constant 0 : index
    %24 = vector.load %arg1[%c12, %c0_24, %c0_25] : memref<36x8x144xf32, #tpu.memory_space<vmem>>, vector<1x8x144xf32>
    %25 = vector.shape_cast %24 : vector<1x8x144xf32> to vector<8x144xf32>
    %c13 = arith.constant 13 : index
    %c0_26 = arith.constant 0 : index
    %c0_27 = arith.constant 0 : index
    %26 = vector.load %arg1[%c13, %c0_26, %c0_27] : memref<36x8x144xf32, #tpu.memory_space<vmem>>, vector<1x8x144xf32>
    %27 = vector.shape_cast %26 : vector<1x8x144xf32> to vector<8x144xf32>
    %c14 = arith.constant 14 : index
    %c0_28 = arith.constant 0 : index
    %c0_29 = arith.constant 0 : index
    %28 = vector.load %arg1[%c14, %c0_28, %c0_29] : memref<36x8x144xf32, #tpu.memory_space<vmem>>, vector<1x8x144xf32>
    %29 = vector.shape_cast %28 : vector<1x8x144xf32> to vector<8x144xf32>
    %c15 = arith.constant 15 : index
    %c0_30 = arith.constant 0 : index
    %c0_31 = arith.constant 0 : index
    %30 = vector.load %arg1[%c15, %c0_30, %c0_31] : memref<36x8x144xf32, #tpu.memory_space<vmem>>, vector<1x8x144xf32>
    %31 = vector.shape_cast %30 : vector<1x8x144xf32> to vector<8x144xf32>
    %c16 = arith.constant 16 : index
    %c0_32 = arith.constant 0 : index
    %c0_33 = arith.constant 0 : index
    %32 = vector.load %arg1[%c16, %c0_32, %c0_33] : memref<36x8x144xf32, #tpu.memory_space<vmem>>, vector<1x8x144xf32>
    %33 = vector.shape_cast %32 : vector<1x8x144xf32> to vector<8x144xf32>
    %c17 = arith.constant 17 : index
    %c0_34 = arith.constant 0 : index
    %c0_35 = arith.constant 0 : index
    %34 = vector.load %arg1[%c17, %c0_34, %c0_35] : memref<36x8x144xf32, #tpu.memory_space<vmem>>, vector<1x8x144xf32>
    %35 = vector.shape_cast %34 : vector<1x8x144xf32> to vector<8x144xf32>
    %c18 = arith.constant 18 : index
    %c0_36 = arith.constant 0 : index
    %c0_37 = arith.constant 0 : index
    %36 = vector.load %arg1[%c18, %c0_36, %c0_37] : memref<36x8x144xf32, #tpu.memory_space<vmem>>, vector<1x8x144xf32>
    %37 = vector.shape_cast %36 : vector<1x8x144xf32> to vector<8x144xf32>
    %c19 = arith.constant 19 : index
    %c0_38 = arith.constant 0 : index
    %c0_39 = arith.constant 0 : index
    %38 = vector.load %arg1[%c19, %c0_38, %c0_39] : memref<36x8x144xf32, #tpu.memory_space<vmem>>, vector<1x8x144xf32>
    %39 = vector.shape_cast %38 : vector<1x8x144xf32> to vector<8x144xf32>
    %c20 = arith.constant 20 : index
    %c0_40 = arith.constant 0 : index
    %c0_41 = arith.constant 0 : index
    %40 = vector.load %arg1[%c20, %c0_40, %c0_41] : memref<36x8x144xf32, #tpu.memory_space<vmem>>, vector<1x8x144xf32>
    %41 = vector.shape_cast %40 : vector<1x8x144xf32> to vector<8x144xf32>
    %c21 = arith.constant 21 : index
    %c0_42 = arith.constant 0 : index
    %c0_43 = arith.constant 0 : index
    %42 = vector.load %arg1[%c21, %c0_42, %c0_43] : memref<36x8x144xf32, #tpu.memory_space<vmem>>, vector<1x8x144xf32>
    %43 = vector.shape_cast %42 : vector<1x8x144xf32> to vector<8x144xf32>
    %c22 = arith.constant 22 : index
    %c0_44 = arith.constant 0 : index
    %c0_45 = arith.constant 0 : index
    %44 = vector.load %arg1[%c22, %c0_44, %c0_45] : memref<36x8x144xf32, #tpu.memory_space<vmem>>, vector<1x8x144xf32>
    %45 = vector.shape_cast %44 : vector<1x8x144xf32> to vector<8x144xf32>
    %c23 = arith.constant 23 : index
    %c0_46 = arith.constant 0 : index
    %c0_47 = arith.constant 0 : index
    %46 = vector.load %arg1[%c23, %c0_46, %c0_47] : memref<36x8x144xf32, #tpu.memory_space<vmem>>, vector<1x8x144xf32>
    %47 = vector.shape_cast %46 : vector<1x8x144xf32> to vector<8x144xf32>
    %c24 = arith.constant 24 : index
    %c0_48 = arith.constant 0 : index
    %c0_49 = arith.constant 0 : index
    %48 = vector.load %arg1[%c24, %c0_48, %c0_49] : memref<36x8x144xf32, #tpu.memory_space<vmem>>, vector<1x8x144xf32>
    %49 = vector.shape_cast %48 : vector<1x8x144xf32> to vector<8x144xf32>
    %c25 = arith.constant 25 : index
    %c0_50 = arith.constant 0 : index
    %c0_51 = arith.constant 0 : index
    %50 = vector.load %arg1[%c25, %c0_50, %c0_51] : memref<36x8x144xf32, #tpu.memory_space<vmem>>, vector<1x8x144xf32>
    %51 = vector.shape_cast %50 : vector<1x8x144xf32> to vector<8x144xf32>
    %c26 = arith.constant 26 : index
    %c0_52 = arith.constant 0 : index
    %c0_53 = arith.constant 0 : index
    %52 = vector.load %arg1[%c26, %c0_52, %c0_53] : memref<36x8x144xf32, #tpu.memory_space<vmem>>, vector<1x8x144xf32>
    %53 = vector.shape_cast %52 : vector<1x8x144xf32> to vector<8x144xf32>
    %c27 = arith.constant 27 : index
    %c0_54 = arith.constant 0 : index
    %c0_55 = arith.constant 0 : index
    %54 = vector.load %arg1[%c27, %c0_54, %c0_55] : memref<36x8x144xf32, #tpu.memory_space<vmem>>, vector<1x8x144xf32>
    %55 = vector.shape_cast %54 : vector<1x8x144xf32> to vector<8x144xf32>
    %c28 = arith.constant 28 : index
    %c0_56 = arith.constant 0 : index
    %c0_57 = arith.constant 0 : index
    %56 = vector.load %arg1[%c28, %c0_56, %c0_57] : memref<36x8x144xf32, #tpu.memory_space<vmem>>, vector<1x8x144xf32>
    %57 = vector.shape_cast %56 : vector<1x8x144xf32> to vector<8x144xf32>
    %c29 = arith.constant 29 : index
    %c0_58 = arith.constant 0 : index
    %c0_59 = arith.constant 0 : index
    %58 = vector.load %arg1[%c29, %c0_58, %c0_59] : memref<36x8x144xf32, #tpu.memory_space<vmem>>, vector<1x8x144xf32>
    %59 = vector.shape_cast %58 : vector<1x8x144xf32> to vector<8x144xf32>
    %c30 = arith.constant 30 : index
    %c0_60 = arith.constant 0 : index
    %c0_61 = arith.constant 0 : index
    %60 = vector.load %arg1[%c30, %c0_60, %c0_61] : memref<36x8x144xf32, #tpu.memory_space<vmem>>, vector<1x8x144xf32>
    %61 = vector.shape_cast %60 : vector<1x8x144xf32> to vector<8x144xf32>
    %c31 = arith.constant 31 : index
    %c0_62 = arith.constant 0 : index
    %c0_63 = arith.constant 0 : index
    %62 = vector.load %arg1[%c31, %c0_62, %c0_63] : memref<36x8x144xf32, #tpu.memory_space<vmem>>, vector<1x8x144xf32>
    %63 = vector.shape_cast %62 : vector<1x8x144xf32> to vector<8x144xf32>
    %c32 = arith.constant 32 : index
    %c0_64 = arith.constant 0 : index
    %c0_65 = arith.constant 0 : index
    %64 = vector.load %arg1[%c32, %c0_64, %c0_65] : memref<36x8x144xf32, #tpu.memory_space<vmem>>, vector<1x8x144xf32>
    %65 = vector.shape_cast %64 : vector<1x8x144xf32> to vector<8x144xf32>
    %c33 = arith.constant 33 : index
    %c0_66 = arith.constant 0 : index
    %c0_67 = arith.constant 0 : index
    %66 = vector.load %arg1[%c33, %c0_66, %c0_67] : memref<36x8x144xf32, #tpu.memory_space<vmem>>, vector<1x8x144xf32>
    %67 = vector.shape_cast %66 : vector<1x8x144xf32> to vector<8x144xf32>
    %c34 = arith.constant 34 : index
    %c0_68 = arith.constant 0 : index
    %c0_69 = arith.constant 0 : index
    %68 = vector.load %arg1[%c34, %c0_68, %c0_69] : memref<36x8x144xf32, #tpu.memory_space<vmem>>, vector<1x8x144xf32>
    %69 = vector.shape_cast %68 : vector<1x8x144xf32> to vector<8x144xf32>
    %c35 = arith.constant 35 : index
    %c0_70 = arith.constant 0 : index
    %c0_71 = arith.constant 0 : index
    %70 = vector.load %arg1[%c35, %c0_70, %c0_71] : memref<36x8x144xf32, #tpu.memory_space<vmem>>, vector<1x8x144xf32>
    %71 = vector.shape_cast %70 : vector<1x8x144xf32> to vector<8x144xf32>
    %c0_72 = arith.constant 0 : index
    %72 = memref.load %arg2[%c0_72] : memref<105xf32, #tpu.memory_space<smem>>
    %c1_73 = arith.constant 1 : index
    %73 = memref.load %arg2[%c1_73] : memref<105xf32, #tpu.memory_space<smem>>
    %c2_74 = arith.constant 2 : index
    %74 = memref.load %arg2[%c2_74] : memref<105xf32, #tpu.memory_space<smem>>
    %c3_75 = arith.constant 3 : index
    %75 = memref.load %arg2[%c3_75] : memref<105xf32, #tpu.memory_space<smem>>
    %c4_76 = arith.constant 4 : index
    %76 = memref.load %arg2[%c4_76] : memref<105xf32, #tpu.memory_space<smem>>
    %c5_77 = arith.constant 5 : index
    %77 = memref.load %arg2[%c5_77] : memref<105xf32, #tpu.memory_space<smem>>
    %c6_78 = arith.constant 6 : index
    %78 = memref.load %arg2[%c6_78] : memref<105xf32, #tpu.memory_space<smem>>
    %c7_79 = arith.constant 7 : index
    %79 = memref.load %arg2[%c7_79] : memref<105xf32, #tpu.memory_space<smem>>
    %c8_80 = arith.constant 8 : index
    %80 = memref.load %arg2[%c8_80] : memref<105xf32, #tpu.memory_space<smem>>
    %c9_81 = arith.constant 9 : index
    %81 = memref.load %arg2[%c9_81] : memref<105xf32, #tpu.memory_space<smem>>
    %c10_82 = arith.constant 10 : index
    %82 = memref.load %arg2[%c10_82] : memref<105xf32, #tpu.memory_space<smem>>
    %c11_83 = arith.constant 11 : index
    %83 = memref.load %arg2[%c11_83] : memref<105xf32, #tpu.memory_space<smem>>
    %c12_84 = arith.constant 12 : index
    %84 = memref.load %arg2[%c12_84] : memref<105xf32, #tpu.memory_space<smem>>
    %c13_85 = arith.constant 13 : index
    %85 = memref.load %arg2[%c13_85] : memref<105xf32, #tpu.memory_space<smem>>
    %c14_86 = arith.constant 14 : index
    %86 = memref.load %arg2[%c14_86] : memref<105xf32, #tpu.memory_space<smem>>
    %c15_87 = arith.constant 15 : index
    %87 = memref.load %arg2[%c15_87] : memref<105xf32, #tpu.memory_space<smem>>
    %c16_88 = arith.constant 16 : index
    %88 = memref.load %arg2[%c16_88] : memref<105xf32, #tpu.memory_space<smem>>
    %c17_89 = arith.constant 17 : index
    %89 = memref.load %arg2[%c17_89] : memref<105xf32, #tpu.memory_space<smem>>
    %c18_90 = arith.constant 18 : index
    %90 = memref.load %arg2[%c18_90] : memref<105xf32, #tpu.memory_space<smem>>
    %c19_91 = arith.constant 19 : index
    %91 = memref.load %arg2[%c19_91] : memref<105xf32, #tpu.memory_space<smem>>
    %c20_92 = arith.constant 20 : index
    %92 = memref.load %arg2[%c20_92] : memref<105xf32, #tpu.memory_space<smem>>
    %c21_93 = arith.constant 21 : index
    %93 = memref.load %arg2[%c21_93] : memref<105xf32, #tpu.memory_space<smem>>
    %c22_94 = arith.constant 22 : index
    %94 = memref.load %arg2[%c22_94] : memref<105xf32, #tpu.memory_space<smem>>
    %c23_95 = arith.constant 23 : index
    %95 = memref.load %arg2[%c23_95] : memref<105xf32, #tpu.memory_space<smem>>
    %c24_96 = arith.constant 24 : index
    %96 = memref.load %arg2[%c24_96] : memref<105xf32, #tpu.memory_space<smem>>
    %97 = vector.broadcast %72 : f32 to vector<8x144xf32>
    %98 = arith.mulf %97, %1 : vector<8x144xf32>
    %99 = vector.broadcast %73 : f32 to vector<8x144xf32>
    %100 = arith.mulf %99, %3 : vector<8x144xf32>
    %101 = arith.addf %98, %100 : vector<8x144xf32>
    %102 = vector.broadcast %74 : f32 to vector<8x144xf32>
    %103 = arith.mulf %102, %5 : vector<8x144xf32>
    %104 = arith.addf %101, %103 : vector<8x144xf32>
    %105 = vector.broadcast %75 : f32 to vector<8x144xf32>
    %106 = arith.mulf %105, %7 : vector<8x144xf32>
    %107 = arith.addf %104, %106 : vector<8x144xf32>
    %108 = vector.broadcast %76 : f32 to vector<8x144xf32>
    %109 = arith.mulf %108, %9 : vector<8x144xf32>
    %110 = arith.addf %107, %109 : vector<8x144xf32>
    %111 = vector.broadcast %77 : f32 to vector<8x144xf32>
    %112 = arith.mulf %111, %13 : vector<8x144xf32>
    %113 = arith.addf %110, %112 : vector<8x144xf32>
    %114 = vector.broadcast %78 : f32 to vector<8x144xf32>
    %115 = arith.mulf %114, %15 : vector<8x144xf32>
    %116 = arith.addf %113, %115 : vector<8x144xf32>
    %117 = vector.broadcast %79 : f32 to vector<8x144xf32>
    %118 = arith.mulf %117, %17 : vector<8x144xf32>
    %119 = arith.addf %116, %118 : vector<8x144xf32>
    %120 = vector.broadcast %80 : f32 to vector<8x144xf32>
    %121 = arith.mulf %120, %19 : vector<8x144xf32>
    %122 = arith.addf %119, %121 : vector<8x144xf32>
    %123 = vector.broadcast %81 : f32 to vector<8x144xf32>
    %124 = arith.mulf %123, %21 : vector<8x144xf32>
    %125 = arith.addf %122, %124 : vector<8x144xf32>
    %126 = vector.broadcast %82 : f32 to vector<8x144xf32>
    %127 = arith.mulf %126, %25 : vector<8x144xf32>
    %128 = arith.addf %125, %127 : vector<8x144xf32>
    %129 = vector.broadcast %83 : f32 to vector<8x144xf32>
    %130 = arith.mulf %129, %27 : vector<8x144xf32>
    %131 = arith.addf %128, %130 : vector<8x144xf32>
    %132 = vector.broadcast %84 : f32 to vector<8x144xf32>
    %133 = arith.mulf %132, %29 : vector<8x144xf32>
    %134 = arith.addf %131, %133 : vector<8x144xf32>
    %135 = vector.broadcast %85 : f32 to vector<8x144xf32>
    %136 = arith.mulf %135, %31 : vector<8x144xf32>
    %137 = arith.addf %134, %136 : vector<8x144xf32>
    %138 = vector.broadcast %86 : f32 to vector<8x144xf32>
    %139 = arith.mulf %138, %33 : vector<8x144xf32>
    %140 = arith.addf %137, %139 : vector<8x144xf32>
    %141 = vector.broadcast %87 : f32 to vector<8x144xf32>
    %142 = arith.mulf %141, %37 : vector<8x144xf32>
    %143 = arith.addf %140, %142 : vector<8x144xf32>
    %144 = vector.broadcast %88 : f32 to vector<8x144xf32>
    %145 = arith.mulf %144, %39 : vector<8x144xf32>
    %146 = arith.addf %143, %145 : vector<8x144xf32>
    %147 = vector.broadcast %89 : f32 to vector<8x144xf32>
    %148 = arith.mulf %147, %41 : vector<8x144xf32>
    %149 = arith.addf %146, %148 : vector<8x144xf32>
    %150 = vector.broadcast %90 : f32 to vector<8x144xf32>
    %151 = arith.mulf %150, %43 : vector<8x144xf32>
    %152 = arith.addf %149, %151 : vector<8x144xf32>
    %153 = vector.broadcast %91 : f32 to vector<8x144xf32>
    %154 = arith.mulf %153, %45 : vector<8x144xf32>
    %155 = arith.addf %152, %154 : vector<8x144xf32>
    %156 = vector.broadcast %92 : f32 to vector<8x144xf32>
    %157 = arith.mulf %156, %49 : vector<8x144xf32>
    %158 = arith.addf %155, %157 : vector<8x144xf32>
    %159 = vector.broadcast %93 : f32 to vector<8x144xf32>
    %160 = arith.mulf %159, %51 : vector<8x144xf32>
    %161 = arith.addf %158, %160 : vector<8x144xf32>
    %162 = vector.broadcast %94 : f32 to vector<8x144xf32>
    %163 = arith.mulf %162, %53 : vector<8x144xf32>
    %164 = arith.addf %161, %163 : vector<8x144xf32>
    %165 = vector.broadcast %95 : f32 to vector<8x144xf32>
    %166 = arith.mulf %165, %55 : vector<8x144xf32>
    %167 = arith.addf %164, %166 : vector<8x144xf32>
    %168 = vector.broadcast %96 : f32 to vector<8x144xf32>
    %169 = arith.mulf %168, %57 : vector<8x144xf32>
    %170 = arith.addf %167, %169 : vector<8x144xf32>
    %171 = vector.broadcast %72 : f32 to vector<8x144xf32>
    %172 = arith.mulf %171, %3 : vector<8x144xf32>
    %173 = vector.broadcast %73 : f32 to vector<8x144xf32>
    %174 = arith.mulf %173, %5 : vector<8x144xf32>
    %175 = arith.addf %172, %174 : vector<8x144xf32>
    %176 = vector.broadcast %74 : f32 to vector<8x144xf32>
    %177 = arith.mulf %176, %7 : vector<8x144xf32>
    %178 = arith.addf %175, %177 : vector<8x144xf32>
    %179 = vector.broadcast %75 : f32 to vector<8x144xf32>
    %180 = arith.mulf %179, %9 : vector<8x144xf32>
    %181 = arith.addf %178, %180 : vector<8x144xf32>
    %182 = vector.broadcast %76 : f32 to vector<8x144xf32>
    %183 = arith.mulf %182, %11 : vector<8x144xf32>
    %184 = arith.addf %181, %183 : vector<8x144xf32>
    %185 = vector.broadcast %77 : f32 to vector<8x144xf32>
    %186 = arith.mulf %185, %15 : vector<8x144xf32>
    %187 = arith.addf %184, %186 : vector<8x144xf32>
    %188 = vector.broadcast %78 : f32 to vector<8x144xf32>
    %189 = arith.mulf %188, %17 : vector<8x144xf32>
    %190 = arith.addf %187, %189 : vector<8x144xf32>
    %191 = vector.broadcast %79 : f32 to vector<8x144xf32>
    %192 = arith.mulf %191, %19 : vector<8x144xf32>
    %193 = arith.addf %190, %192 : vector<8x144xf32>
    %194 = vector.broadcast %80 : f32 to vector<8x144xf32>
    %195 = arith.mulf %194, %21 : vector<8x144xf32>
    %196 = arith.addf %193, %195 : vector<8x144xf32>
    %197 = vector.broadcast %81 : f32 to vector<8x144xf32>
    %198 = arith.mulf %197, %23 : vector<8x144xf32>
    %199 = arith.addf %196, %198 : vector<8x144xf32>
    %200 = vector.broadcast %82 : f32 to vector<8x144xf32>
    %201 = arith.mulf %200, %27 : vector<8x144xf32>
    %202 = arith.addf %199, %201 : vector<8x144xf32>
    %203 = vector.broadcast %83 : f32 to vector<8x144xf32>
    %204 = arith.mulf %203, %29 : vector<8x144xf32>
    %205 = arith.addf %202, %204 : vector<8x144xf32>
    %206 = vector.broadcast %84 : f32 to vector<8x144xf32>
    %207 = arith.mulf %206, %31 : vector<8x144xf32>
    %208 = arith.addf %205, %207 : vector<8x144xf32>
    %209 = vector.broadcast %85 : f32 to vector<8x144xf32>
    %210 = arith.mulf %209, %33 : vector<8x144xf32>
    %211 = arith.addf %208, %210 : vector<8x144xf32>
    %212 = vector.broadcast %86 : f32 to vector<8x144xf32>
    %213 = arith.mulf %212, %35 : vector<8x144xf32>
    %214 = arith.addf %211, %213 : vector<8x144xf32>
    %215 = vector.broadcast %87 : f32 to vector<8x144xf32>
    %216 = arith.mulf %215, %39 : vector<8x144xf32>
    %217 = arith.addf %214, %216 : vector<8x144xf32>
    %218 = vector.broadcast %88 : f32 to vector<8x144xf32>
    %219 = arith.mulf %218, %41 : vector<8x144xf32>
    %220 = arith.addf %217, %219 : vector<8x144xf32>
    %221 = vector.broadcast %89 : f32 to vector<8x144xf32>
    %222 = arith.mulf %221, %43 : vector<8x144xf32>
    %223 = arith.addf %220, %222 : vector<8x144xf32>
    %224 = vector.broadcast %90 : f32 to vector<8x144xf32>
    %225 = arith.mulf %224, %45 : vector<8x144xf32>
    %226 = arith.addf %223, %225 : vector<8x144xf32>
    %227 = vector.broadcast %91 : f32 to vector<8x144xf32>
    %228 = arith.mulf %227, %47 : vector<8x144xf32>
    %229 = arith.addf %226, %228 : vector<8x144xf32>
    %230 = vector.broadcast %92 : f32 to vector<8x144xf32>
    %231 = arith.mulf %230, %51 : vector<8x144xf32>
    %232 = arith.addf %229, %231 : vector<8x144xf32>
    %233 = vector.broadcast %93 : f32 to vector<8x144xf32>
    %234 = arith.mulf %233, %53 : vector<8x144xf32>
    %235 = arith.addf %232, %234 : vector<8x144xf32>
    %236 = vector.broadcast %94 : f32 to vector<8x144xf32>
    %237 = arith.mulf %236, %55 : vector<8x144xf32>
    %238 = arith.addf %235, %237 : vector<8x144xf32>
    %239 = vector.broadcast %95 : f32 to vector<8x144xf32>
    %240 = arith.mulf %239, %57 : vector<8x144xf32>
    %241 = arith.addf %238, %240 : vector<8x144xf32>
    %242 = vector.broadcast %96 : f32 to vector<8x144xf32>
    %243 = arith.mulf %242, %59 : vector<8x144xf32>
    %244 = arith.addf %241, %243 : vector<8x144xf32>
    %245 = arith.maximumf %170, %244 : vector<8x144xf32>
    %246 = vector.broadcast %72 : f32 to vector<8x144xf32>
    %247 = arith.mulf %246, %13 : vector<8x144xf32>
    %248 = vector.broadcast %73 : f32 to vector<8x144xf32>
    %249 = arith.mulf %248, %15 : vector<8x144xf32>
    %250 = arith.addf %247, %249 : vector<8x144xf32>
    %251 = vector.broadcast %74 : f32 to vector<8x144xf32>
    %252 = arith.mulf %251, %17 : vector<8x144xf32>
    %253 = arith.addf %250, %252 : vector<8x144xf32>
    %254 = vector.broadcast %75 : f32 to vector<8x144xf32>
    %255 = arith.mulf %254, %19 : vector<8x144xf32>
    %256 = arith.addf %253, %255 : vector<8x144xf32>
    %257 = vector.broadcast %76 : f32 to vector<8x144xf32>
    %258 = arith.mulf %257, %21 : vector<8x144xf32>
    %259 = arith.addf %256, %258 : vector<8x144xf32>
    %260 = vector.broadcast %77 : f32 to vector<8x144xf32>
    %261 = arith.mulf %260, %25 : vector<8x144xf32>
    %262 = arith.addf %259, %261 : vector<8x144xf32>
    %263 = vector.broadcast %78 : f32 to vector<8x144xf32>
    %264 = arith.mulf %263, %27 : vector<8x144xf32>
    %265 = arith.addf %262, %264 : vector<8x144xf32>
    %266 = vector.broadcast %79 : f32 to vector<8x144xf32>
    %267 = arith.mulf %266, %29 : vector<8x144xf32>
    %268 = arith.addf %265, %267 : vector<8x144xf32>
    %269 = vector.broadcast %80 : f32 to vector<8x144xf32>
    %270 = arith.mulf %269, %31 : vector<8x144xf32>
    %271 = arith.addf %268, %270 : vector<8x144xf32>
    %272 = vector.broadcast %81 : f32 to vector<8x144xf32>
    %273 = arith.mulf %272, %33 : vector<8x144xf32>
    %274 = arith.addf %271, %273 : vector<8x144xf32>
    %275 = vector.broadcast %82 : f32 to vector<8x144xf32>
    %276 = arith.mulf %275, %37 : vector<8x144xf32>
    %277 = arith.addf %274, %276 : vector<8x144xf32>
    %278 = vector.broadcast %83 : f32 to vector<8x144xf32>
    %279 = arith.mulf %278, %39 : vector<8x144xf32>
    %280 = arith.addf %277, %279 : vector<8x144xf32>
    %281 = vector.broadcast %84 : f32 to vector<8x144xf32>
    %282 = arith.mulf %281, %41 : vector<8x144xf32>
    %283 = arith.addf %280, %282 : vector<8x144xf32>
    %284 = vector.broadcast %85 : f32 to vector<8x144xf32>
    %285 = arith.mulf %284, %43 : vector<8x144xf32>
    %286 = arith.addf %283, %285 : vector<8x144xf32>
    %287 = vector.broadcast %86 : f32 to vector<8x144xf32>
    %288 = arith.mulf %287, %45 : vector<8x144xf32>
    %289 = arith.addf %286, %288 : vector<8x144xf32>
    %290 = vector.broadcast %87 : f32 to vector<8x144xf32>
    %291 = arith.mulf %290, %49 : vector<8x144xf32>
    %292 = arith.addf %289, %291 : vector<8x144xf32>
    %293 = vector.broadcast %88 : f32 to vector<8x144xf32>
    %294 = arith.mulf %293, %51 : vector<8x144xf32>
    %295 = arith.addf %292, %294 : vector<8x144xf32>
    %296 = vector.broadcast %89 : f32 to vector<8x144xf32>
    %297 = arith.mulf %296, %53 : vector<8x144xf32>
    %298 = arith.addf %295, %297 : vector<8x144xf32>
    %299 = vector.broadcast %90 : f32 to vector<8x144xf32>
    %300 = arith.mulf %299, %55 : vector<8x144xf32>
    %301 = arith.addf %298, %300 : vector<8x144xf32>
    %302 = vector.broadcast %91 : f32 to vector<8x144xf32>
    %303 = arith.mulf %302, %57 : vector<8x144xf32>
    %304 = arith.addf %301, %303 : vector<8x144xf32>
    %305 = vector.broadcast %92 : f32 to vector<8x144xf32>
    %306 = arith.mulf %305, %61 : vector<8x144xf32>
    %307 = arith.addf %304, %306 : vector<8x144xf32>
    %308 = vector.broadcast %93 : f32 to vector<8x144xf32>
    %309 = arith.mulf %308, %63 : vector<8x144xf32>
    %310 = arith.addf %307, %309 : vector<8x144xf32>
    %311 = vector.broadcast %94 : f32 to vector<8x144xf32>
    %312 = arith.mulf %311, %65 : vector<8x144xf32>
    %313 = arith.addf %310, %312 : vector<8x144xf32>
    %314 = vector.broadcast %95 : f32 to vector<8x144xf32>
    %315 = arith.mulf %314, %67 : vector<8x144xf32>
    %316 = arith.addf %313, %315 : vector<8x144xf32>
    %317 = vector.broadcast %96 : f32 to vector<8x144xf32>
    %318 = arith.mulf %317, %69 : vector<8x144xf32>
    %319 = arith.addf %316, %318 : vector<8x144xf32>
    %320 = arith.maximumf %245, %319 : vector<8x144xf32>
    %321 = vector.broadcast %72 : f32 to vector<8x144xf32>
    %322 = arith.mulf %321, %15 : vector<8x144xf32>
    %323 = vector.broadcast %73 : f32 to vector<8x144xf32>
    %324 = arith.mulf %323, %17 : vector<8x144xf32>
    %325 = arith.addf %322, %324 : vector<8x144xf32>
    %326 = vector.broadcast %74 : f32 to vector<8x144xf32>
    %327 = arith.mulf %326, %19 : vector<8x144xf32>
    %328 = arith.addf %325, %327 : vector<8x144xf32>
    %329 = vector.broadcast %75 : f32 to vector<8x144xf32>
    %330 = arith.mulf %329, %21 : vector<8x144xf32>
    %331 = arith.addf %328, %330 : vector<8x144xf32>
    %332 = vector.broadcast %76 : f32 to vector<8x144xf32>
    %333 = arith.mulf %332, %23 : vector<8x144xf32>
    %334 = arith.addf %331, %333 : vector<8x144xf32>
    %335 = vector.broadcast %77 : f32 to vector<8x144xf32>
    %336 = arith.mulf %335, %27 : vector<8x144xf32>
    %337 = arith.addf %334, %336 : vector<8x144xf32>
    %338 = vector.broadcast %78 : f32 to vector<8x144xf32>
    %339 = arith.mulf %338, %29 : vector<8x144xf32>
    %340 = arith.addf %337, %339 : vector<8x144xf32>
    %341 = vector.broadcast %79 : f32 to vector<8x144xf32>
    %342 = arith.mulf %341, %31 : vector<8x144xf32>
    %343 = arith.addf %340, %342 : vector<8x144xf32>
    %344 = vector.broadcast %80 : f32 to vector<8x144xf32>
    %345 = arith.mulf %344, %33 : vector<8x144xf32>
    %346 = arith.addf %343, %345 : vector<8x144xf32>
    %347 = vector.broadcast %81 : f32 to vector<8x144xf32>
    %348 = arith.mulf %347, %35 : vector<8x144xf32>
    %349 = arith.addf %346, %348 : vector<8x144xf32>
    %350 = vector.broadcast %82 : f32 to vector<8x144xf32>
    %351 = arith.mulf %350, %39 : vector<8x144xf32>
    %352 = arith.addf %349, %351 : vector<8x144xf32>
    %353 = vector.broadcast %83 : f32 to vector<8x144xf32>
    %354 = arith.mulf %353, %41 : vector<8x144xf32>
    %355 = arith.addf %352, %354 : vector<8x144xf32>
    %356 = vector.broadcast %84 : f32 to vector<8x144xf32>
    %357 = arith.mulf %356, %43 : vector<8x144xf32>
    %358 = arith.addf %355, %357 : vector<8x144xf32>
    %359 = vector.broadcast %85 : f32 to vector<8x144xf32>
    %360 = arith.mulf %359, %45 : vector<8x144xf32>
    %361 = arith.addf %358, %360 : vector<8x144xf32>
    %362 = vector.broadcast %86 : f32 to vector<8x144xf32>
    %363 = arith.mulf %362, %47 : vector<8x144xf32>
    %364 = arith.addf %361, %363 : vector<8x144xf32>
    %365 = vector.broadcast %87 : f32 to vector<8x144xf32>
    %366 = arith.mulf %365, %51 : vector<8x144xf32>
    %367 = arith.addf %364, %366 : vector<8x144xf32>
    %368 = vector.broadcast %88 : f32 to vector<8x144xf32>
    %369 = arith.mulf %368, %53 : vector<8x144xf32>
    %370 = arith.addf %367, %369 : vector<8x144xf32>
    %371 = vector.broadcast %89 : f32 to vector<8x144xf32>
    %372 = arith.mulf %371, %55 : vector<8x144xf32>
    %373 = arith.addf %370, %372 : vector<8x144xf32>
    %374 = vector.broadcast %90 : f32 to vector<8x144xf32>
    %375 = arith.mulf %374, %57 : vector<8x144xf32>
    %376 = arith.addf %373, %375 : vector<8x144xf32>
    %377 = vector.broadcast %91 : f32 to vector<8x144xf32>
    %378 = arith.mulf %377, %59 : vector<8x144xf32>
    %379 = arith.addf %376, %378 : vector<8x144xf32>
    %380 = vector.broadcast %92 : f32 to vector<8x144xf32>
    %381 = arith.mulf %380, %63 : vector<8x144xf32>
    %382 = arith.addf %379, %381 : vector<8x144xf32>
    %383 = vector.broadcast %93 : f32 to vector<8x144xf32>
    %384 = arith.mulf %383, %65 : vector<8x144xf32>
    %385 = arith.addf %382, %384 : vector<8x144xf32>
    %386 = vector.broadcast %94 : f32 to vector<8x144xf32>
    %387 = arith.mulf %386, %67 : vector<8x144xf32>
    %388 = arith.addf %385, %387 : vector<8x144xf32>
    %389 = vector.broadcast %95 : f32 to vector<8x144xf32>
    %390 = arith.mulf %389, %69 : vector<8x144xf32>
    %391 = arith.addf %388, %390 : vector<8x144xf32>
    %392 = vector.broadcast %96 : f32 to vector<8x144xf32>
    %393 = arith.mulf %392, %71 : vector<8x144xf32>
    %394 = arith.addf %391, %393 : vector<8x144xf32>
    %395 = arith.maximumf %320, %394 : vector<8x144xf32>
    %c100 = arith.constant 100 : index
    %396 = memref.load %arg2[%c100] : memref<105xf32, #tpu.memory_space<smem>>
    %397 = vector.broadcast %396 : f32 to vector<8x144xf32>
    %398 = arith.addf %395, %397 : vector<8x144xf32>
    %cst = arith.constant 0.000000e+00 : f32
    %399 = vector.broadcast %cst : f32 to vector<8x144xf32>
    %400 = arith.cmpf oge, %398, %399 : vector<8x144xf32>
    %cst_97 = arith.constant 0.00999999977 : f32
    %401 = vector.broadcast %cst_97 : f32 to vector<8x144xf32>
    %402 = arith.mulf %401, %398 : vector<8x144xf32>
    %403 = arith.select %400, %398, %402 : vector<8x144xi1>, vector<8x144xf32>
    %c25_98 = arith.constant 25 : index
    %404 = memref.load %arg2[%c25_98] : memref<105xf32, #tpu.memory_space<smem>>
    %c26_99 = arith.constant 26 : index
    %405 = memref.load %arg2[%c26_99] : memref<105xf32, #tpu.memory_space<smem>>
    %c27_100 = arith.constant 27 : index
    %406 = memref.load %arg2[%c27_100] : memref<105xf32, #tpu.memory_space<smem>>
    %c28_101 = arith.constant 28 : index
    %407 = memref.load %arg2[%c28_101] : memref<105xf32, #tpu.memory_space<smem>>
    %c29_102 = arith.constant 29 : index
    %408 = memref.load %arg2[%c29_102] : memref<105xf32, #tpu.memory_space<smem>>
    %c30_103 = arith.constant 30 : index
    %409 = memref.load %arg2[%c30_103] : memref<105xf32, #tpu.memory_space<smem>>
    %c31_104 = arith.constant 31 : index
    %410 = memref.load %arg2[%c31_104] : memref<105xf32, #tpu.memory_space<smem>>
    %c32_105 = arith.constant 32 : index
    %411 = memref.load %arg2[%c32_105] : memref<105xf32, #tpu.memory_space<smem>>
    %c33_106 = arith.constant 33 : index
    %412 = memref.load %arg2[%c33_106] : memref<105xf32, #tpu.memory_space<smem>>
    %c34_107 = arith.constant 34 : index
    %413 = memref.load %arg2[%c34_107] : memref<105xf32, #tpu.memory_space<smem>>
    %c35_108 = arith.constant 35 : index
    %414 = memref.load %arg2[%c35_108] : memref<105xf32, #tpu.memory_space<smem>>
    %c36 = arith.constant 36 : index
    %415 = memref.load %arg2[%c36] : memref<105xf32, #tpu.memory_space<smem>>
    %c37 = arith.constant 37 : index
    %416 = memref.load %arg2[%c37] : memref<105xf32, #tpu.memory_space<smem>>
    %c38 = arith.constant 38 : index
    %417 = memref.load %arg2[%c38] : memref<105xf32, #tpu.memory_space<smem>>
    %c39 = arith.constant 39 : index
    %418 = memref.load %arg2[%c39] : memref<105xf32, #tpu.memory_space<smem>>
    %c40 = arith.constant 40 : index
    %419 = memref.load %arg2[%c40] : memref<105xf32, #tpu.memory_space<smem>>
    %c41 = arith.constant 41 : index
    %420 = memref.load %arg2[%c41] : memref<105xf32, #tpu.memory_space<smem>>
    %c42 = arith.constant 42 : index
    %421 = memref.load %arg2[%c42] : memref<105xf32, #tpu.memory_space<smem>>
    %c43 = arith.constant 43 : index
    %422 = memref.load %arg2[%c43] : memref<105xf32, #tpu.memory_space<smem>>
    %c44 = arith.constant 44 : index
    %423 = memref.load %arg2[%c44] : memref<105xf32, #tpu.memory_space<smem>>
    %c45 = arith.constant 45 : index
    %424 = memref.load %arg2[%c45] : memref<105xf32, #tpu.memory_space<smem>>
    %c46 = arith.constant 46 : index
    %425 = memref.load %arg2[%c46] : memref<105xf32, #tpu.memory_space<smem>>
    %c47 = arith.constant 47 : index
    %426 = memref.load %arg2[%c47] : memref<105xf32, #tpu.memory_space<smem>>
    %c48 = arith.constant 48 : index
    %427 = memref.load %arg2[%c48] : memref<105xf32, #tpu.memory_space<smem>>
    %c49 = arith.constant 49 : index
    %428 = memref.load %arg2[%c49] : memref<105xf32, #tpu.memory_space<smem>>
    %429 = vector.broadcast %404 : f32 to vector<8x144xf32>
    %430 = arith.mulf %429, %1 : vector<8x144xf32>
    %431 = vector.broadcast %405 : f32 to vector<8x144xf32>
    %432 = arith.mulf %431, %3 : vector<8x144xf32>
    %433 = arith.addf %430, %432 : vector<8x144xf32>
    %434 = vector.broadcast %406 : f32 to vector<8x144xf32>
    %435 = arith.mulf %434, %5 : vector<8x144xf32>
    %436 = arith.addf %433, %435 : vector<8x144xf32>
    %437 = vector.broadcast %407 : f32 to vector<8x144xf32>
    %438 = arith.mulf %437, %7 : vector<8x144xf32>
    %439 = arith.addf %436, %438 : vector<8x144xf32>
    %440 = vector.broadcast %408 : f32 to vector<8x144xf32>
    %441 = arith.mulf %440, %9 : vector<8x144xf32>
    %442 = arith.addf %439, %441 : vector<8x144xf32>
    %443 = vector.broadcast %409 : f32 to vector<8x144xf32>
    %444 = arith.mulf %443, %13 : vector<8x144xf32>
    %445 = arith.addf %442, %444 : vector<8x144xf32>
    %446 = vector.broadcast %410 : f32 to vector<8x144xf32>
    %447 = arith.mulf %446, %15 : vector<8x144xf32>
    %448 = arith.addf %445, %447 : vector<8x144xf32>
    %449 = vector.broadcast %411 : f32 to vector<8x144xf32>
    %450 = arith.mulf %449, %17 : vector<8x144xf32>
    %451 = arith.addf %448, %450 : vector<8x144xf32>
    %452 = vector.broadcast %412 : f32 to vector<8x144xf32>
    %453 = arith.mulf %452, %19 : vector<8x144xf32>
    %454 = arith.addf %451, %453 : vector<8x144xf32>
    %455 = vector.broadcast %413 : f32 to vector<8x144xf32>
    %456 = arith.mulf %455, %21 : vector<8x144xf32>
    %457 = arith.addf %454, %456 : vector<8x144xf32>
    %458 = vector.broadcast %414 : f32 to vector<8x144xf32>
    %459 = arith.mulf %458, %25 : vector<8x144xf32>
    %460 = arith.addf %457, %459 : vector<8x144xf32>
    %461 = vector.broadcast %415 : f32 to vector<8x144xf32>
    %462 = arith.mulf %461, %27 : vector<8x144xf32>
    %463 = arith.addf %460, %462 : vector<8x144xf32>
    %464 = vector.broadcast %416 : f32 to vector<8x144xf32>
    %465 = arith.mulf %464, %29 : vector<8x144xf32>
    %466 = arith.addf %463, %465 : vector<8x144xf32>
    %467 = vector.broadcast %417 : f32 to vector<8x144xf32>
    %468 = arith.mulf %467, %31 : vector<8x144xf32>
    %469 = arith.addf %466, %468 : vector<8x144xf32>
    %470 = vector.broadcast %418 : f32 to vector<8x144xf32>
    %471 = arith.mulf %470, %33 : vector<8x144xf32>
    %472 = arith.addf %469, %471 : vector<8x144xf32>
    %473 = vector.broadcast %419 : f32 to vector<8x144xf32>
    %474 = arith.mulf %473, %37 : vector<8x144xf32>
    %475 = arith.addf %472, %474 : vector<8x144xf32>
    %476 = vector.broadcast %420 : f32 to vector<8x144xf32>
    %477 = arith.mulf %476, %39 : vector<8x144xf32>
    %478 = arith.addf %475, %477 : vector<8x144xf32>
    %479 = vector.broadcast %421 : f32 to vector<8x144xf32>
    %480 = arith.mulf %479, %41 : vector<8x144xf32>
    %481 = arith.addf %478, %480 : vector<8x144xf32>
    %482 = vector.broadcast %422 : f32 to vector<8x144xf32>
    %483 = arith.mulf %482, %43 : vector<8x144xf32>
    %484 = arith.addf %481, %483 : vector<8x144xf32>
    %485 = vector.broadcast %423 : f32 to vector<8x144xf32>
    %486 = arith.mulf %485, %45 : vector<8x144xf32>
    %487 = arith.addf %484, %486 : vector<8x144xf32>
    %488 = vector.broadcast %424 : f32 to vector<8x144xf32>
    %489 = arith.mulf %488, %49 : vector<8x144xf32>
    %490 = arith.addf %487, %489 : vector<8x144xf32>
    %491 = vector.broadcast %425 : f32 to vector<8x144xf32>
    %492 = arith.mulf %491, %51 : vector<8x144xf32>
    %493 = arith.addf %490, %492 : vector<8x144xf32>
    %494 = vector.broadcast %426 : f32 to vector<8x144xf32>
    %495 = arith.mulf %494, %53 : vector<8x144xf32>
    %496 = arith.addf %493, %495 : vector<8x144xf32>
    %497 = vector.broadcast %427 : f32 to vector<8x144xf32>
    %498 = arith.mulf %497, %55 : vector<8x144xf32>
    %499 = arith.addf %496, %498 : vector<8x144xf32>
    %500 = vector.broadcast %428 : f32 to vector<8x144xf32>
    %501 = arith.mulf %500, %57 : vector<8x144xf32>
    %502 = arith.addf %499, %501 : vector<8x144xf32>
    %503 = vector.broadcast %404 : f32 to vector<8x144xf32>
    %504 = arith.mulf %503, %3 : vector<8x144xf32>
    %505 = vector.broadcast %405 : f32 to vector<8x144xf32>
    %506 = arith.mulf %505, %5 : vector<8x144xf32>
    %507 = arith.addf %504, %506 : vector<8x144xf32>
    %508 = vector.broadcast %406 : f32 to vector<8x144xf32>
    %509 = arith.mulf %508, %7 : vector<8x144xf32>
    %510 = arith.addf %507, %509 : vector<8x144xf32>
    %511 = vector.broadcast %407 : f32 to vector<8x144xf32>
    %512 = arith.mulf %511, %9 : vector<8x144xf32>
    %513 = arith.addf %510, %512 : vector<8x144xf32>
    %514 = vector.broadcast %408 : f32 to vector<8x144xf32>
    %515 = arith.mulf %514, %11 : vector<8x144xf32>
    %516 = arith.addf %513, %515 : vector<8x144xf32>
    %517 = vector.broadcast %409 : f32 to vector<8x144xf32>
    %518 = arith.mulf %517, %15 : vector<8x144xf32>
    %519 = arith.addf %516, %518 : vector<8x144xf32>
    %520 = vector.broadcast %410 : f32 to vector<8x144xf32>
    %521 = arith.mulf %520, %17 : vector<8x144xf32>
    %522 = arith.addf %519, %521 : vector<8x144xf32>
    %523 = vector.broadcast %411 : f32 to vector<8x144xf32>
    %524 = arith.mulf %523, %19 : vector<8x144xf32>
    %525 = arith.addf %522, %524 : vector<8x144xf32>
    %526 = vector.broadcast %412 : f32 to vector<8x144xf32>
    %527 = arith.mulf %526, %21 : vector<8x144xf32>
    %528 = arith.addf %525, %527 : vector<8x144xf32>
    %529 = vector.broadcast %413 : f32 to vector<8x144xf32>
    %530 = arith.mulf %529, %23 : vector<8x144xf32>
    %531 = arith.addf %528, %530 : vector<8x144xf32>
    %532 = vector.broadcast %414 : f32 to vector<8x144xf32>
    %533 = arith.mulf %532, %27 : vector<8x144xf32>
    %534 = arith.addf %531, %533 : vector<8x144xf32>
    %535 = vector.broadcast %415 : f32 to vector<8x144xf32>
    %536 = arith.mulf %535, %29 : vector<8x144xf32>
    %537 = arith.addf %534, %536 : vector<8x144xf32>
    %538 = vector.broadcast %416 : f32 to vector<8x144xf32>
    %539 = arith.mulf %538, %31 : vector<8x144xf32>
    %540 = arith.addf %537, %539 : vector<8x144xf32>
    %541 = vector.broadcast %417 : f32 to vector<8x144xf32>
    %542 = arith.mulf %541, %33 : vector<8x144xf32>
    %543 = arith.addf %540, %542 : vector<8x144xf32>
    %544 = vector.broadcast %418 : f32 to vector<8x144xf32>
    %545 = arith.mulf %544, %35 : vector<8x144xf32>
    %546 = arith.addf %543, %545 : vector<8x144xf32>
    %547 = vector.broadcast %419 : f32 to vector<8x144xf32>
    %548 = arith.mulf %547, %39 : vector<8x144xf32>
    %549 = arith.addf %546, %548 : vector<8x144xf32>
    %550 = vector.broadcast %420 : f32 to vector<8x144xf32>
    %551 = arith.mulf %550, %41 : vector<8x144xf32>
    %552 = arith.addf %549, %551 : vector<8x144xf32>
    %553 = vector.broadcast %421 : f32 to vector<8x144xf32>
    %554 = arith.mulf %553, %43 : vector<8x144xf32>
    %555 = arith.addf %552, %554 : vector<8x144xf32>
    %556 = vector.broadcast %422 : f32 to vector<8x144xf32>
    %557 = arith.mulf %556, %45 : vector<8x144xf32>
    %558 = arith.addf %555, %557 : vector<8x144xf32>
    %559 = vector.broadcast %423 : f32 to vector<8x144xf32>
    %560 = arith.mulf %559, %47 : vector<8x144xf32>
    %561 = arith.addf %558, %560 : vector<8x144xf32>
    %562 = vector.broadcast %424 : f32 to vector<8x144xf32>
    %563 = arith.mulf %562, %51 : vector<8x144xf32>
    %564 = arith.addf %561, %563 : vector<8x144xf32>
    %565 = vector.broadcast %425 : f32 to vector<8x144xf32>
    %566 = arith.mulf %565, %53 : vector<8x144xf32>
    %567 = arith.addf %564, %566 : vector<8x144xf32>
    %568 = vector.broadcast %426 : f32 to vector<8x144xf32>
    %569 = arith.mulf %568, %55 : vector<8x144xf32>
    %570 = arith.addf %567, %569 : vector<8x144xf32>
    %571 = vector.broadcast %427 : f32 to vector<8x144xf32>
    %572 = arith.mulf %571, %57 : vector<8x144xf32>
    %573 = arith.addf %570, %572 : vector<8x144xf32>
    %574 = vector.broadcast %428 : f32 to vector<8x144xf32>
    %575 = arith.mulf %574, %59 : vector<8x144xf32>
    %576 = arith.addf %573, %575 : vector<8x144xf32>
    %577 = arith.maximumf %502, %576 : vector<8x144xf32>
    %578 = vector.broadcast %404 : f32 to vector<8x144xf32>
    %579 = arith.mulf %578, %13 : vector<8x144xf32>
    %580 = vector.broadcast %405 : f32 to vector<8x144xf32>
    %581 = arith.mulf %580, %15 : vector<8x144xf32>
    %582 = arith.addf %579, %581 : vector<8x144xf32>
    %583 = vector.broadcast %406 : f32 to vector<8x144xf32>
    %584 = arith.mulf %583, %17 : vector<8x144xf32>
    %585 = arith.addf %582, %584 : vector<8x144xf32>
    %586 = vector.broadcast %407 : f32 to vector<8x144xf32>
    %587 = arith.mulf %586, %19 : vector<8x144xf32>
    %588 = arith.addf %585, %587 : vector<8x144xf32>
    %589 = vector.broadcast %408 : f32 to vector<8x144xf32>
    %590 = arith.mulf %589, %21 : vector<8x144xf32>
    %591 = arith.addf %588, %590 : vector<8x144xf32>
    %592 = vector.broadcast %409 : f32 to vector<8x144xf32>
    %593 = arith.mulf %592, %25 : vector<8x144xf32>
    %594 = arith.addf %591, %593 : vector<8x144xf32>
    %595 = vector.broadcast %410 : f32 to vector<8x144xf32>
    %596 = arith.mulf %595, %27 : vector<8x144xf32>
    %597 = arith.addf %594, %596 : vector<8x144xf32>
    %598 = vector.broadcast %411 : f32 to vector<8x144xf32>
    %599 = arith.mulf %598, %29 : vector<8x144xf32>
    %600 = arith.addf %597, %599 : vector<8x144xf32>
    %601 = vector.broadcast %412 : f32 to vector<8x144xf32>
    %602 = arith.mulf %601, %31 : vector<8x144xf32>
    %603 = arith.addf %600, %602 : vector<8x144xf32>
    %604 = vector.broadcast %413 : f32 to vector<8x144xf32>
    %605 = arith.mulf %604, %33 : vector<8x144xf32>
    %606 = arith.addf %603, %605 : vector<8x144xf32>
    %607 = vector.broadcast %414 : f32 to vector<8x144xf32>
    %608 = arith.mulf %607, %37 : vector<8x144xf32>
    %609 = arith.addf %606, %608 : vector<8x144xf32>
    %610 = vector.broadcast %415 : f32 to vector<8x144xf32>
    %611 = arith.mulf %610, %39 : vector<8x144xf32>
    %612 = arith.addf %609, %611 : vector<8x144xf32>
    %613 = vector.broadcast %416 : f32 to vector<8x144xf32>
    %614 = arith.mulf %613, %41 : vector<8x144xf32>
    %615 = arith.addf %612, %614 : vector<8x144xf32>
    %616 = vector.broadcast %417 : f32 to vector<8x144xf32>
    %617 = arith.mulf %616, %43 : vector<8x144xf32>
    %618 = arith.addf %615, %617 : vector<8x144xf32>
    %619 = vector.broadcast %418 : f32 to vector<8x144xf32>
    %620 = arith.mulf %619, %45 : vector<8x144xf32>
    %621 = arith.addf %618, %620 : vector<8x144xf32>
    %622 = vector.broadcast %419 : f32 to vector<8x144xf32>
    %623 = arith.mulf %622, %49 : vector<8x144xf32>
    %624 = arith.addf %621, %623 : vector<8x144xf32>
    %625 = vector.broadcast %420 : f32 to vector<8x144xf32>
    %626 = arith.mulf %625, %51 : vector<8x144xf32>
    %627 = arith.addf %624, %626 : vector<8x144xf32>
    %628 = vector.broadcast %421 : f32 to vector<8x144xf32>
    %629 = arith.mulf %628, %53 : vector<8x144xf32>
    %630 = arith.addf %627, %629 : vector<8x144xf32>
    %631 = vector.broadcast %422 : f32 to vector<8x144xf32>
    %632 = arith.mulf %631, %55 : vector<8x144xf32>
    %633 = arith.addf %630, %632 : vector<8x144xf32>
    %634 = vector.broadcast %423 : f32 to vector<8x144xf32>
    %635 = arith.mulf %634, %57 : vector<8x144xf32>
    %636 = arith.addf %633, %635 : vector<8x144xf32>
    %637 = vector.broadcast %424 : f32 to vector<8x144xf32>
    %638 = arith.mulf %637, %61 : vector<8x144xf32>
    %639 = arith.addf %636, %638 : vector<8x144xf32>
    %640 = vector.broadcast %425 : f32 to vector<8x144xf32>
    %641 = arith.mulf %640, %63 : vector<8x144xf32>
    %642 = arith.addf %639, %641 : vector<8x144xf32>
    %643 = vector.broadcast %426 : f32 to vector<8x144xf32>
    %644 = arith.mulf %643, %65 : vector<8x144xf32>
    %645 = arith.addf %642, %644 : vector<8x144xf32>
    %646 = vector.broadcast %427 : f32 to vector<8x144xf32>
    %647 = arith.mulf %646, %67 : vector<8x144xf32>
    %648 = arith.addf %645, %647 : vector<8x144xf32>
    %649 = vector.broadcast %428 : f32 to vector<8x144xf32>
    %650 = arith.mulf %649, %69 : vector<8x144xf32>
    %651 = arith.addf %648, %650 : vector<8x144xf32>
    %652 = arith.maximumf %577, %651 : vector<8x144xf32>
    %653 = vector.broadcast %404 : f32 to vector<8x144xf32>
    %654 = arith.mulf %653, %15 : vector<8x144xf32>
    %655 = vector.broadcast %405 : f32 to vector<8x144xf32>
    %656 = arith.mulf %655, %17 : vector<8x144xf32>
    %657 = arith.addf %654, %656 : vector<8x144xf32>
    %658 = vector.broadcast %406 : f32 to vector<8x144xf32>
    %659 = arith.mulf %658, %19 : vector<8x144xf32>
    %660 = arith.addf %657, %659 : vector<8x144xf32>
    %661 = vector.broadcast %407 : f32 to vector<8x144xf32>
    %662 = arith.mulf %661, %21 : vector<8x144xf32>
    %663 = arith.addf %660, %662 : vector<8x144xf32>
    %664 = vector.broadcast %408 : f32 to vector<8x144xf32>
    %665 = arith.mulf %664, %23 : vector<8x144xf32>
    %666 = arith.addf %663, %665 : vector<8x144xf32>
    %667 = vector.broadcast %409 : f32 to vector<8x144xf32>
    %668 = arith.mulf %667, %27 : vector<8x144xf32>
    %669 = arith.addf %666, %668 : vector<8x144xf32>
    %670 = vector.broadcast %410 : f32 to vector<8x144xf32>
    %671 = arith.mulf %670, %29 : vector<8x144xf32>
    %672 = arith.addf %669, %671 : vector<8x144xf32>
    %673 = vector.broadcast %411 : f32 to vector<8x144xf32>
    %674 = arith.mulf %673, %31 : vector<8x144xf32>
    %675 = arith.addf %672, %674 : vector<8x144xf32>
    %676 = vector.broadcast %412 : f32 to vector<8x144xf32>
    %677 = arith.mulf %676, %33 : vector<8x144xf32>
    %678 = arith.addf %675, %677 : vector<8x144xf32>
    %679 = vector.broadcast %413 : f32 to vector<8x144xf32>
    %680 = arith.mulf %679, %35 : vector<8x144xf32>
    %681 = arith.addf %678, %680 : vector<8x144xf32>
    %682 = vector.broadcast %414 : f32 to vector<8x144xf32>
    %683 = arith.mulf %682, %39 : vector<8x144xf32>
    %684 = arith.addf %681, %683 : vector<8x144xf32>
    %685 = vector.broadcast %415 : f32 to vector<8x144xf32>
    %686 = arith.mulf %685, %41 : vector<8x144xf32>
    %687 = arith.addf %684, %686 : vector<8x144xf32>
    %688 = vector.broadcast %416 : f32 to vector<8x144xf32>
    %689 = arith.mulf %688, %43 : vector<8x144xf32>
    %690 = arith.addf %687, %689 : vector<8x144xf32>
    %691 = vector.broadcast %417 : f32 to vector<8x144xf32>
    %692 = arith.mulf %691, %45 : vector<8x144xf32>
    %693 = arith.addf %690, %692 : vector<8x144xf32>
    %694 = vector.broadcast %418 : f32 to vector<8x144xf32>
    %695 = arith.mulf %694, %47 : vector<8x144xf32>
    %696 = arith.addf %693, %695 : vector<8x144xf32>
    %697 = vector.broadcast %419 : f32 to vector<8x144xf32>
    %698 = arith.mulf %697, %51 : vector<8x144xf32>
    %699 = arith.addf %696, %698 : vector<8x144xf32>
    %700 = vector.broadcast %420 : f32 to vector<8x144xf32>
    %701 = arith.mulf %700, %53 : vector<8x144xf32>
    %702 = arith.addf %699, %701 : vector<8x144xf32>
    %703 = vector.broadcast %421 : f32 to vector<8x144xf32>
    %704 = arith.mulf %703, %55 : vector<8x144xf32>
    %705 = arith.addf %702, %704 : vector<8x144xf32>
    %706 = vector.broadcast %422 : f32 to vector<8x144xf32>
    %707 = arith.mulf %706, %57 : vector<8x144xf32>
    %708 = arith.addf %705, %707 : vector<8x144xf32>
    %709 = vector.broadcast %423 : f32 to vector<8x144xf32>
    %710 = arith.mulf %709, %59 : vector<8x144xf32>
    %711 = arith.addf %708, %710 : vector<8x144xf32>
    %712 = vector.broadcast %424 : f32 to vector<8x144xf32>
    %713 = arith.mulf %712, %63 : vector<8x144xf32>
    %714 = arith.addf %711, %713 : vector<8x144xf32>
    %715 = vector.broadcast %425 : f32 to vector<8x144xf32>
    %716 = arith.mulf %715, %65 : vector<8x144xf32>
    %717 = arith.addf %714, %716 : vector<8x144xf32>
    %718 = vector.broadcast %426 : f32 to vector<8x144xf32>
    %719 = arith.mulf %718, %67 : vector<8x144xf32>
    %720 = arith.addf %717, %719 : vector<8x144xf32>
    %721 = vector.broadcast %427 : f32 to vector<8x144xf32>
    %722 = arith.mulf %721, %69 : vector<8x144xf32>
    %723 = arith.addf %720, %722 : vector<8x144xf32>
    %724 = vector.broadcast %428 : f32 to vector<8x144xf32>
    %725 = arith.mulf %724, %71 : vector<8x144xf32>
    %726 = arith.addf %723, %725 : vector<8x144xf32>
    %727 = arith.maximumf %652, %726 : vector<8x144xf32>
    %c101 = arith.constant 101 : index
    %728 = memref.load %arg2[%c101] : memref<105xf32, #tpu.memory_space<smem>>
    %729 = vector.broadcast %728 : f32 to vector<8x144xf32>
    %730 = arith.addf %727, %729 : vector<8x144xf32>
    %cst_109 = arith.constant 0.000000e+00 : f32
    %731 = vector.broadcast %cst_109 : f32 to vector<8x144xf32>
    %732 = arith.cmpf oge, %730, %731 : vector<8x144xf32>
    %cst_110 = arith.constant 0.00999999977 : f32
    %733 = vector.broadcast %cst_110 : f32 to vector<8x144xf32>
    %734 = arith.mulf %733, %730 : vector<8x144xf32>
    %735 = arith.select %732, %730, %734 : vector<8x144xi1>, vector<8x144xf32>
    %c50 = arith.constant 50 : index
    %736 = memref.load %arg2[%c50] : memref<105xf32, #tpu.memory_space<smem>>
    %c51 = arith.constant 51 : index
    %737 = memref.load %arg2[%c51] : memref<105xf32, #tpu.memory_space<smem>>
    %c52 = arith.constant 52 : index
    %738 = memref.load %arg2[%c52] : memref<105xf32, #tpu.memory_space<smem>>
    %c53 = arith.constant 53 : index
    %739 = memref.load %arg2[%c53] : memref<105xf32, #tpu.memory_space<smem>>
    %c54 = arith.constant 54 : index
    %740 = memref.load %arg2[%c54] : memref<105xf32, #tpu.memory_space<smem>>
    %c55 = arith.constant 55 : index
    %741 = memref.load %arg2[%c55] : memref<105xf32, #tpu.memory_space<smem>>
    %c56 = arith.constant 56 : index
    %742 = memref.load %arg2[%c56] : memref<105xf32, #tpu.memory_space<smem>>
    %c57 = arith.constant 57 : index
    %743 = memref.load %arg2[%c57] : memref<105xf32, #tpu.memory_space<smem>>
    %c58 = arith.constant 58 : index
    %744 = memref.load %arg2[%c58] : memref<105xf32, #tpu.memory_space<smem>>
    %c59 = arith.constant 59 : index
    %745 = memref.load %arg2[%c59] : memref<105xf32, #tpu.memory_space<smem>>
    %c60 = arith.constant 60 : index
    %746 = memref.load %arg2[%c60] : memref<105xf32, #tpu.memory_space<smem>>
    %c61 = arith.constant 61 : index
    %747 = memref.load %arg2[%c61] : memref<105xf32, #tpu.memory_space<smem>>
    %c62 = arith.constant 62 : index
    %748 = memref.load %arg2[%c62] : memref<105xf32, #tpu.memory_space<smem>>
    %c63 = arith.constant 63 : index
    %749 = memref.load %arg2[%c63] : memref<105xf32, #tpu.memory_space<smem>>
    %c64 = arith.constant 64 : index
    %750 = memref.load %arg2[%c64] : memref<105xf32, #tpu.memory_space<smem>>
    %c65 = arith.constant 65 : index
    %751 = memref.load %arg2[%c65] : memref<105xf32, #tpu.memory_space<smem>>
    %c66 = arith.constant 66 : index
    %752 = memref.load %arg2[%c66] : memref<105xf32, #tpu.memory_space<smem>>
    %c67 = arith.constant 67 : index
    %753 = memref.load %arg2[%c67] : memref<105xf32, #tpu.memory_space<smem>>
    %c68 = arith.constant 68 : index
    %754 = memref.load %arg2[%c68] : memref<105xf32, #tpu.memory_space<smem>>
    %c69 = arith.constant 69 : index
    %755 = memref.load %arg2[%c69] : memref<105xf32, #tpu.memory_space<smem>>
    %c70 = arith.constant 70 : index
    %756 = memref.load %arg2[%c70] : memref<105xf32, #tpu.memory_space<smem>>
    %c71 = arith.constant 71 : index
    %757 = memref.load %arg2[%c71] : memref<105xf32, #tpu.memory_space<smem>>
    %c72 = arith.constant 72 : index
    %758 = memref.load %arg2[%c72] : memref<105xf32, #tpu.memory_space<smem>>
    %c73 = arith.constant 73 : index
    %759 = memref.load %arg2[%c73] : memref<105xf32, #tpu.memory_space<smem>>
    %c74 = arith.constant 74 : index
    %760 = memref.load %arg2[%c74] : memref<105xf32, #tpu.memory_space<smem>>
    %761 = vector.broadcast %736 : f32 to vector<8x144xf32>
    %762 = arith.mulf %761, %1 : vector<8x144xf32>
    %763 = vector.broadcast %737 : f32 to vector<8x144xf32>
    %764 = arith.mulf %763, %3 : vector<8x144xf32>
    %765 = arith.addf %762, %764 : vector<8x144xf32>
    %766 = vector.broadcast %738 : f32 to vector<8x144xf32>
    %767 = arith.mulf %766, %5 : vector<8x144xf32>
    %768 = arith.addf %765, %767 : vector<8x144xf32>
    %769 = vector.broadcast %739 : f32 to vector<8x144xf32>
    %770 = arith.mulf %769, %7 : vector<8x144xf32>
    %771 = arith.addf %768, %770 : vector<8x144xf32>
    %772 = vector.broadcast %740 : f32 to vector<8x144xf32>
    %773 = arith.mulf %772, %9 : vector<8x144xf32>
    %774 = arith.addf %771, %773 : vector<8x144xf32>
    %775 = vector.broadcast %741 : f32 to vector<8x144xf32>
    %776 = arith.mulf %775, %13 : vector<8x144xf32>
    %777 = arith.addf %774, %776 : vector<8x144xf32>
    %778 = vector.broadcast %742 : f32 to vector<8x144xf32>
    %779 = arith.mulf %778, %15 : vector<8x144xf32>
    %780 = arith.addf %777, %779 : vector<8x144xf32>
    %781 = vector.broadcast %743 : f32 to vector<8x144xf32>
    %782 = arith.mulf %781, %17 : vector<8x144xf32>
    %783 = arith.addf %780, %782 : vector<8x144xf32>
    %784 = vector.broadcast %744 : f32 to vector<8x144xf32>
    %785 = arith.mulf %784, %19 : vector<8x144xf32>
    %786 = arith.addf %783, %785 : vector<8x144xf32>
    %787 = vector.broadcast %745 : f32 to vector<8x144xf32>
    %788 = arith.mulf %787, %21 : vector<8x144xf32>
    %789 = arith.addf %786, %788 : vector<8x144xf32>
    %790 = vector.broadcast %746 : f32 to vector<8x144xf32>
    %791 = arith.mulf %790, %25 : vector<8x144xf32>
    %792 = arith.addf %789, %791 : vector<8x144xf32>
    %793 = vector.broadcast %747 : f32 to vector<8x144xf32>
    %794 = arith.mulf %793, %27 : vector<8x144xf32>
    %795 = arith.addf %792, %794 : vector<8x144xf32>
    %796 = vector.broadcast %748 : f32 to vector<8x144xf32>
    %797 = arith.mulf %796, %29 : vector<8x144xf32>
    %798 = arith.addf %795, %797 : vector<8x144xf32>
    %799 = vector.broadcast %749 : f32 to vector<8x144xf32>
    %800 = arith.mulf %799, %31 : vector<8x144xf32>
    %801 = arith.addf %798, %800 : vector<8x144xf32>
    %802 = vector.broadcast %750 : f32 to vector<8x144xf32>
    %803 = arith.mulf %802, %33 : vector<8x144xf32>
    %804 = arith.addf %801, %803 : vector<8x144xf32>
    %805 = vector.broadcast %751 : f32 to vector<8x144xf32>
    %806 = arith.mulf %805, %37 : vector<8x144xf32>
    %807 = arith.addf %804, %806 : vector<8x144xf32>
    %808 = vector.broadcast %752 : f32 to vector<8x144xf32>
    %809 = arith.mulf %808, %39 : vector<8x144xf32>
    %810 = arith.addf %807, %809 : vector<8x144xf32>
    %811 = vector.broadcast %753 : f32 to vector<8x144xf32>
    %812 = arith.mulf %811, %41 : vector<8x144xf32>
    %813 = arith.addf %810, %812 : vector<8x144xf32>
    %814 = vector.broadcast %754 : f32 to vector<8x144xf32>
    %815 = arith.mulf %814, %43 : vector<8x144xf32>
    %816 = arith.addf %813, %815 : vector<8x144xf32>
    %817 = vector.broadcast %755 : f32 to vector<8x144xf32>
    %818 = arith.mulf %817, %45 : vector<8x144xf32>
    %819 = arith.addf %816, %818 : vector<8x144xf32>
    %820 = vector.broadcast %756 : f32 to vector<8x144xf32>
    %821 = arith.mulf %820, %49 : vector<8x144xf32>
    %822 = arith.addf %819, %821 : vector<8x144xf32>
    %823 = vector.broadcast %757 : f32 to vector<8x144xf32>
    %824 = arith.mulf %823, %51 : vector<8x144xf32>
    %825 = arith.addf %822, %824 : vector<8x144xf32>
    %826 = vector.broadcast %758 : f32 to vector<8x144xf32>
    %827 = arith.mulf %826, %53 : vector<8x144xf32>
    %828 = arith.addf %825, %827 : vector<8x144xf32>
    %829 = vector.broadcast %759 : f32 to vector<8x144xf32>
    %830 = arith.mulf %829, %55 : vector<8x144xf32>
    %831 = arith.addf %828, %830 : vector<8x144xf32>
    %832 = vector.broadcast %760 : f32 to vector<8x144xf32>
    %833 = arith.mulf %832, %57 : vector<8x144xf32>
    %834 = arith.addf %831, %833 : vector<8x144xf32>
    %835 = vector.broadcast %736 : f32 to vector<8x144xf32>
    %836 = arith.mulf %835, %3 : vector<8x144xf32>
    %837 = vector.broadcast %737 : f32 to vector<8x144xf32>
    %838 = arith.mulf %837, %5 : vector<8x144xf32>
    %839 = arith.addf %836, %838 : vector<8x144xf32>
    %840 = vector.broadcast %738 : f32 to vector<8x144xf32>
    %841 = arith.mulf %840, %7 : vector<8x144xf32>
    %842 = arith.addf %839, %841 : vector<8x144xf32>
    %843 = vector.broadcast %739 : f32 to vector<8x144xf32>
    %844 = arith.mulf %843, %9 : vector<8x144xf32>
    %845 = arith.addf %842, %844 : vector<8x144xf32>
    %846 = vector.broadcast %740 : f32 to vector<8x144xf32>
    %847 = arith.mulf %846, %11 : vector<8x144xf32>
    %848 = arith.addf %845, %847 : vector<8x144xf32>
    %849 = vector.broadcast %741 : f32 to vector<8x144xf32>
    %850 = arith.mulf %849, %15 : vector<8x144xf32>
    %851 = arith.addf %848, %850 : vector<8x144xf32>
    %852 = vector.broadcast %742 : f32 to vector<8x144xf32>
    %853 = arith.mulf %852, %17 : vector<8x144xf32>
    %854 = arith.addf %851, %853 : vector<8x144xf32>
    %855 = vector.broadcast %743 : f32 to vector<8x144xf32>
    %856 = arith.mulf %855, %19 : vector<8x144xf32>
    %857 = arith.addf %854, %856 : vector<8x144xf32>
    %858 = vector.broadcast %744 : f32 to vector<8x144xf32>
    %859 = arith.mulf %858, %21 : vector<8x144xf32>
    %860 = arith.addf %857, %859 : vector<8x144xf32>
    %861 = vector.broadcast %745 : f32 to vector<8x144xf32>
    %862 = arith.mulf %861, %23 : vector<8x144xf32>
    %863 = arith.addf %860, %862 : vector<8x144xf32>
    %864 = vector.broadcast %746 : f32 to vector<8x144xf32>
    %865 = arith.mulf %864, %27 : vector<8x144xf32>
    %866 = arith.addf %863, %865 : vector<8x144xf32>
    %867 = vector.broadcast %747 : f32 to vector<8x144xf32>
    %868 = arith.mulf %867, %29 : vector<8x144xf32>
    %869 = arith.addf %866, %868 : vector<8x144xf32>
    %870 = vector.broadcast %748 : f32 to vector<8x144xf32>
    %871 = arith.mulf %870, %31 : vector<8x144xf32>
    %872 = arith.addf %869, %871 : vector<8x144xf32>
    %873 = vector.broadcast %749 : f32 to vector<8x144xf32>
    %874 = arith.mulf %873, %33 : vector<8x144xf32>
    %875 = arith.addf %872, %874 : vector<8x144xf32>
    %876 = vector.broadcast %750 : f32 to vector<8x144xf32>
    %877 = arith.mulf %876, %35 : vector<8x144xf32>
    %878 = arith.addf %875, %877 : vector<8x144xf32>
    %879 = vector.broadcast %751 : f32 to vector<8x144xf32>
    %880 = arith.mulf %879, %39 : vector<8x144xf32>
    %881 = arith.addf %878, %880 : vector<8x144xf32>
    %882 = vector.broadcast %752 : f32 to vector<8x144xf32>
    %883 = arith.mulf %882, %41 : vector<8x144xf32>
    %884 = arith.addf %881, %883 : vector<8x144xf32>
    %885 = vector.broadcast %753 : f32 to vector<8x144xf32>
    %886 = arith.mulf %885, %43 : vector<8x144xf32>
    %887 = arith.addf %884, %886 : vector<8x144xf32>
    %888 = vector.broadcast %754 : f32 to vector<8x144xf32>
    %889 = arith.mulf %888, %45 : vector<8x144xf32>
    %890 = arith.addf %887, %889 : vector<8x144xf32>
    %891 = vector.broadcast %755 : f32 to vector<8x144xf32>
    %892 = arith.mulf %891, %47 : vector<8x144xf32>
    %893 = arith.addf %890, %892 : vector<8x144xf32>
    %894 = vector.broadcast %756 : f32 to vector<8x144xf32>
    %895 = arith.mulf %894, %51 : vector<8x144xf32>
    %896 = arith.addf %893, %895 : vector<8x144xf32>
    %897 = vector.broadcast %757 : f32 to vector<8x144xf32>
    %898 = arith.mulf %897, %53 : vector<8x144xf32>
    %899 = arith.addf %896, %898 : vector<8x144xf32>
    %900 = vector.broadcast %758 : f32 to vector<8x144xf32>
    %901 = arith.mulf %900, %55 : vector<8x144xf32>
    %902 = arith.addf %899, %901 : vector<8x144xf32>
    %903 = vector.broadcast %759 : f32 to vector<8x144xf32>
    %904 = arith.mulf %903, %57 : vector<8x144xf32>
    %905 = arith.addf %902, %904 : vector<8x144xf32>
    %906 = vector.broadcast %760 : f32 to vector<8x144xf32>
    %907 = arith.mulf %906, %59 : vector<8x144xf32>
    %908 = arith.addf %905, %907 : vector<8x144xf32>
    %909 = arith.maximumf %834, %908 : vector<8x144xf32>
    %910 = vector.broadcast %736 : f32 to vector<8x144xf32>
    %911 = arith.mulf %910, %13 : vector<8x144xf32>
    %912 = vector.broadcast %737 : f32 to vector<8x144xf32>
    %913 = arith.mulf %912, %15 : vector<8x144xf32>
    %914 = arith.addf %911, %913 : vector<8x144xf32>
    %915 = vector.broadcast %738 : f32 to vector<8x144xf32>
    %916 = arith.mulf %915, %17 : vector<8x144xf32>
    %917 = arith.addf %914, %916 : vector<8x144xf32>
    %918 = vector.broadcast %739 : f32 to vector<8x144xf32>
    %919 = arith.mulf %918, %19 : vector<8x144xf32>
    %920 = arith.addf %917, %919 : vector<8x144xf32>
    %921 = vector.broadcast %740 : f32 to vector<8x144xf32>
    %922 = arith.mulf %921, %21 : vector<8x144xf32>
    %923 = arith.addf %920, %922 : vector<8x144xf32>
    %924 = vector.broadcast %741 : f32 to vector<8x144xf32>
    %925 = arith.mulf %924, %25 : vector<8x144xf32>
    %926 = arith.addf %923, %925 : vector<8x144xf32>
    %927 = vector.broadcast %742 : f32 to vector<8x144xf32>
    %928 = arith.mulf %927, %27 : vector<8x144xf32>
    %929 = arith.addf %926, %928 : vector<8x144xf32>
    %930 = vector.broadcast %743 : f32 to vector<8x144xf32>
    %931 = arith.mulf %930, %29 : vector<8x144xf32>
    %932 = arith.addf %929, %931 : vector<8x144xf32>
    %933 = vector.broadcast %744 : f32 to vector<8x144xf32>
    %934 = arith.mulf %933, %31 : vector<8x144xf32>
    %935 = arith.addf %932, %934 : vector<8x144xf32>
    %936 = vector.broadcast %745 : f32 to vector<8x144xf32>
    %937 = arith.mulf %936, %33 : vector<8x144xf32>
    %938 = arith.addf %935, %937 : vector<8x144xf32>
    %939 = vector.broadcast %746 : f32 to vector<8x144xf32>
    %940 = arith.mulf %939, %37 : vector<8x144xf32>
    %941 = arith.addf %938, %940 : vector<8x144xf32>
    %942 = vector.broadcast %747 : f32 to vector<8x144xf32>
    %943 = arith.mulf %942, %39 : vector<8x144xf32>
    %944 = arith.addf %941, %943 : vector<8x144xf32>
    %945 = vector.broadcast %748 : f32 to vector<8x144xf32>
    %946 = arith.mulf %945, %41 : vector<8x144xf32>
    %947 = arith.addf %944, %946 : vector<8x144xf32>
    %948 = vector.broadcast %749 : f32 to vector<8x144xf32>
    %949 = arith.mulf %948, %43 : vector<8x144xf32>
    %950 = arith.addf %947, %949 : vector<8x144xf32>
    %951 = vector.broadcast %750 : f32 to vector<8x144xf32>
    %952 = arith.mulf %951, %45 : vector<8x144xf32>
    %953 = arith.addf %950, %952 : vector<8x144xf32>
    %954 = vector.broadcast %751 : f32 to vector<8x144xf32>
    %955 = arith.mulf %954, %49 : vector<8x144xf32>
    %956 = arith.addf %953, %955 : vector<8x144xf32>
    %957 = vector.broadcast %752 : f32 to vector<8x144xf32>
    %958 = arith.mulf %957, %51 : vector<8x144xf32>
    %959 = arith.addf %956, %958 : vector<8x144xf32>
    %960 = vector.broadcast %753 : f32 to vector<8x144xf32>
    %961 = arith.mulf %960, %53 : vector<8x144xf32>
    %962 = arith.addf %959, %961 : vector<8x144xf32>
    %963 = vector.broadcast %754 : f32 to vector<8x144xf32>
    %964 = arith.mulf %963, %55 : vector<8x144xf32>
    %965 = arith.addf %962, %964 : vector<8x144xf32>
    %966 = vector.broadcast %755 : f32 to vector<8x144xf32>
    %967 = arith.mulf %966, %57 : vector<8x144xf32>
    %968 = arith.addf %965, %967 : vector<8x144xf32>
    %969 = vector.broadcast %756 : f32 to vector<8x144xf32>
    %970 = arith.mulf %969, %61 : vector<8x144xf32>
    %971 = arith.addf %968, %970 : vector<8x144xf32>
    %972 = vector.broadcast %757 : f32 to vector<8x144xf32>
    %973 = arith.mulf %972, %63 : vector<8x144xf32>
    %974 = arith.addf %971, %973 : vector<8x144xf32>
    %975 = vector.broadcast %758 : f32 to vector<8x144xf32>
    %976 = arith.mulf %975, %65 : vector<8x144xf32>
    %977 = arith.addf %974, %976 : vector<8x144xf32>
    %978 = vector.broadcast %759 : f32 to vector<8x144xf32>
    %979 = arith.mulf %978, %67 : vector<8x144xf32>
    %980 = arith.addf %977, %979 : vector<8x144xf32>
    %981 = vector.broadcast %760 : f32 to vector<8x144xf32>
    %982 = arith.mulf %981, %69 : vector<8x144xf32>
    %983 = arith.addf %980, %982 : vector<8x144xf32>
    %984 = arith.maximumf %909, %983 : vector<8x144xf32>
    %985 = vector.broadcast %736 : f32 to vector<8x144xf32>
    %986 = arith.mulf %985, %15 : vector<8x144xf32>
    %987 = vector.broadcast %737 : f32 to vector<8x144xf32>
    %988 = arith.mulf %987, %17 : vector<8x144xf32>
    %989 = arith.addf %986, %988 : vector<8x144xf32>
    %990 = vector.broadcast %738 : f32 to vector<8x144xf32>
    %991 = arith.mulf %990, %19 : vector<8x144xf32>
    %992 = arith.addf %989, %991 : vector<8x144xf32>
    %993 = vector.broadcast %739 : f32 to vector<8x144xf32>
    %994 = arith.mulf %993, %21 : vector<8x144xf32>
    %995 = arith.addf %992, %994 : vector<8x144xf32>
    %996 = vector.broadcast %740 : f32 to vector<8x144xf32>
    %997 = arith.mulf %996, %23 : vector<8x144xf32>
    %998 = arith.addf %995, %997 : vector<8x144xf32>
    %999 = vector.broadcast %741 : f32 to vector<8x144xf32>
    %1000 = arith.mulf %999, %27 : vector<8x144xf32>
    %1001 = arith.addf %998, %1000 : vector<8x144xf32>
    %1002 = vector.broadcast %742 : f32 to vector<8x144xf32>
    %1003 = arith.mulf %1002, %29 : vector<8x144xf32>
    %1004 = arith.addf %1001, %1003 : vector<8x144xf32>
    %1005 = vector.broadcast %743 : f32 to vector<8x144xf32>
    %1006 = arith.mulf %1005, %31 : vector<8x144xf32>
    %1007 = arith.addf %1004, %1006 : vector<8x144xf32>
    %1008 = vector.broadcast %744 : f32 to vector<8x144xf32>
    %1009 = arith.mulf %1008, %33 : vector<8x144xf32>
    %1010 = arith.addf %1007, %1009 : vector<8x144xf32>
    %1011 = vector.broadcast %745 : f32 to vector<8x144xf32>
    %1012 = arith.mulf %1011, %35 : vector<8x144xf32>
    %1013 = arith.addf %1010, %1012 : vector<8x144xf32>
    %1014 = vector.broadcast %746 : f32 to vector<8x144xf32>
    %1015 = arith.mulf %1014, %39 : vector<8x144xf32>
    %1016 = arith.addf %1013, %1015 : vector<8x144xf32>
    %1017 = vector.broadcast %747 : f32 to vector<8x144xf32>
    %1018 = arith.mulf %1017, %41 : vector<8x144xf32>
    %1019 = arith.addf %1016, %1018 : vector<8x144xf32>
    %1020 = vector.broadcast %748 : f32 to vector<8x144xf32>
    %1021 = arith.mulf %1020, %43 : vector<8x144xf32>
    %1022 = arith.addf %1019, %1021 : vector<8x144xf32>
    %1023 = vector.broadcast %749 : f32 to vector<8x144xf32>
    %1024 = arith.mulf %1023, %45 : vector<8x144xf32>
    %1025 = arith.addf %1022, %1024 : vector<8x144xf32>
    %1026 = vector.broadcast %750 : f32 to vector<8x144xf32>
    %1027 = arith.mulf %1026, %47 : vector<8x144xf32>
    %1028 = arith.addf %1025, %1027 : vector<8x144xf32>
    %1029 = vector.broadcast %751 : f32 to vector<8x144xf32>
    %1030 = arith.mulf %1029, %51 : vector<8x144xf32>
    %1031 = arith.addf %1028, %1030 : vector<8x144xf32>
    %1032 = vector.broadcast %752 : f32 to vector<8x144xf32>
    %1033 = arith.mulf %1032, %53 : vector<8x144xf32>
    %1034 = arith.addf %1031, %1033 : vector<8x144xf32>
    %1035 = vector.broadcast %753 : f32 to vector<8x144xf32>
    %1036 = arith.mulf %1035, %55 : vector<8x144xf32>
    %1037 = arith.addf %1034, %1036 : vector<8x144xf32>
    %1038 = vector.broadcast %754 : f32 to vector<8x144xf32>
    %1039 = arith.mulf %1038, %57 : vector<8x144xf32>
    %1040 = arith.addf %1037, %1039 : vector<8x144xf32>
    %1041 = vector.broadcast %755 : f32 to vector<8x144xf32>
    %1042 = arith.mulf %1041, %59 : vector<8x144xf32>
    %1043 = arith.addf %1040, %1042 : vector<8x144xf32>
    %1044 = vector.broadcast %756 : f32 to vector<8x144xf32>
    %1045 = arith.mulf %1044, %63 : vector<8x144xf32>
    %1046 = arith.addf %1043, %1045 : vector<8x144xf32>
    %1047 = vector.broadcast %757 : f32 to vector<8x144xf32>
    %1048 = arith.mulf %1047, %65 : vector<8x144xf32>
    %1049 = arith.addf %1046, %1048 : vector<8x144xf32>
    %1050 = vector.broadcast %758 : f32 to vector<8x144xf32>
    %1051 = arith.mulf %1050, %67 : vector<8x144xf32>
    %1052 = arith.addf %1049, %1051 : vector<8x144xf32>
    %1053 = vector.broadcast %759 : f32 to vector<8x144xf32>
    %1054 = arith.mulf %1053, %69 : vector<8x144xf32>
    %1055 = arith.addf %1052, %1054 : vector<8x144xf32>
    %1056 = vector.broadcast %760 : f32 to vector<8x144xf32>
    %1057 = arith.mulf %1056, %71 : vector<8x144xf32>
    %1058 = arith.addf %1055, %1057 : vector<8x144xf32>
    %1059 = arith.maximumf %984, %1058 : vector<8x144xf32>
    %c102 = arith.constant 102 : index
    %1060 = memref.load %arg2[%c102] : memref<105xf32, #tpu.memory_space<smem>>
    %1061 = vector.broadcast %1060 : f32 to vector<8x144xf32>
    %1062 = arith.addf %1059, %1061 : vector<8x144xf32>
    %cst_111 = arith.constant 0.000000e+00 : f32
    %1063 = vector.broadcast %cst_111 : f32 to vector<8x144xf32>
    %1064 = arith.cmpf oge, %1062, %1063 : vector<8x144xf32>
    %cst_112 = arith.constant 0.00999999977 : f32
    %1065 = vector.broadcast %cst_112 : f32 to vector<8x144xf32>
    %1066 = arith.mulf %1065, %1062 : vector<8x144xf32>
    %1067 = arith.select %1064, %1062, %1066 : vector<8x144xi1>, vector<8x144xf32>
    %c75 = arith.constant 75 : index
    %1068 = memref.load %arg2[%c75] : memref<105xf32, #tpu.memory_space<smem>>
    %c76 = arith.constant 76 : index
    %1069 = memref.load %arg2[%c76] : memref<105xf32, #tpu.memory_space<smem>>
    %c77 = arith.constant 77 : index
    %1070 = memref.load %arg2[%c77] : memref<105xf32, #tpu.memory_space<smem>>
    %c78 = arith.constant 78 : index
    %1071 = memref.load %arg2[%c78] : memref<105xf32, #tpu.memory_space<smem>>
    %c79 = arith.constant 79 : index
    %1072 = memref.load %arg2[%c79] : memref<105xf32, #tpu.memory_space<smem>>
    %c80 = arith.constant 80 : index
    %1073 = memref.load %arg2[%c80] : memref<105xf32, #tpu.memory_space<smem>>
    %c81 = arith.constant 81 : index
    %1074 = memref.load %arg2[%c81] : memref<105xf32, #tpu.memory_space<smem>>
    %c82 = arith.constant 82 : index
    %1075 = memref.load %arg2[%c82] : memref<105xf32, #tpu.memory_space<smem>>
    %c83 = arith.constant 83 : index
    %1076 = memref.load %arg2[%c83] : memref<105xf32, #tpu.memory_space<smem>>
    %c84 = arith.constant 84 : index
    %1077 = memref.load %arg2[%c84] : memref<105xf32, #tpu.memory_space<smem>>
    %c85 = arith.constant 85 : index
    %1078 = memref.load %arg2[%c85] : memref<105xf32, #tpu.memory_space<smem>>
    %c86 = arith.constant 86 : index
    %1079 = memref.load %arg2[%c86] : memref<105xf32, #tpu.memory_space<smem>>
    %c87 = arith.constant 87 : index
    %1080 = memref.load %arg2[%c87] : memref<105xf32, #tpu.memory_space<smem>>
    %c88 = arith.constant 88 : index
    %1081 = memref.load %arg2[%c88] : memref<105xf32, #tpu.memory_space<smem>>
    %c89 = arith.constant 89 : index
    %1082 = memref.load %arg2[%c89] : memref<105xf32, #tpu.memory_space<smem>>
    %c90 = arith.constant 90 : index
    %1083 = memref.load %arg2[%c90] : memref<105xf32, #tpu.memory_space<smem>>
    %c91 = arith.constant 91 : index
    %1084 = memref.load %arg2[%c91] : memref<105xf32, #tpu.memory_space<smem>>
    %c92 = arith.constant 92 : index
    %1085 = memref.load %arg2[%c92] : memref<105xf32, #tpu.memory_space<smem>>
    %c93 = arith.constant 93 : index
    %1086 = memref.load %arg2[%c93] : memref<105xf32, #tpu.memory_space<smem>>
    %c94 = arith.constant 94 : index
    %1087 = memref.load %arg2[%c94] : memref<105xf32, #tpu.memory_space<smem>>
    %c95 = arith.constant 95 : index
    %1088 = memref.load %arg2[%c95] : memref<105xf32, #tpu.memory_space<smem>>
    %c96 = arith.constant 96 : index
    %1089 = memref.load %arg2[%c96] : memref<105xf32, #tpu.memory_space<smem>>
    %c97 = arith.constant 97 : index
    %1090 = memref.load %arg2[%c97] : memref<105xf32, #tpu.memory_space<smem>>
    %c98 = arith.constant 98 : index
    %1091 = memref.load %arg2[%c98] : memref<105xf32, #tpu.memory_space<smem>>
    %c99 = arith.constant 99 : index
    %1092 = memref.load %arg2[%c99] : memref<105xf32, #tpu.memory_space<smem>>
    %1093 = vector.broadcast %1068 : f32 to vector<8x144xf32>
    %1094 = arith.mulf %1093, %1 : vector<8x144xf32>
    %1095 = vector.broadcast %1069 : f32 to vector<8x144xf32>
    %1096 = arith.mulf %1095, %3 : vector<8x144xf32>
    %1097 = arith.addf %1094, %1096 : vector<8x144xf32>
    %1098 = vector.broadcast %1070 : f32 to vector<8x144xf32>
    %1099 = arith.mulf %1098, %5 : vector<8x144xf32>
    %1100 = arith.addf %1097, %1099 : vector<8x144xf32>
    %1101 = vector.broadcast %1071 : f32 to vector<8x144xf32>
    %1102 = arith.mulf %1101, %7 : vector<8x144xf32>
    %1103 = arith.addf %1100, %1102 : vector<8x144xf32>
    %1104 = vector.broadcast %1072 : f32 to vector<8x144xf32>
    %1105 = arith.mulf %1104, %9 : vector<8x144xf32>
    %1106 = arith.addf %1103, %1105 : vector<8x144xf32>
    %1107 = vector.broadcast %1073 : f32 to vector<8x144xf32>
    %1108 = arith.mulf %1107, %13 : vector<8x144xf32>
    %1109 = arith.addf %1106, %1108 : vector<8x144xf32>
    %1110 = vector.broadcast %1074 : f32 to vector<8x144xf32>
    %1111 = arith.mulf %1110, %15 : vector<8x144xf32>
    %1112 = arith.addf %1109, %1111 : vector<8x144xf32>
    %1113 = vector.broadcast %1075 : f32 to vector<8x144xf32>
    %1114 = arith.mulf %1113, %17 : vector<8x144xf32>
    %1115 = arith.addf %1112, %1114 : vector<8x144xf32>
    %1116 = vector.broadcast %1076 : f32 to vector<8x144xf32>
    %1117 = arith.mulf %1116, %19 : vector<8x144xf32>
    %1118 = arith.addf %1115, %1117 : vector<8x144xf32>
    %1119 = vector.broadcast %1077 : f32 to vector<8x144xf32>
    %1120 = arith.mulf %1119, %21 : vector<8x144xf32>
    %1121 = arith.addf %1118, %1120 : vector<8x144xf32>
    %1122 = vector.broadcast %1078 : f32 to vector<8x144xf32>
    %1123 = arith.mulf %1122, %25 : vector<8x144xf32>
    %1124 = arith.addf %1121, %1123 : vector<8x144xf32>
    %1125 = vector.broadcast %1079 : f32 to vector<8x144xf32>
    %1126 = arith.mulf %1125, %27 : vector<8x144xf32>
    %1127 = arith.addf %1124, %1126 : vector<8x144xf32>
    %1128 = vector.broadcast %1080 : f32 to vector<8x144xf32>
    %1129 = arith.mulf %1128, %29 : vector<8x144xf32>
    %1130 = arith.addf %1127, %1129 : vector<8x144xf32>
    %1131 = vector.broadcast %1081 : f32 to vector<8x144xf32>
    %1132 = arith.mulf %1131, %31 : vector<8x144xf32>
    %1133 = arith.addf %1130, %1132 : vector<8x144xf32>
    %1134 = vector.broadcast %1082 : f32 to vector<8x144xf32>
    %1135 = arith.mulf %1134, %33 : vector<8x144xf32>
    %1136 = arith.addf %1133, %1135 : vector<8x144xf32>
    %1137 = vector.broadcast %1083 : f32 to vector<8x144xf32>
    %1138 = arith.mulf %1137, %37 : vector<8x144xf32>
    %1139 = arith.addf %1136, %1138 : vector<8x144xf32>
    %1140 = vector.broadcast %1084 : f32 to vector<8x144xf32>
    %1141 = arith.mulf %1140, %39 : vector<8x144xf32>
    %1142 = arith.addf %1139, %1141 : vector<8x144xf32>
    %1143 = vector.broadcast %1085 : f32 to vector<8x144xf32>
    %1144 = arith.mulf %1143, %41 : vector<8x144xf32>
    %1145 = arith.addf %1142, %1144 : vector<8x144xf32>
    %1146 = vector.broadcast %1086 : f32 to vector<8x144xf32>
    %1147 = arith.mulf %1146, %43 : vector<8x144xf32>
    %1148 = arith.addf %1145, %1147 : vector<8x144xf32>
    %1149 = vector.broadcast %1087 : f32 to vector<8x144xf32>
    %1150 = arith.mulf %1149, %45 : vector<8x144xf32>
    %1151 = arith.addf %1148, %1150 : vector<8x144xf32>
    %1152 = vector.broadcast %1088 : f32 to vector<8x144xf32>
    %1153 = arith.mulf %1152, %49 : vector<8x144xf32>
    %1154 = arith.addf %1151, %1153 : vector<8x144xf32>
    %1155 = vector.broadcast %1089 : f32 to vector<8x144xf32>
    %1156 = arith.mulf %1155, %51 : vector<8x144xf32>
    %1157 = arith.addf %1154, %1156 : vector<8x144xf32>
    %1158 = vector.broadcast %1090 : f32 to vector<8x144xf32>
    %1159 = arith.mulf %1158, %53 : vector<8x144xf32>
    %1160 = arith.addf %1157, %1159 : vector<8x144xf32>
    %1161 = vector.broadcast %1091 : f32 to vector<8x144xf32>
    %1162 = arith.mulf %1161, %55 : vector<8x144xf32>
    %1163 = arith.addf %1160, %1162 : vector<8x144xf32>
    %1164 = vector.broadcast %1092 : f32 to vector<8x144xf32>
    %1165 = arith.mulf %1164, %57 : vector<8x144xf32>
    %1166 = arith.addf %1163, %1165 : vector<8x144xf32>
    %1167 = vector.broadcast %1068 : f32 to vector<8x144xf32>
    %1168 = arith.mulf %1167, %3 : vector<8x144xf32>
    %1169 = vector.broadcast %1069 : f32 to vector<8x144xf32>
    %1170 = arith.mulf %1169, %5 : vector<8x144xf32>
    %1171 = arith.addf %1168, %1170 : vector<8x144xf32>
    %1172 = vector.broadcast %1070 : f32 to vector<8x144xf32>
    %1173 = arith.mulf %1172, %7 : vector<8x144xf32>
    %1174 = arith.addf %1171, %1173 : vector<8x144xf32>
    %1175 = vector.broadcast %1071 : f32 to vector<8x144xf32>
    %1176 = arith.mulf %1175, %9 : vector<8x144xf32>
    %1177 = arith.addf %1174, %1176 : vector<8x144xf32>
    %1178 = vector.broadcast %1072 : f32 to vector<8x144xf32>
    %1179 = arith.mulf %1178, %11 : vector<8x144xf32>
    %1180 = arith.addf %1177, %1179 : vector<8x144xf32>
    %1181 = vector.broadcast %1073 : f32 to vector<8x144xf32>
    %1182 = arith.mulf %1181, %15 : vector<8x144xf32>
    %1183 = arith.addf %1180, %1182 : vector<8x144xf32>
    %1184 = vector.broadcast %1074 : f32 to vector<8x144xf32>
    %1185 = arith.mulf %1184, %17 : vector<8x144xf32>
    %1186 = arith.addf %1183, %1185 : vector<8x144xf32>
    %1187 = vector.broadcast %1075 : f32 to vector<8x144xf32>
    %1188 = arith.mulf %1187, %19 : vector<8x144xf32>
    %1189 = arith.addf %1186, %1188 : vector<8x144xf32>
    %1190 = vector.broadcast %1076 : f32 to vector<8x144xf32>
    %1191 = arith.mulf %1190, %21 : vector<8x144xf32>
    %1192 = arith.addf %1189, %1191 : vector<8x144xf32>
    %1193 = vector.broadcast %1077 : f32 to vector<8x144xf32>
    %1194 = arith.mulf %1193, %23 : vector<8x144xf32>
    %1195 = arith.addf %1192, %1194 : vector<8x144xf32>
    %1196 = vector.broadcast %1078 : f32 to vector<8x144xf32>
    %1197 = arith.mulf %1196, %27 : vector<8x144xf32>
    %1198 = arith.addf %1195, %1197 : vector<8x144xf32>
    %1199 = vector.broadcast %1079 : f32 to vector<8x144xf32>
    %1200 = arith.mulf %1199, %29 : vector<8x144xf32>
    %1201 = arith.addf %1198, %1200 : vector<8x144xf32>
    %1202 = vector.broadcast %1080 : f32 to vector<8x144xf32>
    %1203 = arith.mulf %1202, %31 : vector<8x144xf32>
    %1204 = arith.addf %1201, %1203 : vector<8x144xf32>
    %1205 = vector.broadcast %1081 : f32 to vector<8x144xf32>
    %1206 = arith.mulf %1205, %33 : vector<8x144xf32>
    %1207 = arith.addf %1204, %1206 : vector<8x144xf32>
    %1208 = vector.broadcast %1082 : f32 to vector<8x144xf32>
    %1209 = arith.mulf %1208, %35 : vector<8x144xf32>
    %1210 = arith.addf %1207, %1209 : vector<8x144xf32>
    %1211 = vector.broadcast %1083 : f32 to vector<8x144xf32>
    %1212 = arith.mulf %1211, %39 : vector<8x144xf32>
    %1213 = arith.addf %1210, %1212 : vector<8x144xf32>
    %1214 = vector.broadcast %1084 : f32 to vector<8x144xf32>
    %1215 = arith.mulf %1214, %41 : vector<8x144xf32>
    %1216 = arith.addf %1213, %1215 : vector<8x144xf32>
    %1217 = vector.broadcast %1085 : f32 to vector<8x144xf32>
    %1218 = arith.mulf %1217, %43 : vector<8x144xf32>
    %1219 = arith.addf %1216, %1218 : vector<8x144xf32>
    %1220 = vector.broadcast %1086 : f32 to vector<8x144xf32>
    %1221 = arith.mulf %1220, %45 : vector<8x144xf32>
    %1222 = arith.addf %1219, %1221 : vector<8x144xf32>
    %1223 = vector.broadcast %1087 : f32 to vector<8x144xf32>
    %1224 = arith.mulf %1223, %47 : vector<8x144xf32>
    %1225 = arith.addf %1222, %1224 : vector<8x144xf32>
    %1226 = vector.broadcast %1088 : f32 to vector<8x144xf32>
    %1227 = arith.mulf %1226, %51 : vector<8x144xf32>
    %1228 = arith.addf %1225, %1227 : vector<8x144xf32>
    %1229 = vector.broadcast %1089 : f32 to vector<8x144xf32>
    %1230 = arith.mulf %1229, %53 : vector<8x144xf32>
    %1231 = arith.addf %1228, %1230 : vector<8x144xf32>
    %1232 = vector.broadcast %1090 : f32 to vector<8x144xf32>
    %1233 = arith.mulf %1232, %55 : vector<8x144xf32>
    %1234 = arith.addf %1231, %1233 : vector<8x144xf32>
    %1235 = vector.broadcast %1091 : f32 to vector<8x144xf32>
    %1236 = arith.mulf %1235, %57 : vector<8x144xf32>
    %1237 = arith.addf %1234, %1236 : vector<8x144xf32>
    %1238 = vector.broadcast %1092 : f32 to vector<8x144xf32>
    %1239 = arith.mulf %1238, %59 : vector<8x144xf32>
    %1240 = arith.addf %1237, %1239 : vector<8x144xf32>
    %1241 = arith.maximumf %1166, %1240 : vector<8x144xf32>
    %1242 = vector.broadcast %1068 : f32 to vector<8x144xf32>
    %1243 = arith.mulf %1242, %13 : vector<8x144xf32>
    %1244 = vector.broadcast %1069 : f32 to vector<8x144xf32>
    %1245 = arith.mulf %1244, %15 : vector<8x144xf32>
    %1246 = arith.addf %1243, %1245 : vector<8x144xf32>
    %1247 = vector.broadcast %1070 : f32 to vector<8x144xf32>
    %1248 = arith.mulf %1247, %17 : vector<8x144xf32>
    %1249 = arith.addf %1246, %1248 : vector<8x144xf32>
    %1250 = vector.broadcast %1071 : f32 to vector<8x144xf32>
    %1251 = arith.mulf %1250, %19 : vector<8x144xf32>
    %1252 = arith.addf %1249, %1251 : vector<8x144xf32>
    %1253 = vector.broadcast %1072 : f32 to vector<8x144xf32>
    %1254 = arith.mulf %1253, %21 : vector<8x144xf32>
    %1255 = arith.addf %1252, %1254 : vector<8x144xf32>
    %1256 = vector.broadcast %1073 : f32 to vector<8x144xf32>
    %1257 = arith.mulf %1256, %25 : vector<8x144xf32>
    %1258 = arith.addf %1255, %1257 : vector<8x144xf32>
    %1259 = vector.broadcast %1074 : f32 to vector<8x144xf32>
    %1260 = arith.mulf %1259, %27 : vector<8x144xf32>
    %1261 = arith.addf %1258, %1260 : vector<8x144xf32>
    %1262 = vector.broadcast %1075 : f32 to vector<8x144xf32>
    %1263 = arith.mulf %1262, %29 : vector<8x144xf32>
    %1264 = arith.addf %1261, %1263 : vector<8x144xf32>
    %1265 = vector.broadcast %1076 : f32 to vector<8x144xf32>
    %1266 = arith.mulf %1265, %31 : vector<8x144xf32>
    %1267 = arith.addf %1264, %1266 : vector<8x144xf32>
    %1268 = vector.broadcast %1077 : f32 to vector<8x144xf32>
    %1269 = arith.mulf %1268, %33 : vector<8x144xf32>
    %1270 = arith.addf %1267, %1269 : vector<8x144xf32>
    %1271 = vector.broadcast %1078 : f32 to vector<8x144xf32>
    %1272 = arith.mulf %1271, %37 : vector<8x144xf32>
    %1273 = arith.addf %1270, %1272 : vector<8x144xf32>
    %1274 = vector.broadcast %1079 : f32 to vector<8x144xf32>
    %1275 = arith.mulf %1274, %39 : vector<8x144xf32>
    %1276 = arith.addf %1273, %1275 : vector<8x144xf32>
    %1277 = vector.broadcast %1080 : f32 to vector<8x144xf32>
    %1278 = arith.mulf %1277, %41 : vector<8x144xf32>
    %1279 = arith.addf %1276, %1278 : vector<8x144xf32>
    %1280 = vector.broadcast %1081 : f32 to vector<8x144xf32>
    %1281 = arith.mulf %1280, %43 : vector<8x144xf32>
    %1282 = arith.addf %1279, %1281 : vector<8x144xf32>
    %1283 = vector.broadcast %1082 : f32 to vector<8x144xf32>
    %1284 = arith.mulf %1283, %45 : vector<8x144xf32>
    %1285 = arith.addf %1282, %1284 : vector<8x144xf32>
    %1286 = vector.broadcast %1083 : f32 to vector<8x144xf32>
    %1287 = arith.mulf %1286, %49 : vector<8x144xf32>
    %1288 = arith.addf %1285, %1287 : vector<8x144xf32>
    %1289 = vector.broadcast %1084 : f32 to vector<8x144xf32>
    %1290 = arith.mulf %1289, %51 : vector<8x144xf32>
    %1291 = arith.addf %1288, %1290 : vector<8x144xf32>
    %1292 = vector.broadcast %1085 : f32 to vector<8x144xf32>
    %1293 = arith.mulf %1292, %53 : vector<8x144xf32>
    %1294 = arith.addf %1291, %1293 : vector<8x144xf32>
    %1295 = vector.broadcast %1086 : f32 to vector<8x144xf32>
    %1296 = arith.mulf %1295, %55 : vector<8x144xf32>
    %1297 = arith.addf %1294, %1296 : vector<8x144xf32>
    %1298 = vector.broadcast %1087 : f32 to vector<8x144xf32>
    %1299 = arith.mulf %1298, %57 : vector<8x144xf32>
    %1300 = arith.addf %1297, %1299 : vector<8x144xf32>
    %1301 = vector.broadcast %1088 : f32 to vector<8x144xf32>
    %1302 = arith.mulf %1301, %61 : vector<8x144xf32>
    %1303 = arith.addf %1300, %1302 : vector<8x144xf32>
    %1304 = vector.broadcast %1089 : f32 to vector<8x144xf32>
    %1305 = arith.mulf %1304, %63 : vector<8x144xf32>
    %1306 = arith.addf %1303, %1305 : vector<8x144xf32>
    %1307 = vector.broadcast %1090 : f32 to vector<8x144xf32>
    %1308 = arith.mulf %1307, %65 : vector<8x144xf32>
    %1309 = arith.addf %1306, %1308 : vector<8x144xf32>
    %1310 = vector.broadcast %1091 : f32 to vector<8x144xf32>
    %1311 = arith.mulf %1310, %67 : vector<8x144xf32>
    %1312 = arith.addf %1309, %1311 : vector<8x144xf32>
    %1313 = vector.broadcast %1092 : f32 to vector<8x144xf32>
    %1314 = arith.mulf %1313, %69 : vector<8x144xf32>
    %1315 = arith.addf %1312, %1314 : vector<8x144xf32>
    %1316 = arith.maximumf %1241, %1315 : vector<8x144xf32>
    %1317 = vector.broadcast %1068 : f32 to vector<8x144xf32>
    %1318 = arith.mulf %1317, %15 : vector<8x144xf32>
    %1319 = vector.broadcast %1069 : f32 to vector<8x144xf32>
    %1320 = arith.mulf %1319, %17 : vector<8x144xf32>
    %1321 = arith.addf %1318, %1320 : vector<8x144xf32>
    %1322 = vector.broadcast %1070 : f32 to vector<8x144xf32>
    %1323 = arith.mulf %1322, %19 : vector<8x144xf32>
    %1324 = arith.addf %1321, %1323 : vector<8x144xf32>
    %1325 = vector.broadcast %1071 : f32 to vector<8x144xf32>
    %1326 = arith.mulf %1325, %21 : vector<8x144xf32>
    %1327 = arith.addf %1324, %1326 : vector<8x144xf32>
    %1328 = vector.broadcast %1072 : f32 to vector<8x144xf32>
    %1329 = arith.mulf %1328, %23 : vector<8x144xf32>
    %1330 = arith.addf %1327, %1329 : vector<8x144xf32>
    %1331 = vector.broadcast %1073 : f32 to vector<8x144xf32>
    %1332 = arith.mulf %1331, %27 : vector<8x144xf32>
    %1333 = arith.addf %1330, %1332 : vector<8x144xf32>
    %1334 = vector.broadcast %1074 : f32 to vector<8x144xf32>
    %1335 = arith.mulf %1334, %29 : vector<8x144xf32>
    %1336 = arith.addf %1333, %1335 : vector<8x144xf32>
    %1337 = vector.broadcast %1075 : f32 to vector<8x144xf32>
    %1338 = arith.mulf %1337, %31 : vector<8x144xf32>
    %1339 = arith.addf %1336, %1338 : vector<8x144xf32>
    %1340 = vector.broadcast %1076 : f32 to vector<8x144xf32>
    %1341 = arith.mulf %1340, %33 : vector<8x144xf32>
    %1342 = arith.addf %1339, %1341 : vector<8x144xf32>
    %1343 = vector.broadcast %1077 : f32 to vector<8x144xf32>
    %1344 = arith.mulf %1343, %35 : vector<8x144xf32>
    %1345 = arith.addf %1342, %1344 : vector<8x144xf32>
    %1346 = vector.broadcast %1078 : f32 to vector<8x144xf32>
    %1347 = arith.mulf %1346, %39 : vector<8x144xf32>
    %1348 = arith.addf %1345, %1347 : vector<8x144xf32>
    %1349 = vector.broadcast %1079 : f32 to vector<8x144xf32>
    %1350 = arith.mulf %1349, %41 : vector<8x144xf32>
    %1351 = arith.addf %1348, %1350 : vector<8x144xf32>
    %1352 = vector.broadcast %1080 : f32 to vector<8x144xf32>
    %1353 = arith.mulf %1352, %43 : vector<8x144xf32>
    %1354 = arith.addf %1351, %1353 : vector<8x144xf32>
    %1355 = vector.broadcast %1081 : f32 to vector<8x144xf32>
    %1356 = arith.mulf %1355, %45 : vector<8x144xf32>
    %1357 = arith.addf %1354, %1356 : vector<8x144xf32>
    %1358 = vector.broadcast %1082 : f32 to vector<8x144xf32>
    %1359 = arith.mulf %1358, %47 : vector<8x144xf32>
    %1360 = arith.addf %1357, %1359 : vector<8x144xf32>
    %1361 = vector.broadcast %1083 : f32 to vector<8x144xf32>
    %1362 = arith.mulf %1361, %51 : vector<8x144xf32>
    %1363 = arith.addf %1360, %1362 : vector<8x144xf32>
    %1364 = vector.broadcast %1084 : f32 to vector<8x144xf32>
    %1365 = arith.mulf %1364, %53 : vector<8x144xf32>
    %1366 = arith.addf %1363, %1365 : vector<8x144xf32>
    %1367 = vector.broadcast %1085 : f32 to vector<8x144xf32>
    %1368 = arith.mulf %1367, %55 : vector<8x144xf32>
    %1369 = arith.addf %1366, %1368 : vector<8x144xf32>
    %1370 = vector.broadcast %1086 : f32 to vector<8x144xf32>
    %1371 = arith.mulf %1370, %57 : vector<8x144xf32>
    %1372 = arith.addf %1369, %1371 : vector<8x144xf32>
    %1373 = vector.broadcast %1087 : f32 to vector<8x144xf32>
    %1374 = arith.mulf %1373, %59 : vector<8x144xf32>
    %1375 = arith.addf %1372, %1374 : vector<8x144xf32>
    %1376 = vector.broadcast %1088 : f32 to vector<8x144xf32>
    %1377 = arith.mulf %1376, %63 : vector<8x144xf32>
    %1378 = arith.addf %1375, %1377 : vector<8x144xf32>
    %1379 = vector.broadcast %1089 : f32 to vector<8x144xf32>
    %1380 = arith.mulf %1379, %65 : vector<8x144xf32>
    %1381 = arith.addf %1378, %1380 : vector<8x144xf32>
    %1382 = vector.broadcast %1090 : f32 to vector<8x144xf32>
    %1383 = arith.mulf %1382, %67 : vector<8x144xf32>
    %1384 = arith.addf %1381, %1383 : vector<8x144xf32>
    %1385 = vector.broadcast %1091 : f32 to vector<8x144xf32>
    %1386 = arith.mulf %1385, %69 : vector<8x144xf32>
    %1387 = arith.addf %1384, %1386 : vector<8x144xf32>
    %1388 = vector.broadcast %1092 : f32 to vector<8x144xf32>
    %1389 = arith.mulf %1388, %71 : vector<8x144xf32>
    %1390 = arith.addf %1387, %1389 : vector<8x144xf32>
    %1391 = arith.maximumf %1316, %1390 : vector<8x144xf32>
    %c103 = arith.constant 103 : index
    %1392 = memref.load %arg2[%c103] : memref<105xf32, #tpu.memory_space<smem>>
    %1393 = vector.broadcast %1392 : f32 to vector<8x144xf32>
    %1394 = arith.addf %1391, %1393 : vector<8x144xf32>
    %cst_113 = arith.constant 0.000000e+00 : f32
    %1395 = vector.broadcast %cst_113 : f32 to vector<8x144xf32>
    %1396 = arith.cmpf oge, %1394, %1395 : vector<8x144xf32>
    %cst_114 = arith.constant 0.00999999977 : f32
    %1397 = vector.broadcast %cst_114 : f32 to vector<8x144xf32>
    %1398 = arith.mulf %1397, %1394 : vector<8x144xf32>
    %1399 = arith.select %1396, %1394, %1398 : vector<8x144xi1>, vector<8x144xf32>
    %c0_115 = arith.constant 0 : index
    %c0_116 = arith.constant 0 : index
    %1400 = vector.load %arg3[%c0_115, %c0_116] : memref<576x512xbf16, #tpu.memory_space<vmem>>, vector<144x512xbf16>
    %1401 = arith.truncf %403 : vector<8x144xf32> to vector<8x144xbf16>
    %cst_117 = arith.constant dense<0.000000e+00> : vector<8x512xf32>
    %1402 = tpu.matmul %1401, %1400, %cst_117 {dimension_numbers = #tpu.dot_dimension_numbers<[1], [0], [0], [1], [0, 0, 1, 1], [], []>} : vector<8x144xbf16>, vector<144x512xbf16>, vector<8x512xf32> -> vector<8x512xf32>
    %c144 = arith.constant 144 : index
    %c0_118 = arith.constant 0 : index
    %1403 = vector.load %arg3[%c144, %c0_118] : memref<576x512xbf16, #tpu.memory_space<vmem>>, vector<144x512xbf16>
    %1404 = arith.truncf %735 : vector<8x144xf32> to vector<8x144xbf16>
    %cst_119 = arith.constant dense<0.000000e+00> : vector<8x512xf32>
    %1405 = tpu.matmul %1404, %1403, %cst_119 {dimension_numbers = #tpu.dot_dimension_numbers<[1], [0], [0], [1], [0, 0, 1, 1], [], []>} : vector<8x144xbf16>, vector<144x512xbf16>, vector<8x512xf32> -> vector<8x512xf32>
    %1406 = arith.addf %1402, %1405 : vector<8x512xf32>
    %c288 = arith.constant 288 : index
    %c0_120 = arith.constant 0 : index
    %1407 = vector.load %arg3[%c288, %c0_120] : memref<576x512xbf16, #tpu.memory_space<vmem>>, vector<144x512xbf16>
    %1408 = arith.truncf %1067 : vector<8x144xf32> to vector<8x144xbf16>
    %cst_121 = arith.constant dense<0.000000e+00> : vector<8x512xf32>
    %1409 = tpu.matmul %1408, %1407, %cst_121 {dimension_numbers = #tpu.dot_dimension_numbers<[1], [0], [0], [1], [0, 0, 1, 1], [], []>} : vector<8x144xbf16>, vector<144x512xbf16>, vector<8x512xf32> -> vector<8x512xf32>
    %1410 = arith.addf %1406, %1409 : vector<8x512xf32>
    %c432 = arith.constant 432 : index
    %c0_122 = arith.constant 0 : index
    %1411 = vector.load %arg3[%c432, %c0_122] : memref<576x512xbf16, #tpu.memory_space<vmem>>, vector<144x512xbf16>
    %1412 = arith.truncf %1399 : vector<8x144xf32> to vector<8x144xbf16>
    %cst_123 = arith.constant dense<0.000000e+00> : vector<8x512xf32>
    %1413 = tpu.matmul %1412, %1411, %cst_123 {dimension_numbers = #tpu.dot_dimension_numbers<[1], [0], [0], [1], [0, 0, 1, 1], [], []>} : vector<8x144xbf16>, vector<144x512xbf16>, vector<8x512xf32> -> vector<8x512xf32>
    %1414 = arith.addf %1410, %1413 : vector<8x512xf32>
    %c0_124 = arith.constant 0 : index
    %c0_125 = arith.constant 0 : index
    %1415 = vector.load %arg4[%c0_124, %c0_125] : memref<1x512xf32, #tpu.memory_space<vmem>>, vector<1x512xf32>
    %1416 = vector.broadcast %1415 : vector<1x512xf32> to vector<8x512xf32>
    %1417 = arith.addf %1414, %1416 : vector<8x512xf32>
    %1418 = vector.extract_strided_slice %1417 {offsets = [0, 0], sizes = [8, 128], strides = [1, 1]} : vector<8x512xf32> to vector<8x128xf32>
    %1419 = vector.extract_strided_slice %1417 {offsets = [0, 128], sizes = [8, 128], strides = [1, 1]} : vector<8x512xf32> to vector<8x128xf32>
    %1420 = arith.maximumf %1418, %1419 : vector<8x128xf32>
    %1421 = vector.extract_strided_slice %1417 {offsets = [0, 256], sizes = [8, 128], strides = [1, 1]} : vector<8x512xf32> to vector<8x128xf32>
    %1422 = vector.extract_strided_slice %1417 {offsets = [0, 384], sizes = [8, 128], strides = [1, 1]} : vector<8x512xf32> to vector<8x128xf32>
    %1423 = arith.maximumf %1421, %1422 : vector<8x128xf32>
    %1424 = arith.maximumf %1420, %1423 : vector<8x128xf32>
    %cst_126 = arith.constant 0.000000e+00 : f32
    %1425 = vector.broadcast %cst_126 : f32 to vector<8x128xf32>
    %1426 = arith.cmpf oge, %1424, %1425 : vector<8x128xf32>
    %cst_127 = arith.constant 2.000000e-01 : f32
    %1427 = vector.broadcast %cst_127 : f32 to vector<8x128xf32>
    %1428 = arith.mulf %1427, %1424 : vector<8x128xf32>
    %1429 = arith.select %1426, %1424, %1428 : vector<8x128xi1>, vector<8x128xf32>
    %1430 = arith.truncf %1429 : vector<8x128xf32> to vector<8x128xbf16>
    %c0_128 = arith.constant 0 : index
    %c0_129 = arith.constant 0 : index
    %1431 = vector.load %arg5[%c0_128, %c0_129] : memref<128x128xbf16, #tpu.memory_space<vmem>>, vector<128x128xbf16>
    %cst_130 = arith.constant dense<0.000000e+00> : vector<8x128xf32>
    %1432 = tpu.matmul %1430, %1431, %cst_130 {dimension_numbers = #tpu.dot_dimension_numbers<[1], [0], [0], [1], [0, 0, 1, 1], [], []>} : vector<8x128xbf16>, vector<128x128xbf16>, vector<8x128xf32> -> vector<8x128xf32>
    %c0_131 = arith.constant 0 : index
    %c0_132 = arith.constant 0 : index
    %1433 = vector.load %arg6[%c0_131, %c0_132] : memref<1x128xf32, #tpu.memory_space<vmem>>, vector<1x128xf32>
    %1434 = vector.broadcast %1433 : vector<1x128xf32> to vector<8x128xf32>
    %1435 = arith.addf %1432, %1434 : vector<8x128xf32>
    %cst_133 = arith.constant 0.000000e+00 : f32
    %1436 = vector.broadcast %cst_133 : f32 to vector<8x128xf32>
    %1437 = arith.cmpf oge, %1435, %1436 : vector<8x128xf32>
    %cst_134 = arith.constant 2.000000e-01 : f32
    %1438 = vector.broadcast %cst_134 : f32 to vector<8x128xf32>
    %1439 = arith.mulf %1438, %1435 : vector<8x128xf32>
    %1440 = arith.select %1437, %1435, %1439 : vector<8x128xi1>, vector<8x128xf32>
    %c0_135 = arith.constant 0 : index
    %c0_136 = arith.constant 0 : index
    %1441 = vector.load %arg7[%c0_135, %c0_136] : memref<1x128xf32, #tpu.memory_space<vmem>>, vector<1x128xf32>
    %1442 = vector.broadcast %1441 : vector<1x128xf32> to vector<8x128xf32>
    %1443 = arith.mulf %1440, %1442 : vector<8x128xf32>
    %cst_137 = arith.constant dense<0.000000e+00> : vector<8xf32>
    %1444 = vector.multi_reduction <add>, %1443, %cst_137 [1] : vector<8x128xf32> to vector<8xf32>
    %1445 = vector.shape_cast %1444 : vector<8xf32> to vector<8x1xf32>
    %c104 = arith.constant 104 : index
    %1446 = memref.load %arg2[%c104] : memref<105xf32, #tpu.memory_space<smem>>
    %1447 = vector.broadcast %1446 : f32 to vector<8x1xf32>
    %1448 = arith.addf %1445, %1447 : vector<8x1xf32>
    %1449 = vector.shape_cast %1448 : vector<8x1xf32> to vector<8x1xf32>
    %1450 = vector.broadcast %1449 : vector<8x1xf32> to vector<8x128xf32>
    %c0_138 = arith.constant 0 : index
    %c0_139 = arith.constant 0 : index
    %1451 = vector.load %arg8[%c0_138, %c0_139] : memref<8x128xf32, #tpu.memory_space<vmem>>, vector<8x128xf32>
    tpu.vector_store %arg8[%c0_138, %c0_139], %1450 {strides = array<i32>} : memref<8x128xf32, #tpu.memory_space<vmem>>, vector<8x128xf32>,
    return
  }
  func.func @transform_0(%arg0: i32) -> (i32, i32, i32) {
    %c0_i32 = arith.constant 0 : i32
    %c0_i32_0 = arith.constant 0 : i32
    %c0_i32_1 = arith.constant 0 : i32
    return %c0_i32, %arg0, %c0_i32_0 : i32, i32, i32
  }
  func.func @transform_1(%arg0: i32) -> i32 {
    %c0_i32 = arith.constant 0 : i32
    %c0_i32_0 = arith.constant 0 : i32
    return %c0_i32 : i32
  }
  func.func @transform_2(%arg0: i32) -> (i32, i32) {
    %c0_i32 = arith.constant 0 : i32
    %c0_i32_0 = arith.constant 0 : i32
    %c0_i32_1 = arith.constant 0 : i32
    return %c0_i32, %c0_i32_0 : i32, i32
  }
  func.func @transform_3(%arg0: i32) -> (i32, i32) {
    %c0_i32 = arith.constant 0 : i32
    %c0_i32_0 = arith.constant 0 : i32
    %c0_i32_1 = arith.constant 0 : i32
    return %c0_i32, %c0_i32_0 : i32, i32
  }
  func.func @transform_4(%arg0: i32) -> (i32, i32) {
    %c0_i32 = arith.constant 0 : i32
    %c0_i32_0 = arith.constant 0 : i32
    %c0_i32_1 = arith.constant 0 : i32
    return %c0_i32, %c0_i32_0 : i32, i32
  }
  func.func @transform_5(%arg0: i32) -> (i32, i32) {
    %c0_i32 = arith.constant 0 : i32
    %c0_i32_0 = arith.constant 0 : i32
    %c0_i32_1 = arith.constant 0 : i32
    return %c0_i32, %c0_i32_0 : i32, i32
  }
  func.func @transform_6(%arg0: i32) -> (i32, i32) {
    %c0_i32 = arith.constant 0 : i32
    %c0_i32_0 = arith.constant 0 : i32
    %c0_i32_1 = arith.constant 0 : i32
    return %c0_i32, %c0_i32_0 : i32, i32
  }
  func.func @transform_7(%arg0: i32) -> (i32, i32) {
    %c0_i32 = arith.constant 0 : i32
    %c0_i32_0 = arith.constant 0 : i32
    return %arg0, %c0_i32 : i32, i32
  }
}

</mosaic_0001>

<bundles_post_ra>
// kernel: forward.1
= control target key start
LH: loop header
LB: loop body
LE: loop exit
PB: predicated region body
PF: predicated region fallthrough
CT: control target
= control target key end

     0   :  { %12 = vsyncpa [#allocation3], 0  ;;  %s4585_s27 = smov [#allocation2]   ;;  %s9803_s0 = inlined_call_operand.vmem [shape: f32[36,8,144], index: 0, kind: input, shape index: {}]   ;;  %s9804_s1 = inlined_call_operand.vmem [shape: f32[105], index: 1, kind: input, shape index: {}]   ;;  %s9805_s2 = inlined_call_operand.vmem [shape: bf16[576,512], index: 2, kind: input, shape index: {}]   ;;  %s9806_s3 = inlined_call_operand.vmem [shape: f32[1,512], index: 3, kind: input, shape index: {}]   ;;  %s9807_s4 = inlined_call_operand.vmem [shape: bf16[128,128], index: 4, kind: input, shape index: {}]   ;;  %s9808_s5 = inlined_call_operand.vmem [shape: f32[1,128], index: 5, kind: input, shape index: {}]   ;;  %s9809_s6 = inlined_call_operand.vmem [shape: f32[1,128], index: 6, kind: input, shape index: {}]   ;;  %s9810_s7 = inlined_call_operand.vmem [shape: f32[8,128], index: 7, kind: output, shape index: {}]  }
   0x1   :  { %s20_s26 = sshll.u32 %s9804_s1, 4  ;;  %s21_s26 = int_to_ptr.vmem [resolvable:$true] %s20_s26 }
   0x2   :  { %23 = dma.vmem_to_smem %s21_s26, 16, %s4585_s27, [#allocation3]  }
   0x3   :  { %4583 = dma.done.wait [#allocation3], 16  }
   0x4   :  { %4584 = vsyncadd [#allocation3], 4294967280 }
   0x5   :  { %38 = sfence }
   0x6   :  { %v4271_v0 = vld [vmem:[%s9805_s2 + $0x204] sm:$0xf]  ;;  %v3698_v1 = vld [vmem:[%s9805_s2 + $0x210] sm:$0xf0]  ;;  %v3696_v5 = vld [vmem:[%s9805_s2 + $0x200] sm:$0xf] }
   0x7   :  { %v4267_v2 = vld [vmem:[%s9805_s2 + $0x1e4] sm:$0xf]  ;;  %v3701_v3 = vor.u32 %v4271_v0, %v3698_v1  ;;  %v3682_v4 = vld [vmem:[%s9805_s2 + $0x1f0] sm:$0xf0]  ;;  %v4273_v8 = vld [vmem:[%s9805_s2 + $0x20c] sm:$0xf0] }
   0x8   :  { %v3685_v6 = vor.u32 %v4267_v2, %v3682_v4  ;;  %v4263_v7 = vld [vmem:[%s9805_s2 + $0x1c4] sm:$0xf]  ;;  %v3666_v9 = vld [vmem:[%s9805_s2 + $0x1d0] sm:$0xf0]  ;;  %v3697_v10 = vor.u32 %v4273_v8, %v3696_v5  ;;  %v3680_v11 = vld [vmem:[%s9805_s2 + $0x1e0] sm:$0xf] }
   0x9   :  { %2265 = vmatpush.bf16.msra.mxu2 %v3701_v3  ;;  %v4269_v12 = vld [vmem:[%s9805_s2 + $0x1ec] sm:$0xf0]  ;;  %v3664_v14 = vld [vmem:[%s9805_s2 + $0x1c0] sm:$0xf]  ;;  %v3669_v15 = vor.u32 %v4263_v7, %v3666_v9  ;;  %v4259_v19 = vld [vmem:[%s9805_s2 + $0x1a4] sm:$0xf] }
   0xa   :  { %2239 = vmatpush.bf16.msra.mxu0 %v3697_v10  ;;  %v3681_v13 = vor.u32 %v4269_v12, %v3680_v11  ;;  %v4265_v16 = vld [vmem:[%s9805_s2 + $0x1cc] sm:$0xf0]  ;;  %v3712_v17 = vld [vmem:[%s9805_s2 + $0x220] sm:$0xf]  ;;  %v3650_v20 = vld [vmem:[%s9805_s2 + $0x1b0] sm:$0xf0] }
   0xb   :  { %v4277_v18 = vld [vmem:[%s9805_s2 + $0x22c] sm:$0xf0]  ;;  %v3704_v22 = vld [vmem:[%s9805_s2 + $0x208] sm:$0xf]  ;;  %v4274_v23 = vld [vmem:[%s9805_s2 + $0x214] sm:$0xf0]  ;;  %v3665_v24 = vor.u32 %v4265_v16, %v3664_v14  ;;  %v3653_v27 = vor.u32 %v4259_v19, %v3650_v20 }
   0xc   :  { %v3713_v21 = vor.u32 %v4277_v18, %v3712_v17  ;;  %v3648_v25 = vld [vmem:[%s9805_s2 + $0x1a0] sm:$0xf]  ;;  %v3705_v26 = vor.u32 %v4274_v23, %v3704_v22  ;;  %v4261_v28 = vld [vmem:[%s9805_s2 + $0x1ac] sm:$0xf0]  ;;  %v3688_v29 = vld [vmem:[%s9805_s2 + $0x1e8] sm:$0xf] }
   0xd   :  { %2266 = vmatpush.bf16.msra.mxu2 %v3685_v6  ;;  %v4270_v30 = vld [vmem:[%s9805_s2 + $0x1f4] sm:$0xf0]  ;;  %v4255_v31 = vld [vmem:[%s9805_s2 + $0x184] sm:$0xf]  ;;  %v3634_v32 = vld [vmem:[%s9805_s2 + $0x190] sm:$0xf0]  ;;  %v3649_v36 = vor.u32 %v4261_v28, %v3648_v25 }
   0xe   :  { %2240 = vmatpush.bf16.msra.mxu0 %v3681_v13  ;;  %2259 = vmatpush.bf16.msra.mxu1 %v3713_v21  ;;  %v3689_v33 = vor.u32 %v4270_v30, %v3688_v29  ;;  %v3672_v34 = vld [vmem:[%s9805_s2 + $0x1c8] sm:$0xf]  ;;  %v4266_v35 = vld [vmem:[%s9805_s2 + $0x1d4] sm:$0xf0]  ;;  %v4275_v37 = vld [vmem:[%s9805_s2 + $0x224] sm:$0xf]  ;;  %v3637_v38 = vor.u32 %v4255_v31, %v3634_v32 }
   0xf   :  { %v3632_v39 = vld [vmem:[%s9805_s2 + $0x180] sm:$0xf]  ;;  %v4257_v40 = vld [vmem:[%s9805_s2 + $0x18c] sm:$0xf0]  ;;  %v3714_v41 = vld [vmem:[%s9805_s2 + $0x230] sm:$0xf0]  ;;  %v3673_v44 = vor.u32 %v4266_v35, %v3672_v34 }
  0x10   :  { %v4251_v42 = vld [vmem:[%s9805_s2 + $0x164] sm:$0xf]  ;;  %v3618_v43 = vld [vmem:[%s9805_s2 + $0x170] sm:$0xf0]  ;;  %v3717_v45 = vor.u32 %v4275_v37, %v3714_v41  ;;  %v3656_v46 = vld [vmem:[%s9805_s2 + $0x1a8] sm:$0xf]  ;;  %v3633_v50 = vor.u32 %v4257_v40, %v3632_v39 }
  0x11   :  { %2267 = vmatpush.bf16.msra.mxu2 %v3669_v15  ;;  %v4262_v47 = vld [vmem:[%s9805_s2 + $0x1b4] sm:$0xf0]  ;;  %v3720_v48 = vld [vmem:[%s9805_s2 + $0x228] sm:$0xf]  ;;  %s4737_s28 = sld [smem:[#allocation2 + $0x19]]  ;;  %v3621_v52 = vor.u32 %v4251_v42, %v3618_v43  ;;  %v40_v63 = vld [vmem:[%s9803_s0] sm:$0xff] }
  0x12   :  { %2291 = vmatpush.bf16.msrb.mxu1 %v3705_v26  ;;  %2241 = vmatpush.bf16.msra.mxu0 %v3665_v24  ;;  %v4278_v49 = vld [vmem:[%s9805_s2 + $0x234] sm:$0xf0]  ;;  %v3616_v53 = vld [vmem:[%s9805_s2 + $0x160] sm:$0xf]  ;;  %v4253_v54 = vld [vmem:[%s9805_s2 + $0x16c] sm:$0xf0]  ;;  %v3657_v57 = vor.u32 %v4262_v47, %v3656_v46 }
  0x13   :  { %2285 = vmatpush.bf16.msra.mxu3 %v3717_v45  ;;  %v3721_v51 = vor.u32 %v4278_v49, %v3720_v48  ;;  %s4745_s10 = sld [smem:[#allocation2 + $0x1a]]  ;;  %v4247_v55 = vld [vmem:[%s9805_s2 + $0x144] sm:$0xf]  ;;  %v3602_v56 = vld [vmem:[%s9805_s2 + $0x150] sm:$0xf0]  ;;  %v3617_v61 = vor.u32 %v4253_v54, %v3616_v53  ;;  %vm2235_vm1 = vcmask 130048  }
  0x14   :  { %s4753_s14 = sld [smem:[#allocation2 + $0x1b]]  ;;  %v4758_v58 = vld [vmem:[%s9805_s2 + $0x124] sm:$0xf]  ;;  %v4763_v59 = vld [vmem:[%s9805_s2 + $0x130] sm:$0xf0]  ;;  %v3605_v1 = vor.u32 %v4247_v55, %v3602_v56 }
  0x15   :  { %2268 = vmatpush.bf16.msra.mxu2 %v3653_v27  ;;  %s4765_s19 = sld [smem:[#allocation2 + $0x1c]]  ;;  %v4770_v60 = vld [vmem:[%s9805_s2 + $0xe0] sm:$0xf]  ;;  %v3409_v0 = vld [vmem:[%s9803_s0 + $0x10] sm:$0xff]  ;;  %v3589_v7 = vor.u32 %v4758_v58, %v4763_v59 }
  0x16   :  { %2292 = vmatpush.bf16.msrb.mxu1 %v3689_v33  ;;  %2242 = vmatpush.bf16.msra.mxu0 %v3649_v36  ;;  %v3600_v62 = vld [vmem:[%s9805_s2 + $0x140] sm:$0xf]  ;;  %s4781_s29 = sld [smem:[#allocation2 + $0x1d]]  ;;  %v4249_v2 = vld [vmem:[%s9805_s2 + $0x14c] sm:$0xf0] }
  0x17   :  { %2311 = vmatpush.bf16.msrb.mxu3 %v3721_v51  ;;  %v3411_v3 = vld [vmem:[%s9803_s0 + $0x20] sm:$0xff]  ;;  %s4789_s11 = sld [smem:[#allocation2 + $0x1e]]  ;;  %v4237_v4 = vld [vmem:[%s9805_s2 + $0xec] sm:$0xf0]  ;;  %v4800_v6 = vstv %s4737_s28  ;;  %v3601_v13 = vor.u32 %v4249_v2, %v3600_v62 }
  0x18   :  { %v3413_v5 = vld [vmem:[%s9803_s0 + $0x30] sm:$0xff]  ;;  %s4797_s17 = sld [smem:[#allocation2 + $0x1f]]  ;;  %v3584_v8 = vld [vmem:[%s9805_s2 + $0x120] sm:$0xf]  ;;  %v631_v9 = vmul.f32 %v4800_v6, %v40_v63  ;;  %v753_v11 = vmul.f32 %v3409_v0, %v4800_v6  ;;  %v3845_v19 = vor.u32 %v4237_v4, %v4770_v60 }
  0x19   :  { %2269 = vmatpush.bf16.msra.mxu2 %v3637_v38  ;;  %s4807_s21 = sld [smem:[#allocation2 + $0x20]]  ;;  %v4811_v10 = vstv %s4745_s10  ;;  %v4817_v12 = vld [vmem:[%s9805_s2 + $0xc0] sm:$0xf]  ;;  %v4245_v14 = vld [vmem:[%s9805_s2 + $0x12c] sm:$0xf0] }
  0x1a   :  { %2293 = vmatpush.bf16.msrb.mxu1 %v3673_v44  ;;  %2243 = vmatpush.bf16.msra.mxu0 %v3633_v50  ;;  %10163 = vst [vmem:[#allocation5_spill] sm:$0xff] %v4811_v10  ;;  %v3415_v15 = vld [vmem:[%s9803_s0 + $0x40] sm:$0xff]  ;;  %s4825_s10 = sld [smem:[#allocation2 + $0x21]]  ;;  %v634_v16 = vmul.f32 %v3409_v0, %v4811_v10  ;;  %v4829_v17 = vstv %s4753_s14  ;;  %v755_v18 = vmul.f32 %v3411_v3, %v4811_v10  ;;  %v4233_v20 = vld [vmem:[%s9805_s2 + $0xcc] sm:$0xf0] }
  0x1b   :  { %10164 = vst [vmem:[#allocation6_spill] sm:$0xff] %v4829_v17  ;;  %v3417_v21 = vld [vmem:[%s9803_s0 + $0x50] sm:$0xff]  ;;  %s4839_s1 = sld [smem:[#allocation2 + $0x22]]  ;;  %v639_v22 = vmul.f32 %v3411_v3, %v4829_v17  ;;  %v4843_v23 = vstv %s4765_s19  ;;  %v759_v24 = vmul.f32 %v3413_v5, %v4829_v17  ;;  %v4849_v25 = vld [vmem:[%s9805_s2 + $0xa0] sm:$0xf]  ;;  %v3585_v31 = vor.u32 %v4245_v14, %v3584_v8 }
  0x1c   :  { %v4854_v26 = vld [vmem:[%s9805_s2 + $0xac] sm:$0xf0]  ;;  %s4856_s16 = sld [smem:[#allocation2 + $0x23]]  ;;  %v636_v27 = vadd.f32 %v634_v16, %v631_v9  ;;  %v644_v28 = vmul.f32 %v3413_v5, %v4843_v23  ;;  %v4860_v29 = vstv %s4781_s29  ;;  %v757_v30 = vadd.f32 %v755_v18, %v753_v11  ;;  %v4865_v32 = vld [vmem:[%s9805_s2 + $0x80] sm:$0xf] }
  0x1d   :  { %2270 = vmatpush.bf16.msra.mxu2 %v3621_v52  ;;  %s4867_s20 = sld [smem:[#allocation2 + $0x24]]  ;;  %v649_v33 = vmul.f32 %v3415_v15, %v4860_v29  ;;  %v4871_v34 = vstv %s4789_s11  ;;  %v763_v35 = vmul.f32 %v3415_v15, %v4843_v23  ;;  %v4877_v36 = vld [vmem:[%s9805_s2 + $0x8c] sm:$0xf0]  ;;  %v4882_v37 = vld [vmem:[%s9803_s0 + $0x60] sm:$0xff]  ;;  %v767_v41 = vmul.f32 %v3417_v21, %v4860_v29 }
  0x1e   :  { %2294 = vmatpush.bf16.msrb.mxu1 %v3657_v57  ;;  %2244 = vmatpush.bf16.msra.mxu0 %v3617_v61  ;;  %10165 = vst [vmem:[#allocation7_spill] sm:$0xff] %v4882_v37  ;;  %s4884_s24 = sld [smem:[#allocation2 + $0x25]]  ;;  %v641_v38 = vadd.f32 %v639_v22, %v636_v27  ;;  %v4887_v39 = vstv %s4797_s17  ;;  %v761_v40 = vadd.f32 %v759_v24, %v757_v30  ;;  %v4896_v44 = vld [vmem:[%s9803_s0 + $0x70] sm:$0xff]  ;;  %v4905_v46 = vld [vmem:[%s9803_s0 + $0x80] sm:$0xff] }
  0x1f   :  { %v3829_v42 = vor.u32 %v4233_v20, %v4817_v12  ;;  %v3813_v43 = vor.u32 %v4854_v26, %v4849_v25  ;;  %s4898_s26 = sld [smem:[#allocation2 + $0x26]]  ;;  %v654_v45 = vmul.f32 %v4882_v37, %v4871_v34  ;;  %v4910_v48 = vstv %s4807_s21  ;;  %v4929_v55 = vld [vmem:[%s9803_s0 + $0x90] sm:$0xff]  ;;  %v4956_v0 = vld [vmem:[%s9803_s0 + $0xa0] sm:$0xff] }
  0x20   :  { %s4907_s30 = sld [smem:[#allocation2 + $0x27]]  ;;  %v646_v47 = vadd.f32 %v644_v28, %v641_v38  ;;  %v765_v49 = vadd.f32 %v763_v35, %v761_v40  ;;  %v771_v50 = vmul.f32 %v4896_v44, %v4871_v34  ;;  %v3797_v51 = vor.u32 %v4877_v36, %v4865_v32  ;;  %v4969_v5 = vld [vmem:[%s9803_s0 + $0xb0] sm:$0xff]  ;;  %v4985_v12 = vld [vmem:[%s9803_s0 + $0xc0] sm:$0xff] }
  0x21   :  { %2271 = vmatpush.bf16.msra.mxu2 %v3605_v1  ;;  %s4916_s8 = sld [smem:[#allocation2 + $0x28]]  ;;  %v659_v52 = vmul.f32 %v4896_v44, %v4887_v39  ;;  %v775_v53 = vmul.f32 %v4905_v46, %v4887_v39  ;;  %v4924_v54 = vmul.f32 %v4882_v37, %v4800_v6  ;;  %v4934_v57 = vstv %s4825_s10  ;;  %10166 = vst [vmem:[#allocation8_spill] sm:$0xff] %v4969_v5  ;;  %v5018_v25 = vld [vmem:[%s9803_s0 + $0xf0] sm:$0xff]  ;;  %v5023_v26 = vld [vmem:[%s9803_s0 + $0x100] sm:$0xff] }
  0x22   :  { %2245 = vmatpush.bf16.msra.mxu0 %v3601_v13  ;;  %s4931_s14 = sld [smem:[#allocation2 + $0x29]]  ;;  %v651_v56 = vadd.f32 %v649_v33, %v646_v47  ;;  %v4937_v58 = vstv %s4839_s1  ;;  %v769_v59 = vadd.f32 %v767_v41, %v765_v49  ;;  %v664_v60 = vmul.f32 %v4905_v46, %v4910_v48  ;;  %v4990_v13 = vld [vmem:[%s9803_s0 + $0xd0] sm:$0xff] }
  0x23   :  { %s4939_s12 = sld [smem:[#allocation2 + $0x2a]]  ;;  %v779_v61 = vmul.f32 %v4929_v55, %v4910_v48  ;;  %v4947_v62 = vmul.f32 %v4896_v44, %v4811_v10  ;;  %v4951_v63 = vmul.f32 %v4905_v46, %v4829_v17  ;;  %v4961_v2 = vstv %s4856_s16  ;;  %v5047_v41 = vld [vmem:[%s9803_s0 + $0x110] sm:$0xff] }
  0x24   :  { %s4958_s13 = sld [smem:[#allocation2 + $0x2b]]  ;;  %v656_v1 = vadd.f32 %v654_v45, %v651_v56  ;;  %v4964_v3 = vstv %s4867_s20  ;;  %v773_v4 = vadd.f32 %v771_v50, %v769_v59  ;;  %v674_v8 = vmul.f32 %v4956_v0, %v4937_v58  ;;  %10168 = vst [vmem:[#allocation10_spill] sm:$0xff] %v5047_v41  ;;  %v5079_v59 = vld [vmem:[%s9803_s0 + $0x130] sm:$0xff] }
  0x25   :  { %2272 = vmatpush.bf16.msra.mxu2 %v3589_v7  ;;  %s4971_s18 = sld [smem:[#allocation2 + $0x2c]]  ;;  %v669_v7 = vmul.f32 %v4929_v55, %v4934_v57  ;;  %v4978_v9 = vstv %s4884_s24  ;;  %v783_v11 = vmul.f32 %v4956_v0, %v4934_v57  ;;  %v4995_v15 = vstv %s4898_s26  ;;  %v5095_v32 = vld [vmem:[%s9803_s0 + $0x150] sm:$0xff] }
  0x26   :  { %2246 = vmatpush.bf16.msra.mxu0 %v3585_v31  ;;  %s4992_s29 = sld [smem:[#allocation2 + $0x2d]]  ;;  %v661_v14 = vadd.f32 %v659_v52, %v656_v1  ;;  %10167 = vst [vmem:[#allocation9_spill] sm:$0xff] %v4995_v15  ;;  %v4998_v16 = vstv %s4907_s30  ;;  %v777_v18 = vadd.f32 %v775_v53, %v773_v4  ;;  %v679_v20 = vmul.f32 %v4985_v12, %v4961_v2 }
  0x27   :  { %s5005_s11 = sld [smem:[#allocation2 + $0x2e]]  ;;  %v684_v21 = vmul.f32 %v4990_v13, %v4964_v3  ;;  %v787_v22 = vmul.f32 %v4969_v5, %v4937_v58  ;;  %v791_v24 = vmul.f32 %v4990_v13, %v4961_v2  ;;  %v5030_v30 = vstv %s4916_s8 }
  0x28   :  { %s5025_s30 = sld [smem:[#allocation2 + $0x2f]]  ;;  %v666_v27 = vadd.f32 %v664_v60, %v661_v14  ;;  %v781_v31 = vadd.f32 %v779_v61, %v777_v18  ;;  %v694_v33 = vmul.f32 %v5018_v25, %v4995_v15  ;;  %v5038_v35 = vmul.f32 %v5023_v26, %v4998_v16  ;;  %v5084_v60 = vld [vmem:[%s9803_s0 + $0x140] sm:$0xff] }
  0x29   :  { %2526 = vmatpush.bf16.msrb.mxu2 %v3845_v19  ;;  %v5003_v19 = vld [vmem:[%s9803_s0 + $0xe0] sm:$0xff]  ;;  %s5032_s21 = sld [smem:[#allocation2 + $0x30]]  ;;  %v799_v40 = vmul.f32 %v5018_v25, %v4978_v9  ;;  %v5057_v45 = vstv %s4931_s14  ;;  %v5060_v47 = vstv %s4939_s12  ;;  %v803_v53 = vmul.f32 %v5023_v26, %v4995_v15 }
  0x2a   :  { %v689_v28 = vmul.f32 %v5003_v19, %v4978_v9  ;;  %v795_v38 = vmul.f32 %v5003_v19, %v4964_v3  ;;  %s5054_s15 = sld [smem:[#allocation2 + $0x31]]  ;;  %10169 = vst [vmem:[#allocation11_spill] sm:$0xff] %v5057_v45  ;;  %v785_v49 = vadd.f32 %v783_v11, %v781_v31  ;;  %v5067_v52 = vstv %s4958_s13  ;;  %v5110_v14 = vld [vmem:[%s9803_s0 + $0x160] sm:$0xff] }
  0x2b   :  { %10170 = vst [vmem:[#allocation12_spill] sm:$0xff] %v5060_v47  ;;  %v807_v56 = vmul.f32 %v5047_v41, %v4998_v16  ;;  %v5087_v1 = vstv %s4971_s18  ;;  %v709_v36 = vmul.f32 %v5079_v59, %v5057_v45  ;;  %v815_v11 = vmul.f32 %v5084_v60, %v5057_v45  ;;  %v3455_v18 = vld [vmem:[%s9803_s0 + $0x180] sm:$0xff]  ;;  %s5377_s26 = sld [smem:[#allocation2 + $0x65]] }
  0x2c   :  { %10171 = vst [vmem:[#allocation13_spill] sm:$0xff] %v5067_v52  ;;  %v5090_v4 = vstv %s4992_s29  ;;  %v5129_v37 = vmul.f32 %v5110_v14, %v5087_v1  ;;  %s5829_s20 = sld [smem:[#allocation2]] }
  0x2d   :  { %2527 = vmatpush.bf16.msrb.mxu2 %v3829_v42  ;;  %v5052_v42 = vld [vmem:[%s9803_s0 + $0x120] sm:$0xff]  ;;  %10172 = vst [vmem:[#allocation14_spill] sm:$0xff] %v5087_v1  ;;  %v5120_v31 = vstv %s5005_s11  ;;  %v5132_v41 = vmul.f32 %v3455_v18, %v5090_v4  ;;  %s5848_s11 = sld [smem:[#allocation2 + $0x1]] }
  0x2e   :  { %v5064_v50 = vmul.f32 %v5052_v42, %v5030_v30  ;;  %10174 = vst [vmem:[#allocation16_spill] sm:$0xff] %v5120_v31  ;;  %v5146_v5 = vstv %s5025_s30  ;;  %s5858_s25 = sld [smem:[#allocation2 + $0x2]] }
  0x2f   :  { %10176 = vst [vmem:[#allocation18_spill] sm:$0xff] %v5129_v37  ;;  %s5884_s17 = sld [smem:[#allocation2 + $0x3]] }
  0x30   :  { %10177 = vst [vmem:[#allocation19_spill] sm:$0xff] %v5132_v41  ;;  %s5898_s27 = sld [smem:[#allocation2 + $0x4]] }
  0x31   :  { %2528 = vmatpush.bf16.msrb.mxu2 %v3813_v43  ;;  %v671_v43 = vadd.f32 %v669_v7, %v666_v27  ;;  %v789_v7 = vadd.f32 %v787_v22, %v785_v49  ;;  %v5117_v27 = vmul.f32 %v5095_v32, %v5067_v52  ;;  %v5125_v49 = vld [vmem:[%s9803_s0 + $0x170] sm:$0xff]  ;;  %10179 = vst [vmem:[#allocation21_spill] sm:$0xff] %v5146_v5  ;;  %s5921_s30 = sld [smem:[#allocation2 + $0x5]] }
  0x32   :  { %10175 = vst [vmem:[#allocation17_spill] sm:$0xff] %v5125_v49  ;;  %v5150_v37 = vmul.f32 %v5125_v49, %v5087_v1  ;;  %s5986_s16 = sld [smem:[#allocation2 + $0x7]] }
  0x33   :  { %v676_v61 = vadd.f32 %v674_v8, %v671_v43  ;;  %v811_v8 = vmul.f32 %v5079_v59, %v5030_v30  ;;  %10173 = vst [vmem:[#allocation15_spill] sm:$0xff] %v5117_v27  ;;  %v793_v43 = vadd.f32 %v791_v24, %v789_v7  ;;  %v5143_v24 = vld [vmem:[%s9803_s0 + $0x190] sm:$0xff]  ;;  %s5996_s18 = sld [smem:[#allocation2 + $0x8]] }
  0x34   :  { %10180 = vst [vmem:[#allocation22_spill] sm:$0xff] %v5150_v37  ;;  %v5154_v41 = vmul.f32 %v5143_v24, %v5120_v31  ;;  %v5178_v37 = vld [vmem:[%s9803_s0 + $0x1b0] sm:$0xff]  ;;  %s6007_s22 = sld [smem:[#allocation2 + $0x9]] }
  0x35   :  { %2529 = vmatpush.bf16.msrb.mxu2 %v3797_v51  ;;  %v5101_v51 = vmul.f32 %v5084_v60, %v5060_v47  ;;  %v681_v22 = vadd.f32 %v679_v20, %v676_v61  ;;  %v819_v20 = vmul.f32 %v5095_v32, %v5060_v47  ;;  %v5138_v61 = vmul.f32 %v5110_v14, %v5067_v52  ;;  %s6016_s28 = sld [smem:[#allocation2 + $0xa]] }
  0x36   :  { %v797_v27 = vadd.f32 %v795_v38, %v793_v43  ;;  %10181 = vst [vmem:[#allocation23_spill] sm:$0xff] %v5154_v41  ;;  %v5157_v47 = vstv %s5032_s21  ;;  %v5168_v38 = vld [vmem:[%s9803_s0 + $0x1a0] sm:$0xff]  ;;  %v5171_v43 = vstv %s5054_s15  ;;  %v863_v41 = vmul.f32 %v4929_v55, %v4843_v23  ;;  %s5937_s21 = sld [smem:[#allocation2 + $0x6]] }
  0x37   :  { %10178 = vst [vmem:[#allocation20_spill] sm:$0xff] %v5138_v61  ;;  %v686_v7 = vadd.f32 %v684_v21, %v681_v22  ;;  %v5161_v61 = vmul.f32 %v5143_v24, %v5090_v4  ;;  %v857_v21 = vadd.f32 %v4947_v62, %v4924_v54  ;;  %v5182_v54 = vmul.f32 %v5168_v38, %v5146_v5  ;;  %s6067_s29 = sld [smem:[#allocation2 + $0xc]] }
  0x38   :  { %v801_v49 = vadd.f32 %v799_v40, %v797_v27  ;;  %v5186_v62 = vmul.f32 %v5168_v38, %v5120_v31  ;;  %v867_v40 = vmul.f32 %v4956_v0, %v4860_v29  ;;  %v5194_v27 = vld [vmem:[%s9803_s0 + $0x1c0] sm:$0xff]  ;;  %v5202_v31 = vmul.f32 %v5178_v37, %v5146_v5  ;;  %s6070_s23 = sld [smem:[#allocation2 + $0xd]] }
  0x39   :  { %10182 = vst [vmem:[#allocation24_spill] sm:$0xff] %v5161_v61  ;;  %v691_v22 = vadd.f32 %v689_v28, %v686_v7  ;;  %v861_v28 = vadd.f32 %v4951_v63, %v857_v21  ;;  %v5198_v61 = vmul.f32 %v5178_v37, %v5157_v47  ;;  %v5207_v63 = vld [vmem:[%s9803_s0 + $0x1d0] sm:$0xff]  ;;  %v5211_v21 = vmul.f32 %v5194_v27, %v5171_v43  ;;  %s6119_s13 = sld [smem:[#allocation2 + $0xe]] }
  0x3a   :  { %10183 = vst [vmem:[#allocation25_spill] sm:$0xff] %v5182_v54  ;;  %v805_v54 = vadd.f32 %v803_v53, %v801_v49  ;;  %v871_v53 = vmul.f32 %v4985_v12, %v4871_v34  ;;  %v887_v12 = vmul.f32 %v5023_v26, %v4937_v58  ;;  %s6235_s24 = sld [smem:[#allocation2 + $0x13]] }
  0x3b   :  { %10184 = vst [vmem:[#allocation26_spill] sm:$0xff] %v5186_v62  ;;  %v696_v7 = vadd.f32 %v694_v33, %v691_v22  ;;  %v5215_v33 = vmul.f32 %v5194_v27, %v5157_v47  ;;  %v865_v22 = vadd.f32 %v863_v41, %v861_v28  ;;  %v875_v62 = vmul.f32 %v4990_v13, %v4887_v39  ;;  %s6277_s8 = sld [smem:[#allocation2 + $0x15]] }
  0x3c   :  { %10185 = vst [vmem:[#allocation27_spill] sm:$0xff] %v5194_v27  ;;  %v883_v41 = vmul.f32 %v5018_v25, %v4934_v57  ;;  %v895_v28 = vmul.f32 %v5079_v59, %v4964_v3  ;;  %s6291_s14 = sld [smem:[#allocation2 + $0x16]] }
  0x3d   :  { %10186 = vst [vmem:[#allocation28_spill] sm:$0xff] %v5198_v61  ;;  %v701_v49 = vadd.f32 %v5038_v35, %v696_v7  ;;  %v809_v61 = vadd.f32 %v807_v56, %v805_v54  ;;  %v869_v5 = vadd.f32 %v867_v40, %v865_v22  ;;  %v891_v54 = vmul.f32 %v5052_v42, %v4961_v2  ;;  %s7056_s15 = sld [smem:[#allocation2 + $0x36]] }
  0x3e   :  { %10187 = vst [vmem:[#allocation29_spill] sm:$0xff] %v5202_v31  ;;  %v5222_v31 = vmul.f32 %v5207_v63, %v5171_v43  ;;  %v5239_v40 = vmul.f32 %v5084_v60, %v4978_v9  ;;  %v5243_v22 = vmul.f32 %v5095_v32, %v4995_v15  ;;  %v953_v42 = vmul.f32 %v4896_v44, %v4800_v6  ;;  %v5268_v44 = vld [vmem:[%s9803_s0 + $0x1f0] sm:$0xff]  ;;  %s7385_s1 = sld [smem:[#allocation2 + $0x42]] }
  0x3f   :  { %10188 = vst [vmem:[#allocation30_spill] sm:$0xff] %v5207_v63  ;;  %v706_v35 = vadd.f32 %v5064_v50, %v701_v49  ;;  %v813_v56 = vadd.f32 %v811_v8, %v809_v61  ;;  %v873_v7 = vadd.f32 %v871_v53, %v869_v5  ;;  %v955_v5 = vmul.f32 %v4905_v46, %v4811_v10  ;;  %v5273_v46 = vld [vmem:[%s9803_s0 + $0x200] sm:$0xff]  ;;  %s7715_s19 = sld [smem:[#allocation2 + $0x49]] }
  0x40   :  { %10189 = vst [vmem:[#allocation31_spill] sm:$0xff] %v5211_v21  ;;  %v879_v21 = vmul.f32 %v5003_v19, %v4910_v48  ;;  %v5254_v53 = vmul.f32 %v3455_v18, %v5030_v30  ;;  %v5258_v49 = vmul.f32 %v5143_v24, %v5057_v45  ;;  %v959_v63 = vmul.f32 %v4929_v55, %v4829_v17  ;;  %s8598_s12 = sld [smem:[#allocation2 + $0x52]] }
  0x41   :  { %10190 = vst [vmem:[#allocation32_spill] sm:$0xff] %v5222_v31  ;;  %v5247_v31 = vmul.f32 %v5110_v14, %v4998_v16  ;;  %v711_v50 = vadd.f32 %v709_v36, %v706_v35  ;;  %v817_v8 = vadd.f32 %v815_v11, %v813_v56  ;;  %v877_v61 = vadd.f32 %v875_v62, %v873_v7  ;;  %v3467_v36 = vld [vmem:[%s9803_s0 + $0x1e0] sm:$0xff]  ;;  %v10194_v56 = vld [vmem:[#allocation12_spill] sm:$0xff]  ;;  %s8712_s10 = sld [smem:[#allocation2 + $0x58]] }
  0x42   :  { %10192 = vst [vmem:[#allocation34_spill] sm:$0xff] %v5254_v53  ;;  %v957_v62 = vadd.f32 %v955_v5, %v953_v42  ;;  %v963_v55 = vmul.f32 %v4956_v0, %v4843_v23  ;;  %v5280_v7 = vmul.f32 %v5168_v38, %v10194_v56  ;;  %v5288_v53 = vmul.f32 %v5194_v27, %v5087_v1  ;;  %v5298_v0 = vld [vmem:[%s9803_s0 + $0x220] sm:$0xff]  ;;  %v10200_v5 = vld [vmem:[#allocation8_spill] sm:$0xff] }
  0x43   :  { %10191 = vst [vmem:[#allocation33_spill] sm:$0xff] %v5247_v31  ;;  %v716_v11 = vadd.f32 %v5101_v51, %v711_v50  ;;  %v821_v18 = vadd.f32 %v819_v20, %v817_v8  ;;  %v881_v35 = vadd.f32 %v879_v21, %v877_v61  ;;  %v5293_v51 = vld [vmem:[%s9803_s0 + $0x210] sm:$0xff]  ;;  %v10199_v50 = vld [vmem:[#allocation20_spill] sm:$0xff]  ;;  %v967_v61 = vmul.f32 %v10200_v5, %v4860_v29  ;;  %v10202_v1 = vld [vmem:[#allocation21_spill] sm:$0xff] }
  0x44   :  { %10193 = vst [vmem:[#allocation35_spill] sm:$0xff] %v5258_v49  ;;  %v5284_v49 = vmul.f32 %v5178_v37, %v5067_v52  ;;  %v10198_v20 = vld [vmem:[#allocation15_spill] sm:$0xff]  ;;  %v961_v42 = vadd.f32 %v959_v63, %v957_v62  ;;  %v5313_v27 = vmul.f32 %v5273_v46, %v10202_v1  ;;  %v10204_v52 = vld [vmem:[#allocation18_spill] sm:$0xff]  ;;  %v971_v62 = vmul.f32 %v4990_v13, %v4871_v34 }
  0x45   :  { %10195 = vst [vmem:[#allocation36_spill] sm:$0xff] %v5280_v7  ;;  %v721_v21 = vadd.f32 %v10198_v20, %v716_v11  ;;  %v825_v8 = vadd.f32 %v10199_v50, %v821_v18  ;;  %v10201_v7 = vld [vmem:[#allocation16_spill] sm:$0xff]  ;;  %v10205_v20 = vld [vmem:[#allocation22_spill] sm:$0xff]  ;;  %v975_v50 = vmul.f32 %v5003_v19, %v4887_v39  ;;  %v10208_v5 = vld [vmem:[#allocation19_spill] sm:$0xff]  ;;  %v979_v13 = vmul.f32 %v5018_v25, %v4910_v48 }
  0x46   :  { %10196 = vst [vmem:[#allocation37_spill] sm:$0xff] %v5284_v49  ;;  %v885_v49 = vadd.f32 %v883_v41, %v881_v35  ;;  %v5309_v31 = vmul.f32 %v5268_v44, %v10201_v7  ;;  %v965_v63 = vadd.f32 %v963_v55, %v961_v42  ;;  %v5325_v35 = vmul.f32 %v5298_v0, %v5171_v43  ;;  %v10210_v42 = vld [vmem:[#allocation10_spill] sm:$0xff] }
  0x47   :  { %10197 = vst [vmem:[#allocation38_spill] sm:$0xff] %v5288_v53  ;;  %v5305_v53 = vmul.f32 %v3467_v36, %v5090_v4  ;;  %v726_v11 = vadd.f32 %v10204_v52, %v721_v21  ;;  %v829_v18 = vadd.f32 %v10205_v20, %v825_v8  ;;  %v5321_v36 = vmul.f32 %v5293_v51, %v5157_v47  ;;  %v10209_v21 = vld [vmem:[#allocation24_spill] sm:$0xff]  ;;  %v5346_v25 = vld [vmem:[%s9803_s0 + $0x8] sm:$0xff] }
  0x48   :  { %10203 = vst [vmem:[#allocation15_spill] sm:$0xff] %v5313_v27  ;;  %v889_v41 = vadd.f32 %v887_v12, %v885_v49  ;;  %v969_v55 = vadd.f32 %v967_v61, %v965_v63  ;;  %v983_v49 = vmul.f32 %v5023_v26, %v4934_v57  ;;  %v987_v20 = vmul.f32 %v10210_v42, %v4937_v58  ;;  %v10212_v27 = vld [vmem:[#allocation26_spill] sm:$0xff]  ;;  %v5351_v26 = vld [vmem:[%s9803_s0 + $0x18] sm:$0xff]  ;;  %v10216_v63 = vld [vmem:[#allocation25_spill] sm:$0xff] }
  0x49   :  { %10206 = vst [vmem:[#allocation20_spill] sm:$0xff] %v5321_v36  ;;  %v731_v52 = vadd.f32 %v10208_v5, %v726_v11  ;;  %v833_v8 = vadd.f32 %v10209_v21, %v829_v18  ;;  %v10211_v36 = vld [vmem:[#allocation23_spill] sm:$0xff]  ;;  %v995_v61 = vmul.f32 %v5084_v60, %v4964_v3  ;;  %v10215_v60 = vld [vmem:[#allocation17_spill] sm:$0xff]  ;;  %v632_v21 = vmul.f32 %v4800_v6, %v5346_v25 }
  0x4a   :  { %10207 = vst [vmem:[#allocation8_spill] sm:$0xff] %v5325_v35  ;;  %v893_v12 = vadd.f32 %v891_v54, %v889_v41  ;;  %v991_v35 = vmul.f32 %v5079_v59, %v4961_v2  ;;  %v973_v5 = vadd.f32 %v971_v62, %v969_v55  ;;  %v5355_v59 = vmul.f32 %v5095_v32, %v4978_v9  ;;  %v10217_v41 = vld [vmem:[#allocation29_spill] sm:$0xff]  ;;  %v5374_v32 = vld [vmem:[%s9803_s0 + $0x28] sm:$0xff] }
  0x4b   :  { %v736_v19 = vadd.f32 %v10211_v36, %v731_v52  ;;  %v837_v11 = vadd.f32 %v10212_v27, %v833_v8  ;;  %10213 = vst [vmem:[#allocation16_spill] sm:$0xff] %v5346_v25  ;;  %v5359_v27 = vmul.f32 %v5110_v14, %v4995_v15  ;;  %v5363_v18 = vmul.f32 %v10215_v60, %v4998_v16  ;;  %v10222_v60 = vld [vmem:[#allocation13_spill] sm:$0xff] }
  0x4c   :  { %10214 = vst [vmem:[#allocation21_spill] sm:$0xff] %v5351_v26  ;;  %v897_v54 = vadd.f32 %v895_v28, %v893_v12  ;;  %v977_v52 = vadd.f32 %v975_v50, %v973_v5  ;;  %v5369_v28 = vmul.f32 %v5143_v24, %v5030_v30  ;;  %v635_v8 = vmul.f32 %v5351_v26, %v4811_v10  ;;  %v10219_v24 = vld [vmem:[#allocation28_spill] sm:$0xff] }
  0x4d   :  { %v741_v62 = vadd.f32 %v10216_v63, %v736_v19  ;;  %v841_v36 = vadd.f32 %v10217_v41, %v837_v11  ;;  %10218 = vst [vmem:[#allocation18_spill] sm:$0xff] %v5374_v32  ;;  %v640_v50 = vmul.f32 %v5374_v32, %v4829_v17  ;;  %v5389_v19 = vmul.f32 %v5168_v38, %v5057_v45  ;;  %v10223_v63 = vld [vmem:[#allocation27_spill] sm:$0xff]  ;;  %v10224_v41 = vld [vmem:[#allocation14_spill] sm:$0xff] }
  0x4e   :  { %v901_v14 = vadd.f32 %v5239_v40, %v897_v54  ;;  %v981_v42 = vadd.f32 %v979_v13, %v977_v52  ;;  %v5394_v40 = vld [vmem:[%s9803_s0 + $0x38] sm:$0xff]  ;;  %v5399_v5 = vmul.f32 %v5178_v37, %v10194_v56  ;;  %v637_v13 = vadd.f32 %v635_v8, %v632_v21  ;;  %v3477_v52 = vld [vmem:[%s9803_s0 + $0x230] sm:$0xff] }
  0x4f   :  { %v746_v55 = vadd.f32 %v10219_v24, %v741_v62  ;;  %v845_v12 = vadd.f32 %v5215_v33, %v841_v36  ;;  %10220 = vst [vmem:[#allocation22_spill] sm:$0xff] %v5394_v40  ;;  %v5404_v33 = vld [vmem:[%s9803_s0 + $0x48] sm:$0xff]  ;;  %v645_v38 = vmul.f32 %v5394_v40, %v4843_v23  ;;  %v5410_v62 = vmul.f32 %v10223_v63, %v10222_v60  ;;  %v10229_v8 = vld [vmem:[#allocation32_spill] sm:$0xff]  ;;  %v10231_v24 = vld [vmem:[#allocation33_spill] sm:$0xff] }
  0x50   :  { %v905_v11 = vadd.f32 %v5243_v22, %v901_v14  ;;  %10221 = vst [vmem:[#allocation19_spill] sm:$0xff] %v5404_v33  ;;  %v985_v54 = vadd.f32 %v983_v49, %v981_v42  ;;  %v10225_v22 = vld [vmem:[#allocation30_spill] sm:$0xff]  ;;  %v650_v37 = vmul.f32 %v5404_v33, %v4860_v29  ;;  %v10227_v14 = vld [vmem:[#allocation31_spill] sm:$0xff]  ;;  %v642_v63 = vadd.f32 %v640_v50, %v637_v13 }
  0x51   :  { %v5414_v36 = vmul.f32 %v10225_v22, %v10224_v41  ;;  %v5422_v21 = vadd.f32 %v10227_v14, %v746_v55  ;;  %v5425_v49 = vadd.f32 %v10229_v8, %v845_v12  ;;  %v5430_v22 = vmul.f32 %v5268_v44, %v5090_v4  ;;  %v5443_v12 = vld [vmem:[%s9803_s0 + $0x68] sm:$0xff] }
  0x52   :  { %v909_v42 = vadd.f32 %v10231_v24, %v905_v11  ;;  %v989_v25 = vadd.f32 %v987_v20, %v985_v54  ;;  %v5438_v55 = vmul.f32 %v5293_v51, %v10202_v1  ;;  %10235 = vst [vmem:[#allocation29_spill] sm:$0xff] %v5443_v12  ;;  %v10236_v50 = vld [vmem:[#allocation34_spill] sm:$0xff]  ;;  %v5448_v44 = vmul.f32 %v5298_v0, %v5157_v47 }
  0x53   :  { %10226 = vst [vmem:[#allocation24_spill] sm:$0xff] %v5414_v36  ;;  %v5434_v36 = vmul.f32 %v5273_v46, %v10201_v7  ;;  %v5453_v46 = vld [vmem:[%s9803_s0 + $0x78] sm:$0xff]  ;;  %v5458_v51 = vld [vmem:[%s9803_s0 + $0x88] sm:$0xff]  ;;  %v647_v11 = vadd.f32 %v645_v38, %v642_v63  ;;  %v655_v13 = vmul.f32 %v5443_v12, %v4871_v34  ;;  %v5463_v14 = vmul.f32 %v3477_v52, %v5171_v43 }
  0x54   :  { %10228 = vst [vmem:[#allocation10_spill] sm:$0xff] %v5422_v21  ;;  %v913_v20 = vadd.f32 %v10236_v50, %v909_v42  ;;  %v993_v54 = vadd.f32 %v991_v35, %v989_v25  ;;  %v660_v0 = vmul.f32 %v5453_v46, %v4887_v39  ;;  %v665_v8 = vmul.f32 %v5458_v51, %v4910_v48  ;;  %v10241_v42 = vld [vmem:[#allocation35_spill] sm:$0xff]  ;;  %v5476_v38 = vld [vmem:[%s9803_s0 + $0x98] sm:$0xff]  ;;  %v5481_v35 = vld [vmem:[%s9803_s0 + $0xa8] sm:$0xff] }
  0x55   :  { %10230 = vst [vmem:[#allocation23_spill] sm:$0xff] %v5425_v49  ;;  %v5486_v25 = vld [vmem:[%s9803_s0 + $0xc8] sm:$0xff]  ;;  %v652_v52 = vadd.f32 %v650_v37, %v647_v11  ;;  %v675_v24 = vmul.f32 %v5481_v35, %v4937_v58 }
  0x56   :  { %10232 = vst [vmem:[#allocation26_spill] sm:$0xff] %v5430_v22  ;;  %v917_v50 = vadd.f32 %v10241_v42, %v913_v20  ;;  %v997_v63 = vadd.f32 %v995_v61, %v993_v54  ;;  %v5491_v20 = vld [vmem:[%s9803_s0 + $0xd8] sm:$0xff]  ;;  %v5496_v42 = vld [vmem:[%s9803_s0 + $0xe8] sm:$0xff]  ;;  %v680_v37 = vmul.f32 %v5486_v25, %v4961_v2 }
  0x57   :  { %10233 = vst [vmem:[#allocation17_spill] sm:$0xff] %v5434_v36  ;;  %v10244_v61 = vld [vmem:[#allocation36_spill] sm:$0xff]  ;;  %v685_v49 = vmul.f32 %v5491_v20, %v4964_v3  ;;  %v5519_v21 = vmul.f32 %v5496_v42, %v4978_v9  ;;  %v10249_v36 = vld [vmem:[#allocation37_spill] sm:$0xff] }
  0x58   :  { %10234 = vst [vmem:[#allocation25_spill] sm:$0xff] %v5438_v55  ;;  %v921_v11 = vadd.f32 %v10244_v61, %v917_v50  ;;  %v5508_v54 = vld [vmem:[%s9803_s0 + $0xf8] sm:$0xff]  ;;  %v657_v55 = vadd.f32 %v655_v13, %v652_v52  ;;  %v1001_v50 = vadd.f32 %v5355_v59, %v997_v63  ;;  %v5525_v61 = vld [vmem:[%s9803_s0 + $0x128] sm:$0xff]  ;;  %v754_v52 = vmul.f32 %v5351_v26, %v4800_v6 }
  0x59   :  { %10237 = vst [vmem:[#allocation28_spill] sm:$0xff] %v5448_v44  ;;  %v670_v44 = vmul.f32 %v5476_v38, %v4934_v57  ;;  %v5541_v59 = vld [vmem:[%s9803_s0 + $0x138] sm:$0xff]  ;;  %v5546_v63 = vld [vmem:[%s9803_s0 + $0x148] sm:$0xff]  ;;  %v756_v26 = vmul.f32 %v5374_v32, %v4811_v10 }
  0x5a   :  { %10238 = vst [vmem:[#allocation13_spill] sm:$0xff] %v5453_v46  ;;  %v925_v22 = vadd.f32 %v10249_v36, %v921_v11  ;;  %v1005_v36 = vadd.f32 %v5359_v27, %v1001_v50  ;;  %v5558_v11 = vld [vmem:[%s9803_s0 + $0x58] sm:$0xff]  ;;  %v5579_v50 = vld [vmem:[%s9803_s0 + $0x168] sm:$0xff] }
  0x5b   :  { %10239 = vst [vmem:[#allocation27_spill] sm:$0xff] %v5458_v51  ;;  %v5574_v27 = vld [vmem:[%s9803_s0 + $0x158] sm:$0xff] }
  0x5c   :  { %10240 = vst [vmem:[#allocation14_spill] sm:$0xff] %v5463_v14  ;;  %v5513_v14 = vld [vmem:[%s9803_s0 + $0x108] sm:$0xff] }
  0x5d   :  { %10242 = vst [vmem:[#allocation30_spill] sm:$0xff] %v5481_v35  ;;  %v5533_v13 = vmul.f32 %v5513_v14, %v4998_v16 }
  0x5e   :  { %10243 = vst [vmem:[#allocation31_spill] sm:$0xff] %v5486_v25  ;;  %v5529_v25 = vmul.f32 %v5508_v54, %v4995_v15 }
  0x5f   :  { %10245 = vst [vmem:[#allocation32_spill] sm:$0xff] %v5519_v21  ;;  %v5550_v21 = vmul.f32 %v5525_v61, %v5030_v30 }
  0x60   :  { %10246 = vst [vmem:[#allocation33_spill] sm:$0xff] %v5525_v61  ;;  %v10255_v61 = vld [vmem:[#allocation38_spill] sm:$0xff] }
  0x61   :  { %10247 = vst [vmem:[#allocation34_spill] sm:$0xff] %v5529_v25  ;;  %v662_v25 = vadd.f32 %v660_v0, %v657_v55  ;;  %v5566_v55 = vmul.f32 %v5546_v63, %v10194_v56  ;;  %v760_v0 = vmul.f32 %v5394_v40, %v4829_v17  ;;  %v929_v32 = vadd.f32 %v10255_v61, %v925_v22 }
  0x62   :  { %10248 = vst [vmem:[#allocation35_spill] sm:$0xff] %v5533_v13  ;;  %v5562_v13 = vmul.f32 %v5541_v59, %v5057_v45  ;;  %v764_v22 = vmul.f32 %v5404_v33, %v4843_v23  ;;  %v1009_v61 = vadd.f32 %v5363_v18, %v1005_v36  ;;  %v5591_v40 = vmul.f32 %v5574_v27, %v10222_v60  ;;  %v5610_v18 = vld [vmem:[%s9803_s0 + $0x1a8] sm:$0xff] }
  0x63   :  { %10250 = vst [vmem:[#allocation36_spill] sm:$0xff] %v5546_v63  ;;  %v5595_v17 = vmul.f32 %v5579_v50, %v10224_v41 }
  0x64   :  { %10251 = vst [vmem:[#allocation37_spill] sm:$0xff] %v5550_v21  ;;  %v758_v21 = vadd.f32 %v756_v26, %v754_v52  ;;  %v5605_v26 = vld [vmem:[%s9803_s0 + $0x198] sm:$0xff] }
  0x65   :  { %10252 = vst [vmem:[#allocation39_spill] sm:$0xff] %v5558_v11  ;;  %v5622_v33 = vmul.f32 %v5605_v26, %v10201_v7 }
  0x66   :  { %10253 = vst [vmem:[#allocation40_spill] sm:$0xff] %v5562_v13  ;;  %v5584_v13 = vld [vmem:[%s9803_s0 + $0x188] sm:$0xff]  ;;  %v762_v36 = vadd.f32 %v760_v0, %v758_v21  ;;  %v772_v0 = vmul.f32 %v5453_v46, %v4871_v34 }
  0x67   :  { %10254 = vst [vmem:[#allocation41_spill] sm:$0xff] %v5566_v55  ;;  %v667_v55 = vadd.f32 %v665_v8, %v662_v25  ;;  %v5599_v10 = vmul.f32 %v5584_v13, %v5090_v4  ;;  %v933_v8 = vadd.f32 %v5305_v53, %v929_v32  ;;  %v5615_v25 = vld [vmem:[%s9803_s0 + $0x1b8] sm:$0xff]  ;;  %v768_v53 = vmul.f32 %v5558_v11, %v4860_v29  ;;  %v5636_v21 = vld [vmem:[%s9803_s0 + $0x1c8] sm:$0xff] }
  0x68   :  { %10256 = vst [vmem:[#allocation38_spill] sm:$0xff] %v5574_v27  ;;  %v1013_v32 = vadd.f32 %v5369_v28, %v1009_v61  ;;  %v5643_v11 = vmul.f32 %v5636_v21, %v5171_v43 }
  0x69   :  { %10257 = vst [vmem:[#allocation42_spill] sm:$0xff] %v5584_v13  ;;  %v672_v52 = vadd.f32 %v670_v44, %v667_v55  ;;  %v937_v44 = vadd.f32 %v5309_v31, %v933_v8  ;;  %v766_v55 = vadd.f32 %v764_v22, %v762_v36  ;;  %v780_v31 = vmul.f32 %v5476_v38, %v4910_v48  ;;  %v10269_v8 = vld [vmem:[#allocation15_spill] sm:$0xff] }
  0x6a   :  { %10258 = vst [vmem:[#allocation43_spill] sm:$0xff] %v5591_v40  ;;  %v1017_v61 = vadd.f32 %v5389_v19, %v1013_v32  ;;  %v784_v19 = vmul.f32 %v5481_v35, %v4934_v57 }
  0x6b   :  { %10259 = vst [vmem:[#allocation44_spill] sm:$0xff] %v5595_v17  ;;  %v5630_v17 = vmul.f32 %v5615_v25, %v5157_v47  ;;  %v677_v28 = vadd.f32 %v675_v24, %v672_v52  ;;  %v5653_v24 = vld [vmem:[%s9803_s0 + $0xb8] sm:$0xff]  ;;  %v770_v52 = vadd.f32 %v768_v53, %v766_v55 }
  0x6c   :  { %10260 = vst [vmem:[#allocation45_spill] sm:$0xff] %v5599_v10  ;;  %v5626_v10 = vmul.f32 %v5610_v18, %v10202_v1  ;;  %v1021_v36 = vadd.f32 %v5399_v5, %v1017_v61  ;;  %v788_v32 = vmul.f32 %v5653_v24, %v4937_v58  ;;  %v800_v5 = vmul.f32 %v5508_v54, %v4978_v9 }
  0x6d   :  { %10261 = vst [vmem:[#allocation46_spill] sm:$0xff] %v5605_v26  ;;  %v682_v22 = vadd.f32 %v680_v37, %v677_v28  ;;  %v5668_v37 = vld [vmem:[%s9803_s0 + $0x118] sm:$0xff]  ;;  %v774_v28 = vadd.f32 %v772_v0, %v770_v52  ;;  %v804_v61 = vmul.f32 %v5513_v14, %v4995_v15  ;;  %v5693_v52 = vmul.f32 %v5574_v27, %v10194_v56 }
  0x6e   :  { %10262 = vst [vmem:[#allocation47_spill] sm:$0xff] %v5610_v18  ;;  %v1025_v55 = vadd.f32 %v5410_v62, %v1021_v36  ;;  %v5688_v62 = vmul.f32 %v5546_v63, %v5057_v45  ;;  %v10277_v0 = vld [vmem:[#allocation24_spill] sm:$0xff]  ;;  %v10279_v36 = vld [vmem:[#allocation5_spill] sm:$0xff] }
  0x6f   :  { %10263 = vst [vmem:[#allocation48_spill] sm:$0xff] %v5615_v25  ;;  %v687_v53 = vadd.f32 %v685_v49, %v682_v22  ;;  %v5684_v49 = vmul.f32 %v5541_v59, %v5030_v30 }
  0x70   :  { %10264 = vst [vmem:[#allocation49_spill] sm:$0xff] %v5622_v33  ;;  %v1029_v22 = vadd.f32 %v10277_v0, %v1025_v55  ;;  %v5708_v0 = vmul.f32 %v5579_v50, %v10222_v60 }
  0x71   :  { %10265 = vst [vmem:[#allocation50_spill] sm:$0xff] %v5626_v10  ;;  %v941_v10 = vadd.f32 %v10269_v8, %v937_v44  ;;  %v796_v44 = vmul.f32 %v5496_v42, %v4964_v3  ;;  %v10271_v8 = vld [vmem:[#allocation20_spill] sm:$0xff] }
  0x72   :  { %10266 = vst [vmem:[#allocation51_spill] sm:$0xff] %v5630_v17  ;;  %v776_v17 = vmul.f32 %v5458_v51, %v4887_v39 }
  0x73   :  { %10267 = vst [vmem:[#allocation52_spill] sm:$0xff] %v5636_v21  ;;  %v945_v33 = vadd.f32 %v10271_v8, %v941_v10  ;;  %v854_v10 = vmul.f32 %v5443_v12, %v4800_v6  ;;  %v10274_v8 = vld [vmem:[#allocation32_spill] sm:$0xff]  ;;  %v856_v12 = vmul.f32 %v5453_v46, %v10279_v36 }
  0x74   :  { %10268 = vst [vmem:[#allocation53_spill] sm:$0xff] %v5643_v11  ;;  %v792_v11 = vmul.f32 %v5491_v20, %v4961_v2  ;;  %v692_v13 = vadd.f32 %v10274_v8, %v687_v53  ;;  %v778_v40 = vadd.f32 %v776_v17, %v774_v28  ;;  %v10281_v53 = vld [vmem:[#allocation8_spill] sm:$0xff] }
  0x75   :  { %10270 = vst [vmem:[#allocation15_spill] sm:$0xff] %v5653_v24  ;;  %v5677_v24 = vmul.f32 %v5668_v37, %v4998_v16  ;;  %v949_v28 = vadd.f32 %v10281_v53, %v945_v33  ;;  %v5703_v8 = vld [vmem:[%s9803_s0 + $0x178] sm:$0xff]  ;;  %v864_v33 = vmul.f32 %v5476_v38, %v4843_v23  ;;  %v10286_v53 = vld [vmem:[#allocation35_spill] sm:$0xff] }
  0x76   :  { %10272 = vst [vmem:[#allocation20_spill] sm:$0xff] %v5668_v37  ;;  %v10280_v37 = vld [vmem:[#allocation6_spill] sm:$0xff]  ;;  %v782_v55 = vadd.f32 %v780_v31, %v778_v40  ;;  %v5720_v40 = vmul.f32 %v5605_v26, %v5090_v4  ;;  %v10289_v31 = vld [vmem:[#allocation17_spill] sm:$0xff] }
  0x77   :  { %10273 = vst [vmem:[#allocation54_spill] sm:$0xff] %v5677_v24  ;;  %v860_v17 = vmul.f32 %v5458_v51, %v10280_v37  ;;  %v5713_v24 = vmul.f32 %v5703_v8, %v10224_v41  ;;  %v858_v37 = vadd.f32 %v856_v12, %v854_v10  ;;  %v868_v10 = vmul.f32 %v5481_v35, %v4860_v29 }
  0x78   :  { %10275 = vst [vmem:[#allocation32_spill] sm:$0xff] %v5684_v49  ;;  %v786_v51 = vadd.f32 %v784_v19, %v782_v55  ;;  %v10292_v19 = vld [vmem:[#allocation23_spill] sm:$0xff] }
  0x79   :  { %10276 = vst [vmem:[#allocation55_spill] sm:$0xff] %v5688_v62  ;;  %v10283_v62 = vld [vmem:[#allocation34_spill] sm:$0xff]  ;;  %v862_v12 = vadd.f32 %v860_v17, %v858_v37  ;;  %v10297_v37 = vld [vmem:[#allocation25_spill] sm:$0xff] }
  0x7a   :  { %10278 = vst [vmem:[#allocation24_spill] sm:$0xff] %v5693_v52  ;;  %v697_v49 = vadd.f32 %v10283_v62, %v692_v13  ;;  %v10284_v52 = vld [vmem:[#allocation26_spill] sm:$0xff]  ;;  %v5724_v13 = vmul.f32 %v5610_v18, %v10201_v7 }
  0x7b   :  { %10282 = vst [vmem:[#allocation5_spill] sm:$0xff] %v5703_v8  ;;  %v1033_v56 = vadd.f32 %v10284_v52, %v1029_v22  ;;  %v5729_v22 = vmul.f32 %v5615_v25, %v10202_v1 }
  0x7c   :  { %10285 = vst [vmem:[#allocation8_spill] sm:$0xff] %v5713_v24  ;;  %v702_v45 = vadd.f32 %v10286_v53, %v697_v49  ;;  %v10291_v49 = vld [vmem:[#allocation10_spill] sm:$0xff]  ;;  %v5739_v53 = vld [vmem:[%s9803_s0 + $0x1d8] sm:$0xff] }
  0x7d   :  { %10287 = vst [vmem:[#allocation34_spill] sm:$0xff] %v5720_v40  ;;  %v1037_v62 = vadd.f32 %v10289_v31, %v1033_v56  ;;  %v10293_v52 = vmax.f32 %v10291_v49, %v10292_v19  ;;  %v790_v56 = vadd.f32 %v788_v32, %v786_v51  ;;  %v5744_v31 = vmul.f32 %v5636_v21, %v5157_v47  ;;  %v10301_v32 = vld [vmem:[#allocation28_spill] sm:$0xff] }
  0x7e   :  { %10288 = vst [vmem:[#allocation26_spill] sm:$0xff] %v5724_v13  ;;  %v10295_v13 = vld [vmem:[#allocation37_spill] sm:$0xff]  ;;  %v866_v49 = vadd.f32 %v864_v33, %v862_v12  ;;  %v880_v51 = vmul.f32 %v5496_v42, %v4910_v48  ;;  %v888_v33 = vmul.f32 %v5513_v14, %v4937_v58 }
  0x7f   :  { %10290 = vst [vmem:[#allocation35_spill] sm:$0xff] %v5729_v22  ;;  %v951_v55 = vmax.f32 %v10293_v52, %v949_v28  ;;  %v707_v40 = vadd.f32 %v10295_v13, %v702_v45  ;;  %v1041_v17 = vadd.f32 %v10297_v37, %v1037_v62  ;;  %v5749_v22 = vmul.f32 %v5739_v53, %v5171_v43  ;;  %v10299_v28 = vld [vmem:[#allocation31_spill] sm:$0xff]  ;;  %v10300_v52 = vld [vmem:[#allocation40_spill] sm:$0xff]  ;;  %v10302_v12 = vld [vmem:[#allocation41_spill] sm:$0xff] }
  0x80   :  { %10294 = vst [vmem:[#allocation17_spill] sm:$0xff] %v5739_v53  ;;  %v872_v19 = vmul.f32 %v10299_v28, %v4871_v34  ;;  %v794_v24 = vadd.f32 %v792_v11, %v790_v56  ;;  %v876_v45 = vmul.f32 %v5491_v20, %v4887_v39  ;;  %v870_v62 = vadd.f32 %v868_v10, %v866_v49  ;;  %v10303_v11 = vld [vmem:[#allocation33_spill] sm:$0xff] }
  0x81   :  { %10296 = vst [vmem:[#allocation10_spill] sm:$0xff] %v5744_v31  ;;  %v712_v8 = vadd.f32 %v10300_v52, %v707_v40  ;;  %v1045_v13 = vadd.f32 %v10301_v32, %v1041_v17  ;;  %v884_v37 = vmul.f32 %v5508_v54, %v4934_v57  ;;  %v892_v40 = vmul.f32 %v10303_v11, %v4961_v2  ;;  %v10304_v52 = vld [vmem:[#allocation14_spill] sm:$0xff]  ;;  %v10309_v11 = vld [vmem:[#allocation27_spill] sm:$0xff] }
  0x82   :  { %10298 = vst [vmem:[#allocation23_spill] sm:$0xff] %v5749_v22  ;;  %v798_v22 = vadd.f32 %v796_v44, %v794_v24  ;;  %v896_v56 = vmul.f32 %v5541_v59, %v4964_v3  ;;  %v874_v17 = vadd.f32 %v872_v19, %v870_v62  ;;  %v5771_v10 = vmul.f32 %v5546_v63, %v4978_v9  ;;  %v10308_v62 = vld [vmem:[#allocation42_spill] sm:$0xff] }
  0x83   :  { %v717_v28 = vadd.f32 %v10302_v12, %v712_v8  ;;  %v1049_v31 = vadd.f32 %v10304_v52, %v1045_v13  ;;  %v5775_v49 = vmul.f32 %v5574_v27, %v4995_v15  ;;  %v10306_v8 = vld [vmem:[#allocation43_spill] sm:$0xff]  ;;  %v5780_v32 = vmul.f32 %v5579_v50, %v4998_v16 }
  0x84   :  { %v802_v44 = vadd.f32 %v800_v5, %v798_v22  ;;  %v954_v13 = vmul.f32 %v5453_v46, %v4800_v6  ;;  %v878_v19 = vadd.f32 %v876_v45, %v874_v17  ;;  %v5786_v52 = vmul.f32 %v10308_v62, %v5030_v30  ;;  %v10311_v5 = vld [vmem:[#allocation11_spill] sm:$0xff]  ;;  %v10314_v62 = vld [vmem:[#allocation45_spill] sm:$0xff] }
  0x85   :  { %10305 = vst [vmem:[#allocation37_spill] sm:$0xff] %v5775_v49  ;;  %v722_v24 = vadd.f32 %v10306_v8, %v717_v28  ;;  %v1051_v12 = vmax.f32 %v951_v55, %v1049_v31  ;;  %v956_v53 = vmul.f32 %v10309_v11, %v10279_v36  ;;  %v10310_v49 = vld [vmem:[#allocation44_spill] sm:$0xff]  ;;  %v5793_v22 = vmul.f32 %v5605_v26, %v10311_v5  ;;  %v10312_v8 = vld [vmem:[#allocation6_spill] sm:$0xff] }
  0x86   :  { %10307 = vst [vmem:[#allocation25_spill] sm:$0xff] %v5780_v32  ;;  %v806_v28 = vadd.f32 %v804_v61, %v802_v44  ;;  %v960_v32 = vmul.f32 %v5476_v38, %v10312_v8  ;;  %v10313_v6 = vstv %s5377_s26  ;;  %v882_v31 = vadd.f32 %v880_v51, %v878_v19  ;;  %v10315_v36 = vld [vmem:[#allocation54_spill] sm:$0xff]  ;;  %v10321_v19 = vld [vmem:[#allocation32_spill] sm:$0xff] }
  0x87   :  { %v727_v15 = vadd.f32 %v10310_v49, %v722_v24  ;;  %v1055_v55 = vadd.f32 %v10313_v6, %v1051_v12  ;;  %v958_v45 = vadd.f32 %v956_v53, %v954_v13  ;;  %v964_v17 = vmul.f32 %v5481_v35, %v4843_v23  ;;  %v10316_v49 = vld [vmem:[#allocation12_spill] sm:$0xff]  ;;  %v10317_v24 = vld [vmem:[#allocation15_spill] sm:$0xff]  ;;  %v5812_v53 = vld [vmem:[%s9803_s0 + $0x1e8] sm:$0xff] }
  0x88   :  { %v810_v11 = vadd.f32 %v10315_v36, %v806_v28  ;;  %v5805_v61 = vmul.f32 %v5610_v18, %v10316_v49  ;;  %v968_v44 = vmul.f32 %v10317_v24, %v4860_v29  ;;  %10318 = vst [vmem:[#allocation40_spill] sm:$0xff] %v5812_v53  ;;  %v886_v51 = vadd.f32 %v884_v37, %v882_v31  ;;  %v10320_v13 = vld [vmem:[#allocation49_spill] sm:$0xff]  ;;  %v10324_v36 = vld [vmem:[#allocation50_spill] sm:$0xff] }
  0x89   :  { %v732_v46 = vadd.f32 %v10314_v62, %v727_v15  ;;  %vm1057_vm0 = vcmp.ge.f32.partialorder %v1055_v55, 0.0  ;;  %v1059_v8 = vmul.f32 0.01, %v1055_v55  ;;  %v962_v23 = vadd.f32 %v960_v32, %v958_v45  ;;  %v5817_v15 = vld [vmem:[%s9803_s0 + $0x1f8] sm:$0xff]  ;;  %v5834_v32 = vld [vmem:[%s9803_s0 + $0x208] sm:$0xff] }
  0x8a   :  { %10319 = vst [vmem:[#allocation28_spill] sm:$0xff] %v5817_v15  ;;  %v814_v62 = vadd.f32 %v10321_v19, %v810_v11  ;;  %v5823_v29 = vmul.f32 %v5615_v25, %v10222_v60  ;;  %v5827_v28 = vmul.f32 %v5636_v21, %v10224_v41  ;;  %v5844_v11 = vld [vmem:[%s9803_s0 + $0x228] sm:$0xff]  ;;  %v890_v6 = vadd.f32 %v888_v33, %v886_v51  ;;  %v10326_v51 = vld [vmem:[#allocation24_spill] sm:$0xff] }
  0x8b   :  { %v737_v12 = vadd.f32 %v10320_v13, %v732_v46  ;;  %v1061_v37 = vsel %vm1057_vm0, %v1055_v55, %v1059_v8  ;;  %10322 = vst [vmem:[#allocation41_spill] sm:$0xff] %v5834_v32  ;;  %v5839_v46 = vld [vmem:[%s9803_s0 + $0x218] sm:$0xff]  ;;  %v966_v31 = vadd.f32 %v964_v17, %v962_v23  ;;  %v972_v55 = vmul.f32 %v5491_v20, %v4871_v34  ;;  %v10325_v13 = vld [vmem:[#allocation55_spill] sm:$0xff] }
  0x8c   :  { %v5850_v45 = vpack.c.bf16 %v1061_v37, %v1061_v37  ;;  %v818_v19 = vadd.f32 %v10325_v13, %v814_v62  ;;  %v5856_v24 = vmul.f32 %v5812_v53, %v5090_v4  ;;  %v894_v35 = vadd.f32 %v892_v40, %v890_v6  ;;  %v5949_v53 = vld [vmem:[%s9803_s0 + $0x10] sm:$0xff] }
  0x8d   :  { %v742_v8 = vadd.f32 %v10324_v36, %v737_v12  ;;  %v5862_v33 = vmul.f32 %v5817_v15, %v10201_v7  ;;  %v970_v34 = vadd.f32 %v968_v44, %v966_v31  ;;  %v976_v17 = vmul.f32 %v5496_v42, %v4887_v39  ;;  %v10327_v44 = vld [vmem:[#allocation51_spill] sm:$0xff] }
  0x8e   :  { %10323 = vst [vmem:[#allocation14_spill] sm:$0xff] %v5850_v45  ;;  %2247 = vmatmul.bf16.vlgmr.msra.gmra.mxu0 %v5850_v45  ;;  %v822_v23 = vadd.f32 %v10326_v51, %v818_v19  ;;  %v5870_v12 = vmul.f32 %v5834_v32, %v10202_v1  ;;  %v5874_v62 = vmul.f32 %v5839_v46, %v5157_v47  ;;  %v10328_v19 = vld [vmem:[#allocation20_spill] sm:$0xff] }
  0x8f   :  { %v5878_v40 = vmul.f32 %v5844_v11, %v5171_v43  ;;  %v747_v37 = vadd.f32 %v10327_v44, %v742_v8  ;;  %v898_v6 = vadd.f32 %v896_v56, %v894_v35  ;;  %v974_v39 = vadd.f32 %v972_v55, %v970_v34  ;;  %2273 = vmatmul.bf16.vlgmr.msra.gmra.mxu2 %v5850_v45 }
  0x90   :  { %v980_v31 = vmul.f32 %v5508_v54, %v4910_v48  ;;  %v826_v36 = vadd.f32 %v5708_v0, %v822_v23  ;;  %v984_v13 = vmul.f32 %v5513_v14, %v4934_v57  ;;  %v988_v51 = vmul.f32 %v10328_v19, %v4937_v58  ;;  %v10329_v57 = vld [vmem:[#allocation8_spill] sm:$0xff]  ;;  %v10330_v58 = vld [vmem:[#allocation9_spill] sm:$0xff] }
  0x91   :  { %v992_v8 = vmul.f32 %v5541_v59, %v4961_v2  ;;  %v902_v35 = vadd.f32 %v5771_v10, %v898_v6  ;;  %v978_v48 = vadd.f32 %v976_v17, %v974_v39  ;;  %v996_v56 = vmul.f32 %v5546_v63, %v4964_v3  ;;  %v10331_v2 = vld [vmem:[#allocation5_spill] sm:$0xff] }
  0x92   :  { %v1000_v0 = vmul.f32 %v5574_v27, %v4978_v9  ;;  %v830_v55 = vadd.f32 %v10329_v57, %v826_v36  ;;  %v5903_v34 = vmul.f32 %v5579_v50, %v10330_v58  ;;  %v5907_v10 = vmul.f32 %v10331_v2, %v4998_v16  ;;  %v10332_v3 = vld [vmem:[#allocation53_spill] sm:$0xff] }
  0x93   :  { %v5911_v17 = vmul.f32 %v5605_v26, %v5030_v30  ;;  %v5914_v23 = vadd.f32 %v10332_v3, %v747_v37  ;;  %v10333_v9 = vld [vmem:[#allocation37_spill] sm:$0xff]  ;;  %v982_v6 = vadd.f32 %v980_v31, %v978_v48  ;;  %v5919_v39 = vmul.f32 %v5610_v18, %v10311_v5  ;;  %v10339_v3 = vld [vmem:[#allocation34_spill] sm:$0xff] }
  0x94   :  { %v906_v44 = vadd.f32 %v10333_v9, %v902_v35  ;;  %v5925_v16 = vmul.f32 %v5615_v25, %v10316_v49  ;;  %v5928_v36 = vstv %s5829_s20  ;;  %v5931_v30 = vstv %s5848_s11  ;;  %v10337_v37 = vld [vmem:[#allocation25_spill] sm:$0xff]  ;;  %v10338_v49 = vld [vmem:[#allocation16_spill] sm:$0xff]  ;;  %s6127_s11 = sld [smem:[#allocation2 + $0xf]] }
  0x95   :  { %10334 = vst [vmem:[#allocation43_spill] sm:$0xff] %v5928_v36  ;;  %v5934_v57 = vstv %s5858_s25  ;;  %v986_v31 = vadd.f32 %v984_v13, %v982_v6  ;;  %v4362_v5 = vld [vmem:[%s9803_s0] sm:$0xff]  ;;  %v174_v58 = vmul.f32 %v5928_v36, %v10338_v49  ;;  %v834_v9 = vadd.f32 %v10339_v3, %v830_v55  ;;  %v10341_v3 = vld [vmem:[#allocation18_spill] sm:$0xff]  ;;  %s6032_s25 = sld [smem:[#allocation2 + $0xb]] }
  0x96   :  { %10335 = vst [vmem:[#allocation44_spill] sm:$0xff] %v5931_v30  ;;  %v910_v35 = vadd.f32 %v10337_v37, %v906_v44  ;;  %v173_v48 = vmul.f32 %v4362_v5, %v5928_v36  ;;  %v176_v13 = vmul.f32 %v5949_v53, %v5931_v30  ;;  %v10340_v44 = vld [vmem:[#allocation21_spill] sm:$0xff]  ;;  %v182_v2 = vmul.f32 %v10341_v3, %v5934_v57  ;;  %s6173_s20 = sld [smem:[#allocation2 + $0x11]] }
  0x97   :  { %10336 = vst [vmem:[#allocation11_spill] sm:$0xff] %v5934_v57  ;;  %v177_v6 = vmul.f32 %v10340_v44, %v5931_v30  ;;  %v5958_v37 = vld [vmem:[%s9803_s0 + $0x20] sm:$0xff]  ;;  %v990_v49 = vadd.f32 %v988_v51, %v986_v31  ;;  %v5966_v19 = vstv %s5884_s17  ;;  %v5970_v45 = vmul.f32 %v5636_v21, %v10222_v60  ;;  %v5975_v30 = vld [vmem:[%s9803_s0 + $0x30] sm:$0xff]  ;;  %v10343_v31 = vld [vmem:[#allocation22_spill] sm:$0xff]  ;;  %s8631_s17 = sld [smem:[#allocation2 + $0x66]] }
  0x98   :  { %v181_v55 = vmul.f32 %v5958_v37, %v5934_v57  ;;  %v914_v5 = vadd.f32 %v5786_v52, %v910_v35  ;;  %10342 = vst [vmem:[#allocation6_spill] sm:$0xff] %v5966_v19  ;;  %v178_v25 = vadd.f32 %v176_v13, %v173_v48  ;;  %v186_v52 = vmul.f32 %v5975_v30, %v5966_v19  ;;  %v10345_v60 = vld [vmem:[#allocation26_spill] sm:$0xff]  ;;  %v10350_v21 = vld [vmem:[#allocation7_spill] sm:$0xff] }
  0x99   :  { %v179_v18 = vadd.f32 %v177_v6, %v174_v58  ;;  %v994_v35 = vadd.f32 %v992_v8, %v990_v49  ;;  %v187_v57 = vmul.f32 %v10343_v31, %v5966_v19  ;;  %v5983_v3 = vstv %s5898_s27  ;;  %v5991_v6 = vld [vmem:[%s9803_s0 + $0x40] sm:$0xff]  ;;  %s8701_s27 = sld [smem:[#allocation2 + $0x57]] }
  0x9a   :  { %v918_v51 = vadd.f32 %v5793_v22, %v914_v5  ;;  %10344 = vst [vmem:[#allocation45_spill] sm:$0xff] %v5983_v3  ;;  %v838_v48 = vadd.f32 %v10345_v60, %v834_v9  ;;  %v183_v58 = vadd.f32 %v181_v55, %v178_v25  ;;  %v191_v22 = vmul.f32 %v5991_v6, %v5983_v3  ;;  %v10347_v9 = vld [vmem:[#allocation19_spill] sm:$0xff] }
  0x9b   :  { %v184_v13 = vadd.f32 %v182_v2, %v179_v18  ;;  %10346 = vst [vmem:[#allocation54_spill] sm:$0xff] %v5991_v6  ;;  %v998_v5 = vadd.f32 %v996_v56, %v994_v35  ;;  %v192_v49 = vmul.f32 %v10347_v9, %v5983_v3  ;;  %v6001_v60 = vstv %s5921_s30  ;;  %v10349_v18 = vld [vmem:[#allocation17_spill] sm:$0xff]  ;;  %s7337_s30 = sld [smem:[#allocation2 + $0x3d]] }
  0x9c   :  { %v922_v8 = vadd.f32 %v5805_v61, %v918_v51  ;;  %10348 = vst [vmem:[#allocation12_spill] sm:$0xff] %v6001_v60  ;;  %v6005_v25 = vmul.f32 %v10349_v18, %v10224_v41  ;;  %v188_v2 = vadd.f32 %v186_v52, %v183_v58  ;;  %v196_v6 = vmul.f32 %v10350_v21, %v6001_v60  ;;  %v10352_v41 = vld [vmem:[#allocation35_spill] sm:$0xff]  ;;  %v4276_v21 = vld [vmem:[%s9805_s2 + $0x22c] sm:$0xf] }
  0x9d   :  { %v189_v55 = vadd.f32 %v187_v57, %v184_v13  ;;  %v1002_v56 = vadd.f32 %v1000_v0, %v998_v5  ;;  %v6014_v51 = vmul.f32 %v5817_v15, %v5090_v4  ;;  %v6019_v35 = vstv %s5937_s21  ;;  %v10353_v0 = vld [vmem:[#allocation29_spill] sm:$0xff]  ;;  %v3640_v13 = vld [vmem:[%s9805_s2 + $0x188] sm:$0xf]  ;;  %s7262_s21 = sld [smem:[#allocation2 + $0x3b]] }
  0x9e   :  { %v926_v61 = vadd.f32 %v5823_v29, %v922_v8  ;;  %10351 = vst [vmem:[#allocation49_spill] sm:$0xff] %v6019_v35  ;;  %v842_v18 = vadd.f32 %v10352_v41, %v838_v48  ;;  %v6024_v52 = vmul.f32 %v5834_v32, %v10201_v7  ;;  %v3722_v29 = vld [vmem:[%s9805_s2 + $0x238] sm:$0xf0]  ;;  %v193_v4 = vadd.f32 %v191_v22, %v188_v2  ;;  %v4258_v8 = vld [vmem:[%s9805_s2 + $0x194] sm:$0xf0]  ;;  %v6059_v41 = vld [vmem:[%s9803_s0 + $0x70] sm:$0xff] }
  0x9f   :  { %v197_v57 = vmul.f32 %v10353_v0, %v6001_v60  ;;  %v1006_v58 = vadd.f32 %v5903_v34, %v1002_v56  ;;  %v3725_v7 = vor.u32 %v4276_v21, %v3722_v29  ;;  %v3780_v22 = vld [vmem:[%s9805_s2 + $0x60] sm:$0xf]  ;;  %v194_v5 = vadd.f32 %v192_v49, %v189_v55  ;;  %v4235_v34 = vld [vmem:[%s9805_s2 + $0xe4] sm:$0xf]  ;;  %10354 = vst [vmem:[#allocation32_spill] sm:$0xff] %v6059_v41 }
  0xa0   :  { %v930_v48 = vadd.f32 %v5827_v28, %v926_v61  ;;  %v3641_v2 = vor.u32 %v4258_v8, %v3640_v13  ;;  %v4221_v28 = vld [vmem:[%s9805_s2 + $0x6c] sm:$0xf0]  ;;  %v3846_v61 = vld [vmem:[%s9805_s2 + $0xf0] sm:$0xf0]  ;;  %v198_v56 = vadd.f32 %v196_v6, %v193_v4  ;;  %v201_v49 = vmul.f32 %v6059_v41, %v6019_v35  ;;  %v10355_v55 = vld [vmem:[#allocation13_spill] sm:$0xff] }
  0xa1   :  { %v202_v21 = vmul.f32 %v10355_v55, %v6019_v35  ;;  %v1010_v0 = vadd.f32 %v5907_v10, %v1006_v58  ;;  %2337 = vmatpush.bf16.msrb.mxu0 %v3725_v7  ;;  %v3781_v13 = vor.u32 %v4221_v28, %v3780_v22  ;;  %v3849_v8 = vor.u32 %v4235_v34, %v3846_v61  ;;  %v10356_v6 = vld [vmem:[#allocation10_spill] sm:$0xff]  ;;  %v4217_v7 = vld [vmem:[%s9805_s2 + $0x4c] sm:$0xf0]  ;;  %v4231_v22 = vld [vmem:[%s9805_s2 + $0xc4] sm:$0xf] }
  0xa2   :  { %v934_v29 = vadd.f32 %v5856_v24, %v930_v48  ;;  %v846_v4 = vadd.f32 %v10356_v6, %v842_v18  ;;  %2295 = vmatpush.bf16.msrb.mxu1 %v3641_v2  ;;  %v199_v32 = vadd.f32 %v197_v57, %v194_v5  ;;  %v203_v15 = vadd.f32 %v201_v49, %v198_v56  ;;  %v3624_v10 = vld [vmem:[%s9805_s2 + $0x168] sm:$0xf]  ;;  %v4254_v18 = vld [vmem:[%s9805_s2 + $0x174] sm:$0xf0]  ;;  %v3764_v57 = vld [vmem:[%s9805_s2 + $0x40] sm:$0xf] }
  0xa3   :  { %v6073_v41 = vstv %s5986_s16  ;;  %v1014_v24 = vadd.f32 %v5911_v17, %v1010_v0  ;;  %2530 = vmatpush.bf16.msrb.mxu2 %v3781_v13  ;;  %v6094_v48 = vstv %s5996_s18  ;;  %v3625_v58 = vor.u32 %v4254_v18, %v3624_v10  ;;  %v3830_v5 = vld [vmem:[%s9805_s2 + $0xd0] sm:$0xf0]  ;;  %s6220_s18 = sld [smem:[#allocation2 + $0x12]] }
  0xa4   :  { %v938_v35 = vadd.f32 %v5862_v33, %v934_v29  ;;  %v6089_v33 = vld [vmem:[%s9803_s0 + $0x80] sm:$0xff]  ;;  %v204_v2 = vadd.f32 %v202_v21, %v199_v32  ;;  %v10358_v28 = vld [vmem:[#allocation27_spill] sm:$0xff]  ;;  %v6117_v29 = vmul.f32 %v5839_v46, %v10202_v1  ;;  %v3765_v0 = vor.u32 %v4217_v7, %v3764_v57  ;;  %v3478_v32 = vld [vmem:[%s9803_s0 + $0x238] sm:$0xff]  ;;  %s7013_s16 = sld [smem:[#allocation2 + $0x33]] }
  0xa5   :  { %2552 = vmatpush.bf16.msra.mxu0 %v3849_v8  ;;  %10357 = vst [vmem:[#allocation50_spill] sm:$0xff] %v6089_v33  ;;  %v206_v17 = vmul.f32 %v6089_v33, %v6073_v41  ;;  %v207_v34 = vmul.f32 %v10358_v28, %v6073_v41  ;;  %v6110_v61 = vld [vmem:[%s9803_s0 + $0x90] sm:$0xff]  ;;  %v1018_v49 = vadd.f32 %v5919_v39, %v1014_v24 }
  0xa6   :  { %10359 = vst [vmem:[#allocation55_spill] sm:$0xff] %v6110_v61  ;;  %v211_v56 = vmul.f32 %v6110_v61, %v6094_v48  ;;  %v3833_v13 = vor.u32 %v4231_v22, %v3830_v5  ;;  %v10360_v21 = vld [vmem:[#allocation23_spill] sm:$0xff]  ;;  %2296 = vmatpush.bf16.msrb.mxu1 %v3625_v58  ;;  %v212_v1 = vmul.f32 %v5476_v38, %v6094_v48  ;;  %v6161_v58 = vld [vmem:[%s9803_s0 + $0xa0] sm:$0xff] }
  0xa7   :  { %v6125_v8 = vadd.f32 %v10360_v21, %v846_v4  ;;  %v208_v39 = vadd.f32 %v206_v17, %v203_v15  ;;  %v209_v6 = vadd.f32 %v207_v34, %v204_v2  ;;  %v942_v46 = vadd.f32 %v5870_v12, %v938_v35  ;;  %2531 = vmatpush.bf16.msrb.mxu2 %v3765_v0  ;;  %v3608_v4 = vld [vmem:[%s9805_s2 + $0x148] sm:$0xf]  ;;  %v4250_v15 = vld [vmem:[%s9805_s2 + $0x154] sm:$0xf0]  ;;  %v3748_v12 = vld [vmem:[%s9805_s2 + $0x20] sm:$0xf] }
  0xa8   :  { %v1022_v24 = vadd.f32 %v5925_v16, %v1018_v49  ;;  %v6135_v10 = vmul.f32 %v5844_v11, %v5157_v47  ;;  %v6147_v35 = vstv %s6007_s22  ;;  %v3609_v16 = vor.u32 %v4250_v15, %v3608_v4  ;;  %v4213_v47 = vld [vmem:[%s9805_s2 + $0x2c] sm:$0xf0]  ;;  %v4227_v11 = vld [vmem:[%s9805_s2 + $0xa4] sm:$0xf]  ;;  %v3814_v18 = vld [vmem:[%s9805_s2 + $0xb0] sm:$0xf0] }
  0xa9   :  { %2553 = vmatpush.bf16.msra.mxu0 %v3833_v13  ;;  %10361 = vst [vmem:[#allocation24_spill] sm:$0xff] %v6147_v35  ;;  %v213_v57 = vadd.f32 %v211_v56, %v208_v39  ;;  %v214_v17 = vadd.f32 %v212_v1, %v209_v6  ;;  %v216_v7 = vmul.f32 %v6161_v58, %v6147_v35  ;;  %s6169_s22 = sld [smem:[#allocation2 + $0x10]]  ;;  %v10362_v49 = vld [vmem:[#allocation30_spill] sm:$0xff]  ;;  %v6178_v21 = vstv %s6016_s28  ;;  %v4209_v1 = vld [vmem:[%s9805_s2 + $0xc] sm:$0xf0] }
  0xaa   :  { %v1026_v22 = vadd.f32 %v5970_v45, %v1022_v24  ;;  %v6167_v5 = vmul.f32 %v3478_v32, %v5171_v43  ;;  %v3749_v2 = vor.u32 %v4213_v47, %v3748_v12  ;;  %v3817_v34 = vor.u32 %v4227_v11, %v3814_v18  ;;  %2297 = vmatpush.bf16.msrb.mxu1 %v3609_v16  ;;  %v3592_v32 = vld [vmem:[%s9805_s2 + $0x128] sm:$0xf]  ;;  %v3798_v24 = vld [vmem:[%s9805_s2 + $0x90] sm:$0xf0]  ;;  %s7027_s28 = sld [smem:[#allocation2 + $0x34]] }
  0xab   :  { %v852_v56 = vmax.f32 %v5914_v23, %v6125_v8  ;;  %v217_v0 = vmul.f32 %v10362_v49, %v6147_v35  ;;  %v218_v13 = vadd.f32 %v216_v7, %v213_v57  ;;  %v946_v43 = vadd.f32 %v5874_v62, %v942_v46  ;;  %v4246_v23 = vld [vmem:[%s9805_s2 + $0x134] sm:$0xf0]  ;;  %v3732_v8 = vld [vmem:[%s9805_s2] sm:$0xf]  ;;  %v4223_v46 = vld [vmem:[%s9805_s2 + $0x84] sm:$0xf] }
  0xac   :  { %v1030_v45 = vadd.f32 %v6005_v25, %v1026_v22  ;;  %2532 = vmatpush.bf16.msrb.mxu2 %v3749_v2  ;;  %v6194_v62 = vld [vmem:[%s9803_s0 + $0xc0] sm:$0xff]  ;;  %v6199_v39 = vstv %s6032_s25  ;;  %v3593_v6 = vor.u32 %v4246_v23, %v3592_v32  ;;  %v10364_v15 = vld [vmem:[#allocation31_spill] sm:$0xff]  ;;  %v3733_v18 = vor.u32 %v4209_v1, %v3732_v8  ;;  %s7072_s25 = sld [smem:[#allocation2 + $0x37]] }
  0xad   :  { %2554 = vmatpush.bf16.msra.mxu0 %v3817_v34  ;;  %10363 = vst [vmem:[#allocation51_spill] sm:$0xff] %v6194_v62  ;;  %v221_v25 = vmul.f32 %v6194_v62, %v6178_v21  ;;  %v219_v4 = vadd.f32 %v217_v0, %v214_v17  ;;  %v222_v12 = vmul.f32 %v10364_v15, %v6178_v21  ;;  %v6215_v16 = vld [vmem:[%s9803_s0 + $0xd0] sm:$0xff]  ;;  %v6225_v2 = vstv %s6067_s29  ;;  %v6240_v23 = vld [vmem:[%s9803_s0 + $0xe0] sm:$0xff]  ;;  %s7181_s29 = sld [smem:[#allocation2 + $0x39]] }
  0xae   :  { %v226_v47 = vmul.f32 %v6215_v16, %v6199_v39  ;;  %v1034_v11 = vadd.f32 %v6014_v51, %v1030_v45  ;;  %v3801_v57 = vor.u32 %v4223_v46, %v3798_v24  ;;  %2298 = vmatpush.bf16.msrb.mxu1 %v3593_v6  ;;  %v227_v22 = vmul.f32 %v5491_v20, %v6199_v39  ;;  %v6261_v1 = vld [vmem:[%s9803_s0 + $0x100] sm:$0xff]  ;;  %v6326_v62 = vld [vmem:[%s9803_s0 + $0x130] sm:$0xff] }
  0xaf   :  { %v223_v7 = vadd.f32 %v221_v25, %v218_v13  ;;  %v224_v17 = vadd.f32 %v222_v12, %v219_v4  ;;  %10365 = vst [vmem:[#allocation8_spill] sm:$0xff] %v6225_v2  ;;  %v6228_v34 = vstv %s6070_s23  ;;  %v950_v0 = vadd.f32 %v5878_v40, %v946_v43  ;;  %v6275_v4 = vld [vmem:[%s9805_s2 + $0x218] sm:$0xf0]  ;;  %s7250_s23 = sld [smem:[#allocation2 + $0x3a]] }
  0xb0   :  { %10366 = vst [vmem:[#allocation9_spill] sm:$0xff] %v6228_v34  ;;  %v1038_v32 = vadd.f32 %v6024_v52, %v1034_v11  ;;  %2533 = vmatpush.bf16.msrb.mxu2 %v3733_v18  ;;  %v6233_v45 = vstv %s6119_s13  ;;  %v231_v8 = vmul.f32 %v6240_v23, %v6225_v2  ;;  %v232_v40 = vmul.f32 %v5496_v42, %v6225_v2  ;;  %v6249_v52 = vld [vmem:[%s9803_s0 + $0xf0] sm:$0xff]  ;;  %s6254_s13 = sld [smem:[#allocation2 + $0x14]] }
  0xb1   :  { %2555 = vmatpush.bf16.msra.mxu0 %v3801_v57  ;;  %v228_v51 = vadd.f32 %v226_v47, %v223_v7  ;;  %10367 = vst [vmem:[#allocation53_spill] sm:$0xff] %v6233_v45  ;;  %v229_v13 = vadd.f32 %v227_v22, %v224_v17  ;;  %v236_v43 = vmul.f32 %v6249_v52, %v6228_v34  ;;  %v6280_v47 = vstv %s6127_s11  ;;  %v6289_v7 = vld [vmem:[%s9805_s2 + $0x1ec] sm:$0xf]  ;;  %v6296_v17 = vld [vmem:[%s9803_s0 + $0x120] sm:$0xff] }
  0xb2   :  { %v1042_v25 = vadd.f32 %v6117_v29, %v1038_v32  ;;  %v237_v6 = vmul.f32 %v5508_v54, %v6228_v34  ;;  %v241_v46 = vmul.f32 %v6261_v1, %v6233_v45  ;;  %v242_v24 = vmul.f32 %v5513_v14, %v6233_v45  ;;  %v6270_v29 = vld [vmem:[%s9805_s2 + $0x20c] sm:$0xf]  ;;  %10368 = vst [vmem:[#allocation37_spill] sm:$0xff] %v6280_v47 }
  0xb3   :  { %v233_v15 = vadd.f32 %v231_v8, %v228_v51  ;;  %v234_v12 = vadd.f32 %v232_v40, %v229_v13  ;;  %v6283_v11 = vstv %s6169_s22  ;;  %v952_v18 = vmax.f32 %v852_v56, %v950_v0  ;;  %10370 = vst [vmem:[#allocation16_spill] sm:$0xff] %v6296_v17  ;;  %v6308_v56 = vld [vmem:[%s9805_s2 + $0x1cc] sm:$0xf]  ;;  %v6313_v0 = vld [vmem:[%s9805_s2 + $0x1d8] sm:$0xf0]  ;;  %v10371_v13 = vld [vmem:[#allocation33_spill] sm:$0xff] }
  0xb4   :  { %10369 = vst [vmem:[#allocation25_spill] sm:$0xff] %v6283_v11  ;;  %v1046_v57 = vadd.f32 %v6135_v10, %v1042_v25  ;;  %v246_v22 = vmul.f32 %v6296_v17, %v6280_v47  ;;  %v6303_v10 = vld [vmem:[%s9805_s2 + $0x1f8] sm:$0xf0]  ;;  %v247_v8 = vmul.f32 %v10371_v13, %v6280_v47  ;;  %v6318_v40 = vstv %s6173_s20  ;;  %v6342_v13 = vld [vmem:[%s9803_s0 + $0x140] sm:$0xff]  ;;  %s6994_s20 = sld [smem:[#allocation2 + $0x32]] }
  0xb5   :  { %v238_v32 = vadd.f32 %v236_v43, %v233_v15  ;;  %v239_v51 = vadd.f32 %v237_v6, %v234_v12  ;;  %10372 = vst [vmem:[#allocation34_spill] sm:$0xff] %v6318_v40  ;;  %v3709_v17 = vor.u32 %v6270_v29, %v6275_v4  ;;  %v251_v43 = vmul.f32 %v6326_v62, %v6283_v11  ;;  %v6358_v4 = vld [vmem:[%s9803_s0 + $0x150] sm:$0xff]  ;;  %s7483_s22 = sld [smem:[#allocation2 + $0x45]] }
  0xb6   :  { %v1050_v25 = vadd.f32 %v6167_v5, %v1046_v57  ;;  %v252_v5 = vmul.f32 %v5541_v59, %v6283_v11  ;;  %v6333_v12 = vstv %s6220_s18  ;;  %10374 = vst [vmem:[#allocation22_spill] sm:$0xff] %v6342_v13  ;;  %s6353_s18 = sld [smem:[#allocation2 + $0x17]]  ;;  %v6380_v11 = vstv %s6291_s14 }
  0xb7   :  { %v243_v6 = vadd.f32 %v241_v46, %v238_v32  ;;  %v244_v15 = vadd.f32 %v242_v24, %v239_v51  ;;  %10373 = vst [vmem:[#allocation21_spill] sm:$0xff] %v6333_v12  ;;  %v256_v46 = vmul.f32 %v6342_v13, %v6318_v40  ;;  %v6349_v51 = vstv %s6235_s24  ;;  %s7114_s14 = sld [smem:[#allocation2 + $0x38]] }
  0xb8   :  { %v1052_v57 = vmax.f32 %v952_v18, %v1050_v25  ;;  %v257_v18 = vmul.f32 %v5546_v63, %v6318_v40  ;;  %10375 = vst [vmem:[#allocation26_spill] sm:$0xff] %v6349_v51  ;;  %v10376_v25 = vstv %s5377_s26  ;;  %v261_v13 = vmul.f32 %v6358_v4, %v6333_v12  ;;  %v6375_v63 = vld [vmem:[%s9803_s0 + $0x160] sm:$0xff]  ;;  %s7037_s26 = sld [smem:[#allocation2 + $0x35]] }
  0xb9   :  { %v248_v24 = vadd.f32 %v246_v22, %v243_v6  ;;  %v249_v32 = vadd.f32 %v247_v8, %v244_v15  ;;  %10377 = vst [vmem:[#allocation19_spill] sm:$0xff] %v6358_v4  ;;  %v6363_v22 = vstv %s6254_s13  ;;  %v295_v8 = vmul.f32 %v5949_v53, %v5928_v36  ;;  %s6382_s13 = sld [smem:[#allocation2 + $0x18]] }
  0xba   :  { %v1056_v29 = vadd.f32 %v10376_v25, %v1052_v57  ;;  %10378 = vst [vmem:[#allocation7_spill] sm:$0xff] %v6363_v22  ;;  %v262_v57 = vmul.f32 %v5574_v27, %v6333_v12  ;;  %v6370_v25 = vstv %s6277_s8  ;;  %v266_v4 = vmul.f32 %v6375_v63, %v6349_v51  ;;  %s7471_s8 = sld [smem:[#allocation2 + $0x44]] }
  0xbb   :  { %v253_v6 = vadd.f32 %v251_v43, %v248_v24  ;;  %v254_v15 = vadd.f32 %v252_v5, %v249_v32  ;;  %10379 = vst [vmem:[#allocation35_spill] sm:$0xff] %v6370_v25  ;;  %v267_v5 = vmul.f32 %v5579_v50, %v6349_v51  ;;  %v6389_v24 = vld [vmem:[%s9803_s0 + $0x180] sm:$0xff]  ;;  %s8561_s24 = sld [smem:[#allocation2 + $0x51]] }
  0xbc   :  { %vm1058_vm2 = vcmp.ge.f32.partialorder %v1056_v29, 0.0  ;;  %v1060_v40 = vmul.f32 0.01, %v1056_v29  ;;  %10380 = vst [vmem:[#allocation29_spill] sm:$0xff] %v6375_v63  ;;  %v271_v32 = vmul.f32 %v6389_v24, %v6363_v22  ;;  %v10382_v63 = vld [vmem:[#allocation42_spill] sm:$0xff] }
  0xbd   :  { %v258_v53 = vadd.f32 %v256_v46, %v253_v6  ;;  %v259_v43 = vadd.f32 %v257_v18, %v254_v15  ;;  %10381 = vst [vmem:[#allocation13_spill] sm:$0xff] %v6389_v24  ;;  %v272_v27 = vmul.f32 %v10382_v63, %v6363_v22  ;;  %v6398_v46 = vld [vmem:[%s9803_s0 + $0x190] sm:$0xff]  ;;  %v277_v6 = vmul.f32 %v5605_v26, %v6370_v25  ;;  %v6409_v63 = vld [vmem:[%s9803_s0 + $0x1a0] sm:$0xff] }
  0xbe   :  { %v1062_v12 = vsel %vm1058_vm2, %v1056_v29, %v1060_v40  ;;  %10383 = vst [vmem:[#allocation10_spill] sm:$0xff] %v6398_v46  ;;  %v276_v18 = vmul.f32 %v6398_v46, %v6370_v25  ;;  %v281_v40 = vmul.f32 %v6409_v63, %v6380_v11  ;;  %v296_v29 = vmul.f32 %v10340_v44, %v5928_v36  ;;  %v10385_v46 = vld [vmem:[#allocation44_spill] sm:$0xff]  ;;  %v10387_v26 = vld [vmem:[#allocation11_spill] sm:$0xff] }
  0xbf   :  { %v6404_v15 = vpack.c.bf16 %v1062_v12, %v1062_v12  ;;  %v263_v51 = vadd.f32 %v261_v13, %v258_v53  ;;  %v264_v24 = vadd.f32 %v262_v57, %v259_v43  ;;  %10384 = vst [vmem:[#allocation27_spill] sm:$0xff] %v6409_v63  ;;  %v297_v22 = vmul.f32 %v5958_v37, %v10385_v46  ;;  %v10386_v12 = vld [vmem:[#allocation18_spill] sm:$0xff] }
  0xc0   :  { %v298_v25 = vmul.f32 %v10386_v12, %v10385_v46  ;;  %v301_v13 = vmul.f32 %v5975_v30, %v10387_v26  ;;  %v302_v44 = vmul.f32 %v10343_v31, %v10387_v26  ;;  %v6430_v37 = vstv %s6353_s18  ;;  %v10389_v12 = vld [vmem:[#allocation54_spill] sm:$0xff]  ;;  %s7352_s18 = sld [smem:[#allocation2 + $0x3f]] }
  0xc1   :  { %3726 = vmatmul.msk.bf16.vlgmr.msra.gmra.mxu1 %vm2235_vm1, %v6404_v15  ;;  %3727 = vmatmul.msk.bf16.vlgmr.msra.gmra.mxu3 %vm2235_vm1, %v6404_v15  ;;  %v268_v57 = vadd.f32 %v266_v4, %v263_v51  ;;  %v269_v53 = vadd.f32 %v267_v5, %v264_v24  ;;  %10388 = vst [vmem:[#allocation23_spill] sm:$0xff] %v6430_v37  ;;  %v10390_v4 = vld [vmem:[#allocation47_spill] sm:$0xff] }
  0xc2   :  { %2317 = vmatpush.bf16.msra.mxu3 %v3709_v17  ;;  %3729 = vmatmul.msk.bf16.vlgmr.msrb.gmra.mxu0 %vm2235_vm1, %v6404_v15  ;;  %v299_v43 = vadd.f32 %v297_v22, %v295_v8  ;;  %v300_v30 = vadd.f32 %v298_v25, %v296_v29  ;;  %v305_v63 = vmul.f32 %v10389_v12, %v5966_v19  ;;  %v4384_v24 = vld [vmem:[%s9803_s0 + $0x50] sm:$0xff] }
  0xc3   :  { %v273_v46 = vadd.f32 %v271_v32, %v268_v57  ;;  %v274_v36 = vadd.f32 %v272_v27, %v269_v53  ;;  %v282_v51 = vmul.f32 %v10390_v4, %v6380_v11  ;;  %v306_v31 = vmul.f32 %v10347_v9, %v5966_v19  ;;  %v10391_v8 = vld [vmem:[#allocation39_spill] sm:$0xff]  ;;  %v4260_v53 = vld [vmem:[%s9805_s2 + $0x1ac] sm:$0xf] }
  0xc4   :  { %v303_v17 = vadd.f32 %v301_v13, %v299_v43  ;;  %v304_v5 = vadd.f32 %v302_v44, %v300_v30  ;;  %v309_v22 = vmul.f32 %v4384_v24, %v5983_v3  ;;  %v310_v25 = vmul.f32 %v10391_v8, %v5983_v3  ;;  %v6447_v27 = vld [vmem:[%s9803_s0 + $0x1b0] sm:$0xff]  ;;  %v4256_v4 = vld [vmem:[%s9805_s2 + $0x18c] sm:$0xf] }
  0xc5   :  { %v278_v29 = vadd.f32 %v276_v18, %v273_v46  ;;  %v279_v32 = vadd.f32 %v277_v6, %v274_v36  ;;  %10392 = vst [vmem:[#allocation30_spill] sm:$0xff] %v6447_v27  ;;  %v286_v9 = vmul.f32 %v6447_v27, %v6430_v37  ;;  %v6452_v13 = vstv %s6382_s13  ;;  %v3658_v36 = vld [vmem:[%s9805_s2 + $0x1b8] sm:$0xf0] }
  0xc6   :  { %10393 = vst [vmem:[#allocation31_spill] sm:$0xff] %v6452_v13  ;;  %v10394_v57 = vor.u32 %v6289_v7, %v6303_v10  ;;  %v307_v46 = vadd.f32 %v305_v63, %v303_v17  ;;  %v308_v18 = vadd.f32 %v306_v31, %v304_v5  ;;  %v10395_v6 = vld [vmem:[#allocation32_spill] sm:$0xff]  ;;  %v314_v43 = vmul.f32 %v10355_v55, %v6001_v60  ;;  %v10397_v5 = vld [vmem:[#allocation49_spill] sm:$0xff] }
  0xc7   :  { %v313_v44 = vmul.f32 %v10395_v6, %v6001_v60  ;;  %v283_v30 = vadd.f32 %v281_v40, %v278_v29  ;;  %v284_v12 = vadd.f32 %v282_v51, %v279_v32  ;;  %v10396_v7 = vld [vmem:[#allocation48_spill] sm:$0xff]  ;;  %v317_v24 = vmul.f32 %v6089_v33, %v10397_v5  ;;  %v6482_v51 = vld [vmem:[%s9803_s0 + $0x1c0] sm:$0xff] }
  0xc8   :  { %2318 = vmatpush.bf16.msra.mxu3 %v10394_v57  ;;  %v287_v10 = vmul.f32 %v10396_v7, %v6430_v37  ;;  %v3642_v63 = vld [vmem:[%s9805_s2 + $0x198] sm:$0xf0]  ;;  %v311_v31 = vadd.f32 %v309_v22, %v307_v46  ;;  %v312_v17 = vadd.f32 %v310_v25, %v308_v18  ;;  %v318_v55 = vmul.f32 %v10358_v28, %v10397_v5 }
  0xc9   :  { %v3661_v40 = vor.u32 %v4260_v53, %v3658_v36  ;;  %10398 = vst [vmem:[#allocation33_spill] sm:$0xff] %v6482_v51  ;;  %v291_v8 = vmul.f32 %v6482_v51, %v6452_v13  ;;  %v321_v29 = vmul.f32 %v6110_v61, %v6073_v41  ;;  %v10399_v22 = vor.u32 %v6308_v56, %v6313_v0  ;;  %v10400_v46 = vld [vmem:[#allocation52_spill] sm:$0xff]  ;;  %v6502_v0 = vld [vmem:[%s9803_s0 + $0xb0] sm:$0xff] }
  0xca   :  { %v288_v25 = vadd.f32 %v286_v9, %v283_v30  ;;  %v315_v32 = vadd.f32 %v313_v44, %v311_v31  ;;  %v316_v57 = vadd.f32 %v314_v43, %v312_v17  ;;  %v322_v28 = vmul.f32 %v5476_v38, %v6073_v41  ;;  %10401 = vst [vmem:[#allocation42_spill] sm:$0xff] %v6502_v0  ;;  %v10402_v9 = vld [vmem:[#allocation15_spill] sm:$0xff] }
  0xcb   :  { %v3645_v53 = vor.u32 %v4256_v4, %v3642_v63  ;;  %v289_v36 = vadd.f32 %v287_v10, %v284_v12  ;;  %v292_v18 = vmul.f32 %v10400_v46, %v6452_v13  ;;  %v325_v37 = vmul.f32 %v6161_v58, %v6094_v48  ;;  %v10410_v46 = vld [vmem:[#allocation36_spill] sm:$0xff] }
  0xcc   :  { %2319 = vmatpush.bf16.msra.mxu3 %v10399_v22  ;;  %v319_v7 = vadd.f32 %v317_v24, %v315_v32  ;;  %v320_v51 = vadd.f32 %v318_v55, %v316_v57  ;;  %v326_v56 = vmul.f32 %v10362_v49, %v6094_v48  ;;  %v329_v38 = vmul.f32 %v6502_v0, %v6147_v35  ;;  %v10408_v57 = vld [vmem:[#allocation25_spill] sm:$0xff] }
  0xcd   :  { %v330_v44 = vmul.f32 %v10402_v9, %v6147_v35  ;;  %v333_v43 = vmul.f32 %v6215_v16, %v6178_v21  ;;  %v334_v30 = vmul.f32 %v5491_v20, %v6178_v21  ;;  %v6512_v12 = vadd.f32 %v291_v8, %v288_v25  ;;  %v10405_v8 = vld [vmem:[#allocation14_spill] sm:$0xff]  ;;  %v10423_v0 = vld [vmem:[#allocation5_spill] sm:$0xff] }
  0xce   :  { %v323_v49 = vadd.f32 %v321_v29, %v319_v7  ;;  %v324_v10 = vadd.f32 %v322_v28, %v320_v51  ;;  %v337_v4 = vmul.f32 %v6240_v23, %v6199_v39  ;;  %v6516_v63 = vadd.f32 %v292_v18, %v289_v36  ;;  %v10409_v28 = vld [vmem:[#allocation22_spill] sm:$0xff] }
  0xcf   :  { %10403 = vst [vmem:[#allocation18_spill] sm:$0xff] %v6512_v12  ;;  %v338_v31 = vmul.f32 %v5496_v42, %v6199_v39  ;;  %v341_v17 = vmul.f32 %v6249_v52, %v6225_v2  ;;  %v342_v24 = vmul.f32 %v5508_v54, %v6225_v2  ;;  %v346_v51 = vmul.f32 %v5513_v14, %v6228_v34  ;;  %v6532_v42 = vld [vmem:[%s9803_s0 + $0x110] sm:$0xff]  ;;  %v10407_v54 = vld [vmem:[#allocation20_spill] sm:$0xff]  ;;  %v10411_v7 = vld [vmem:[#allocation34_spill] sm:$0xff] }
  0xd0   :  { %2320 = vmatpush.bf16.msra.mxu3 %v3661_v40  ;;  %10404 = vst [vmem:[#allocation54_spill] sm:$0xff] %v6516_v63  ;;  %v327_v20 = vadd.f32 %v325_v37, %v323_v49  ;;  %v328_v55 = vadd.f32 %v326_v56, %v324_v10  ;;  %v345_v40 = vmul.f32 %v6261_v1, %v6228_v34  ;;  %v10412_v56 = vld [vmem:[#allocation19_spill] sm:$0xff]  ;;  %v10413_v49 = vld [vmem:[#allocation38_spill] sm:$0xff] }
  0xd1   :  { %2299 = vmatmul.bf16.vlgmr.msrb.gmra.mxu1 %v10405_v8  ;;  %10406 = vst [vmem:[#allocation47_spill] sm:$0xff] %v6532_v42  ;;  %v349_v29 = vmul.f32 %v6532_v42, %v6233_v45  ;;  %v350_v37 = vmul.f32 %v10407_v54, %v6233_v45  ;;  %v6540_v22 = vmul.f32 %v6326_v62, %v6280_v47  ;;  %v6575_v54 = vld [vmem:[%s9803_s0 + $0x170] sm:$0xff]  ;;  %v6584_v8 = vld [vmem:[%s9803_s0 + $0x60] sm:$0xff] }
  0xd2   :  { %v6544_v14 = vmul.f32 %v5541_v59, %v6280_v47  ;;  %v331_v25 = vadd.f32 %v329_v38, %v327_v20  ;;  %v332_v32 = vadd.f32 %v330_v44, %v328_v55  ;;  %v6548_v36 = vmul.f32 %v10409_v28, %v10408_v57  ;;  %v10414_v59 = vld [vmem:[#allocation21_spill] sm:$0xff]  ;;  %3728 = vmatmul.msk.bf16.vlgmr.msrb.gmra.mxu3 %vm2235_vm1, %v6404_v15  ;;  %v6591_v15 = vld [vmem:[%s9803_s0 + $0x68] sm:$0xff] }
  0xd3   :  { %v6552_v18 = vmul.f32 %v10410_v46, %v10408_v57  ;;  %v6556_v9 = vmul.f32 %v10412_v56, %v10411_v7  ;;  %v6560_v10 = vmul.f32 %v10413_v49, %v10411_v7  ;;  %v6568_v44 = vmul.f32 %v5579_v50, %v10414_v59  ;;  %10416 = vst [vmem:[#allocation39_spill] sm:$0xff] %v6575_v54  ;;  %v10417_v46 = vld [vmem:[#allocation26_spill] sm:$0xff]  ;;  %v10419_v50 = vld [vmem:[#allocation43_spill] sm:$0xff] }
  0xd4   :  { %2321 = vmatpush.bf16.msra.mxu3 %v3645_v53  ;;  %v10415_v53 = vld [vmem:[#allocation29_spill] sm:$0xff]  ;;  %v335_v20 = vadd.f32 %v333_v43, %v331_v25  ;;  %v336_v55 = vadd.f32 %v334_v30, %v332_v32  ;;  %v6579_v49 = vmul.f32 %v6575_v54, %v10417_v46  ;;  %10418 = vst [vmem:[#allocation48_spill] sm:$0xff] %v6584_v8  ;;  %v10421_v30 = vld [vmem:[#allocation44_spill] sm:$0xff] }
  0xd5   :  { %v6564_v38 = vmul.f32 %v10415_v53, %v10414_v59  ;;  %v395_v63 = vmul.f32 %v6584_v8, %v10419_v50  ;;  %10420 = vst [vmem:[#allocation49_spill] sm:$0xff] %v6591_v15  ;;  %v396_v43 = vmul.f32 %v6591_v15, %v10419_v50  ;;  %v397_v25 = vmul.f32 %v10395_v6, %v10421_v30  ;;  %v6600_v32 = vld [vmem:[%s9803_s0 + $0x78] sm:$0xff]  ;;  %v6613_v15 = vld [vmem:[%s9803_s0 + $0x88] sm:$0xff] }
  0xd6   :  { %10422 = vst [vmem:[#allocation52_spill] sm:$0xff] %v6600_v32  ;;  %v398_v54 = vmul.f32 %v6600_v32, %v10421_v30  ;;  %v401_v8 = vmul.f32 %v6089_v33, %v10387_v26  ;;  %v339_v12 = vadd.f32 %v337_v4, %v335_v20  ;;  %v340_v42 = vadd.f32 %v338_v31, %v336_v55  ;;  %v6622_v4 = vld [vmem:[%s9803_s0 + $0x98] sm:$0xff]  ;;  %v10426_v55 = vld [vmem:[#allocation7_spill] sm:$0xff]  ;;  %v10427_v33 = vld [vmem:[#allocation10_spill] sm:$0xff] }
  0xd7   :  { %v6608_v59 = vmul.f32 %v10423_v0, %v10417_v46  ;;  %10424 = vst [vmem:[#allocation15_spill] sm:$0xff] %v6613_v15  ;;  %v402_v6 = vmul.f32 %v6613_v15, %v10387_v26  ;;  %v399_v50 = vadd.f32 %v397_v25, %v395_v63  ;;  %v405_v30 = vmul.f32 %v6110_v61, %v5966_v19  ;;  %v10428_v63 = vld [vmem:[#allocation46_spill] sm:$0xff] }
  0xd8   :  { %v400_v7 = vadd.f32 %v398_v54, %v396_v43  ;;  %10425 = vst [vmem:[#allocation20_spill] sm:$0xff] %v6622_v4  ;;  %v406_v0 = vmul.f32 %v6622_v4, %v5966_v19  ;;  %v343_v31 = vadd.f32 %v341_v17, %v339_v12  ;;  %v344_v20 = vadd.f32 %v342_v24, %v340_v42  ;;  %v6639_v26 = vld [vmem:[%s9803_s0 + $0xa8] sm:$0xff]  ;;  %v10430_v42 = vld [vmem:[#allocation35_spill] sm:$0xff] }
  0xd9   :  { %v6628_v32 = vmul.f32 %v10427_v33, %v10426_v55  ;;  %v6632_v54 = vmul.f32 %v10428_v63, %v10426_v55  ;;  %v403_v43 = vadd.f32 %v401_v8, %v399_v50  ;;  %v409_v61 = vmul.f32 %v6161_v58, %v5983_v3  ;;  %10429 = vst [vmem:[#allocation22_spill] sm:$0xff] %v6639_v26  ;;  %v10431_v19 = vld [vmem:[#allocation27_spill] sm:$0xff] }
  0xda   :  { %v404_v25 = vadd.f32 %v402_v6, %v400_v7  ;;  %v410_v12 = vmul.f32 %v6639_v26, %v5983_v3  ;;  %v347_v17 = vadd.f32 %v345_v40, %v343_v31  ;;  %v348_v24 = vadd.f32 %v346_v51, %v344_v20  ;;  %v6650_v6 = vld [vmem:[%s9803_s0 + $0x1a8] sm:$0xff]  ;;  %v10433_v63 = vld [vmem:[#allocation51_spill] sm:$0xff] }
  0xdb   :  { %v6645_v4 = vmul.f32 %v10431_v19, %v10430_v42  ;;  %10432 = vst [vmem:[#allocation36_spill] sm:$0xff] %v6650_v6  ;;  %v6654_v8 = vmul.f32 %v6650_v6, %v10430_v42  ;;  %v407_v7 = vadd.f32 %v405_v30, %v403_v43  ;;  %v413_v3 = vmul.f32 %v10433_v63, %v6001_v60  ;;  %v6661_v40 = vld [vmem:[%s9803_s0 + $0xc8] sm:$0xff]  ;;  %v6672_v30 = vld [vmem:[%s9803_s0 + $0x1b8] sm:$0xff] }
  0xdc   :  { %v408_v50 = vadd.f32 %v406_v0, %v404_v25  ;;  %10434 = vst [vmem:[#allocation38_spill] sm:$0xff] %v6661_v40  ;;  %v414_v51 = vmul.f32 %v6661_v40, %v6001_v60  ;;  %v351_v31 = vadd.f32 %v349_v29, %v347_v17  ;;  %v352_v20 = vadd.f32 %v350_v37, %v348_v24  ;;  %v6683_v29 = vld [vmem:[%s9803_s0 + $0xd8] sm:$0xff]  ;;  %v10437_v40 = vld [vmem:[#allocation23_spill] sm:$0xff]  ;;  %v10438_v60 = vld [vmem:[#allocation33_spill] sm:$0xff] }
  0xdd   :  { %v6667_v26 = vmul.f32 %v6447_v27, %v6380_v11  ;;  %10435 = vst [vmem:[#allocation5_spill] sm:$0xff] %v6672_v30  ;;  %v6676_v0 = vmul.f32 %v6672_v30, %v6380_v11  ;;  %v411_v43 = vadd.f32 %v409_v61, %v407_v7  ;;  %v417_v63 = vmul.f32 %v6215_v16, %v10397_v5  ;;  %v6696_v61 = vld [vmem:[%s9803_s0 + $0x1c8] sm:$0xff] }
  0xde   :  { %v412_v25 = vadd.f32 %v410_v12, %v408_v50  ;;  %v418_v37 = vmul.f32 %v6683_v29, %v10397_v5  ;;  %v355_v17 = vadd.f32 %v6540_v22, %v351_v31  ;;  %v356_v24 = vadd.f32 %v6544_v14, %v352_v20  ;;  %10440 = vst [vmem:[#allocation51_spill] sm:$0xff] %v6696_v61  ;;  %v6707_v14 = vld [vmem:[%s9803_s0 + $0xe8] sm:$0xff] }
  0xdf   :  { %10436 = vst [vmem:[#allocation46_spill] sm:$0xff] %v6676_v0  ;;  %v6691_v0 = vmul.f32 %v10438_v60, %v10437_v40  ;;  %v6700_v12 = vmul.f32 %v6696_v61, %v10437_v40  ;;  %v415_v7 = vadd.f32 %v413_v3, %v411_v43  ;;  %v421_v22 = vmul.f32 %v6240_v23, %v6073_v41  ;;  %v6716_v3 = vld [vmem:[%s9803_s0 + $0x1d0] sm:$0xff]  ;;  %v10443_v43 = vld [vmem:[#allocation17_spill] sm:$0xff] }
  0xe0   :  { %v416_v50 = vadd.f32 %v414_v51, %v412_v25  ;;  %v422_v31 = vmul.f32 %v6707_v14, %v6073_v41  ;;  %v359_v20 = vadd.f32 %v6548_v36, %v355_v17  ;;  %10442 = vst [vmem:[#allocation57_spill] sm:$0xff] %v6716_v3  ;;  %v6720_v51 = vmul.f32 %v6716_v3, %v6452_v13 }
  0xe1   :  { %10439 = vst [vmem:[#allocation35_spill] sm:$0xff] %v6691_v0  ;;  %v360_v0 = vadd.f32 %v6552_v18, %v356_v24  ;;  %v6724_v25 = vmul.f32 %v10443_v43, %v6452_v13  ;;  %v419_v40 = vadd.f32 %v417_v63, %v415_v7  ;;  %v425_v36 = vmul.f32 %v6249_v52, %v6094_v48  ;;  %v6731_v18 = vld [vmem:[%s9803_s0 + $0xf8] sm:$0xff]  ;;  %v6742_v63 = vld [vmem:[%s9803_s0 + $0x108] sm:$0xff] }
  0xe2   :  { %10441 = vst [vmem:[#allocation56_spill] sm:$0xff] %v6700_v12  ;;  %v420_v12 = vadd.f32 %v418_v37, %v416_v50  ;;  %v426_v17 = vmul.f32 %v6731_v18, %v6094_v48  ;;  %v363_v24 = vadd.f32 %v6556_v9, %v359_v20  ;;  %v429_v43 = vmul.f32 %v6261_v1, %v6147_v35  ;;  %v10445_v13 = vld [vmem:[#allocation16_spill] sm:$0xff]  ;;  %v6751_v9 = vld [vmem:[%s9803_s0 + $0x128] sm:$0xff] }
  0xe3   :  { %10444 = vst [vmem:[#allocation17_spill] sm:$0xff] %v6724_v25  ;;  %v364_v3 = vadd.f32 %v6560_v10, %v360_v0  ;;  %v430_v37 = vmul.f32 %v6742_v63, %v6147_v35  ;;  %v423_v7 = vadd.f32 %v421_v22, %v419_v40  ;;  %v433_v25 = vmul.f32 %v10445_v13, %v6178_v21  ;;  %v6762_v40 = vld [vmem:[%s9803_s0 + $0x138] sm:$0xff] }
  0xe4   :  { %v424_v50 = vadd.f32 %v422_v31, %v420_v12  ;;  %10446 = vst [vmem:[#allocation16_spill] sm:$0xff] %v6751_v9  ;;  %v434_v10 = vmul.f32 %v6751_v9, %v6178_v21  ;;  %v367_v0 = vadd.f32 %v6564_v38, %v363_v24  ;;  %v437_v35 = vmul.f32 %v6326_v62, %v6199_v39  ;;  %v6771_v38 = vld [vmem:[%s9803_s0 + $0x148] sm:$0xff] }
  0xe5   :  { %v368_v20 = vadd.f32 %v6568_v44, %v364_v3  ;;  %v438_v13 = vmul.f32 %v6762_v40, %v6199_v39  ;;  %v427_v12 = vadd.f32 %v425_v36, %v423_v7  ;;  %v441_v31 = vmul.f32 %v10409_v28, %v6225_v2  ;;  %10447 = vst [vmem:[#allocation58_spill] sm:$0xff] %v6771_v38  ;;  %v6782_v36 = vld [vmem:[%s9803_s0 + $0x158] sm:$0xff] }
  0xe6   :  { %v428_v22 = vadd.f32 %v426_v17, %v424_v50  ;;  %v442_v44 = vmul.f32 %v6771_v38, %v6225_v2  ;;  %v371_v3 = vadd.f32 %v6579_v49, %v367_v0  ;;  %v445_v9 = vmul.f32 %v10412_v56, %v6228_v34  ;;  %10448 = vst [vmem:[#allocation59_spill] sm:$0xff] %v6782_v36  ;;  %v10450_v0 = vld [vmem:[#allocation13_spill] sm:$0xff] }
  0xe7   :  { %v372_v24 = vadd.f32 %v6608_v59, %v368_v20  ;;  %v446_v17 = vmul.f32 %v6782_v36, %v6228_v34  ;;  %v431_v7 = vadd.f32 %v429_v43, %v427_v12  ;;  %v449_v2 = vmul.f32 %v10415_v53, %v6233_v45  ;;  %v6791_v59 = vld [vmem:[%s9803_s0 + $0x168] sm:$0xff]  ;;  %v6809_v12 = vld [vmem:[%s9803_s0 + $0x198] sm:$0xff] }
  0xe8   :  { %v432_v50 = vadd.f32 %v430_v37, %v428_v22  ;;  %10449 = vst [vmem:[#allocation60_spill] sm:$0xff] %v6791_v59  ;;  %v450_v49 = vmul.f32 %v6791_v59, %v6233_v45  ;;  %v453_v20 = vmul.f32 %v10450_v0, %v6280_v47  ;;  %v6800_v34 = vld [vmem:[%s9803_s0 + $0x188] sm:$0xff]  ;;  %v457_v37 = vmul.f32 %v10427_v33, %v10408_v57 }
  0xe9   :  { %10451 = vst [vmem:[#allocation13_spill] sm:$0xff] %v6800_v34  ;;  %v454_v43 = vmul.f32 %v6800_v34, %v6280_v47  ;;  %v458_v22 = vmul.f32 %v6809_v12, %v10408_v57  ;;  %v435_v0 = vadd.f32 %v433_v25, %v431_v7  ;;  %v10453_v59 = vld [vmem:[#allocation34_spill] sm:$0xff]  ;;  %v375_v34 = vadd.f32 %v6628_v32, %v371_v3  ;;  %v10454_v47 = vld [vmem:[#allocation21_spill] sm:$0xff]  ;;  %v10455_v3 = vld [vmem:[#allocation40_spill] sm:$0xff] }
  0xea   :  { %10452 = vst [vmem:[#allocation61_spill] sm:$0xff] %v6809_v12  ;;  %v436_v45 = vadd.f32 %v434_v10, %v432_v50  ;;  %v461_v53 = vmul.f32 %v10431_v19, %v10453_v59  ;;  %v462_v36 = vmul.f32 %v6650_v6, %v10453_v59  ;;  %v376_v33 = vadd.f32 %v6632_v54, %v372_v24  ;;  %v4412_v32 = vld [vmem:[%s9803_s0 + $0x1e0] sm:$0xff]  ;;  %v10463_v19 = vld [vmem:[#allocation55_spill] sm:$0xff] }
  0xeb   :  { %v6821_v56 = vmul.f32 %v6447_v27, %v10454_v47  ;;  %v6825_v38 = vmul.f32 %v6672_v30, %v10454_v47  ;;  %v439_v25 = vadd.f32 %v437_v35, %v435_v0  ;;  %v6829_v7 = vmul.f32 %v10438_v60, %v10417_v46  ;;  %v6848_v35 = vld [vmem:[%s9803_s0 + $0x1f0] sm:$0xff]  ;;  %v10458_v0 = vld [vmem:[#allocation32_spill] sm:$0xff] }
  0xec   :  { %v440_v10 = vadd.f32 %v438_v13, %v436_v45  ;;  %v6833_v50 = vmul.f32 %v6696_v61, %v10417_v46  ;;  %v6839_v54 = vmul.f32 %v4412_v32, %v10426_v55  ;;  %v6843_v24 = vmul.f32 %v10455_v3, %v10426_v55  ;;  %10456 = vst [vmem:[#allocation40_spill] sm:$0xff] %v6848_v35  ;;  %v10457_v13 = vld [vmem:[#allocation43_spill] sm:$0xff]  ;;  %v10459_v32 = vld [vmem:[#allocation52_spill] sm:$0xff]  ;;  %v10461_v3 = vld [vmem:[#allocation50_spill] sm:$0xff] }
  0xed   :  { %v6852_v45 = vmul.f32 %v6848_v35, %v10430_v42  ;;  %v495_v46 = vmul.f32 %v10458_v0, %v10457_v13  ;;  %v443_v61 = vadd.f32 %v441_v31, %v439_v25  ;;  %v496_v47 = vmul.f32 %v10459_v32, %v10457_v13  ;;  %v10460_v30 = vld [vmem:[#allocation44_spill] sm:$0xff]  ;;  %v10462_v35 = vld [vmem:[#allocation11_spill] sm:$0xff] }
  0xee   :  { %v444_v60 = vadd.f32 %v442_v44, %v440_v10  ;;  %v497_v55 = vmul.f32 %v10461_v3, %v10460_v30  ;;  %v379_v27 = vadd.f32 %v6645_v4, %v375_v34  ;;  %v380_v59 = vadd.f32 %v6654_v8, %v376_v33  ;;  %v10464_v44 = vld [vmem:[#allocation20_spill] sm:$0xff]  ;;  %v6875_v33 = vld [vmem:[%s9803_s0 + $0x200] sm:$0xff]  ;;  %v10467_v4 = vld [vmem:[#allocation6_spill] sm:$0xff] }
  0xef   :  { %v498_v6 = vmul.f32 %v6613_v15, %v10460_v30  ;;  %v501_v57 = vmul.f32 %v10463_v19, %v10462_v35  ;;  %v447_v12 = vadd.f32 %v445_v9, %v443_v61  ;;  %v502_v25 = vmul.f32 %v10464_v44, %v10462_v35  ;;  %v10465_v10 = vld [vmem:[#allocation28_spill] sm:$0xff]  ;;  %10466 = vst [vmem:[#allocation43_spill] sm:$0xff] %v6875_v33  ;;  %v10468_v30 = vld [vmem:[#allocation22_spill] sm:$0xff] }
  0xf0   :  { %v448_v0 = vadd.f32 %v446_v17, %v444_v60  ;;  %v499_v31 = vadd.f32 %v497_v55, %v495_v46  ;;  %v6870_v13 = vmul.f32 %v10465_v10, %v10430_v42  ;;  %v6879_v34 = vmul.f32 %v6875_v33, %v6380_v11  ;;  %v10469_v17 = vld [vmem:[#allocation46_spill] sm:$0xff]  ;;  %v10470_v10 = vld [vmem:[#allocation45_spill] sm:$0xff] }
  0xf1   :  { %v500_v19 = vadd.f32 %v498_v6, %v496_v47  ;;  %v505_v60 = vmul.f32 %v6161_v58, %v10467_v4  ;;  %v451_v46 = vadd.f32 %v449_v2, %v447_v12  ;;  %v506_v61 = vmul.f32 %v10468_v30, %v10467_v4  ;;  %v10471_v44 = vld [vmem:[#allocation42_spill] sm:$0xff]  ;;  %v6892_v58 = vld [vmem:[%s9803_s0 + $0xb8] sm:$0xff] }
  0xf2   :  { %v452_v55 = vadd.f32 %v450_v49, %v448_v0  ;;  %v503_v8 = vadd.f32 %v501_v57, %v499_v31  ;;  %v383_v9 = vadd.f32 %v6667_v26, %v379_v27  ;;  %v384_v35 = vadd.f32 %v10469_v17, %v380_v59  ;;  %v10472_v57 = vld [vmem:[#allocation41_spill] sm:$0xff]  ;;  %v10473_v6 = vld [vmem:[#allocation12_spill] sm:$0xff]  ;;  %v10474_v31 = vld [vmem:[#allocation35_spill] sm:$0xff] }
  0xf3   :  { %v504_v3 = vadd.f32 %v502_v25, %v500_v19  ;;  %v509_v15 = vmul.f32 %v10471_v44, %v10470_v10  ;;  %v455_v32 = vadd.f32 %v453_v20, %v451_v46  ;;  %v510_v2 = vmul.f32 %v6892_v58, %v10470_v10  ;;  %v10475_v25 = vld [vmem:[#allocation56_spill] sm:$0xff]  ;;  %v10477_v17 = vld [vmem:[#allocation17_spill] sm:$0xff] }
  0xf4   :  { %v456_v33 = vadd.f32 %v454_v43, %v452_v55  ;;  %v507_v47 = vadd.f32 %v505_v60, %v503_v8  ;;  %v482_v26 = vmul.f32 %v10472_v57, %v6380_v11  ;;  %v513_v59 = vmul.f32 %v6215_v16, %v10473_v6 }
  0xf5   :  { %v508_v27 = vadd.f32 %v506_v61, %v504_v3  ;;  %v514_v49 = vmul.f32 %v6683_v29, %v10473_v6  ;;  %v459_v20 = vadd.f32 %v457_v37, %v455_v32  ;;  %v517_v0 = vmul.f32 %v6240_v23, %v10397_v5  ;;  %v10476_v23 = vld [vmem:[#allocation23_spill] sm:$0xff]  ;;  %v6965_v6 = vld [vmem:[%s9803_s0 + $0x118] sm:$0xff] }
  0xf6   :  { %v460_v43 = vadd.f32 %v458_v22, %v456_v33  ;;  %v511_v12 = vadd.f32 %v509_v15, %v507_v47  ;;  %v387_v44 = vadd.f32 %v10474_v31, %v383_v9  ;;  %v388_v19 = vadd.f32 %v10475_v25, %v384_v35  ;;  %v6913_v15 = vld [vmem:[%s9803_s0 + $0x210] sm:$0xff]  ;;  %v6920_v22 = vld [vmem:[%s9803_s0 + $0x218] sm:$0xff]  ;;  %10481 = vst [vmem:[#allocation32_spill] sm:$0xff] %v6965_v6 }
  0xf7   :  { %v512_v4 = vadd.f32 %v510_v2, %v508_v27  ;;  %v518_v60 = vmul.f32 %v6707_v14, %v10397_v5  ;;  %v463_v46 = vadd.f32 %v461_v53, %v459_v20  ;;  %v521_v8 = vmul.f32 %v6249_v52, %v6073_v41  ;;  %v10479_v2 = vld [vmem:[#allocation47_spill] sm:$0xff] }
  0xf8   :  { %v464_v55 = vadd.f32 %v462_v36, %v460_v43  ;;  %v515_v16 = vadd.f32 %v513_v59, %v511_v12  ;;  %v485_v37 = vmul.f32 %v6913_v15, %v10476_v23  ;;  %v6924_v5 = vmul.f32 %v6920_v22, %v10476_v23 }
  0xf9   :  { %v516_v53 = vadd.f32 %v514_v49, %v512_v4  ;;  %v522_v52 = vmul.f32 %v6731_v18, %v6073_v41  ;;  %v467_v36 = vadd.f32 %v6821_v56, %v463_v46  ;;  %v525_v61 = vmul.f32 %v6261_v1, %v6094_v48  ;;  %v6947_v1 = vld [vmem:[%s9803_s0 + $0x220] sm:$0xff] }
  0xfa   :  { %v468_v32 = vadd.f32 %v6825_v38, %v464_v55  ;;  %v519_v33 = vadd.f32 %v517_v0, %v515_v16  ;;  %v6933_v9 = vadd.f32 %v6720_v51, %v387_v44  ;;  %v6936_v35 = vadd.f32 %v10477_v17, %v388_v19  ;;  %v10478_v38 = vld [vmem:[#allocation24_spill] sm:$0xff]  ;;  %v10480_v51 = vld [vmem:[#allocation31_spill] sm:$0xff]  ;;  %v10482_v0 = vld [vmem:[#allocation18_spill] sm:$0xff] }
  0xfb   :  { %v520_v3 = vadd.f32 %v518_v60, %v516_v53  ;;  %v526_v10 = vmul.f32 %v6742_v63, %v6094_v48  ;;  %v471_v41 = vadd.f32 %v6829_v7, %v467_v36  ;;  %v529_v57 = vmul.f32 %v10479_v2, %v10478_v38  ;;  %v6956_v48 = vld [vmem:[%s9803_s0 + $0x228] sm:$0xff]  ;;  %v10486_v53 = vld [vmem:[#allocation19_spill] sm:$0xff]  ;;  %v10490_v17 = vld [vmem:[#allocation60_spill] sm:$0xff] }
  0xfc   :  { %v472_v56 = vadd.f32 %v6833_v50, %v468_v32  ;;  %v523_v47 = vadd.f32 %v521_v8, %v519_v33  ;;  %v6951_v27 = vmul.f32 %v6947_v1, %v10480_v51  ;;  %v6960_v7 = vmul.f32 %v6956_v48, %v10480_v51  ;;  %v10483_v44 = vld [vmem:[#allocation54_spill] sm:$0xff]  ;;  %v10485_v8 = vld [vmem:[#allocation8_spill] sm:$0xff]  ;;  %v10487_v36 = vld [vmem:[#allocation59_spill] sm:$0xff] }
  0xfd   :  { %v524_v50 = vadd.f32 %v522_v52, %v520_v3  ;;  %v530_v59 = vmul.f32 %v6965_v6, %v10478_v38  ;;  %v475_v49 = vadd.f32 %v6839_v54, %v471_v41  ;;  %v533_v12 = vmul.f32 %v6326_v62, %v6178_v21  ;;  %v10484_v62 = vld [vmem:[#allocation58_spill] sm:$0xff]  ;;  %v10492_v41 = vld [vmem:[#allocation39_spill] sm:$0xff]  ;;  %v10494_v2 = vld [vmem:[#allocation37_spill] sm:$0xff] }
  0xfe   :  { %v476_v20 = vadd.f32 %v6843_v24, %v472_v56  ;;  %v527_v43 = vadd.f32 %v525_v61, %v523_v47  ;;  %v534_v4 = vmul.f32 %v6762_v40, %v6178_v21  ;;  %v537_v24 = vmul.f32 %v10409_v28, %v6199_v39  ;;  %v10489_v61 = vld [vmem:[#allocation29_spill] sm:$0xff]  ;;  %v7001_v47 = vld [vmem:[%s9803_s0 + $0x178] sm:$0xff] }
  0xff   :  { %v528_v19 = vadd.f32 %v526_v10, %v524_v50  ;;  %v479_v60 = vadd.f32 %v6852_v45, %v475_v49  ;;  %v538_v16 = vmul.f32 %v10484_v62, %v6199_v39  ;;  %v541_v52 = vmul.f32 %v10486_v53, %v10485_v8  ;;  %v10488_v45 = vld [vmem:[#allocation9_spill] sm:$0xff]  ;;  %10493 = vst [vmem:[#allocation44_spill] sm:$0xff] %v7001_v47  ;;  %v7255_v6 = vld [vmem:[%s9803_s0 + $0x38] sm:$0xff] }
 0x100   :  { %v480_v54 = vadd.f32 %v6870_v13, %v476_v20  ;;  %v531_v46 = vadd.f32 %v529_v57, %v527_v43  ;;  %v542_v32 = vmul.f32 %v10487_v36, %v10485_v8  ;;  %v545_v13 = vmul.f32 %v10489_v61, %v10488_v45  ;;  %v10491_v39 = vld [vmem:[#allocation53_spill] sm:$0xff]  ;;  %v10495_v57 = vld [vmem:[#allocation10_spill] sm:$0xff]  ;;  %v10498_v20 = vld [vmem:[#allocation27_spill] sm:$0xff] }
 0x101   :  { %v532_v55 = vadd.f32 %v530_v59, %v528_v19  ;;  %v483_v21 = vadd.f32 %v6879_v34, %v479_v60  ;;  %v546_v3 = vmul.f32 %v10490_v17, %v10488_v45  ;;  %v549_v56 = vmul.f32 %v10492_v41, %v10491_v39  ;;  %v10496_v59 = vld [vmem:[#allocation61_spill] sm:$0xff]  ;;  %v10499_v19 = vld [vmem:[#allocation36_spill] sm:$0xff]  ;;  %v10500_v60 = vld [vmem:[#allocation34_spill] sm:$0xff] }
 0x102   :  { %v535_v33 = vadd.f32 %v533_v12, %v531_v46  ;;  %v484_v28 = vadd.f32 %v482_v26, %v480_v54  ;;  %v550_v34 = vmul.f32 %v7001_v47, %v10491_v39  ;;  %v553_v50 = vmul.f32 %v10495_v57, %v10494_v2  ;;  %v10497_v26 = vld [vmem:[#allocation25_spill] sm:$0xff]  ;;  %v10501_v54 = vld [vmem:[#allocation30_spill] sm:$0xff] }
 0x103   :  { %v536_v10 = vadd.f32 %v534_v4, %v532_v55  ;;  %v554_v49 = vmul.f32 %v10496_v59, %v10494_v2  ;;  %v7011_v43 = vmul.f32 %v10498_v20, %v10497_v26  ;;  %v7017_v4 = vmul.f32 %v10499_v19, %v10497_v26  ;;  %v10504_v45 = vld [vmem:[#allocation33_spill] sm:$0xff]  ;;  %v10506_v2 = vld [vmem:[#allocation26_spill] sm:$0xff] }
 0x104   :  { %v539_v38 = vadd.f32 %v537_v24, %v535_v33  ;;  %v7021_v46 = vmul.f32 %v10501_v54, %v10500_v60  ;;  %v10502_v24 = vld [vmem:[#allocation5_spill] sm:$0xff]  ;;  %v487_v8 = vadd.f32 %v485_v37, %v483_v21  ;;  %v488_v39 = vadd.f32 %v6924_v5, %v484_v28  ;;  %v4422_v37 = vld [vmem:[%s9803_s0 + $0x1d8] sm:$0xff]  ;;  %v3782_v5 = vld [vmem:[%s9805_s2 + $0x70] sm:$0xf0] }
 0x105   :  { %v540_v12 = vadd.f32 %v538_v16, %v536_v10  ;;  %v7025_v55 = vmul.f32 %v10502_v24, %v10500_v60  ;;  %v10503_v33 = vld [vmem:[#allocation21_spill] sm:$0xff]  ;;  %v10505_v16 = vld [vmem:[#allocation51_spill] sm:$0xff] }
 0x106   :  { %v543_v53 = vadd.f32 %v541_v52, %v539_v38  ;;  %v7031_v61 = vmul.f32 %v10504_v45, %v10503_v33  ;;  %v7035_v10 = vmul.f32 %v10505_v16, %v10503_v33  ;;  %v10507_v57 = vld [vmem:[#allocation57_spill] sm:$0xff]  ;;  %v7048_v52 = vmul.f32 %v4422_v37, %v10506_v2  ;;  %v10508_v28 = vld [vmem:[#allocation7_spill] sm:$0xff]  ;;  %v10509_v38 = vld [vmem:[#allocation40_spill] sm:$0xff] }
 0x107   :  { %v544_v41 = vadd.f32 %v542_v32, %v540_v12  ;;  %v7042_v26 = vmul.f32 %v10507_v57, %v10506_v2  ;;  %v4219_v21 = vld [vmem:[%s9805_s2 + $0x64] sm:$0xf]  ;;  %v7060_v20 = vmul.f32 %v10509_v38, %v10508_v28  ;;  %v4423_v12 = vld [vmem:[%s9803_s0 + $0x1f8] sm:$0xff]  ;;  %v10510_v60 = vld [vmem:[#allocation43_spill] sm:$0xff]  ;;  %v7082_v33 = vmul.f32 %v6913_v15, %v6380_v11 }
 0x108   :  { %v547_v32 = vadd.f32 %v545_v13, %v543_v53  ;;  %v7066_v19 = vmul.f32 %v4423_v12, %v10508_v28  ;;  %v7070_v54 = vmul.f32 %v10510_v60, %v10430_v42  ;;  %v4424_v13 = vld [vmem:[%s9803_s0 + $0x208] sm:$0xff]  ;;  %v3785_v45 = vor.u32 %v4219_v21, %v3782_v5  ;;  %v3766_v15 = vld [vmem:[%s9805_s2 + $0x50] sm:$0xf0]  ;;  %v3610_v21 = vld [vmem:[%s9805_s2 + $0x158] sm:$0xf0] }
 0x109   :  { %v548_v24 = vadd.f32 %v546_v3, %v544_v41  ;;  %v7078_v53 = vmul.f32 %v4424_v13, %v10430_v42  ;;  %v4252_v16 = vld [vmem:[%s9805_s2 + $0x16c] sm:$0xf]  ;;  %v3626_v3 = vld [vmem:[%s9805_s2 + $0x178] sm:$0xf0]  ;;  %v4215_v41 = vld [vmem:[%s9805_s2 + $0x44] sm:$0xf]  ;;  %v7094_v42 = vadd.f32 %v6951_v27, %v487_v8  ;;  %v7106_v5 = vstv %s6994_s20 }
 0x10a   :  { %v551_v2 = vadd.f32 %v549_v56, %v547_v32  ;;  %v3629_v57 = vor.u32 %v4252_v16, %v3626_v3  ;;  %v4248_v37 = vld [vmem:[%s9805_s2 + $0x14c] sm:$0xf]  ;;  %10511 = vst [vmem:[#allocation50_spill] sm:$0xff] %v7106_v5  ;;  %v7109_v28 = vadd.f32 %v6960_v7, %v488_v39  ;;  %2556 = vmatpush.bf16.msra.mxu0 %v3785_v45  ;;  %v4211_v32 = vld [vmem:[%s9805_s2 + $0x24] sm:$0xf]  ;;  %v7134_v13 = vstv %s7013_s16  ;;  %s7396_s20 = sld [smem:[#allocation2 + $0x43]] }
 0x10b   :  { %v552_v27 = vadd.f32 %v550_v34, %v548_v24  ;;  %v3769_v56 = vor.u32 %v4215_v41, %v3766_v15  ;;  %v3613_v8 = vor.u32 %v4248_v37, %v3610_v21  ;;  %v3750_v12 = vld [vmem:[%s9805_s2 + $0x30] sm:$0xf0]  ;;  %v3860_v7 = vld [vmem:[%s9805_s2 + $0x100] sm:$0xf]  ;;  %v4241_v34 = vld [vmem:[%s9805_s2 + $0x10c] sm:$0xf0]  ;;  %v7138_v16 = vmul.f32 %v6920_v22, %v6380_v11 }
 0x10c   :  { %v555_v38 = vadd.f32 %v553_v50, %v551_v2  ;;  %2322 = vmatpush.bf16.msra.mxu3 %v3629_v57  ;;  %v4425_v39 = vld [vmem:[%s9803_s0] sm:$0xff]  ;;  %v4426_v50 = vld [vmem:[%s9803_s0 + $0x8] sm:$0xff]  ;;  %10512 = vst [vmem:[#allocation11_spill] sm:$0xff] %v7134_v13  ;;  %v3594_v41 = vld [vmem:[%s9805_s2 + $0x138] sm:$0xf0]  ;;  %v3861_v2 = vor.u32 %v4241_v34, %v3860_v7  ;;  %v7159_v15 = vmul.f32 %v6947_v1, %v10476_v23  ;;  %s8464_s16 = sld [smem:[#allocation2 + $0x4f]] }
 0x10d   :  { %v1089_v60 = vmul.f32 %v4425_v39, %v7106_v5  ;;  %v1090_v24 = vmul.f32 %v4426_v50, %v7106_v5  ;;  %v556_v45 = vadd.f32 %v554_v49, %v552_v27  ;;  %v4244_v3 = vld [vmem:[%s9805_s2 + $0x12c] sm:$0xf]  ;;  %v3852_v57 = vld [vmem:[%s9805_s2 + $0xe8] sm:$0xf]  ;;  %v7152_v49 = vld [vmem:[%s9803_s0 + $0x10] sm:$0xff]  ;;  %v3753_v34 = vor.u32 %v4211_v32, %v3750_v12 }
 0x10e   :  { %v1092_v11 = vmul.f32 %v7152_v49, %v7134_v13  ;;  %v559_v22 = vadd.f32 %v7011_v43, %v555_v38  ;;  %v4238_v37 = vld [vmem:[%s9805_s2 + $0xf4] sm:$0xf0]  ;;  %v4239_v21 = vld [vmem:[%s9805_s2 + $0x104] sm:$0xf]  ;;  %v3862_v27 = vld [vmem:[%s9805_s2 + $0x110] sm:$0xf0]  ;;  %v7178_v38 = vstv %s7027_s28  ;;  %2557 = vmatpush.bf16.msra.mxu0 %v3769_v56  ;;  %2546 = vmatpush.bf16.msra.mxu1 %v3861_v2  ;;  %v3597_v31 = vor.u32 %v4244_v3, %v3594_v41 }
 0x10f   :  { %v7173_v43 = vld [vmem:[%s9803_s0 + $0x18] sm:$0xff]  ;;  %10513 = vst [vmem:[#allocation55_spill] sm:$0xff] %v7178_v38  ;;  %v560_v7 = vadd.f32 %v7017_v4, %v556_v45  ;;  %v3865_v39 = vor.u32 %v4239_v21, %v3862_v27  ;;  %v7184_v50 = vstv %s7037_s26  ;;  %v4207_v47 = vld [vmem:[%s9805_s2 + $0x4] sm:$0xf]  ;;  %v3734_v4 = vld [vmem:[%s9805_s2 + $0x10] sm:$0xf0]  ;;  %v7196_v45 = vmul.f32 %v6956_v48, %v10476_v23 }
 0x110   :  { %v1093_v1 = vmul.f32 %v7173_v43, %v7134_v13  ;;  %10514 = vst [vmem:[#allocation28_spill] sm:$0xff] %v7184_v50  ;;  %v563_v25 = vadd.f32 %v7021_v46, %v559_v22  ;;  %2323 = vmatpush.bf16.msra.mxu3 %v3613_v8  ;;  %v1094_v56 = vadd.f32 %v1092_v11, %v1089_v60  ;;  %v3836_v46 = vld [vmem:[%s9805_s2 + $0xc8] sm:$0xf]  ;;  %v4234_v8 = vld [vmem:[%s9805_s2 + $0xd4] sm:$0xf0]  ;;  %v7207_v60 = vld [vmem:[%s9803_s0 + $0x20] sm:$0xff] }
 0x111   :  { %v564_v12 = vadd.f32 %v7025_v55, %v560_v7  ;;  %v3853_v2 = vor.u32 %v4238_v37, %v3852_v57  ;;  %v1097_v55 = vmul.f32 %v7207_v60, %v7178_v38  ;;  %v4430_v48 = vld [vmem:[%s9803_s0 + $0x230] sm:$0xff]  ;;  %v7221_v3 = vld [vmem:[%s9805_s2 + $0xa8] sm:$0xf]  ;;  %v7226_v41 = vld [vmem:[%s9805_s2 + $0xb4] sm:$0xf0]  ;;  %v10515_v22 = vmax.f32 %v10482_v0, %v6933_v9  ;;  %s7268_s26 = sld [smem:[#allocation2 + $0x64]] }
 0x112   :  { %v1095_v32 = vadd.f32 %v1093_v1, %v1090_v24  ;;  %2572 = vmatpush.bf16.msrb.mxu1 %v3865_v39  ;;  %v567_v23 = vadd.f32 %v7031_v61, %v563_v25  ;;  %v7216_v24 = vmul.f32 %v4430_v48, %v10480_v51  ;;  %v7231_v25 = vld [vmem:[%s9803_s0 + $0x28] sm:$0xff]  ;;  %v7238_v57 = vld [vmem:[%s9803_s0 + $0x30] sm:$0xff]  ;;  %2558 = vmatpush.bf16.msra.mxu0 %v3753_v34  ;;  %s7346_s28 = sld [smem:[#allocation2 + $0x3e]] }
 0x113   :  { %v1098_v61 = vmul.f32 %v7231_v25, %v7178_v38  ;;  %v1102_v11 = vmul.f32 %v7238_v57, %v7184_v50  ;;  %v7246_v37 = vmax.f32 %v10515_v22, %v7094_v42  ;;  %v568_v21 = vadd.f32 %v7035_v10, %v564_v12 }
 0x114   :  { %v3737_v27 = vor.u32 %v4207_v47, %v3734_v4  ;;  %v1099_v1 = vadd.f32 %v1097_v55, %v1094_v56  ;;  %v571_v7 = vadd.f32 %v7042_v26, %v567_v23  ;;  %2324 = vmatpush.bf16.msra.mxu3 %v3597_v31  ;;  %v3837_v39 = vor.u32 %v4234_v8, %v3836_v46  ;;  %v7280_v4 = vld [vmem:[%s9803_s0 + $0x48] sm:$0xff] }
 0x115   :  { %v1100_v48 = vadd.f32 %v1098_v61, %v1095_v32  ;;  %v1103_v9 = vmul.f32 %v7255_v6, %v7184_v50  ;;  %v572_v0 = vadd.f32 %v7048_v52, %v568_v21  ;;  %v3821_v31 = vor.u32 %v7226_v41, %v7221_v3  ;;  %v7273_v52 = vld [vmem:[%s9803_s0 + $0x40] sm:$0xff]  ;;  %v10516_v32 = vld [vmem:[#allocation14_spill] sm:$0xff]  ;;  %v10517_v3 = vld [vmem:[#allocation48_spill] sm:$0xff] }
 0x116   :  { %v1104_v47 = vadd.f32 %v1102_v11, %v1099_v1  ;;  %v7265_v10 = vstv %s7056_s15  ;;  %v575_v26 = vadd.f32 %v7060_v20, %v571_v7  ;;  %2559 = vmatpush.bf16.msra.mxu0 %v3737_v27  ;;  %v7287_v12 = vstv %s7072_s25  ;;  %s7302_s25 = sld [smem:[#allocation2 + $0x3c]]  ;;  %v10518_v11 = vld [vmem:[#allocation49_spill] sm:$0xff]  ;;  %v4437_v7 = vld [vmem:[%s9803_s0 + $0x238] sm:$0xff] }
 0x117   :  { %v1105_v42 = vadd.f32 %v1103_v9, %v1100_v48  ;;  %v1107_v34 = vmul.f32 %v7273_v52, %v7265_v10  ;;  %v1108_v56 = vmul.f32 %v7280_v4, %v7265_v10  ;;  %v576_v20 = vadd.f32 %v7066_v19, %v572_v0  ;;  %2325 = vmatmul.bf16.vlgmr.msra.gmra.mxu3 %v10516_v32  ;;  %v3804_v19 = vld [vmem:[%s9805_s2 + $0x88] sm:$0xf]  ;;  %v4226_v48 = vld [vmem:[%s9805_s2 + $0x94] sm:$0xf0]  ;;  %v4240_v9 = vld [vmem:[%s9805_s2 + $0x10c] sm:$0xf] }
 0x118   :  { %2578 = vmatpush.bf16.msrb.mxu3 %v3853_v2  ;;  %v7290_v2 = vstv %s7114_s14  ;;  %v7293_v46 = vstv %s7181_s29  ;;  %v579_v8 = vadd.f32 %v7070_v54, %v575_v26  ;;  %v1112_v41 = vmul.f32 %v10517_v3, %v7287_v12  ;;  %v7309_v54 = vld [vmem:[%s9803_s0 + $0x70] sm:$0xff]  ;;  %v3870_v0 = vld [vmem:[%s9805_s2 + $0x118] sm:$0xf0]  ;;  %s7365_s15 = sld [smem:[#allocation2 + $0x40]] }
 0x119   :  { %v1109_v55 = vadd.f32 %v1107_v34, %v1104_v47  ;;  %v1110_v23 = vadd.f32 %v1108_v56, %v1105_v42  ;;  %v580_v61 = vadd.f32 %v7078_v53, %v576_v20  ;;  %v1113_v22 = vmul.f32 %v10518_v11, %v7287_v12  ;;  %10519 = vst [vmem:[#allocation6_spill] sm:$0xff] %v7309_v54  ;;  %v10520_v53 = vld [vmem:[#allocation52_spill] sm:$0xff]  ;;  %v7332_v47 = vld [vmem:[%s9803_s0 + $0x80] sm:$0xff]  ;;  %v10521_v56 = vld [vmem:[#allocation15_spill] sm:$0xff]  ;;  %s8658_s14 = sld [smem:[#allocation2 + $0x54]] }
 0x11a   :  { %v1117_v21 = vmul.f32 %v7309_v54, %v7290_v2  ;;  %v1118_v27 = vmul.f32 %v10520_v53, %v7290_v2  ;;  %v583_v1 = vadd.f32 %v7082_v33, %v579_v8  ;;  %v3873_v42 = vor.u32 %v4240_v9, %v3870_v0  ;;  %s8800_s29 = sld [smem:[#allocation2 + $0x5b]] }
 0x11b   :  { %v1114_v33 = vadd.f32 %v1112_v41, %v1109_v55  ;;  %v584_v26 = vadd.f32 %v7138_v16, %v580_v61  ;;  %v1115_v34 = vadd.f32 %v1113_v22, %v1110_v23  ;;  %v1123_v20 = vmul.f32 %v10521_v56, %v7293_v46  ;;  %v4218_v56 = vld [vmem:[%s9805_s2 + $0x54] sm:$0xf0] }
 0x11c   :  { %2579 = vmatpush.bf16.msrb.mxu3 %v3837_v39  ;;  %v590_v39 = vmul.f32 %v4437_v7, %v10480_v51  ;;  %v1122_v51 = vmul.f32 %v7332_v47, %v7293_v46  ;;  %v10522_v32 = vmax.f32 %v10483_v44, %v6936_v35  ;;  %v587_v55 = vadd.f32 %v7159_v15, %v583_v1  ;;  %v4222_v15 = vld [vmem:[%s9805_s2 + $0x74] sm:$0xf0] }
 0x11d   :  { %v1119_v3 = vadd.f32 %v1117_v21, %v1114_v33  ;;  %v7349_v16 = vstv %s7250_s23  ;;  %v588_v41 = vadd.f32 %v7196_v45, %v584_v26  ;;  %v3805_v61 = vor.u32 %v4226_v48, %v3804_v19  ;;  %2624 = vmatpush.bf16.msrb.mxu0 %v3873_v42  ;;  %v3992_v19 = vld [vmem:[%s9805_s2 + $0x320] sm:$0xf]  ;;  %v7378_v21 = vld [vmem:[%s9803_s0 + $0x90] sm:$0xff]  ;;  %v7401_v42 = vld [vmem:[%s9805_s2 + $0xec] sm:$0xf]  ;;  %s7510_s23 = sld [smem:[#allocation2 + $0x46]] }
 0x11e   :  { %v494_v8 = vmax.f32 %v10522_v32, %v7109_v28  ;;  %10523 = vst [vmem:[#allocation22_spill] sm:$0xff] %v7349_v16  ;;  %v1120_v23 = vadd.f32 %v1118_v27, %v1115_v34  ;;  %v7355_v11 = vstv %s7262_s21  ;;  %v591_v35 = vadd.f32 %v7216_v24, %v587_v55  ;;  %v3788_v28 = vld [vmem:[%s9805_s2 + $0x68] sm:$0xf]  ;;  %v4309_v24 = vld [vmem:[%s9805_s2 + $0x32c] sm:$0xf0]  ;;  %v10525_v27 = vld [vmem:[#allocation20_spill] sm:$0xff] }
 0x11f   :  { %10524 = vst [vmem:[#allocation46_spill] sm:$0xff] %v7355_v11  ;;  %v596_v44 = vstv %s7268_s26  ;;  %v1124_v45 = vadd.f32 %v1122_v51, %v1119_v3  ;;  %s7373_s26 = sld [smem:[#allocation2 + $0x41]]  ;;  %v1127_v53 = vmul.f32 %v7378_v21, %v7349_v16  ;;  %v1128_v1 = vmul.f32 %v10525_v27, %v7349_v16  ;;  %v7390_v48 = vld [vmem:[%s9803_s0 + $0xa0] sm:$0xff]  ;;  %v7406_v34 = vld [vmem:[%s9805_s2 + $0xf8] sm:$0xf0] }
 0x120   :  { %2580 = vmatpush.bf16.msrb.mxu3 %v3821_v31  ;;  %v592_v31 = vadd.f32 %v590_v39, %v588_v41  ;;  %v1125_v22 = vadd.f32 %v1123_v20, %v1120_v23  ;;  %v593_v7 = vmax.f32 %v7246_v37, %v591_v35  ;;  %v3993_v39 = vor.u32 %v4309_v24, %v3992_v19  ;;  %v4307_v55 = vld [vmem:[%s9805_s2 + $0x324] sm:$0xf]  ;;  %v3976_v3 = vld [vmem:[%s9805_s2 + $0x300] sm:$0xf]  ;;  %v4305_v41 = vld [vmem:[%s9805_s2 + $0x30c] sm:$0xf0] }
 0x121   :  { %10526 = vst [vmem:[#allocation45_spill] sm:$0xff] %v7390_v48  ;;  %v1132_v9 = vmul.f32 %v7390_v48, %v7355_v11  ;;  %v1133_v0 = vmul.f32 %v10468_v30, %v7355_v11  ;;  %v3789_v51 = vor.u32 %v4222_v15, %v3788_v28  ;;  %v1129_v37 = vadd.f32 %v1127_v53, %v1124_v45  ;;  %v3772_v30 = vld [vmem:[%s9805_s2 + $0x48] sm:$0xf]  ;;  %v7429_v23 = vld [vmem:[%s9803_s0 + $0xc0] sm:$0xff]  ;;  %v3994_v45 = vld [vmem:[%s9805_s2 + $0x330] sm:$0xf0] }
 0x122   :  { %v594_v33 = vmax.f32 %v494_v8, %v592_v31  ;;  %v597_v26 = vadd.f32 %v596_v44, %v593_v7  ;;  %2851 = vmatpush.bf16.msra.mxu2 %v3993_v39  ;;  %v1130_v20 = vadd.f32 %v1128_v1, %v1125_v22  ;;  %v7415_v32 = vstv %s7302_s25  ;;  %10528 = vst [vmem:[#allocation41_spill] sm:$0xff] %v7429_v23  ;;  %v7441_v22 = vld [vmem:[%s9805_s2 + $0xcc] sm:$0xf]  ;;  %v7446_v1 = vld [vmem:[%s9805_s2 + $0xd8] sm:$0xf0]  ;;  %s7651_s25 = sld [smem:[#allocation2 + $0x48]] }
 0x123   :  { %10527 = vst [vmem:[#allocation42_spill] sm:$0xff] %v7415_v32  ;;  %v1137_v35 = vmul.f32 %v7429_v23, %v7415_v32  ;;  %v3977_v31 = vor.u32 %v4305_v41, %v3976_v3  ;;  %v3773_v53 = vor.u32 %v4218_v56, %v3772_v30  ;;  %v7451_v7 = vld [vmem:[%s9805_s2 + $0x28] sm:$0xf]  ;;  %v7456_v39 = vld [vmem:[%s9805_s2 + $0x34] sm:$0xf0]  ;;  %v3997_v30 = vor.u32 %v4307_v55, %v3994_v45  ;;  %v7488_v55 = vld [vmem:[%s9803_s0 + $0xd0] sm:$0xff] }
 0x124   :  { %2581 = vmatpush.bf16.msrb.mxu3 %v3805_v61  ;;  %v598_v8 = vadd.f32 %v596_v44, %v594_v33  ;;  %v1134_v61 = vadd.f32 %v1132_v9, %v1129_v37  ;;  %v10529_v44 = vld [vmem:[#allocation38_spill] sm:$0xff]  ;;  %vm599_vm3 = vcmp.ge.f32.partialorder %v597_v26, 0.0  ;;  %v601_v15 = vmul.f32 0.01, %v597_v26  ;;  %v3960_v56 = vld [vmem:[%s9805_s2 + $0x2e0] sm:$0xf] }
 0x125   :  { %v1138_v28 = vmul.f32 %v10529_v44, %v7415_v32  ;;  %v1135_v19 = vadd.f32 %v1133_v0, %v1130_v20  ;;  %v7459_v33 = vstv %s7337_s30  ;;  %v4301_v20 = vld [vmem:[%s9805_s2 + $0x2ec] sm:$0xf0]  ;;  %10531 = vst [vmem:[#allocation35_spill] sm:$0xff] %v7488_v55  ;;  %v7501_v44 = vld [vmem:[%s9805_s2 + $0xac] sm:$0xf]  ;;  %v7516_v45 = vstv %s7352_s18  ;;  %s7638_s30 = sld [smem:[#allocation2 + $0x47]] }
 0x126   :  { %vm600_vm4 = vcmp.ge.f32.partialorder %v598_v8, 0.0  ;;  %v602_v24 = vmul.f32 0.01, %v598_v8  ;;  %v603_v27 = vsel %vm599_vm3, %v597_v26, %v601_v15  ;;  %2852 = vmatpush.bf16.msra.mxu2 %v3977_v31  ;;  %v1139_v9 = vadd.f32 %v1137_v35, %v1134_v61  ;;  %10530 = vst [vmem:[#allocation12_spill] sm:$0xff] %v7459_v33  ;;  %v7523_v31 = vld [vmem:[%s9805_s2 + $0x8c] sm:$0xf] }
 0x127   :  { %v1140_v0 = vadd.f32 %v1138_v28, %v1135_v19  ;;  %v3857_v26 = vor.u32 %v7401_v42, %v7406_v34  ;;  %v3978_v42 = vld [vmem:[%s9805_s2 + $0x310] sm:$0xf0]  ;;  %v3961_v34 = vor.u32 %v4301_v20, %v3960_v56  ;;  %v1142_v41 = vmul.f32 %v7488_v55, %v7459_v33  ;;  %v7506_v28 = vld [vmem:[%s9805_s2 + $0xb8] sm:$0xf0]  ;;  %10533 = vst [vmem:[#allocation23_spill] sm:$0xff] %v7516_v45  ;;  %s9237_s18 = sld [smem:[#allocation2 + $0x63]] }
 0x128   :  { %2582 = vmatpush.bf16.msrb.mxu3 %v3789_v51  ;;  %v7461_v51 = vpack.c.bf16 %v603_v27, %v603_v27  ;;  %v604_v37 = vsel %vm600_vm4, %v598_v8, %v602_v24  ;;  %v7478_v8 = vld [vmem:[%s9805_s2 + $0x304] sm:$0xf]  ;;  %v1143_v61 = vmul.f32 %v6683_v29, %v7459_v33  ;;  %v3841_v35 = vor.u32 %v7441_v22, %v7446_v1  ;;  %v7528_v19 = vld [vmem:[%s9805_s2 + $0x98] sm:$0xf0]  ;;  %v3944_v24 = vld [vmem:[%s9805_s2 + $0x2c0] sm:$0xf] }
 0x129   :  { %v7473_v3 = vpack.c.bf16 %v604_v37, %v604_v37  ;;  %v3757_v29 = vor.u32 %v7456_v39, %v7451_v7  ;;  %v7513_v15 = vstv %s7346_s28  ;;  %v1144_v22 = vadd.f32 %v1142_v41, %v1139_v9  ;;  %v7536_v1 = vld [vmem:[%s9803_s0 + $0xe0] sm:$0xff]  ;;  %v3740_v37 = vld [vmem:[%s9805_s2 + $0x8] sm:$0xf]  ;;  %v4210_v9 = vld [vmem:[%s9805_s2 + $0x14] sm:$0xf0]  ;;  %s7773_s28 = sld [smem:[#allocation2 + $0x4a]] }
 0x12a   :  { %2534 = vmatmul.bf16.vlgmr.msrb.gmra.mxu2 %v7461_v51  ;;  %2560 = vmatmul.bf16.vlgmr.msra.gmra.mxu0 %v7461_v51  ;;  %10532 = vst [vmem:[#allocation56_spill] sm:$0xff] %v7513_v15  ;;  %v1145_v27 = vadd.f32 %v1143_v61, %v1140_v0  ;;  %v1147_v7 = vmul.f32 %v7536_v1, %v7513_v15  ;;  %v7541_v39 = vstv %s7365_s15  ;;  %v4297_v0 = vld [vmem:[%s9805_s2 + $0x2cc] sm:$0xf0]  ;;  %v7563_v20 = vstv %s7373_s26  ;;  %v3962_v41 = vld [vmem:[%s9805_s2 + $0x2f0] sm:$0xf0]  ;;  %s8383_s26 = sld [smem:[#allocation2 + $0x4b]] }
 0x12b   :  { %3874 = vmatmul.msk.bf16.vlgmr.msra.gmra.mxu1 %vm2235_vm1, %v7473_v3  ;;  %10534 = vst [vmem:[#allocation17_spill] sm:$0xff] %v7536_v1  ;;  %2877 = vmatpush.bf16.msra.mxu0 %v3997_v30  ;;  %v1148_v56 = vmul.f32 %v6707_v14, %v7513_v15  ;;  %v4299_v14 = vld [vmem:[%s9805_s2 + $0x2e4] sm:$0xf]  ;;  %v3868_v61 = vld [vmem:[%s9805_s2 + $0x108] sm:$0xf]  ;;  %v1153_v23 = vmul.f32 %v6731_v18, %v7516_v45 }
 0x12c   :  { %2583 = vmatpush.bf16.msrb.mxu3 %v3773_v53  ;;  %10535 = vst [vmem:[#allocation24_spill] sm:$0xff] %v7541_v39  ;;  %2604 = vmatpush.bf16.msra.mxu1 %v3857_v26  ;;  %v3981_v53 = vor.u32 %v7478_v8, %v3978_v42  ;;  %v7558_v26 = vld [vmem:[%s9803_s0 + $0xf0] sm:$0xff]  ;;  %v3825_v8 = vor.u32 %v7501_v44, %v7506_v28  ;;  %v7570_v42 = vld [vmem:[%s9805_s2 + $0x6c] sm:$0xf]  ;;  %v3928_v15 = vld [vmem:[%s9805_s2 + $0x2a0] sm:$0xf] }
 0x12d   :  { %10536 = vst [vmem:[#allocation47_spill] sm:$0xff] %v7558_v26  ;;  %v1152_v30 = vmul.f32 %v7558_v26, %v7516_v45  ;;  %2853 = vmatpush.bf16.msra.mxu2 %v3961_v34  ;;  %v3945_v44 = vor.u32 %v4297_v0, %v3944_v24  ;;  %v1149_v28 = vadd.f32 %v1147_v7, %v1144_v22  ;;  %v4242_v26 = vld [vmem:[%s9805_s2 + $0x114] sm:$0xf0]  ;;  %v4293_v1 = vld [vmem:[%s9805_s2 + $0x2ac] sm:$0xf0]  ;;  %v7595_v34 = vld [vmem:[%s9803_s0 + $0x100] sm:$0xff]  ;;  %v7602_v22 = vstv %s7385_s1 }
 0x12e   :  { %10537 = vst [vmem:[#allocation31_spill] sm:$0xff] %v7563_v20  ;;  %v1150_v33 = vadd.f32 %v1148_v56, %v1145_v27  ;;  %v1157_v18 = vmul.f32 %v7595_v34, %v7541_v39  ;;  %v1158_v24 = vmul.f32 %v6742_v63, %v7541_v39  ;;  %v7609_v27 = vld [vmem:[%s9805_s2 + $0x78] sm:$0xf0]  ;;  %v7614_v0 = vld [vmem:[%s9805_s2 + $0x4c] sm:$0xf]  ;;  %v3741_v56 = vor.u32 %v4210_v9, %v3740_v37  ;;  %v7624_v7 = vld [vmem:[%s9803_s0 + $0x120] sm:$0xff] }
 0x12f   :  { %10538 = vst [vmem:[#allocation18_spill] sm:$0xff] %v7595_v34  ;;  %v7619_v63 = vld [vmem:[%s9805_s2 + $0x58] sm:$0xf0]  ;;  %v1154_v39 = vadd.f32 %v1152_v30, %v1149_v28  ;;  %2878 = vmatpush.bf16.msra.mxu0 %v3981_v53  ;;  %v3965_v34 = vor.u32 %v4299_v14, %v3962_v41  ;;  %v7631_v45 = vld [vmem:[%s9805_s2 + $0x2c4] sm:$0xf]  ;;  %v3929_v53 = vor.u32 %v4293_v1, %v3928_v15  ;;  %s8506_s1 = sld [smem:[#allocation2 + $0x50]] }
 0x130   :  { %10539 = vst [vmem:[#allocation54_spill] sm:$0xff] %v7602_v22  ;;  %2584 = vmatpush.bf16.msrb.mxu3 %v3757_v29  ;;  %v1162_v29 = vmul.f32 %v7624_v7, %v7563_v20  ;;  %2605 = vmatpush.bf16.msra.mxu1 %v3841_v35  ;;  %v7636_v37 = vld [vmem:[%s9805_s2 + $0x2d0] sm:$0xf0]  ;;  %v1155_v9 = vadd.f32 %v1153_v23, %v1150_v33  ;;  %v10541_v30 = vld [vmem:[#allocation16_spill] sm:$0xff]  ;;  %v3912_v14 = vld [vmem:[%s9805_s2 + $0x280] sm:$0xf] }
 0x131   :  { %10540 = vst [vmem:[#allocation58_spill] sm:$0xff] %v7624_v7  ;;  %v1163_v28 = vmul.f32 %v10541_v30, %v7563_v20  ;;  %v7643_v7 = vstv %s7396_s20  ;;  %v3869_v35 = vor.u32 %v4242_v26, %v3868_v61  ;;  %2854 = vmatpush.bf16.msra.mxu2 %v3945_v44  ;;  %v4289_v41 = vld [vmem:[%s9805_s2 + $0x28c] sm:$0xf0]  ;;  %v1159_v23 = vadd.f32 %v1157_v18, %v1154_v39  ;;  %v7669_v39 = vld [vmem:[%s9805_s2 + $0x2c] sm:$0xf]  ;;  %s8426_s20 = sld [smem:[#allocation2 + $0x4e]] }
 0x132   :  { %10542 = vst [vmem:[#allocation8_spill] sm:$0xff] %v7643_v7  ;;  %v7656_v33 = vld [vmem:[%s9803_s0 + $0x130] sm:$0xff]  ;;  %v1160_v61 = vadd.f32 %v1158_v24, %v1155_v9  ;;  %v1168_v44 = vmul.f32 %v6762_v40, %v7602_v22  ;;  %v7674_v18 = vld [vmem:[%s9805_s2 + $0x38] sm:$0xf0]  ;;  %v7679_v30 = vld [vmem:[%s9805_s2 + $0xc] sm:$0xf]  ;;  %v3949_v40 = vor.u32 %v7631_v45, %v7636_v37  ;;  %v7691_v26 = vstv %s7471_s8 }
 0x133   :  { %10543 = vst [vmem:[#allocation19_spill] sm:$0xff] %v7656_v33  ;;  %v1167_v15 = vmul.f32 %v7656_v33, %v7602_v22  ;;  %v1164_v24 = vadd.f32 %v1162_v29, %v1159_v23  ;;  %2879 = vmatpush.bf16.msra.mxu0 %v3965_v34  ;;  %v7696_v1 = vld [vmem:[%s9805_s2 + $0x18] sm:$0xf0]  ;;  %v3913_v22 = vor.u32 %v4289_v41, %v3912_v14  ;;  %v4008_v45 = vld [vmem:[%s9805_s2 + $0x340] sm:$0xf] }
 0x134   :  { %2585 = vmatpush.bf16.msrb.mxu3 %v3741_v56  ;;  %v7686_v56 = vld [vmem:[%s9803_s0 + $0x140] sm:$0xff]  ;;  %10545 = vst [vmem:[#allocation9_spill] sm:$0xff] %v7691_v26  ;;  %2606 = vmatpush.bf16.msra.mxu1 %v3825_v8  ;;  %v4313_v29 = vld [vmem:[%s9805_s2 + $0x34c] sm:$0xf0]  ;;  %v1165_v37 = vadd.f32 %v1163_v28, %v1160_v61  ;;  %v1173_v23 = vmul.f32 %v10484_v62, %v7643_v7  ;;  %v7707_v8 = vstv %s7483_s22  ;;  %v3930_v14 = vld [vmem:[%s9805_s2 + $0x2b0] sm:$0xf0] }
 0x135   :  { %10544 = vst [vmem:[#allocation59_spill] sm:$0xff] %v7686_v56  ;;  %v1172_v9 = vmul.f32 %v7686_v56, %v7643_v7  ;;  %v4291_v34 = vld [vmem:[%s9805_s2 + $0x2a4] sm:$0xf]  ;;  %2855 = vmatpush.bf16.msra.mxu2 %v3929_v53  ;;  %v4009_v41 = vor.u32 %v4313_v29, %v4008_v45  ;;  %v1169_v28 = vadd.f32 %v1167_v15, %v1164_v24  ;;  %v7720_v62 = vld [vmem:[%s9803_s0 + $0x150] sm:$0xff]  ;;  %v3896_v15 = vld [vmem:[%s9805_s2 + $0x260] sm:$0xf]  ;;  %v7739_v61 = vstv %s7510_s23 }
 0x136   :  { %10546 = vst [vmem:[#allocation29_spill] sm:$0xff] %v7720_v62  ;;  %v4287_v53 = vld [vmem:[%s9805_s2 + $0x284] sm:$0xf]  ;;  %v4285_v24 = vld [vmem:[%s9805_s2 + $0x26c] sm:$0xf0]  ;;  %v1170_v45 = vadd.f32 %v1168_v44, %v1165_v37  ;;  %v1178_v29 = vmul.f32 %v10487_v36, %v7691_v26  ;;  %v10548_v33 = vor.u32 %v7523_v31, %v7528_v19  ;;  %v3933_v20 = vor.u32 %v4291_v34, %v3930_v14  ;;  %s8696_s22 = sld [smem:[#allocation2 + $0x56]] }
 0x137   :  { %2586 = vmatmul.bf16.vlgmr.msrb.gmra.mxu3 %v7461_v51  ;;  %v3914_v7 = vld [vmem:[%s9805_s2 + $0x290] sm:$0xf0]  ;;  %v7749_v56 = vld [vmem:[%s9805_s2 + $0x264] sm:$0xf]  ;;  %v1174_v36 = vadd.f32 %v1172_v9, %v1169_v28  ;;  %2880 = vmatpush.bf16.msra.mxu0 %v3949_v40  ;;  %v1183_v9 = vmul.f32 %v10490_v17, %v7707_v8  ;;  %v7771_v28 = vstv %s7638_s30  ;;  %v3897_v55 = vor.u32 %v4285_v24, %v3896_v15  ;;  %s8400_s30 = sld [smem:[#allocation2 + $0x4c]] }
 0x138   :  { %2598 = vmatpush.bf16.msra.mxu3 %v3869_v35  ;;  %v1177_v35 = vmul.f32 %v7720_v62, %v7691_v26  ;;  %v7754_v44 = vld [vmem:[%s9805_s2 + $0x270] sm:$0xf0]  ;;  %v7759_v37 = vld [vmem:[%s9803_s0 + $0x160] sm:$0xff]  ;;  %v1211_v26 = vmul.f32 %v7152_v49, %v7106_v5  ;;  %2607 = vmatpush.bf16.msra.mxu1 %v10548_v33  ;;  %v7783_v19 = vstv %s7651_s25  ;;  %v3917_v17 = vor.u32 %v4287_v53, %v3914_v7  ;;  %s8825_s25 = sld [smem:[#allocation2 + $0x5c]] }
 0x139   :  { %10547 = vst [vmem:[#allocation60_spill] sm:$0xff] %v7759_v37  ;;  %v1182_v62 = vmul.f32 %v7759_v37, %v7707_v8  ;;  %2856 = vmatpush.bf16.msra.mxu2 %v3913_v22  ;;  %v7778_v49 = vld [vmem:[%s9803_s0 + $0x180] sm:$0xff]  ;;  %v3901_v22 = vor.u32 %v7749_v56, %v7754_v44  ;;  %v7796_v14 = vld [vmem:[%s9803_s0 + $0x190] sm:$0xff]  ;;  %v1193_v7 = vmul.f32 %v10496_v59, %v7771_v28 }
 0x13a   :  { %v1179_v37 = vadd.f32 %v1177_v35, %v1174_v36  ;;  %10549 = vst [vmem:[#allocation53_spill] sm:$0xff] %v7778_v49  ;;  %v1187_v31 = vmul.f32 %v7778_v49, %v7739_v61  ;;  %3877 = vmatmul.msk.bf16.vlgmr.msrb.gmra.mxu0 %vm2235_vm1, %v7473_v3  ;;  %v10551_v40 = vld [vmem:[#allocation13_spill] sm:$0xff]  ;;  %v1192_v35 = vmul.f32 %v7796_v14, %v7771_v28  ;;  %v7838_v36 = vstv %s7715_s19 }
 0x13b   :  { %10550 = vst [vmem:[#allocation39_spill] sm:$0xff] %v7783_v19  ;;  %3875 = vmatmul.msk.bf16.vlgmr.msrb.gmra.mxu1 %vm2235_vm1, %v7473_v3  ;;  %v1212_v56 = vmul.f32 %v7173_v43, %v7106_v5  ;;  %v10553_v53 = vor.u32 %v7570_v42, %v7609_v27  ;;  %2881 = vmatpush.bf16.msra.mxu0 %v3933_v20  ;;  %v7810_v15 = vld [vmem:[%s9803_s0 + $0x1a0] sm:$0xff] }
 0x13c   :  { %2871 = vmatpush.bf16.msrb.mxu3 %v4009_v41  ;;  %v1175_v41 = vadd.f32 %v1173_v23, %v1170_v45  ;;  %v1188_v23 = vmul.f32 %v10551_v40, %v7739_v61  ;;  %v1184_v34 = vadd.f32 %v1182_v62, %v1179_v37  ;;  %10552 = vst [vmem:[#allocation37_spill] sm:$0xff] %v7796_v14  ;;  %v4000_v45 = vld [vmem:[%s9805_s2 + $0x328] sm:$0xf]  ;;  %v4279_v40 = vld [vmem:[%s9805_s2 + $0x244] sm:$0xf] }
 0x13d   :  { %2608 = vmatpush.bf16.msra.mxu1 %v10553_v53  ;;  %v1197_v24 = vmul.f32 %v7810_v15, %v7783_v19  ;;  %v1213_v59 = vmul.f32 %v7207_v60, %v7134_v13  ;;  %2857 = vmatpush.bf16.msra.mxu2 %v3897_v55  ;;  %v1214_v42 = vmul.f32 %v7231_v25, %v7134_v13  ;;  %v7831_v55 = vld [vmem:[%s9803_s0 + $0x1a8] sm:$0xff] }
 0x13e   :  { %v1180_v33 = vadd.f32 %v1178_v29, %v1175_v41  ;;  %v1189_v43 = vadd.f32 %v1187_v31, %v1184_v34  ;;  %v1217_v20 = vmul.f32 %v7238_v57, %v7178_v38  ;;  %v1218_v27 = vmul.f32 %v7255_v6, %v7178_v38  ;;  %v4310_v29 = vld [vmem:[%s9805_s2 + $0x334] sm:$0xf0]  ;;  %10554 = vst [vmem:[#allocation10_spill] sm:$0xff] %v7838_v36 }
 0x13f   :  { %v1198_v25 = vmul.f32 %v7831_v55, %v7783_v19  ;;  %v1215_v57 = vadd.f32 %v1213_v59, %v1211_v26  ;;  %v1221_v6 = vmul.f32 %v7273_v52, %v7184_v50  ;;  %v1216_v37 = vadd.f32 %v1214_v42, %v1212_v56  ;;  %2882 = vmatpush.bf16.msra.mxu0 %v3917_v17  ;;  %v4455_v26 = vld [vmem:[%s9803_s0 + $0x50] sm:$0xff]  ;;  %v4456_v17 = vld [vmem:[%s9803_s0 + $0x58] sm:$0xff] }
 0x140   :  { %v1185_v62 = vadd.f32 %v1183_v9, %v1180_v33  ;;  %v1194_v44 = vadd.f32 %v1192_v35, %v1189_v43  ;;  %v1222_v41 = vmul.f32 %v7280_v4, %v7184_v50  ;;  %v10555_v9 = vor.u32 %v7614_v0, %v7619_v63  ;;  %v3882_v4 = vld [vmem:[%s9805_s2 + $0x250] sm:$0xf0]  ;;  %v4311_v35 = vld [vmem:[%s9805_s2 + $0x344] sm:$0xf] }
 0x141   :  { %v1219_v33 = vadd.f32 %v1217_v20, %v1215_v57  ;;  %v1225_v52 = vmul.f32 %v4455_v26, %v7265_v10  ;;  %v7856_v0 = vstv %s7773_s28  ;;  %v1220_v63 = vadd.f32 %v1218_v27, %v1216_v37  ;;  %v7871_v56 = vld [vmem:[%s9803_s0 + $0x1b0] sm:$0xff]  ;;  %v7925_v26 = vld [vmem:[%s9803_s0 + $0x1c0] sm:$0xff]  ;;  %s8414_s28 = sld [smem:[#allocation2 + $0x4d]] }
 0x142   :  { %v1190_v60 = vadd.f32 %v1188_v23, %v1185_v62  ;;  %2609 = vmatpush.bf16.msra.mxu1 %v10555_v9  ;;  %v4001_v23 = vor.u32 %v4310_v29, %v4000_v45  ;;  %10556 = vst [vmem:[#allocation61_spill] sm:$0xff] %v7856_v0  ;;  %v1226_v34 = vmul.f32 %v4456_v17, %v7265_v10  ;;  %v7878_v62 = vld [vmem:[%s9803_s0 + $0x1b8] sm:$0xff] }
 0x143   :  { %10557 = vst [vmem:[#allocation25_spill] sm:$0xff] %v7871_v56  ;;  %v1202_v53 = vmul.f32 %v7871_v56, %v7838_v36  ;;  %v1203_v59 = vmul.f32 %v7878_v62, %v7838_v36  ;;  %v1223_v43 = vadd.f32 %v1221_v6, %v1219_v33  ;;  %v1229_v42 = vmul.f32 %v7309_v54, %v7287_v12  ;;  %v7887_v29 = vld [vmem:[%s9803_s0 + $0x78] sm:$0xff]  ;;  %v7918_v33 = vld [vmem:[%s9805_s2 + $0x2ec] sm:$0xf]  ;;  %v10585_v36 = vld [vmem:[#allocation59_spill] sm:$0xff] }
 0x144   :  { %v1195_v31 = vadd.f32 %v1193_v7, %v1190_v60  ;;  %v4010_v7 = vld [vmem:[%s9805_s2 + $0x350] sm:$0xf0]  ;;  %10558 = vst [vmem:[#allocation27_spill] sm:$0xff] %v7878_v62  ;;  %v1199_v20 = vadd.f32 %v1197_v24, %v1194_v44  ;;  %v1224_v45 = vadd.f32 %v1222_v41, %v1220_v63  ;;  %v1230_v60 = vmul.f32 %v7887_v29, %v7287_v12  ;;  %v4308_v44 = vld [vmem:[%s9805_s2 + $0x32c] sm:$0xf] }
 0x145   :  { %10559 = vst [vmem:[#allocation36_spill] sm:$0xff] %v7887_v29  ;;  %v10560_v57 = vor.u32 %v7669_v39, %v7674_v18  ;;  %2883 = vmatpush.bf16.msra.mxu0 %v3901_v22  ;;  %v3885_v6 = vor.u32 %v4279_v40, %v3882_v4  ;;  %v1227_v37 = vadd.f32 %v1225_v52, %v1223_v43  ;;  %v4002_v41 = vld [vmem:[%s9805_s2 + $0x338] sm:$0xf0]  ;;  %v7905_v39 = vld [vmem:[%s9803_s0 + $0x88] sm:$0xff] }
 0x146   :  { %v1200_v27 = vadd.f32 %v1198_v25, %v1195_v31  ;;  %v1233_v24 = vmul.f32 %v7332_v47, %v7290_v2  ;;  %v4013_v25 = vor.u32 %v4311_v35, %v4010_v7  ;;  %v1228_v9 = vadd.f32 %v1226_v34, %v1224_v45  ;;  %10561 = vst [vmem:[#allocation34_spill] sm:$0xff] %v7905_v39  ;;  %v4304_v22 = vld [vmem:[%s9805_s2 + $0x30c] sm:$0xf]  ;;  %v3986_v31 = vld [vmem:[%s9805_s2 + $0x318] sm:$0xf0] }
 0x147   :  { %2610 = vmatpush.bf16.msra.mxu1 %v10560_v57  ;;  %v1234_v18 = vmul.f32 %v7905_v39, %v7290_v2  ;;  %3876 = vmatmul.msk.bf16.vlgmr.msra.gmra.mxu3 %vm2235_vm1, %v7473_v3  ;;  %10562 = vst [vmem:[#allocation30_spill] sm:$0xff] %v7925_v26  ;;  %v1207_v52 = vmul.f32 %v7925_v26, %v7856_v0  ;;  %v7932_v40 = vld [vmem:[%s9803_s0 + $0x1c8] sm:$0xff]  ;;  %v7941_v17 = vld [vmem:[%s9805_s2 + $0x2f8] sm:$0xf0] }
 0x148   :  { %10563 = vst [vmem:[#allocation5_spill] sm:$0xff] %v7932_v40  ;;  %v1208_v4 = vmul.f32 %v7932_v40, %v7856_v0  ;;  %v1231_v63 = vadd.f32 %v1229_v42, %v1227_v37  ;;  %v1237_v3 = vmul.f32 %v7378_v21, %v7293_v46  ;;  %2903 = vmatpush.bf16.msra.mxu3 %v4001_v23  ;;  %v7946_v34 = vld [vmem:[%s9805_s2 + $0x2cc] sm:$0xf]  ;;  %v7951_v35 = vld [vmem:[%s9805_s2 + $0x2d8] sm:$0xf0] }
 0x149   :  { %v1204_v7 = vadd.f32 %v1202_v53, %v1199_v20  ;;  %v1205_v43 = vadd.f32 %v1203_v59, %v1200_v27  ;;  %v1232_v42 = vadd.f32 %v1230_v60, %v1228_v9  ;;  %v7956_v45 = vld [vmem:[%s9803_s0 + $0x98] sm:$0xff]  ;;  %v10565_v57 = vor.u32 %v7679_v30, %v7696_v1  ;;  %2884 = vmatpush.bf16.msra.mxu0 %v3885_v6  ;;  %v7968_v27 = vld [vmem:[%s9803_s0 + $0xa8] sm:$0xff]  ;;  %v8029_v30 = vld [vmem:[%s9803_s0 + $0x110] sm:$0xff] }
 0x14a   :  { %10564 = vst [vmem:[#allocation21_spill] sm:$0xff] %v7956_v45  ;;  %v1238_v23 = vmul.f32 %v7956_v45, %v7293_v46  ;;  %v4005_v37 = vor.u32 %v4308_v44, %v4002_v41  ;;  %v1235_v49 = vadd.f32 %v1233_v24, %v1231_v63  ;;  %v1241_v53 = vmul.f32 %v7390_v48, %v7349_v16  ;;  %v7979_v24 = vld [vmem:[%s9803_s0 + $0xb0] sm:$0xff]  ;;  %v10584_v26 = vld [vmem:[#allocation54_spill] sm:$0xff] }
 0x14b   :  { %2611 = vmatpush.bf16.msra.mxu1 %v10565_v57  ;;  %v3989_v59 = vor.u32 %v4304_v22, %v3986_v31  ;;  %v1236_v20 = vadd.f32 %v1234_v18, %v1232_v42  ;;  %v1242_v60 = vmul.f32 %v7968_v27, %v7349_v16  ;;  %v3973_v1 = vor.u32 %v7918_v33, %v7941_v17  ;;  %v10569_v22 = vld [vmem:[#allocation35_spill] sm:$0xff]  ;;  %v7995_v33 = vld [vmem:[%s9803_s0 + $0xd8] sm:$0xff] }
 0x14c   :  { %v1239_v6 = vadd.f32 %v1237_v3, %v1235_v49  ;;  %10566 = vst [vmem:[#allocation33_spill] sm:$0xff] %v7979_v24  ;;  %v7984_v44 = vadd.f32 %v1207_v52, %v1204_v7  ;;  %v7986_v41 = vadd.f32 %v1208_v4, %v1205_v43  ;;  %v1246_v18 = vmul.f32 %v6892_v58, %v7355_v11  ;;  %v10570_v52 = vld [vmem:[#allocation12_spill] sm:$0xff]  ;;  %v10571_v4 = vld [vmem:[#allocation17_spill] sm:$0xff]  ;;  %v8004_v58 = vld [vmem:[%s9803_s0 + $0xe8] sm:$0xff] }
 0x14d   :  { %v1240_v9 = vadd.f32 %v1238_v23, %v1236_v20  ;;  %v1249_v31 = vmul.f32 %v10569_v22, %v7415_v32  ;;  %v1253_v63 = vmul.f32 %v10571_v4, %v10570_v52  ;;  %v1254_v17 = vmul.f32 %v8004_v58, %v10570_v52  ;;  %v10572_v7 = vld [vmem:[#allocation56_spill] sm:$0xff]  ;;  %v10573_v43 = vld [vmem:[#allocation47_spill] sm:$0xff]  ;;  %v10576_v20 = vld [vmem:[#allocation18_spill] sm:$0xff]  ;;  %10578 = vst [vmem:[#allocation40_spill] sm:$0xff] %v8029_v30 }
 0x14e   :  { %2612 = vmatmul.bf16.vlgmr.msra.gmra.mxu1 %v7461_v51  ;;  %10567 = vst [vmem:[#allocation51_spill] sm:$0xff] %v7984_v44  ;;  %v1243_v49 = vadd.f32 %v1241_v53, %v1239_v6  ;;  %v1250_v51 = vmul.f32 %v7995_v33, %v7415_v32  ;;  %v1257_v42 = vmul.f32 %v10573_v43, %v10572_v7  ;;  %v8013_v23 = vld [vmem:[%s9803_s0 + $0xf8] sm:$0xff]  ;;  %v10575_v53 = vld [vmem:[#allocation23_spill] sm:$0xff]  ;;  %v8022_v6 = vld [vmem:[%s9803_s0 + $0x108] sm:$0xff] }
 0x14f   :  { %2897 = vmatpush.bf16.msrb.mxu1 %v4013_v25  ;;  %v1245_v25 = vmul.f32 %v7979_v24, %v7355_v11  ;;  %10568 = vst [vmem:[#allocation26_spill] sm:$0xff] %v7986_v41  ;;  %v1244_v3 = vadd.f32 %v1242_v60, %v1240_v9  ;;  %v1258_v57 = vmul.f32 %v8013_v23, %v10572_v7  ;;  %v10579_v41 = vld [vmem:[#allocation24_spill] sm:$0xff]  ;;  %v10581_v7 = vld [vmem:[#allocation31_spill] sm:$0xff] }
 0x150   :  { %10574 = vst [vmem:[#allocation57_spill] sm:$0xff] %v8013_v23  ;;  %v1261_v60 = vmul.f32 %v10576_v20, %v10575_v53  ;;  %v1262_v9 = vmul.f32 %v8022_v6, %v10575_v53  ;;  %v1265_v44 = vmul.f32 %v8029_v30, %v10579_v41  ;;  %v10582_v52 = vld [vmem:[#allocation19_spill] sm:$0xff]  ;;  %v8040_v32 = vld [vmem:[%s9803_s0 + $0x138] sm:$0xff]  ;;  %v1273_v30 = vmul.f32 %v10585_v36, %v10584_v26 }
 0x151   :  { %10577 = vst [vmem:[#allocation7_spill] sm:$0xff] %v8022_v6  ;;  %v1269_v0 = vmul.f32 %v10582_v52, %v10581_v7  ;;  %v1270_v53 = vmul.f32 %v8040_v32, %v10581_v7  ;;  %v1317_v36 = vmul.f32 %v7332_v47, %v7178_v38 }
 0x152   :  { %10583 = vst [vmem:[#allocation43_spill] sm:$0xff] %v8040_v32 }
 0x153   :  { %2929 = vmatpush.bf16.msra.mxu1 %v4005_v37  ;;  %v1247_v37 = vadd.f32 %v1245_v25, %v1243_v49  ;;  %v1248_v25 = vadd.f32 %v1246_v18, %v1244_v3  ;;  %v10580_v49 = vld [vmem:[#allocation32_spill] sm:$0xff]  ;;  %v8049_v18 = vld [vmem:[%s9803_s0 + $0x148] sm:$0xff] }
 0x154   :  { %v1266_v24 = vmul.f32 %v10580_v49, %v10579_v41  ;;  %10586 = vst [vmem:[#allocation14_spill] sm:$0xff] %v8049_v18  ;;  %v1274_v3 = vmul.f32 %v8049_v18, %v10584_v26  ;;  %v8056_v49 = vld [vmem:[%s9803_s0 + $0x60] sm:$0xff]  ;;  %v1313_v26 = vmul.f32 %v7309_v54, %v7134_v13  ;;  %v1314_v41 = vmul.f32 %v7887_v29, %v7134_v13 }
 0x155   :  { %v1251_v40 = vadd.f32 %v1249_v31, %v1247_v37  ;;  %10587 = vst [vmem:[#allocation48_spill] sm:$0xff] %v8056_v49  ;;  %v1252_v31 = vadd.f32 %v1250_v51, %v1248_v25  ;;  %v8063_v37 = vld [vmem:[%s9803_s0 + $0x68] sm:$0xff]  ;;  %v1318_v51 = vmul.f32 %v7905_v39, %v7178_v38  ;;  %v1321_v25 = vmul.f32 %v7378_v21, %v7184_v50  ;;  %v10590_v13 = vld [vmem:[#allocation29_spill] sm:$0xff] }
 0x156   :  { %10588 = vst [vmem:[#allocation49_spill] sm:$0xff] %v8063_v37  ;;  %v1312_v7 = vmul.f32 %v8063_v37, %v7106_v5  ;;  %v1322_v37 = vmul.f32 %v7956_v45, %v7184_v50  ;;  %v8097_v50 = vld [vmem:[%s9803_s0 + $0x168] sm:$0xff] }
 0x157   :  { %2930 = vmatpush.bf16.msra.mxu1 %v3989_v59  ;;  %v1311_v59 = vmul.f32 %v8056_v49, %v7106_v5  ;;  %v1255_v18 = vadd.f32 %v1253_v63, %v1251_v40  ;;  %v1256_v49 = vadd.f32 %v1254_v17, %v1252_v31  ;;  %v10589_v5 = vld [vmem:[#allocation8_spill] sm:$0xff]  ;;  %10593 = vst [vmem:[#allocation52_spill] sm:$0xff] %v8097_v50 }
 0x158   :  { %v1316_v52 = vadd.f32 %v1314_v41, %v1312_v7  ;;  %v1277_v40 = vmul.f32 %v10590_v13, %v10589_v5  ;;  %v8084_v63 = vld [vmem:[%s9803_s0 + $0x158] sm:$0xff] }
 0x159   :  { %v1315_v32 = vadd.f32 %v1313_v26, %v1311_v59  ;;  %v1259_v54 = vadd.f32 %v1257_v42, %v1255_v18  ;;  %v1278_v38 = vmul.f32 %v8084_v63, %v10589_v5  ;;  %v1325_v26 = vmul.f32 %v7390_v48, %v7265_v10  ;;  %v10591_v18 = vld [vmem:[#allocation9_spill] sm:$0xff]  ;;  %v10592_v59 = vld [vmem:[#allocation60_spill] sm:$0xff] }
 0x15a   :  { %v1260_v41 = vadd.f32 %v1258_v57, %v1256_v49  ;;  %v1320_v7 = vadd.f32 %v1318_v51, %v1316_v52  ;;  %v1281_v31 = vmul.f32 %v10592_v59, %v10591_v18  ;;  %v1282_v45 = vmul.f32 %v8097_v50, %v10591_v18  ;;  %v10594_v48 = vld [vmem:[#allocation41_spill] sm:$0xff] }
 0x15b   :  { %2931 = vmatpush.bf16.msra.mxu1 %v3973_v1  ;;  %v1319_v17 = vadd.f32 %v1317_v36, %v1315_v32  ;;  %v1326_v1 = vmul.f32 %v7968_v27, %v7265_v10  ;;  %v1263_v42 = vadd.f32 %v1261_v60, %v1259_v54  ;;  %v1329_v57 = vmul.f32 %v10594_v48, %v7287_v12  ;;  %v8106_v54 = vld [vmem:[%s9803_s0 + $0xc8] sm:$0xff]  ;;  %v8116_v48 = vld [vmem:[%s9803_s0 + $0x170] sm:$0xff] }
 0x15c   :  { %v1264_v32 = vadd.f32 %v1262_v9, %v1260_v41  ;;  %v1324_v52 = vadd.f32 %v1322_v37, %v1320_v7  ;;  %10595 = vst [vmem:[#allocation15_spill] sm:$0xff] %v8106_v54  ;;  %v1330_v60 = vmul.f32 %v8106_v54, %v7287_v12  ;;  %v10596_v49 = vor.u32 %v7946_v34, %v7951_v35  ;;  %v10598_v37 = vld [vmem:[#allocation44_spill] sm:$0xff] }
 0x15d   :  { %v1323_v36 = vadd.f32 %v1321_v25, %v1319_v17  ;;  %v1267_v51 = vadd.f32 %v1265_v44, %v1263_v42  ;;  %10597 = vst [vmem:[#allocation20_spill] sm:$0xff] %v8116_v48  ;;  %v1285_v9 = vmul.f32 %v8116_v48, %v7707_v8  ;;  %v1286_v25 = vmul.f32 %v10598_v37, %v7707_v8  ;;  %v8131_v42 = vld [vmem:[%s9803_s0 + $0x198] sm:$0xff] }
 0x15e   :  { %v1333_v41 = vmul.f32 %v10569_v22, %v7290_v2  ;;  %v1268_v17 = vadd.f32 %v1266_v24, %v1264_v32  ;;  %v1328_v54 = vadd.f32 %v1326_v1, %v1324_v52  ;;  %v1334_v34 = vmul.f32 %v7995_v33, %v7290_v2 }
 0x15f   :  { %2932 = vmatpush.bf16.msra.mxu1 %v10596_v49  ;;  %v1327_v7 = vadd.f32 %v1325_v26, %v1323_v36  ;;  %v1271_v35 = vadd.f32 %v1269_v0, %v1267_v51  ;;  %v1289_v44 = vmul.f32 %v7796_v14, %v7739_v61  ;;  %v1290_v49 = vmul.f32 %v8131_v42, %v7739_v61 }
 0x160   :  { %v1337_v24 = vmul.f32 %v10571_v4, %v7293_v46  ;;  %v1272_v26 = vadd.f32 %v1270_v53, %v1268_v17  ;;  %v1332_v32 = vadd.f32 %v1330_v60, %v1328_v54  ;;  %v1338_v0 = vmul.f32 %v8004_v58, %v7293_v46 }
 0x161   :  { %v1331_v1 = vadd.f32 %v1329_v57, %v1327_v7  ;;  %v1275_v36 = vadd.f32 %v1273_v30, %v1271_v35  ;;  %v8141_v52 = vmul.f32 %v7810_v15, %v7771_v28  ;;  %v8145_v51 = vmul.f32 %v7831_v55, %v7771_v28 }
 0x162   :  { %v1341_v37 = vmul.f32 %v10573_v43, %v7349_v16  ;;  %v1276_v48 = vadd.f32 %v1274_v3, %v1272_v26  ;;  %v1336_v53 = vadd.f32 %v1334_v34, %v1332_v32  ;;  %v1342_v57 = vmul.f32 %v8013_v23, %v7349_v16  ;;  %v10599_v26 = vld [vmem:[#allocation10_spill] sm:$0xff]  ;;  %v10601_v32 = vld [vmem:[#allocation5_spill] sm:$0xff] }
 0x163   :  { %v1335_v4 = vadd.f32 %v1333_v41, %v1331_v1  ;;  %v1279_v54 = vadd.f32 %v1277_v40, %v1275_v36  ;;  %v8153_v30 = vmul.f32 %v7871_v56, %v7783_v19  ;;  %v8157_v60 = vmul.f32 %v7878_v62, %v7783_v19  ;;  %v10600_v40 = vld [vmem:[#allocation30_spill] sm:$0xff] }
 0x164   :  { %v1345_v17 = vmul.f32 %v10576_v20, %v7355_v11  ;;  %v1280_v7 = vadd.f32 %v1278_v38, %v1276_v48  ;;  %v1340_v3 = vadd.f32 %v1338_v0, %v1336_v53  ;;  %v1346_v41 = vmul.f32 %v8022_v6, %v7355_v11  ;;  %v10603_v19 = vld [vmem:[#allocation42_spill] sm:$0xff]  ;;  %v8183_v48 = vld [vmem:[%s9803_s0 + $0x1d0] sm:$0xff] }
 0x165   :  { %v1339_v35 = vadd.f32 %v1337_v24, %v1335_v4  ;;  %v1283_v34 = vadd.f32 %v1281_v31, %v1279_v54  ;;  %v8165_v1 = vmul.f32 %v10600_v40, %v10599_v26  ;;  %v8169_v36 = vmul.f32 %v10601_v32, %v10599_v26  ;;  %v10604_v16 = vld [vmem:[#allocation58_spill] sm:$0xff]  ;;  %10606 = vst [vmem:[#allocation13_spill] sm:$0xff] %v8183_v48  ;;  %v10607_v24 = vld [vmem:[#allocation61_spill] sm:$0xff]  ;;  %v10612_v53 = vld [vmem:[#allocation19_spill] sm:$0xff] }
 0x166   :  { %v1349_v23 = vmul.f32 %v10604_v16, %v10603_v19  ;;  %v1284_v43 = vadd.f32 %v1282_v45, %v1280_v7  ;;  %v1344_v38 = vadd.f32 %v1342_v57, %v1340_v3  ;;  %v8176_v4 = vld [vmem:[%s9803_s0 + $0x128] sm:$0xff]  ;;  %v8187_v0 = vmul.f32 %v8183_v48, %v10607_v24  ;;  %v8192_v16 = vld [vmem:[%s9803_s0 + $0x1d8] sm:$0xff]  ;;  %v10613_v54 = vld [vmem:[#allocation43_spill] sm:$0xff] }
 0x167   :  { %10602 = vst [vmem:[#allocation38_spill] sm:$0xff] %v8169_v36  ;;  %v1343_v20 = vadd.f32 %v1341_v37, %v1339_v35  ;;  %v1350_v31 = vmul.f32 %v8176_v4, %v10603_v19  ;;  %v8196_v45 = vmul.f32 %v8192_v16, %v10607_v24  ;;  %v10611_v37 = vld [vmem:[#allocation12_spill] sm:$0xff]  ;;  %v10615_v48 = vld [vmem:[#allocation59_spill] sm:$0xff]  ;;  %v10616_v19 = vld [vmem:[#allocation14_spill] sm:$0xff]  ;;  %v1287_v11 = vadd.f32 %v1285_v9, %v1283_v34 }
 0x168   :  { %10605 = vst [vmem:[#allocation16_spill] sm:$0xff] %v8176_v4  ;;  %v1353_v57 = vmul.f32 %v10612_v53, %v10611_v37  ;;  %v1354_v7 = vmul.f32 %v10613_v54, %v10611_v37  ;;  %v1348_v3 = vadd.f32 %v1346_v41, %v1344_v38  ;;  %v10614_v4 = vld [vmem:[#allocation56_spill] sm:$0xff]  ;;  %v10617_v6 = vld [vmem:[#allocation23_spill] sm:$0xff]  ;;  %v10620_v38 = vld [vmem:[#allocation53_spill] sm:$0xff] }
 0x169   :  { %10608 = vst [vmem:[#allocation35_spill] sm:$0xff] %v8187_v0  ;;  %v1347_v35 = vadd.f32 %v1345_v17, %v1343_v20  ;;  %v1357_v26 = vmul.f32 %v10615_v48, %v10614_v4  ;;  %v1358_v0 = vmul.f32 %v10616_v19, %v10614_v4  ;;  %v1361_v36 = vmul.f32 %v10590_v13, %v10617_v6  ;;  %v10618_v24 = vld [vmem:[#allocation24_spill] sm:$0xff]  ;;  %v10619_v41 = vld [vmem:[#allocation31_spill] sm:$0xff]  ;;  %v8219_v9 = vld [vmem:[%s9803_s0 + $0x188] sm:$0xff] }
 0x16a   :  { %10609 = vst [vmem:[#allocation32_spill] sm:$0xff] %v8192_v16  ;;  %v1362_v16 = vmul.f32 %v8084_v63, %v10617_v6  ;;  %v1365_v53 = vmul.f32 %v10592_v59, %v10618_v24  ;;  %v1352_v20 = vadd.f32 %v1350_v31, %v1348_v3  ;;  %v1366_v17 = vmul.f32 %v8097_v50, %v10618_v24  ;;  %v10622_v6 = vld [vmem:[#allocation54_spill] sm:$0xff] }
 0x16b   :  { %10610 = vst [vmem:[#allocation8_spill] sm:$0xff] %v8196_v45  ;;  %v1288_v45 = vadd.f32 %v1286_v25, %v1284_v43  ;;  %v1351_v37 = vadd.f32 %v1349_v23, %v1347_v35  ;;  %v1369_v48 = vmul.f32 %v10620_v38, %v10619_v41  ;;  %v1370_v34 = vmul.f32 %v8219_v9, %v10619_v41  ;;  %v10623_v41 = vld [vmem:[#allocation50_spill] sm:$0xff] }
 0x16c   :  { %10621 = vst [vmem:[#allocation29_spill] sm:$0xff] %v8219_v9  ;;  %v1373_v59 = vmul.f32 %v7796_v14, %v10622_v6  ;;  %v1374_v43 = vmul.f32 %v8131_v42, %v10622_v6  ;;  %v1356_v25 = vadd.f32 %v1354_v7, %v1352_v20  ;;  %v1377_v31 = vmul.f32 %v7810_v15, %v10589_v5  ;;  %v10624_v14 = vld [vmem:[#allocation6_spill] sm:$0xff]  ;;  %v10625_v20 = vld [vmem:[#allocation11_spill] sm:$0xff] }
 0x16d   :  { %v1355_v23 = vadd.f32 %v1353_v57, %v1351_v37  ;;  %v1378_v35 = vmul.f32 %v7831_v55, %v10589_v5  ;;  %v1291_v3 = vadd.f32 %v1289_v44, %v1287_v11  ;;  %v1381_v38 = vmul.f32 %v7871_v56, %v10591_v18  ;;  %v10626_v56 = vld [vmem:[#allocation55_spill] sm:$0xff] }
 0x16e   :  { %v1382_v9 = vmul.f32 %v7878_v62, %v10591_v18  ;;  %v1411_v24 = vmul.f32 %v10624_v14, %v10623_v41  ;;  %v1292_v50 = vadd.f32 %v1290_v49, %v1288_v45  ;;  %v1360_v37 = vadd.f32 %v1358_v0, %v1356_v25  ;;  %v10628_v25 = vld [vmem:[#allocation28_spill] sm:$0xff] }
 0x16f   :  { %v1359_v6 = vadd.f32 %v1357_v26, %v1355_v23  ;;  %v1412_v57 = vmul.f32 %v7887_v29, %v10623_v41  ;;  %v1385_v7 = vmul.f32 %v10600_v40, %v7707_v8  ;;  %v1413_v11 = vmul.f32 %v7332_v47, %v10625_v20  ;;  %v10627_v26 = vld [vmem:[#allocation21_spill] sm:$0xff] }
 0x170   :  { %v1414_v44 = vmul.f32 %v7905_v39, %v10625_v20  ;;  %v1417_v18 = vmul.f32 %v7378_v21, %v10626_v56  ;;  %v1364_v14 = vadd.f32 %v1362_v16, %v1360_v37  ;;  %v1386_v49 = vmul.f32 %v10601_v32, %v7707_v8  ;;  %v10629_v47 = vld [vmem:[#allocation45_spill] sm:$0xff] }
 0x171   :  { %v1363_v62 = vadd.f32 %v1361_v36, %v1359_v6  ;;  %v1418_v0 = vmul.f32 %v10627_v26, %v10626_v56  ;;  %v1295_v45 = vadd.f32 %v8141_v52, %v1291_v3  ;;  %v1415_v41 = vadd.f32 %v1413_v11, %v1411_v24  ;;  %v4484_v6 = vld [vmem:[%s9803_s0 + $0x1e0] sm:$0xff] }
 0x172   :  { %v1416_v23 = vadd.f32 %v1414_v44, %v1412_v57  ;;  %v1421_v29 = vmul.f32 %v10629_v47, %v10628_v25  ;;  %v1296_v20 = vadd.f32 %v8145_v51, %v1292_v50  ;;  %v1368_v40 = vadd.f32 %v1366_v17, %v1364_v14  ;;  %v10630_v24 = vld [vmem:[#allocation33_spill] sm:$0xff]  ;;  %v4485_v50 = vld [vmem:[%s9803_s0 + $0x1e8] sm:$0xff]  ;;  %v8270_v51 = vld [vmem:[%s9803_s0 + $0xb8] sm:$0xff] }
 0x173   :  { %v1367_v39 = vadd.f32 %v1365_v53, %v1363_v62  ;;  %v1422_v21 = vmul.f32 %v7968_v27, %v10628_v25  ;;  %v1389_v56 = vmul.f32 %v4484_v6, %v7739_v61  ;;  %v1419_v36 = vadd.f32 %v1417_v18, %v1415_v41  ;;  %v10634_v47 = vld [vmem:[#allocation38_spill] sm:$0xff] }
 0x174   :  { %v1420_v52 = vadd.f32 %v1418_v0, %v1416_v23  ;;  %v1425_v16 = vmul.f32 %v10630_v24, %v7265_v10  ;;  %v1372_v37 = vadd.f32 %v1370_v34, %v1368_v40  ;;  %v1390_v62 = vmul.f32 %v4485_v50, %v7739_v61  ;;  %v10631_v0 = vld [vmem:[#allocation17_spill] sm:$0xff]  ;;  %v10635_v24 = vld [vmem:[#allocation22_spill] sm:$0xff] }
 0x175   :  { %v1371_v3 = vadd.f32 %v1369_v48, %v1367_v39  ;;  %v1426_v18 = vmul.f32 %v8270_v51, %v7265_v10  ;;  %v1423_v53 = vadd.f32 %v1421_v29, %v1419_v36  ;;  %v1429_v39 = vmul.f32 %v10569_v22, %v7287_v12 }
 0x176   :  { %v1424_v17 = vadd.f32 %v1422_v21, %v1420_v52  ;;  %v1430_v40 = vmul.f32 %v7995_v33, %v7287_v12  ;;  %v1299_v48 = vadd.f32 %v8153_v30, %v1295_v45  ;;  %v1300_v34 = vadd.f32 %v8157_v60, %v1296_v20  ;;  %v8287_v12 = vld [vmem:[%s9803_s0 + $0x1f0] sm:$0xff] }
 0x177   :  { %v1375_v57 = vadd.f32 %v1373_v59, %v1371_v3  ;;  %v1376_v11 = vadd.f32 %v1374_v43, %v1372_v37  ;;  %v1427_v44 = vadd.f32 %v1425_v16, %v1423_v53  ;;  %v1433_v41 = vmul.f32 %v10631_v0, %v7290_v2  ;;  %v8294_v59 = vld [vmem:[%s9803_s0 + $0x1f8] sm:$0xff]  ;;  %v10632_v43 = vld [vmem:[#allocation47_spill] sm:$0xff]  ;;  %v10636_v16 = vld [vmem:[#allocation18_spill] sm:$0xff] }
 0x178   :  { %v1428_v14 = vadd.f32 %v1426_v18, %v1424_v17  ;;  %v1434_v10 = vmul.f32 %v8004_v58, %v7290_v2  ;;  %v1393_v22 = vmul.f32 %v8287_v12, %v7771_v28  ;;  %v1394_v30 = vmul.f32 %v8294_v59, %v7771_v28  ;;  %v10637_v37 = vld [vmem:[#allocation7_spill] sm:$0xff] }
 0x179   :  { %v1379_v29 = vadd.f32 %v1377_v31, %v1375_v57  ;;  %v1380_v23 = vadd.f32 %v1378_v35, %v1376_v11  ;;  %v1431_v60 = vadd.f32 %v1429_v39, %v1427_v44  ;;  %v1437_v31 = vmul.f32 %v10632_v43, %v7293_v46  ;;  %v10633_v35 = vld [vmem:[#allocation57_spill] sm:$0xff]  ;;  %v10642_v11 = vld [vmem:[#allocation35_spill] sm:$0xff] }
 0x17a   :  { %v1432_v2 = vadd.f32 %v1430_v40, %v1428_v14  ;;  %v1438_v45 = vmul.f32 %v10633_v35, %v7293_v46  ;;  %v1303_v25 = vadd.f32 %v8165_v1, %v1299_v48  ;;  %v1304_v20 = vadd.f32 %v10634_v47, %v1300_v34  ;;  %v8311_v46 = vld [vmem:[%s9803_s0 + $0x200] sm:$0xff]  ;;  %v10638_v1 = vld [vmem:[#allocation39_spill] sm:$0xff]  ;;  %v8327_v34 = vld [vmem:[%s9803_s0 + $0x118] sm:$0xff] }
 0x17b   :  { %v1383_v21 = vadd.f32 %v1381_v38, %v1379_v29  ;;  %v1384_v6 = vadd.f32 %v1382_v9, %v1380_v23  ;;  %v1435_v36 = vadd.f32 %v1433_v41, %v1431_v60  ;;  %v1441_v3 = vmul.f32 %v10636_v16, %v10635_v24  ;;  %v8318_v9 = vld [vmem:[%s9803_s0 + $0x208] sm:$0xff]  ;;  %10641 = vst [vmem:[#allocation41_spill] sm:$0xff] %v8327_v34  ;;  %v10643_v14 = vld [vmem:[#allocation8_spill] sm:$0xff]  ;;  %v10645_v29 = vld [vmem:[#allocation19_spill] sm:$0xff] }
 0x17c   :  { %v1436_v52 = vadd.f32 %v1434_v10, %v1432_v2  ;;  %v1442_v50 = vmul.f32 %v10637_v37, %v10635_v24  ;;  %v1397_v17 = vmul.f32 %v8311_v46, %v10638_v1  ;;  %v1398_v38 = vmul.f32 %v8318_v9, %v10638_v1  ;;  %v10644_v10 = vld [vmem:[#allocation42_spill] sm:$0xff] }
 0x17d   :  { %v1387_v18 = vadd.f32 %v1385_v7, %v1383_v21  ;;  %v1388_v53 = vadd.f32 %v1386_v49, %v1384_v6  ;;  %v1439_v39 = vadd.f32 %v1437_v31, %v1435_v36  ;;  %v10639_v7 = vld [vmem:[#allocation46_spill] sm:$0xff]  ;;  %v10640_v49 = vld [vmem:[#allocation40_spill] sm:$0xff]  ;;  %v8332_v44 = vadd.f32 %v10642_v11, %v1303_v25  ;;  %v10647_v21 = vld [vmem:[#allocation61_spill] sm:$0xff] }
 0x17e   :  { %v1440_v40 = vadd.f32 %v1438_v45, %v1436_v52  ;;  %v1445_v48 = vmul.f32 %v10640_v49, %v10639_v7  ;;  %v1446_v57 = vmul.f32 %v8327_v34, %v10639_v7  ;;  %v8335_v0 = vadd.f32 %v10643_v14, %v1304_v20  ;;  %v8344_v45 = vld [vmem:[%s9803_s0 + $0x210] sm:$0xff]  ;;  %v10646_v25 = vld [vmem:[#allocation10_spill] sm:$0xff]  ;;  %v8358_v20 = vld [vmem:[%s9803_s0 + $0x220] sm:$0xff] }
 0x17f   :  { %v1391_v41 = vadd.f32 %v1389_v56, %v1387_v18  ;;  %v1449_v23 = vmul.f32 %v10645_v29, %v10644_v10  ;;  %v1392_v60 = vadd.f32 %v1390_v62, %v1388_v53  ;;  %v1443_v2 = vadd.f32 %v1441_v3, %v1439_v39  ;;  %v8351_v56 = vld [vmem:[%s9803_s0 + $0x218] sm:$0xff]  ;;  %v10649_v52 = vld [vmem:[#allocation59_spill] sm:$0xff]  ;;  %v8375_v49 = vld [vmem:[%s9803_s0 + $0x228] sm:$0xff] }
 0x180   :  { %v1444_v43 = vadd.f32 %v1442_v50, %v1440_v40  ;;  %v1450_v31 = vmul.f32 %v10613_v54, %v10644_v10  ;;  %v1401_v47 = vmul.f32 %v8344_v45, %v10646_v25  ;;  %v1402_v62 = vmul.f32 %v8351_v56, %v10646_v25  ;;  %v10648_v36 = vld [vmem:[#allocation12_spill] sm:$0xff]  ;;  %v10650_v53 = vld [vmem:[#allocation51_spill] sm:$0xff]  ;;  %v10651_v40 = vld [vmem:[#allocation26_spill] sm:$0xff] }
 0x181   :  { %v8362_v6 = vmul.f32 %v8358_v20, %v10647_v21  ;;  %v1453_v24 = vmul.f32 %v10649_v52, %v10648_v36  ;;  %v1395_v16 = vadd.f32 %v1393_v22, %v1391_v41  ;;  %v1447_v3 = vadd.f32 %v1445_v48, %v1443_v2  ;;  %v10652_v41 = vld [vmem:[#allocation23_spill] sm:$0xff]  ;;  %v10653_v10 = vld [vmem:[#allocation60_spill] sm:$0xff] }
 0x182   :  { %v1448_v50 = vadd.f32 %v1446_v57, %v1444_v43  ;;  %v1454_v18 = vmul.f32 %v10616_v19, %v10648_v36  ;;  %v8379_v11 = vmul.f32 %v8375_v49, %v10647_v21  ;;  %v1457_v22 = vmul.f32 %v10590_v13, %v10614_v4  ;;  %v10654_v2 = vld [vmem:[#allocation52_spill] sm:$0xff]  ;;  %v8959_v34 = vld [vmem:[%s9805_s2 + $0x390] sm:$0xf0] }
 0x183   :  { %v1396_v19 = vadd.f32 %v1394_v30, %v1392_v60  ;;  %v1451_v48 = vadd.f32 %v1449_v23, %v1447_v3  ;;  %v1458_v14 = vmul.f32 %v8084_v63, %v10614_v4  ;;  %v1461_v29 = vmul.f32 %v10653_v10, %v10652_v41  ;;  %v10655_v36 = vld [vmem:[#allocation24_spill] sm:$0xff]  ;;  %v10658_v60 = vld [vmem:[#allocation31_spill] sm:$0xff] }
 0x184   :  { %v1452_v57 = vadd.f32 %v1450_v31, %v1448_v50  ;;  %v1462_v43 = vmul.f32 %v10654_v2, %v10652_v41  ;;  %v10656_v52 = vld [vmem:[#allocation20_spill] sm:$0xff]  ;;  %v1399_v63 = vadd.f32 %v1397_v17, %v1395_v16  ;;  %v10659_v31 = vld [vmem:[#allocation37_spill] sm:$0xff]  ;;  %v1470_v50 = vmul.f32 %v8131_v42, %v10658_v60  ;;  %v10660_v41 = vld [vmem:[#allocation54_spill] sm:$0xff] }
 0x185   :  { %v1465_v7 = vmul.f32 %v10656_v52, %v10655_v36  ;;  %v8396_v13 = vld [vmem:[%s9803_s0 + $0x178] sm:$0xff]  ;;  %v1455_v4 = vadd.f32 %v1453_v24, %v1451_v48  ;;  %v1469_v3 = vmul.f32 %v10659_v31, %v10658_v60  ;;  %v1473_v10 = vmul.f32 %v7810_v15, %v10660_v41  ;;  %v10661_v52 = vld [vmem:[#allocation25_spill] sm:$0xff]  ;;  %v4312_v15 = vld [vmem:[%s9805_s2 + $0x34c] sm:$0xf] }
 0x186   :  { %10657 = vst [vmem:[#allocation44_spill] sm:$0xff] %v8396_v13  ;;  %v1466_v30 = vmul.f32 %v8396_v13, %v10655_v36  ;;  %v1456_v23 = vadd.f32 %v1454_v18, %v1452_v57  ;;  %v1474_v2 = vmul.f32 %v7831_v55, %v10660_v41  ;;  %v8412_v36 = vmul.f32 %v10661_v52, %v10589_v5  ;;  %v10662_v18 = vld [vmem:[#allocation27_spill] sm:$0xff]  ;;  %v4018_v55 = vld [vmem:[%s9805_s2 + $0x358] sm:$0xf0]  ;;  %v10663_v42 = vld [vmem:[#allocation9_spill] sm:$0xff] }
 0x187   :  { %v1400_v17 = vadd.f32 %v1398_v38, %v1396_v19  ;;  %v1459_v24 = vadd.f32 %v1457_v22, %v1455_v4  ;;  %v8418_v48 = vmul.f32 %v10662_v18, %v10589_v5  ;;  %v10664_v57 = vld [vmem:[#allocation30_spill] sm:$0xff]  ;;  %v8434_v38 = vmul.f32 %v10601_v32, %v10663_v42  ;;  %v10665_v5 = vld [vmem:[#allocation13_spill] sm:$0xff]  ;;  %v10666_v19 = vld [vmem:[#allocation32_spill] sm:$0xff] }
 0x188   :  { %v1460_v16 = vadd.f32 %v1458_v14, %v1456_v23  ;;  %v8430_v60 = vmul.f32 %v10664_v57, %v10663_v42  ;;  %v8438_v22 = vmul.f32 %v10665_v5, %v7707_v8  ;;  %v8442_v14 = vmul.f32 %v10666_v19, %v7707_v8  ;;  %v3880_v4 = vld [vmem:[%s9805_s2 + $0x240] sm:$0xf]  ;;  %v4281_v23 = vld [vmem:[%s9805_s2 + $0x24c] sm:$0xf0]  ;;  %v3984_v32 = vld [vmem:[%s9805_s2 + $0x308] sm:$0xf] }
 0x189   :  { %v8453_v31 = vadd.f32 %v1401_v47, %v1399_v63  ;;  %v1463_v41 = vadd.f32 %v1461_v29, %v1459_v24  ;;  %v4021_v18 = vor.u32 %v4312_v15, %v4018_v55  ;;  %v4306_v8 = vld [vmem:[%s9805_s2 + $0x314] sm:$0xf0]  ;;  %v4292_v42 = vld [vmem:[%s9805_s2 + $0x2ac] sm:$0xf]  ;;  %v3938_v57 = vld [vmem:[%s9805_s2 + $0x2b8] sm:$0xf0]  ;;  %v3881_v5 = vor.u32 %v4281_v23, %v3880_v4 }
 0x18a   :  { %v1464_v52 = vadd.f32 %v1462_v43, %v1460_v16  ;;  %v3985_v19 = vor.u32 %v4306_v8, %v3984_v32  ;;  %v3941_v39 = vor.u32 %v4292_v42, %v3938_v57  ;;  %v8467_v47 = vstv %s8383_s26  ;;  %v4016_v16 = vld [vmem:[%s9805_s2 + $0x348] sm:$0xf]  ;;  %v4314_v15 = vld [vmem:[%s9805_s2 + $0x354] sm:$0xf0]  ;;  %v4497_v55 = vld [vmem:[%s9803_s0] sm:$0xff]  ;;  %s8688_s26 = sld [smem:[#allocation2 + $0x55]] }
 0x18b   :  { %10667 = vst [vmem:[#allocation5_spill] sm:$0xff] %v8467_v47  ;;  %v8469_v29 = vadd.f32 %v1402_v62, %v1400_v17  ;;  %v1467_v43 = vadd.f32 %v1465_v7, %v1463_v41  ;;  %v8473_v24 = vmul.f32 %v8287_v12, %v7739_v61  ;;  %2949 = vmatpush.bf16.msrb.mxu0 %v4021_v18  ;;  %v3968_v62 = vld [vmem:[%s9805_s2 + $0x2e8] sm:$0xf]  ;;  %v4302_v12 = vld [vmem:[%s9805_s2 + $0x2f4] sm:$0xf0]  ;;  %v8502_v41 = vstv %s8400_s30 }
 0x18c   :  { %v1468_v63 = vadd.f32 %v1466_v30, %v1464_v52  ;;  %2858 = vmatpush.bf16.msra.mxu2 %v3881_v5  ;;  %2904 = vmatpush.bf16.msra.mxu3 %v3985_v19  ;;  %v4017_v7 = vor.u32 %v4314_v15, %v4016_v16  ;;  %v4288_v30 = vld [vmem:[%s9805_s2 + $0x28c] sm:$0xf]  ;;  %v3922_v17 = vld [vmem:[%s9805_s2 + $0x298] sm:$0xf0]  ;;  %v1547_v4 = vmul.f32 %v4497_v55, %v8467_v47  ;;  %v8511_v5 = vld [vmem:[%s9803_s0 + $0x10] sm:$0xff] }
 0x18d   :  { %v4498_v23 = vld [vmem:[%s9803_s0 + $0x8] sm:$0xff]  ;;  %10668 = vst [vmem:[#allocation58_spill] sm:$0xff] %v8502_v41  ;;  %v1471_v52 = vadd.f32 %v1469_v3, %v1467_v43  ;;  %2933 = vmatpush.bf16.msra.mxu1 %v3941_v39  ;;  %v3969_v8 = vor.u32 %v4302_v12, %v3968_v62  ;;  %v3925_v42 = vor.u32 %v4288_v30, %v3922_v17  ;;  %v8518_v39 = vld [vmem:[%s9803_s0 + $0x18] sm:$0xff] }
 0x18e   :  { %v1548_v32 = vmul.f32 %v4498_v23, %v8467_v47  ;;  %v1472_v18 = vadd.f32 %v1470_v50, %v1468_v63  ;;  %v1490_v57 = vmul.f32 %v8294_v59, %v7739_v61  ;;  %v1550_v19 = vmul.f32 %v8511_v5, %v8502_v41  ;;  %v3952_v63 = vld [vmem:[%s9805_s2 + $0x2c8] sm:$0xf]  ;;  %v4298_v16 = vld [vmem:[%s9805_s2 + $0x2d4] sm:$0xf0]  ;;  %v4284_v15 = vld [vmem:[%s9805_s2 + $0x26c] sm:$0xf] }
 0x18f   :  { %v1551_v3 = vmul.f32 %v8518_v39, %v8502_v41  ;;  %v8523_v61 = vstv %s8414_s28  ;;  %v1475_v59 = vadd.f32 %v1473_v10, %v1471_v52  ;;  %v8527_v43 = vmul.f32 %v8311_v46, %v7771_v28  ;;  %v8541_v10 = vld [vmem:[%s9803_s0 + $0x20] sm:$0xff]  ;;  %v3906_v62 = vld [vmem:[%s9805_s2 + $0x278] sm:$0xf0]  ;;  %v8551_v30 = vld [vmem:[%s9803_s0 + $0x28] sm:$0xff]  ;;  %s9132_s28 = sld [smem:[#allocation2 + $0x61]] }
 0x190   :  { %2923 = vmatpush.bf16.msrb.mxu2 %v4017_v7  ;;  %10669 = vst [vmem:[#allocation43_spill] sm:$0xff] %v8523_v61  ;;  %v1476_v50 = vadd.f32 %v1474_v2, %v1472_v18  ;;  %v1555_v46 = vmul.f32 %v8541_v10, %v8523_v61  ;;  %2905 = vmatpush.bf16.msra.mxu3 %v3969_v8 }
 0x191   :  { %v3953_v2 = vor.u32 %v4298_v16, %v3952_v63  ;;  %v1552_v7 = vadd.f32 %v1550_v19, %v1547_v4  ;;  %v1553_v12 = vadd.f32 %v1551_v3, %v1548_v32  ;;  %v1556_v17 = vmul.f32 %v8551_v30, %v8523_v61  ;;  %2934 = vmatpush.bf16.msra.mxu1 %v3925_v42  ;;  %v3890_v63 = vld [vmem:[%s9805_s2 + $0x258] sm:$0xf0] }
 0x192   :  { %v1479_v55 = vadd.f32 %v8412_v36, %v1475_v59  ;;  %v1480_v23 = vadd.f32 %v8418_v48, %v1476_v50  ;;  %v1494_v52 = vmul.f32 %v8318_v9, %v7771_v28  ;;  %v3909_v18 = vor.u32 %v4284_v15, %v3906_v62  ;;  %v3936_v28 = vld [vmem:[%s9805_s2 + $0x2a8] sm:$0xf]  ;;  %v4294_v9 = vld [vmem:[%s9805_s2 + $0x2b4] sm:$0xf0]  ;;  %v8580_v48 = vld [vmem:[%s9803_s0 + $0x30] sm:$0xff] }
 0x193   :  { %v1407_v4 = vadd.f32 %v8362_v6, %v8453_v31  ;;  %v1557_v32 = vadd.f32 %v1555_v46, %v1552_v7  ;;  %v1558_v8 = vadd.f32 %v1556_v17, %v1553_v12  ;;  %v8564_v19 = vstv %s8426_s20  ;;  %v4280_v6 = vld [vmem:[%s9805_s2 + $0x24c] sm:$0xf]  ;;  %v8612_v7 = vld [vmem:[%s9803_s0 + $0x40] sm:$0xff] }
 0x194   :  { %v1483_v3 = vadd.f32 %v8430_v60, %v1479_v55  ;;  %v1484_v36 = vadd.f32 %v8434_v38, %v1480_v23  ;;  %v1560_v60 = vmul.f32 %v8580_v48, %v8564_v19  ;;  %v8587_v38 = vld [vmem:[%s9803_s0 + $0x38] sm:$0xff]  ;;  %v1408_v42 = vadd.f32 %v8379_v11, %v8469_v29  ;;  %2906 = vmatpush.bf16.msra.mxu3 %v3953_v2 }
 0x195   :  { %v1561_v31 = vmul.f32 %v8587_v38, %v8564_v19  ;;  %v1497_v59 = vmul.f32 %v8344_v45, %v10638_v1  ;;  %v3937_v50 = vor.u32 %v4294_v9, %v3936_v28  ;;  %v8601_v16 = vstv %s8464_s16  ;;  %2935 = vmatpush.bf16.msra.mxu1 %v3909_v18  ;;  %s8617_s16 = sld [smem:[#allocation2 + $0x53]]  ;;  %v10670_v23 = vld [vmem:[#allocation48_spill] sm:$0xff] }
 0x196   :  { %v1487_v15 = vadd.f32 %v8438_v22, %v1483_v3  ;;  %v1488_v46 = vadd.f32 %v8442_v14, %v1484_v36  ;;  %v1498_v11 = vmul.f32 %v8351_v56, %v10638_v1  ;;  %v3893_v45 = vor.u32 %v4280_v6, %v3890_v63  ;;  %v8622_v1 = vld [vmem:[%s9803_s0 + $0x48] sm:$0xff]  ;;  %v4507_v6 = vld [vmem:[%s9803_s0 + $0x230] sm:$0xff] }
 0x197   :  { %v1501_v29 = vmul.f32 %v8358_v20, %v10646_v25  ;;  %v1562_v2 = vadd.f32 %v1560_v60, %v1557_v32  ;;  %v1563_v62 = vadd.f32 %v1561_v31, %v1558_v8  ;;  %v1565_v22 = vmul.f32 %v8612_v7, %v8601_v16  ;;  %v10671_v32 = vld [vmem:[#allocation49_spill] sm:$0xff] }
 0x198   :  { %v1491_v14 = vadd.f32 %v8473_v24, %v1487_v15  ;;  %v1492_v12 = vadd.f32 %v1490_v57, %v1488_v46  ;;  %v1566_v56 = vmul.f32 %v8622_v1, %v8601_v16  ;;  %v8627_v20 = vstv %s8506_s1  ;;  %2907 = vmatpush.bf16.msra.mxu3 %v3937_v50  ;;  %v3920_v24 = vld [vmem:[%s9805_s2 + $0x288] sm:$0xf]  ;;  %v4290_v57 = vld [vmem:[%s9805_s2 + $0x294] sm:$0xf0]  ;;  %s9067_s1 = sld [smem:[#allocation2 + $0x5f]] }
 0x199   :  { %v1502_v17 = vmul.f32 %v8375_v49, %v10646_v25  ;;  %v1567_v55 = vadd.f32 %v1565_v22, %v1562_v2  ;;  %v1570_v18 = vmul.f32 %v10670_v23, %v8627_v20  ;;  %v1571_v8 = vmul.f32 %v10671_v32, %v8627_v20  ;;  %2936 = vmatpush.bf16.msra.mxu1 %v3893_v45  ;;  %v3904_v46 = vld [vmem:[%s9805_s2 + $0x268] sm:$0xf]  ;;  %v8684_v22 = vld [vmem:[%s9803_s0 + $0x80] sm:$0xff] }
 0x19a   :  { %v1495_v25 = vadd.f32 %v8527_v43, %v1491_v14  ;;  %v1496_v49 = vadd.f32 %v1494_v52, %v1492_v12  ;;  %v3921_v3 = vor.u32 %v4290_v57, %v3920_v24  ;;  %v1568_v36 = vadd.f32 %v1566_v56, %v1563_v62  ;;  %v4508_v52 = vld [vmem:[%s9803_s0 + $0x238] sm:$0xff]  ;;  %10676 = vst [vmem:[#allocation14_spill] sm:$0xff] %v8684_v22 }
 0x19b   :  { %v10672_v28 = vmax.f32 %v10650_v53, %v8332_v44  ;;  %v1505_v60 = vmul.f32 %v4507_v6, %v10647_v21  ;;  %v1572_v31 = vadd.f32 %v1570_v18, %v1567_v55  ;;  %v8652_v50 = vstv %s8561_s24  ;;  %v10677_v55 = vld [vmem:[#allocation34_spill] sm:$0xff]  ;;  %v4140_v6 = vld [vmem:[%s9805_s2 + $0x440] sm:$0xf]  ;;  %s8780_s24 = sld [smem:[#allocation2 + $0x5a]] }
 0x19c   :  { %v1499_v63 = vadd.f32 %v1497_v59, %v1495_v25  ;;  %v1500_v43 = vadd.f32 %v1498_v11, %v1496_v49  ;;  %v1506_v15 = vmul.f32 %v4508_v52, %v10647_v21  ;;  %v1573_v44 = vadd.f32 %v1571_v8, %v1568_v36  ;;  %2908 = vmatpush.bf16.msra.mxu3 %v3921_v3  ;;  %v4286_v59 = vld [vmem:[%s9805_s2 + $0x274] sm:$0xf0]  ;;  %v8672_v21 = vld [vmem:[%s9803_s0 + $0x70] sm:$0xff]  ;;  %v4343_v36 = vld [vmem:[%s9805_s2 + $0x444] sm:$0xf] }
 0x19d   :  { %v1409_v9 = vmax.f32 %v10672_v28, %v1407_v4  ;;  %v10673_v53 = vmax.f32 %v10651_v40, %v8335_v0  ;;  %10674 = vst [vmem:[#allocation56_spill] sm:$0xff] %v8672_v21  ;;  %v1575_v11 = vmul.f32 %v8672_v21, %v8652_v50  ;;  %v10675_v0 = vld [vmem:[#allocation36_spill] sm:$0xff]  ;;  %v3905_v62 = vor.u32 %v4286_v59, %v3904_v46  ;;  %v4142_v28 = vld [vmem:[%s9805_s2 + $0x450] sm:$0xf0] }
 0x19e   :  { %v1576_v40 = vmul.f32 %v10675_v0, %v8652_v50  ;;  %v1503_v45 = vadd.f32 %v1501_v29, %v1499_v63  ;;  %v1504_v2 = vadd.f32 %v1502_v17, %v1500_v43  ;;  %v3888_v29 = vld [vmem:[%s9805_s2 + $0x248] sm:$0xf]  ;;  %v4282_v17 = vld [vmem:[%s9805_s2 + $0x254] sm:$0xf0]  ;;  %v1512_v18 = vstv %s8631_s17  ;;  %v8728_v63 = vld [vmem:[%s9803_s0 + $0x90] sm:$0xff] }
 0x19f   :  { %v1410_v4 = vmax.f32 %v10673_v53, %v1408_v42  ;;  %v8679_v42 = vstv %s8598_s12  ;;  %v1577_v12 = vadd.f32 %v1575_v11, %v1572_v31  ;;  %v3889_v32 = vor.u32 %v4282_v17, %v3888_v29  ;;  %v8737_v53 = vld [vmem:[%s9805_s2 + $0x430] sm:$0xf0]  ;;  %v4349_v0 = vld [vmem:[%s9805_s2 + $0x46c] sm:$0xf0] }
 0x1a0   :  { %v1580_v14 = vmul.f32 %v8684_v22, %v8679_v42  ;;  %v1578_v56 = vadd.f32 %v1576_v40, %v1573_v44  ;;  %v1507_v24 = vadd.f32 %v1505_v60, %v1503_v45  ;;  %v1508_v57 = vadd.f32 %v1506_v15, %v1504_v2  ;;  %2909 = vmatpush.bf16.msra.mxu3 %v3905_v62  ;;  %v8723_v60 = vld [vmem:[%s9805_s2 + $0x424] sm:$0xf]  ;;  %v4158_v46 = vld [vmem:[%s9805_s2 + $0x470] sm:$0xf0] }
 0x1a1   :  { %v1581_v23 = vmul.f32 %v10677_v55, %v8679_v42  ;;  %v8704_v25 = vstv %s8617_s16  ;;  %v8746_v59 = vstv %s8658_s14  ;;  %v4145_v11 = vor.u32 %v4343_v36, %v4142_v28  ;;  %v8757_v2 = vld [vmem:[%s9803_s0 + $0xa0] sm:$0xff]  ;;  %s8763_s14 = sld [smem:[#allocation2 + $0x59]] }
 0x1a2   :  { %v1582_v8 = vadd.f32 %v1580_v14, %v1577_v12  ;;  %v1509_v49 = vmax.f32 %v1409_v9, %v1507_v24  ;;  %v1510_v3 = vmax.f32 %v1410_v4, %v1508_v57  ;;  %v4345_v9 = vld [vmem:[%s9805_s2 + $0x44c] sm:$0xf0]  ;;  %v1585_v43 = vmul.f32 %v8728_v63, %v8704_v25  ;;  %v4347_v4 = vld [vmem:[%s9805_s2 + $0x464] sm:$0xf]  ;;  %v4124_v36 = vld [vmem:[%s9805_s2 + $0x420] sm:$0xf] }
 0x1a3   :  { %v1583_v31 = vadd.f32 %v1581_v23, %v1578_v56  ;;  %v1586_v52 = vmul.f32 %v10627_v26, %v8704_v25  ;;  %v4156_v26 = vld [vmem:[%s9805_s2 + $0x460] sm:$0xf]  ;;  %v1590_v62 = vmul.f32 %v8757_v2, %v8746_v59  ;;  %v4141_v56 = vor.u32 %v4345_v9, %v4140_v6  ;;  %v10679_v9 = vld [vmem:[#allocation15_spill] sm:$0xff] }
 0x1a4   :  { %v1513_v15 = vadd.f32 %v1512_v18, %v1509_v49  ;;  %v1514_v44 = vadd.f32 %v1512_v18, %v1510_v3  ;;  %2910 = vmatpush.bf16.msra.mxu3 %v3889_v32  ;;  %v1587_v40 = vadd.f32 %v1585_v43, %v1582_v8  ;;  %v4129_v24 = vor.u32 %v8723_v60, %v8737_v53  ;;  %v8785_v28 = vld [vmem:[%s9803_s0 + $0xc0] sm:$0xff] }
 0x1a5   :  { %v1588_v45 = vadd.f32 %v1586_v52, %v1583_v31  ;;  %v4161_v57 = vor.u32 %v4347_v4, %v4158_v46  ;;  %v1591_v29 = vmul.f32 %v7968_v27, %v8746_v59  ;;  %v8768_v18 = vstv %s8688_s26  ;;  %v4341_v27 = vld [vmem:[%s9805_s2 + $0x42c] sm:$0xf0]  ;;  %10678 = vst [vmem:[#allocation53_spill] sm:$0xff] %v8785_v28  ;;  %v8814_v53 = vld [vmem:[%s9803_s0 + $0xe0] sm:$0xff]  ;;  %s9008_s26 = sld [smem:[#allocation2 + $0x5d]] }
 0x1a6   :  { %vm1515_vm5 = vcmp.ge.f32.partialorder %v1513_v15, 0.0  ;;  %v1517_v14 = vmul.f32 0.01, %v1513_v15  ;;  %vm1516_vm6 = vcmp.ge.f32.partialorder %v1514_v44, 0.0  ;;  %v1518_v12 = vmul.f32 0.01, %v1514_v44 }
 0x1a7   :  { %v1592_v23 = vadd.f32 %v1590_v62, %v1587_v40  ;;  %v4157_v49 = vor.u32 %v4349_v0, %v4156_v26  ;;  %v1593_v3 = vadd.f32 %v1591_v29, %v1588_v45  ;;  %v1595_v6 = vmul.f32 %v8785_v28, %v8768_v18  ;;  %v8805_v52 = vld [vmem:[%s9803_s0 + $0xd0] sm:$0xff]  ;;  %v4335_v26 = vld [vmem:[%s9805_s2 + $0x404] sm:$0xf] }
 0x1a8   :  { %v1519_v17 = vsel %vm1515_vm5, %v1513_v15, %v1517_v14  ;;  %v1520_v55 = vsel %vm1516_vm6, %v1514_v44, %v1518_v12  ;;  %v1596_v60 = vmul.f32 %v10679_v9, %v8768_v18  ;;  %v8792_v31 = vstv %s8696_s22  ;;  %v4110_v62 = vld [vmem:[%s9805_s2 + $0x410] sm:$0xf0]  ;;  %v4337_v14 = vld [vmem:[%s9805_s2 + $0x40c] sm:$0xf0]  ;;  %v8888_v9 = vld [vmem:[%s9805_s2 + $0x458] sm:$0xf0] }
 0x1a9   :  { %v8770_v32 = vpack.c.bf16 %v1519_v17, %v1519_v17  ;;  %v8772_v8 = vpack.c.bf16 %v1520_v55, %v1520_v55  ;;  %10680 = vst [vmem:[#allocation50_spill] sm:$0xff] %v8792_v31  ;;  %v8795_v43 = vstv %s8701_s27  ;;  %v1600_v15 = vmul.f32 %v8805_v52, %v8792_v31  ;;  %v8848_v12 = vld [vmem:[%s9805_s2 + $0x3f0] sm:$0xf0]  ;;  %v8858_v29 = vld [vmem:[%s9805_s2 + $0x3ec] sm:$0xf0]  ;;  %s9228_s22 = sld [smem:[#allocation2 + $0x62]] }
 0x1aa   :  { %10681 = vst [vmem:[#allocation6_spill] sm:$0xff] %v8795_v43  ;;  %v1601_v44 = vmul.f32 %v7995_v33, %v8792_v31  ;;  %v1605_v4 = vmul.f32 %v8814_v53, %v8795_v43  ;;  %v8819_v46 = vstv %s8712_s10  ;;  %v1597_v33 = vadd.f32 %v1595_v6, %v1592_v23  ;;  %v8863_v23 = vld [vmem:[%s9803_s0 + $0xf0] sm:$0xff] }
 0x1ab   :  { %2885 = vmatmul.bf16.vlgmr.msra.gmra.mxu0 %v8770_v32  ;;  %4023 = vmatmul.msk.bf16.vlgmr.msrb.gmra.mxu1 %vm2235_vm1, %v8772_v8  ;;  %10682 = vst [vmem:[#allocation11_spill] sm:$0xff] %v8819_v46  ;;  %v1598_v0 = vadd.f32 %v1596_v60, %v1593_v3  ;;  %v1606_v40 = vmul.f32 %v8004_v58, %v8795_v43  ;;  %v8843_v58 = vld [vmem:[%s9805_s2 + $0x3e4] sm:$0xf]  ;;  %v8893_v60 = vld [vmem:[%s9805_s2 + $0x3c0] sm:$0xf] }
 0x1ac   :  { %3206 = vmatpush.bf16.msra.mxu0 %v4145_v11  ;;  %2859 = vmatmul.bf16.vlgmr.msra.gmra.mxu2 %v8770_v32  ;;  %v4125_v45 = vor.u32 %v4341_v27, %v4124_v36  ;;  %v4108_v11 = vld [vmem:[%s9805_s2 + $0x400] sm:$0xf]  ;;  %v1602_v17 = vadd.f32 %v1600_v15, %v1597_v33  ;;  %v8870_v3 = vld [vmem:[%s9805_s2 + $0x3c4] sm:$0xf]  ;;  %v8875_v36 = vld [vmem:[%s9805_s2 + $0x3d0] sm:$0xf0]  ;;  %v8883_v27 = vstv %s8763_s14  ;;  %v4113_v6 = vor.u32 %v4335_v26, %v4110_v62 }
 0x1ad   :  { %3180 = vmatpush.bf16.msra.mxu2 %v4141_v56  ;;  %4022 = vmatmul.msk.bf16.vlgmr.msrb.gmra.mxu3 %vm2235_vm1, %v8772_v8  ;;  %v8853_v56 = vld [vmem:[%s9805_s2 + $0x3e0] sm:$0xf]  ;;  %v1603_v55 = vadd.f32 %v1601_v44, %v1598_v0  ;;  %10683 = vst [vmem:[#allocation55_spill] sm:$0xff] %v8883_v27  ;;  %v8898_v15 = vld [vmem:[%s9805_s2 + $0x3cc] sm:$0xf0]  ;;  %v4109_v26 = vor.u32 %v4337_v14, %v4108_v11 }
 0x1ae   :  { %3226 = vmatpush.bf16.msrb.mxu1 %v4161_v57  ;;  %3200 = vmatpush.bf16.msrb.mxu3 %v4157_v49  ;;  %v1610_v57 = vmul.f32 %v8863_v23, %v8819_v46  ;;  %v8880_v49 = vld [vmem:[%s9805_s2 + $0x44c] sm:$0xf]  ;;  %v1607_v44 = vadd.f32 %v1605_v4, %v1602_v17  ;;  %v8905_v0 = vld [vmem:[%s9805_s2 + $0x3a4] sm:$0xf]  ;;  %v8910_v62 = vld [vmem:[%s9805_s2 + $0x3b0] sm:$0xf0]  ;;  %v1672_v13 = vmul.f32 %v8551_v30, %v8502_v41  ;;  %v8967_v30 = vstv %s8780_s24 }
 0x1af   :  { %v1608_v33 = vadd.f32 %v1606_v40, %v1603_v55  ;;  %v8915_v4 = vld [vmem:[%s9805_s2 + $0x42c] sm:$0xf]  ;;  %v1671_v40 = vmul.f32 %v8541_v10, %v8502_v41  ;;  %v8929_v11 = vld [vmem:[%s9805_s2 + $0x3a0] sm:$0xf]  ;;  %v8934_v14 = vld [vmem:[%s9805_s2 + $0x3ac] sm:$0xf0]  ;;  %v1670_v55 = vmul.f32 %v8518_v39, %v8467_v47  ;;  %v4097_v28 = vor.u32 %v8843_v58, %v8848_v12 }
 0x1b0   :  { %3207 = vmatpush.bf16.msra.mxu0 %v4129_v24  ;;  %v1611_v24 = vmul.f32 %v10633_v35, %v8819_v46  ;;  %v1669_v35 = vmul.f32 %v8511_v5, %v8467_v47  ;;  %v1612_v17 = vadd.f32 %v1610_v57, %v1607_v44  ;;  %v8939_v5 = vld [vmem:[%s9803_s0 + $0x100] sm:$0xff]  ;;  %v4093_v57 = vor.u32 %v8858_v29, %v8853_v56  ;;  %v8964_v39 = vld [vmem:[%s9805_s2 + $0x40c] sm:$0xf]  ;;  %v8976_v56 = vld [vmem:[%s9805_s2 + $0x418] sm:$0xf0] }
 0x1b1   :  { %3181 = vmatpush.bf16.msra.mxu2 %v4125_v45  ;;  %v8924_v45 = vld [vmem:[%s9805_s2 + $0x438] sm:$0xf0]  ;;  %10684 = vst [vmem:[#allocation21_spill] sm:$0xff] %v8939_v5  ;;  %v1615_v10 = vmul.f32 %v8939_v5, %v8883_v27  ;;  %v8954_v44 = vld [vmem:[%s9805_s2 + $0x384] sm:$0xf]  ;;  %v4081_v58 = vor.u32 %v8870_v3, %v8875_v36  ;;  %v4153_v12 = vor.u32 %v8880_v49, %v8888_v9 }
 0x1b2   :  { %10685 = vst [vmem:[#allocation28_spill] sm:$0xff] %v8967_v30  ;;  %v4148_v29 = vld [vmem:[%s9805_s2 + $0x448] sm:$0xf]  ;;  %v1613_v41 = vadd.f32 %v1611_v24, %v1608_v33  ;;  %v1616_v3 = vmul.f32 %v10637_v37, %v8883_v27  ;;  %v4077_v36 = vor.u32 %v8898_v15, %v8893_v60  ;;  %v4065_v49 = vor.u32 %v8905_v0, %v8910_v62  ;;  %v8995_v46 = vld [vmem:[%s9803_s0 + $0x120] sm:$0xff]  ;;  %v9125_v0 = vld [vmem:[%s9803_s0 + $0x98] sm:$0xff] }
 0x1b3   :  { %v4137_v9 = vor.u32 %v8915_v4, %v8924_v45  ;;  %v1673_v47 = vadd.f32 %v1671_v40, %v1669_v35  ;;  %v1617_v5 = vadd.f32 %v1615_v10, %v1612_v17  ;;  %10686 = vst [vmem:[#allocation45_spill] sm:$0xff] %v8995_v46  ;;  %v1620_v37 = vmul.f32 %v8995_v46, %v8967_v30  ;;  %v9013_v40 = vld [vmem:[%s9805_s2 + $0x380] sm:$0xf]  ;;  %v10687_v10 = vld [vmem:[#allocation16_spill] sm:$0xff] }
 0x1b4   :  { %3208 = vmatpush.bf16.msra.mxu0 %v4113_v6  ;;  %v4346_v6 = vld [vmem:[%s9805_s2 + $0x454] sm:$0xf0]  ;;  %v9000_v33 = vstv %s8800_s29  ;;  %v1674_v24 = vadd.f32 %v1672_v13, %v1670_v55  ;;  %v9018_v13 = vld [vmem:[%s9805_s2 + $0x38c] sm:$0xf0]  ;;  %v1618_v17 = vadd.f32 %v1616_v3, %v1613_v41  ;;  %v1621_v55 = vmul.f32 %v10687_v10, %v8967_v30 }
 0x1b5   :  { %3182 = vmatpush.bf16.msra.mxu2 %v4109_v26  ;;  %v4149_v35 = vor.u32 %v4346_v6, %v4148_v29  ;;  %v1675_v29 = vmul.f32 %v8580_v48, %v8523_v61  ;;  %v9029_v6 = vld [vmem:[%s9803_s0 + $0x130] sm:$0xff]  ;;  %v9034_v15 = vstv %s8825_s25  ;;  %v1679_v41 = vmul.f32 %v8612_v7, %v8564_v19  ;;  %s9049_s25 = sld [smem:[#allocation2 + $0x5e]]  ;;  %v9107_v7 = vld [vmem:[%s9803_s0 + $0x88] sm:$0xff] }
 0x1b6   :  { %10688 = vst [vmem:[#allocation33_spill] sm:$0xff] %v9029_v6  ;;  %v1625_v26 = vmul.f32 %v9029_v6, %v9000_v33  ;;  %v1680_v48 = vmul.f32 %v8622_v1, %v8564_v19  ;;  %v1622_v3 = vadd.f32 %v1620_v37, %v1617_v5  ;;  %v4521_v1 = vld [vmem:[%s9803_s0 + $0x58] sm:$0xff]  ;;  %v1623_v37 = vadd.f32 %v1621_v55, %v1618_v17  ;;  %v4030_v55 = vld [vmem:[%s9805_s2 + $0x370] sm:$0xf0] }
 0x1b7   :  { %v1677_v10 = vadd.f32 %v1675_v29, %v1673_v47  ;;  %v1626_v47 = vmul.f32 %v10613_v54, %v9000_v33  ;;  %v1684_v5 = vmul.f32 %v4521_v1, %v8601_v16  ;;  %v1687_v29 = vmul.f32 %v8672_v21, %v8627_v20  ;;  %v9065_v54 = vld [vmem:[%s9805_s2 + $0x364] sm:$0xf]  ;;  %10692 = vst [vmem:[#allocation38_spill] sm:$0xff] %v9107_v7 }
 0x1b8   :  { %3209 = vmatpush.bf16.msra.mxu0 %v4097_v28  ;;  %v1676_v28 = vmul.f32 %v8587_v38, %v8523_v61  ;;  %v1696_v62 = vmul.f32 %v9125_v0, %v8679_v42  ;;  %v10693_v4 = vor.u32 %v8934_v14, %v8929_v11  ;;  %v9146_v11 = vld [vmem:[%s9803_s0 + $0x158] sm:$0xff] }
 0x1b9   :  { %3183 = vmatpush.bf16.msra.mxu2 %v4093_v57  ;;  %v4520_v57 = vld [vmem:[%s9803_s0 + $0x50] sm:$0xff]  ;;  %10694 = vst [vmem:[#allocation22_spill] sm:$0xff] %v9146_v11 }
 0x1ba   :  { %v1678_v38 = vadd.f32 %v1676_v28, %v1674_v24  ;;  %v1683_v60 = vmul.f32 %v4520_v57, %v8601_v16  ;;  %v1681_v24 = vadd.f32 %v1679_v41, %v1677_v10  ;;  %v4332_v28 = vld [vmem:[%s9805_s2 + $0x3ec] sm:$0xf]  ;;  %v4102_v41 = vld [vmem:[%s9805_s2 + $0x3f8] sm:$0xf0]  ;;  %v9102_v57 = vstv %s9008_s26  ;;  %s9120_s26 = sld [smem:[#allocation2 + $0x60]] }
 0x1bb   :  { %2937 = vmatmul.bf16.vlgmr.msra.gmra.mxu1 %v8770_v32  ;;  %4025 = vmatmul.msk.bf16.vlgmr.msrb.gmra.mxu0 %vm2235_vm1, %v8772_v8  ;;  %v1636_v14 = vmul.f32 %v9146_v11, %v9102_v57 }
 0x1bc   :  { %3210 = vmatpush.bf16.msra.mxu0 %v4081_v58  ;;  %3258 = vmatpush.bf16.msra.mxu1 %v4153_v12  ;;  %v9072_v58 = vld [vmem:[%s9803_s0 + $0x140] sm:$0xff]  ;;  %v1682_v17 = vadd.f32 %v1680_v48, %v1678_v38  ;;  %v1627_v48 = vadd.f32 %v1625_v26, %v1622_v3  ;;  %v1685_v10 = vadd.f32 %v1683_v60, %v1681_v24 }
 0x1bd   :  { %4024 = vmatmul.msk.bf16.vlgmr.msrb.gmra.mxu2 %vm2235_vm1, %v8772_v8  ;;  %2911 = vmatmul.bf16.vlgmr.msra.gmra.mxu3 %v8770_v32  ;;  %10689 = vst [vmem:[#allocation17_spill] sm:$0xff] %v9072_v58  ;;  %v1630_v12 = vmul.f32 %v9072_v58, %v9034_v15  ;;  %v9079_v32 = vld [vmem:[%s9803_s0 + $0x78] sm:$0xff]  ;;  %v1691_v38 = vmul.f32 %v8684_v22, %v8652_v50 }
 0x1be   :  { %10690 = vst [vmem:[#allocation47_spill] sm:$0xff] %v9079_v32  ;;  %v1688_v8 = vmul.f32 %v9079_v32, %v8627_v20  ;;  %3184 = vmatpush.bf16.msra.mxu2 %v4077_v36  ;;  %3232 = vmatpush.bf16.msra.mxu3 %v4149_v35  ;;  %v9097_v36 = vld [vmem:[%s9803_s0 + $0x148] sm:$0xff]  ;;  %v1686_v1 = vadd.f32 %v1684_v5, %v1682_v17 }
 0x1bf   :  { %10691 = vst [vmem:[#allocation57_spill] sm:$0xff] %v9097_v36  ;;  %v1631_v35 = vmul.f32 %v9097_v36, %v9034_v15  ;;  %v1692_v60 = vmul.f32 %v9107_v7, %v8652_v50  ;;  %v1628_v26 = vadd.f32 %v1626_v47, %v1623_v37  ;;  %v1689_v3 = vadd.f32 %v1687_v29, %v1685_v10 }
 0x1c0   :  { %3211 = vmatpush.bf16.msra.mxu0 %v4065_v49  ;;  %3259 = vmatpush.bf16.msra.mxu1 %v4137_v9  ;;  %v1695_v5 = vmul.f32 %v8728_v63, %v8679_v42  ;;  %v4033_v24 = vor.u32 %v9065_v54, %v4030_v55  ;;  %v4105_v17 = vor.u32 %v4332_v28, %v4102_v41  ;;  %v9137_v49 = vld [vmem:[%s9803_s0 + $0x150] sm:$0xff]  ;;  %v9151_v29 = vstv %s9049_s25 }
 0x1c1   :  { %v1690_v46 = vadd.f32 %v1688_v8, %v1686_v1  ;;  %v1632_v45 = vadd.f32 %v1630_v12, %v1627_v48  ;;  %v1635_v9 = vmul.f32 %v9137_v49, %v9102_v57  ;;  %v1693_v47 = vadd.f32 %v1691_v38, %v1689_v3  ;;  %v9156_v12 = vld [vmem:[%s9803_s0 + $0xa8] sm:$0xff]  ;;  %v9200_v3 = vld [vmem:[%s9803_s0 + $0xd8] sm:$0xff] }
 0x1c2   :  { %3185 = vmatpush.bf16.msra.mxu2 %v10693_v4  ;;  %v1699_v37 = vmul.f32 %v8757_v2, %v8704_v25  ;;  %v1700_v8 = vmul.f32 %v9156_v12, %v8704_v25  ;;  %v10695_v55 = vor.u32 %v8954_v44, %v8959_v34  ;;  %v10696_v28 = vor.u32 %v8964_v39, %v8976_v56  ;;  %v9184_v56 = vld [vmem:[%s9803_s0 + $0x160] sm:$0xff] }
 0x1c3   :  { %v1694_v54 = vadd.f32 %v1692_v60, %v1690_v46  ;;  %v1633_v41 = vadd.f32 %v1631_v35, %v1628_v26  ;;  %v1697_v48 = vadd.f32 %v1695_v5, %v1693_v47  ;;  %v9169_v46 = vld [vmem:[%s9803_s0 + $0xb0] sm:$0xff]  ;;  %v9174_v38 = vstv %s9067_s1  ;;  %10700 = vst [vmem:[#allocation39_spill] sm:$0xff] %v9184_v56  ;;  %s9733_s1 = sld [smem:[#allocation2 + $0x67]] }
 0x1c4   :  { %3212 = vmatpush.bf16.msra.mxu0 %v10695_v55  ;;  %3260 = vmatpush.bf16.msra.mxu1 %v10696_v28  ;;  %10697 = vst [vmem:[#allocation18_spill] sm:$0xff] %v9169_v46  ;;  %v1703_v10 = vmul.f32 %v9169_v46, %v8746_v59  ;;  %v1704_v34 = vmul.f32 %v8270_v51, %v8746_v59  ;;  %v9193_v51 = vld [vmem:[%s9803_s0 + $0x168] sm:$0xff] }
 0x1c5   :  { %10698 = vst [vmem:[#allocation7_spill] sm:$0xff] %v9174_v38  ;;  %v1698_v1 = vadd.f32 %v1696_v62, %v1694_v54  ;;  %v10699_v44 = vor.u32 %v9018_v13, %v9013_v40  ;;  %v1637_v39 = vadd.f32 %v1635_v9, %v1632_v45  ;;  %v1640_v35 = vmul.f32 %v9184_v56, %v9151_v29  ;;  %v9209_v9 = vld [vmem:[%s9803_s0 + $0x180] sm:$0xff] }
 0x1c6   :  { %v1701_v60 = vadd.f32 %v1699_v37, %v1697_v48  ;;  %v1707_v26 = vmul.f32 %v8805_v52, %v8768_v18  ;;  %10701 = vst [vmem:[#allocation46_spill] sm:$0xff] %v9193_v51  ;;  %v1641_v40 = vmul.f32 %v9193_v51, %v9151_v29  ;;  %v1708_v5 = vmul.f32 %v9200_v3, %v8768_v18  ;;  %v9233_v48 = vld [vmem:[%s9803_s0 + $0xf8] sm:$0xff] }
 0x1c7   :  { %3186 = vmatpush.bf16.msra.mxu2 %v10699_v44  ;;  %v1702_v13 = vadd.f32 %v1700_v8, %v1698_v1  ;;  %v1638_v62 = vadd.f32 %v1636_v14, %v1633_v41  ;;  %v1711_v45 = vmul.f32 %v8814_v53, %v8792_v31  ;;  %10702 = vst [vmem:[#allocation40_spill] sm:$0xff] %v9209_v9  ;;  %v9214_v37 = vstv %s9120_s26 }
 0x1c8   :  { %3213 = vmatpush.bf16.msra.mxu0 %v4033_v24  ;;  %3261 = vmatpush.bf16.msra.mxu1 %v4105_v17  ;;  %v1705_v4 = vadd.f32 %v1703_v10, %v1701_v60  ;;  %v1645_v47 = vmul.f32 %v9209_v9, %v9174_v38  ;;  %10703 = vst [vmem:[#allocation35_spill] sm:$0xff] %v9214_v37  ;;  %v9219_v24 = vld [vmem:[%s9803_s0 + $0xe8] sm:$0xff]  ;;  %v9224_v8 = vstv %s9132_s28 }
 0x1c9   :  { %v1706_v54 = vadd.f32 %v1704_v34, %v1702_v13  ;;  %v1712_v17 = vmul.f32 %v9219_v24, %v8792_v31  ;;  %v1642_v14 = vadd.f32 %v1640_v35, %v1637_v39  ;;  %10704 = vst [vmem:[#allocation8_spill] sm:$0xff] %v9224_v8  ;;  %v1715_v28 = vmul.f32 %v8863_v23, %v8795_v43  ;;  %v10705_v34 = vld [vmem:[#allocation29_spill] sm:$0xff]  ;;  %v9244_v39 = vld [vmem:[%s9803_s0 + $0x190] sm:$0xff] }
 0x1ca   :  { %v1709_v55 = vadd.f32 %v1707_v26, %v1705_v4  ;;  %v1716_v10 = vmul.f32 %v9233_v48, %v8795_v43  ;;  %v1643_v1 = vadd.f32 %v1641_v40, %v1638_v62  ;;  %v1646_v44 = vmul.f32 %v10705_v34, %v9174_v38  ;;  %v9251_v26 = vld [vmem:[%s9803_s0 + $0x198] sm:$0xff]  ;;  %v9258_v13 = vld [vmem:[%s9803_s0 + $0x1a0] sm:$0xff]  ;;  %v10708_v4 = vld [vmem:[#allocation11_spill] sm:$0xff] }
 0x1cb   :  { %v1710_v41 = vadd.f32 %v1708_v5, %v1706_v54  ;;  %v1650_v35 = vmul.f32 %v9244_v39, %v9214_v37  ;;  %10706 = vst [vmem:[#allocation42_spill] sm:$0xff] %v9251_v26  ;;  %v1651_v40 = vmul.f32 %v9251_v26, %v9214_v37  ;;  %v1655_v5 = vmul.f32 %v9258_v13, %v9224_v8  ;;  %v10709_v54 = vld [vmem:[#allocation21_spill] sm:$0xff]  ;;  %v9267_v34 = vld [vmem:[%s9803_s0 + $0x1a8] sm:$0xff] }
 0x1cc   :  { %v1713_v60 = vadd.f32 %v1711_v45, %v1709_v55  ;;  %10707 = vst [vmem:[#allocation19_spill] sm:$0xff] %v9258_v13  ;;  %v1719_v45 = vmul.f32 %v10709_v54, %v10708_v4  ;;  %v1647_v55 = vadd.f32 %v1645_v47, %v1642_v14  ;;  %v1656_v46 = vmul.f32 %v9267_v34, %v9224_v8  ;;  %v9274_v37 = vld [vmem:[%s9803_s0 + $0x108] sm:$0xff]  ;;  %v4542_v47 = vld [vmem:[%s9803_s0 + $0x60] sm:$0xff] }
 0x1cd   :  { %v1714_v62 = vadd.f32 %v1712_v17, %v1710_v41  ;;  %10710 = vst [vmem:[#allocation10_spill] sm:$0xff] %v9267_v34  ;;  %v1720_v17 = vmul.f32 %v9274_v37, %v10708_v4  ;;  %v10711_v14 = vld [vmem:[#allocation5_spill] sm:$0xff]  ;;  %v4543_v8 = vld [vmem:[%s9803_s0 + $0x68] sm:$0xff]  ;;  %v1648_v26 = vadd.f32 %v1646_v44, %v1643_v1  ;;  %v1779_v44 = vmul.f32 %v8728_v63, %v8564_v19 }
 0x1ce   :  { %v1717_v9 = vadd.f32 %v1715_v28, %v1713_v60  ;;  %v1769_v13 = vmul.f32 %v4542_v47, %v10711_v14  ;;  %v1770_v28 = vmul.f32 %v4543_v8, %v10711_v14  ;;  %v10712_v60 = vld [vmem:[#allocation58_spill] sm:$0xff]  ;;  %v1776_v47 = vmul.f32 %v9107_v7, %v8523_v61  ;;  %v9297_v8 = vld [vmem:[%s9803_s0 + $0x110] sm:$0xff] }
 0x1cf   :  { %v1718_v41 = vadd.f32 %v1716_v10, %v1714_v62  ;;  %v1771_v34 = vmul.f32 %v8672_v21, %v10712_v60  ;;  %v1772_v10 = vmul.f32 %v9079_v32, %v10712_v60  ;;  %v1775_v62 = vmul.f32 %v8684_v22, %v8523_v61  ;;  %10713 = vst [vmem:[#allocation61_spill] sm:$0xff] %v9297_v8  ;;  %v10714_v22 = vld [vmem:[#allocation41_spill] sm:$0xff] }
 0x1d0   :  { %v1721_v4 = vadd.f32 %v1719_v45, %v1717_v9  ;;  %v1723_v21 = vmul.f32 %v9297_v8, %v8883_v27  ;;  %v1724_v32 = vmul.f32 %v10714_v22, %v8883_v27  ;;  %v1780_v9 = vmul.f32 %v9125_v0, %v8564_v19 }
 0x1d1   :  { %v1773_v1 = vadd.f32 %v1771_v34, %v1769_v13  ;;  %v1722_v60 = vadd.f32 %v1720_v17, %v1718_v41  ;;  %v1774_v14 = vadd.f32 %v1772_v10, %v1770_v28  ;;  %v1652_v45 = vadd.f32 %v1650_v35, %v1647_v55  ;;  %v10717_v35 = vld [vmem:[#allocation53_spill] sm:$0xff] }
 0x1d2   :  { %v9308_v61 = vstv %s9228_s22  ;;  %v1783_v43 = vmul.f32 %v8757_v2, %v8601_v16  ;;  %v1653_v8 = vadd.f32 %v1651_v40, %v1648_v26  ;;  %v9313_v13 = vstv %s9237_s18  ;;  %s4206_s18 = sld [smem:[#allocation2 + $0x68]] }
 0x1d3   :  { %10715 = vst [vmem:[#allocation12_spill] sm:$0xff] %v9308_v61  ;;  %v1777_v7 = vadd.f32 %v1775_v62, %v1773_v1  ;;  %v1778_v34 = vadd.f32 %v1776_v47, %v1774_v14  ;;  %v1784_v17 = vmul.f32 %v9156_v12, %v8601_v16  ;;  %v1725_v41 = vadd.f32 %v1723_v21, %v1721_v4  ;;  %v9324_v62 = vld [vmem:[%s9803_s0 + $0x138] sm:$0xff]  ;;  %v4546_v21 = vld [vmem:[%s9803_s0 + $0xc8] sm:$0xff] }
 0x1d4   :  { %10716 = vst [vmem:[#allocation59_spill] sm:$0xff] %v9313_v13  ;;  %v1727_v22 = vmul.f32 %v9029_v6, %v8967_v30  ;;  %v1787_v55 = vmul.f32 %v10717_v35, %v8627_v20  ;;  %v1726_v10 = vadd.f32 %v1724_v32, %v1722_v60  ;;  %v1728_v26 = vmul.f32 %v9324_v62, %v8967_v30  ;;  %v9335_v32 = vld [vmem:[%s9803_s0 + $0x1b0] sm:$0xff] }
 0x1d5   :  { %v1781_v28 = vadd.f32 %v1779_v44, %v1777_v7  ;;  %10718 = vst [vmem:[#allocation51_spill] sm:$0xff] %v9324_v62  ;;  %v1782_v40 = vadd.f32 %v1780_v9, %v1778_v34  ;;  %v1788_v4 = vmul.f32 %v4546_v21, %v8627_v20  ;;  %v1657_v7 = vadd.f32 %v1655_v5, %v1652_v45  ;;  %v9344_v44 = vld [vmem:[%s9803_s0 + $0x1b8] sm:$0xff] }
 0x1d6   :  { %v1660_v14 = vmul.f32 %v9335_v32, %v9308_v61  ;;  %v1791_v47 = vmul.f32 %v8805_v52, %v8652_v50  ;;  %v1658_v1 = vadd.f32 %v1656_v46, %v1653_v8  ;;  %v1661_v5 = vmul.f32 %v9344_v44, %v9308_v61 }
 0x1d7   :  { %v1785_v60 = vadd.f32 %v1783_v43, %v1781_v28  ;;  %v1786_v9 = vadd.f32 %v1784_v17, %v1782_v40  ;;  %v1792_v45 = vmul.f32 %v9200_v3, %v8652_v50  ;;  %v1729_v34 = vadd.f32 %v1727_v22, %v1725_v41  ;;  %v9361_v41 = vld [vmem:[%s9803_s0 + $0x1c0] sm:$0xff]  ;;  %v9370_v40 = vld [vmem:[%s9803_s0 + $0x1c8] sm:$0xff] }
 0x1d8   :  { %v1731_v43 = vmul.f32 %v9072_v58, %v9000_v33  ;;  %v1795_v46 = vmul.f32 %v8814_v53, %v8679_v42  ;;  %v1730_v8 = vadd.f32 %v1728_v26, %v1726_v10  ;;  %v1732_v35 = vmul.f32 %v9097_v36, %v9000_v33  ;;  %10719 = vst [vmem:[#allocation26_spill] sm:$0xff] %v9361_v41 }
 0x1d9   :  { %v1789_v28 = vadd.f32 %v1787_v55, %v1785_v60  ;;  %v1790_v21 = vadd.f32 %v1788_v4, %v1786_v9  ;;  %v1796_v61 = vmul.f32 %v9219_v24, %v8679_v42  ;;  %v1662_v17 = vadd.f32 %v1660_v14, %v1657_v7  ;;  %10720 = vst [vmem:[#allocation23_spill] sm:$0xff] %v9370_v40 }
 0x1da   :  { %v1665_v22 = vmul.f32 %v9361_v41, %v9313_v13  ;;  %v1799_v10 = vmul.f32 %v8863_v23, %v8704_v25  ;;  %v1663_v26 = vadd.f32 %v1661_v5, %v1658_v1  ;;  %v1666_v4 = vmul.f32 %v9370_v40, %v9313_v13 }
 0x1db   :  { %v1793_v55 = vadd.f32 %v1791_v47, %v1789_v28  ;;  %v1794_v7 = vadd.f32 %v1792_v45, %v1790_v21  ;;  %v1800_v14 = vmul.f32 %v9233_v48, %v8704_v25  ;;  %v1733_v60 = vadd.f32 %v1731_v43, %v1729_v34  ;;  %v10722_v34 = vld [vmem:[#allocation45_spill] sm:$0xff] }
 0x1dc   :  { %v1735_v47 = vmul.f32 %v9137_v49, %v9034_v15  ;;  %v1803_v1 = vmul.f32 %v10709_v54, %v8746_v59  ;;  %v1734_v5 = vadd.f32 %v1732_v35, %v1730_v8  ;;  %v1736_v28 = vmul.f32 %v9146_v11, %v9034_v15  ;;  %v4551_v8 = vld [vmem:[%s9803_s0 + $0x128] sm:$0xff] }
 0x1dd   :  { %v1797_v9 = vadd.f32 %v1795_v46, %v1793_v55  ;;  %v1798_v41 = vadd.f32 %v1796_v61, %v1794_v7  ;;  %v1804_v13 = vmul.f32 %v9274_v37, %v8746_v59  ;;  %v9384_v45 = vadd.f32 %v1665_v22, %v1662_v17 }
 0x1de   :  { %v1807_v43 = vmul.f32 %v10722_v34, %v8768_v18  ;;  %v9388_v40 = vadd.f32 %v1666_v4, %v1663_v26  ;;  %v1739_v46 = vmul.f32 %v9184_v56, %v9102_v57  ;;  %v1808_v61 = vmul.f32 %v4551_v8, %v8768_v18  ;;  %v9403_v4 = vld [vmem:[%s9803_s0 + $0x170] sm:$0xff] }
 0x1df   :  { %10721 = vst [vmem:[#allocation60_spill] sm:$0xff] %v9384_v45  ;;  %v1801_v21 = vadd.f32 %v1799_v10, %v1797_v9  ;;  %v1802_v55 = vadd.f32 %v1800_v14, %v1798_v41  ;;  %v1737_v35 = vadd.f32 %v1735_v47, %v1733_v60  ;;  %v1740_v17 = vmul.f32 %v9193_v51, %v9102_v57  ;;  %v10725_v60 = vld [vmem:[#allocation44_spill] sm:$0xff]  ;;  %v10728_v8 = vld [vmem:[#allocation35_spill] sm:$0xff] }
 0x1e0   :  { %10723 = vst [vmem:[#allocation52_spill] sm:$0xff] %v9388_v40  ;;  %v1811_v10 = vmul.f32 %v9029_v6, %v8792_v31  ;;  %v1738_v26 = vadd.f32 %v1736_v28, %v1734_v5  ;;  %v1743_v41 = vmul.f32 %v9403_v4, %v9151_v29  ;;  %v1812_v14 = vmul.f32 %v9324_v62, %v8792_v31  ;;  %v10726_v5 = vld [vmem:[#allocation6_spill] sm:$0xff]  ;;  %v10729_v40 = vld [vmem:[#allocation19_spill] sm:$0xff] }
 0x1e1   :  { %v1805_v22 = vadd.f32 %v1803_v1, %v1801_v21  ;;  %10724 = vst [vmem:[#allocation24_spill] sm:$0xff] %v9403_v4  ;;  %v1806_v7 = vadd.f32 %v1804_v13, %v1802_v55  ;;  %v1744_v47 = vmul.f32 %v10725_v60, %v9151_v29  ;;  %v1747_v9 = vmul.f32 %v9244_v39, %v9174_v38  ;;  %v10727_v21 = vld [vmem:[#allocation42_spill] sm:$0xff] }
 0x1e2   :  { %v1815_v28 = vmul.f32 %v9072_v58, %v10726_v5  ;;  %v1748_v34 = vmul.f32 %v10727_v21, %v9174_v38  ;;  %v9419_v45 = vmul.f32 %v10729_v40, %v10728_v8  ;;  %v1816_v55 = vmul.f32 %v9097_v36, %v10726_v5  ;;  %v10730_v60 = vld [vmem:[#allocation10_spill] sm:$0xff]  ;;  %v10733_v5 = vld [vmem:[#allocation56_spill] sm:$0xff] }
 0x1e3   :  { %v1809_v1 = vadd.f32 %v1807_v43, %v1805_v22  ;;  %v1810_v13 = vadd.f32 %v1808_v61, %v1806_v7  ;;  %v1741_v4 = vadd.f32 %v1739_v46, %v1737_v35  ;;  %v9425_v31 = vmul.f32 %v10730_v60, %v10728_v8  ;;  %v10731_v22 = vld [vmem:[#allocation11_spill] sm:$0xff]  ;;  %v10732_v35 = vld [vmem:[#allocation5_spill] sm:$0xff] }
 0x1e4   :  { %v1819_v58 = vmul.f32 %v9137_v49, %v10731_v22  ;;  %v1742_v62 = vadd.f32 %v1740_v17, %v1738_v26  ;;  %v1820_v38 = vmul.f32 %v9146_v11, %v10731_v22  ;;  %v1823_v61 = vmul.f32 %v9184_v56, %v8883_v27  ;;  %v10735_v17 = vld [vmem:[#allocation40_spill] sm:$0xff]  ;;  %v10738_v11 = vld [vmem:[#allocation38_spill] sm:$0xff] }
 0x1e5   :  { %v1813_v43 = vadd.f32 %v1811_v10, %v1809_v1  ;;  %v1814_v6 = vadd.f32 %v1812_v14, %v1810_v13  ;;  %v1824_v46 = vmul.f32 %v9193_v51, %v8883_v27  ;;  %v1869_v8 = vmul.f32 %v10733_v5, %v10732_v35  ;;  %v10734_v10 = vld [vmem:[#allocation47_spill] sm:$0xff]  ;;  %v10736_v14 = vld [vmem:[#allocation58_spill] sm:$0xff] }
 0x1e6   :  { %v1870_v1 = vmul.f32 %v10734_v10, %v10732_v35  ;;  %v1827_v26 = vmul.f32 %v10735_v17, %v8967_v30  ;;  %v10737_v13 = vld [vmem:[#allocation14_spill] sm:$0xff]  ;;  %v1872_v56 = vmul.f32 %v10738_v11, %v10736_v14  ;;  %v10739_v27 = vld [vmem:[#allocation43_spill] sm:$0xff] }
 0x1e7   :  { %v1817_v7 = vadd.f32 %v1815_v28, %v1813_v43  ;;  %v1818_v36 = vadd.f32 %v1816_v55, %v1814_v6  ;;  %v1871_v22 = vmul.f32 %v10737_v13, %v10736_v14  ;;  %v4553_v43 = vld [vmem:[%s9803_s0 + $0x188] sm:$0xff]  ;;  %v1875_v35 = vmul.f32 %v8728_v63, %v10739_v27 }
 0x1e8   :  { %v1828_v5 = vmul.f32 %v4553_v43, %v8967_v30  ;;  %v1876_v6 = vmul.f32 %v9125_v0, %v10739_v27  ;;  %v1874_v17 = vadd.f32 %v1872_v56, %v1870_v1  ;;  %v1879_v13 = vmul.f32 %v8757_v2, %v8564_v19  ;;  %v10740_v14 = vld [vmem:[#allocation18_spill] sm:$0xff]  ;;  %v4554_v27 = vld [vmem:[%s9803_s0 + $0xb8] sm:$0xff] }
 0x1e9   :  { %v1821_v28 = vadd.f32 %v1819_v58, %v1817_v7  ;;  %v1822_v55 = vadd.f32 %v1820_v38, %v1818_v36  ;;  %v1873_v10 = vadd.f32 %v1871_v22, %v1869_v8  ;;  %v1831_v58 = vmul.f32 %v9244_v39, %v9000_v33 }
 0x1ea   :  { %v1880_v7 = vmul.f32 %v9156_v12, %v8564_v19  ;;  %v1883_v43 = vmul.f32 %v10740_v14, %v8601_v16  ;;  %v1878_v51 = vadd.f32 %v1876_v6, %v1874_v17  ;;  %v1884_v36 = vmul.f32 %v4554_v27, %v8601_v16  ;;  %v10742_v6 = vld [vmem:[#allocation12_spill] sm:$0xff]  ;;  %v10746_v27 = vld [vmem:[#allocation59_spill] sm:$0xff] }
 0x1eb   :  { %v1825_v11 = vadd.f32 %v1823_v61, %v1821_v28  ;;  %v1826_v63 = vadd.f32 %v1824_v46, %v1822_v55  ;;  %v1877_v30 = vadd.f32 %v1875_v35, %v1873_v10  ;;  %v1745_v2 = vadd.f32 %v1743_v41, %v1741_v4  ;;  %v10741_v46 = vld [vmem:[#allocation8_spill] sm:$0xff]  ;;  %v10743_v55 = vld [vmem:[#allocation26_spill] sm:$0xff] }
 0x1ec   :  { %v1832_v38 = vmul.f32 %v10727_v21, %v9000_v33  ;;  %v1887_v19 = vmul.f32 %v8805_v52, %v8627_v20  ;;  %v1882_v8 = vadd.f32 %v1880_v7, %v1878_v51  ;;  %v1888_v22 = vmul.f32 %v9200_v3, %v8627_v20 }
 0x1ed   :  { %v1829_v0 = vadd.f32 %v1827_v26, %v1825_v11  ;;  %v1830_v12 = vadd.f32 %v1828_v5, %v1826_v63  ;;  %v1881_v56 = vadd.f32 %v1879_v13, %v1877_v30  ;;  %v1746_v61 = vadd.f32 %v1744_v47, %v1742_v62  ;;  %v4555_v63 = vld [vmem:[%s9803_s0 + $0x118] sm:$0xff] }
 0x1ee   :  { %v1755_v1 = vmul.f32 %v9335_v32, %v10741_v46  ;;  %v1835_v16 = vmul.f32 %v10729_v40, %v9034_v15  ;;  %v1891_v4 = vmul.f32 %v8814_v53, %v8652_v50  ;;  %v1886_v28 = vadd.f32 %v1884_v36, %v1882_v8 }
 0x1ef   :  { %v1833_v41 = vadd.f32 %v1831_v58, %v1829_v0  ;;  %v1885_v26 = vadd.f32 %v1883_v43, %v1881_v56  ;;  %v1892_v52 = vmul.f32 %v9219_v24, %v8652_v50  ;;  %v1749_v30 = vadd.f32 %v1747_v9, %v1745_v2  ;;  %v10745_v58 = vld [vmem:[#allocation61_spill] sm:$0xff] }
 0x1f0   :  { %v1756_v20 = vmul.f32 %v9344_v44, %v10741_v46  ;;  %v1836_v51 = vmul.f32 %v10730_v60, %v9034_v15  ;;  %v1895_v3 = vmul.f32 %v8863_v23, %v8679_v42  ;;  %v1834_v62 = vadd.f32 %v1832_v38, %v1830_v12  ;;  %v10747_v0 = vld [vmem:[#allocation33_spill] sm:$0xff] }
 0x1f1   :  { %v1889_v47 = vadd.f32 %v1887_v19, %v1885_v26  ;;  %v1890_v5 = vadd.f32 %v1888_v22, %v1886_v28  ;;  %v1896_v53 = vmul.f32 %v9233_v48, %v8679_v42  ;;  %v1750_v35 = vadd.f32 %v1748_v34, %v1746_v61  ;;  %v10744_v42 = vld [vmem:[#allocation23_spill] sm:$0xff]  ;;  %v9525_v22 = vld [vmem:[%s9803_s0 + $0x1d8] sm:$0xff] }
 0x1f2   :  { %v1759_v50 = vmul.f32 %v10743_v55, %v10742_v6  ;;  %v1839_v24 = vmul.f32 %v9335_v32, %v9102_v57  ;;  %v1899_v9 = vmul.f32 %v10709_v54, %v8704_v25  ;;  %v1837_v10 = vadd.f32 %v1835_v16, %v1833_v41  ;;  %v10750_v41 = vld [vmem:[#allocation17_spill] sm:$0xff] }
 0x1f3   :  { %v1893_v17 = vadd.f32 %v1891_v4, %v1889_v47  ;;  %v1894_v13 = vadd.f32 %v1892_v52, %v1890_v5  ;;  %v1900_v23 = vmul.f32 %v9274_v37, %v8704_v25  ;;  %v1753_v11 = vadd.f32 %v9419_v45, %v1749_v30  ;;  %v9510_v45 = vld [vmem:[%s9803_s0 + $0x1d0] sm:$0xff]  ;;  %v10749_v4 = vld [vmem:[#allocation50_spill] sm:$0xff] }
 0x1f4   :  { %v1760_v48 = vmul.f32 %v10744_v42, %v10742_v6  ;;  %v1840_v34 = vmul.f32 %v9344_v44, %v9102_v57  ;;  %v1903_v7 = vmul.f32 %v10745_v58, %v8746_v59  ;;  %v1838_v14 = vadd.f32 %v1836_v51, %v1834_v62  ;;  %v10752_v62 = vld [vmem:[#allocation7_spill] sm:$0xff]  ;;  %v4559_v5 = vld [vmem:[%s9803_s0 + $0x1e8] sm:$0xff] }
 0x1f5   :  { %v1897_v43 = vadd.f32 %v1895_v3, %v1893_v17  ;;  %v1898_v54 = vadd.f32 %v1896_v53, %v1894_v13  ;;  %v1904_v25 = vmul.f32 %v4555_v63, %v8746_v59  ;;  %v1754_v37 = vadd.f32 %v9425_v31, %v1750_v35  ;;  %v10748_v31 = vld [vmem:[#allocation51_spill] sm:$0xff]  ;;  %v4558_v3 = vld [vmem:[%s9803_s0 + $0x1e0] sm:$0xff]  ;;  %v10753_v35 = vld [vmem:[#allocation6_spill] sm:$0xff] }
 0x1f6   :  { %v9514_v36 = vmul.f32 %v9510_v45, %v10746_v27  ;;  %v1843_v2 = vmul.f32 %v10743_v55, %v9151_v29  ;;  %v1907_v38 = vmul.f32 %v10747_v0, %v8768_v18  ;;  %v1841_v19 = vadd.f32 %v1839_v24, %v1837_v10 }
 0x1f7   :  { %v1901_v12 = vadd.f32 %v1899_v9, %v1897_v43  ;;  %v1902_v59 = vadd.f32 %v1900_v23, %v1898_v54  ;;  %v1908_v56 = vmul.f32 %v10748_v31, %v8768_v18  ;;  %v1757_v8 = vadd.f32 %v1755_v1, %v1753_v11  ;;  %v10751_v18 = vld [vmem:[#allocation57_spill] sm:$0xff]  ;;  %v9554_v11 = vld [vmem:[%s9803_s0 + $0x1f0] sm:$0xff] }
 0x1f8   :  { %v9529_v61 = vmul.f32 %v9525_v22, %v10746_v27  ;;  %v1844_v16 = vmul.f32 %v10744_v42, %v9151_v29  ;;  %v1911_v26 = vmul.f32 %v10750_v41, %v10749_v4  ;;  %v1842_v28 = vadd.f32 %v1840_v34, %v1838_v14  ;;  %v10755_v34 = vld [vmem:[#allocation35_spill] sm:$0xff]  ;;  %v4564_v41 = vld [vmem:[%s9803_s0 + $0x178] sm:$0xff] }
 0x1f9   :  { %v1905_v52 = vadd.f32 %v1903_v7, %v1901_v12  ;;  %v1906_v30 = vadd.f32 %v1904_v25, %v1902_v59  ;;  %v1912_v1 = vmul.f32 %v10751_v18, %v10749_v4  ;;  %v1758_v51 = vadd.f32 %v1756_v20, %v1754_v37  ;;  %v10754_v20 = vld [vmem:[#allocation22_spill] sm:$0xff]  ;;  %v10756_v14 = vld [vmem:[#allocation11_spill] sm:$0xff] }
 0x1fa   :  { %v1847_v47 = vmul.f32 %v4558_v3, %v10752_v62  ;;  %v1848_v53 = vmul.f32 %v4559_v5, %v10752_v62  ;;  %v1915_v24 = vmul.f32 %v9137_v49, %v10753_v35  ;;  %v1845_v9 = vadd.f32 %v1843_v2, %v1841_v19  ;;  %v9561_v49 = vld [vmem:[%s9803_s0 + $0x1f8] sm:$0xff]  ;;  %v10757_v43 = vld [vmem:[#allocation39_spill] sm:$0xff]  ;;  %v10758_v37 = vld [vmem:[#allocation46_spill] sm:$0xff] }
 0x1fb   :  { %v1909_v10 = vadd.f32 %v1907_v38, %v1905_v52  ;;  %v1910_v17 = vadd.f32 %v1908_v56, %v1906_v30  ;;  %v1916_v13 = vmul.f32 %v10754_v20, %v10753_v35  ;;  %v9549_v23 = vadd.f32 %v1759_v50, %v1757_v8  ;;  %v9574_v38 = vld [vmem:[%s9803_s0 + $0x200] sm:$0xff]  ;;  %v9581_v12 = vld [vmem:[%s9803_s0 + $0x208] sm:$0xff]  ;;  %v10759_v31 = vld [vmem:[#allocation55_spill] sm:$0xff] }
 0x1fc   :  { %v1851_v58 = vmul.f32 %v9554_v11, %v10755_v34  ;;  %v1852_v7 = vmul.f32 %v9561_v49, %v10755_v34  ;;  %v1919_v50 = vmul.f32 %v10757_v43, %v10756_v14  ;;  %v1846_v54 = vadd.f32 %v1844_v16, %v1842_v28  ;;  %v9596_v28 = vld [vmem:[%s9803_s0 + $0x210] sm:$0xff]  ;;  %v9605_v30 = vld [vmem:[%s9803_s0 + $0x218] sm:$0xff]  ;;  %v4132_v35 = vld [vmem:[%s9805_s2 + $0x428] sm:$0xf] }
 0x1fd   :  { %v1913_v63 = vadd.f32 %v1911_v26, %v1909_v10  ;;  %v1914_v25 = vadd.f32 %v1912_v1, %v1910_v17  ;;  %v1920_v2 = vmul.f32 %v10758_v37, %v10756_v14  ;;  %v9569_v0 = vadd.f32 %v1760_v48, %v1758_v51  ;;  %v10760_v48 = vld [vmem:[#allocation24_spill] sm:$0xff]  ;;  %v4317_v5 = vld [vmem:[%s9805_s2 + $0x36c] sm:$0xf0]  ;;  %v4116_v37 = vld [vmem:[%s9805_s2 + $0x408] sm:$0xf] }
 0x1fe   :  { %v1855_v19 = vmul.f32 %v9574_v38, %v10741_v46  ;;  %v9585_v59 = vmul.f32 %v9581_v12, %v10741_v46  ;;  %v1923_v56 = vmul.f32 %v10760_v48, %v10759_v31  ;;  %v1849_v8 = vadd.f32 %v1847_v47, %v1845_v9  ;;  %v10761_v1 = vld [vmem:[#allocation28_spill] sm:$0xff]  ;;  %v4028_v47 = vld [vmem:[%s9805_s2 + $0x360] sm:$0xf]  ;;  %v4100_v48 = vld [vmem:[%s9805_s2 + $0x3e8] sm:$0xf] }
 0x1ff   :  { %v1917_v16 = vadd.f32 %v1915_v24, %v1913_v63  ;;  %v1918_v4 = vadd.f32 %v1916_v13, %v1914_v25  ;;  %v1924_v26 = vmul.f32 %v4564_v41, %v10759_v31  ;;  %v9600_v52 = vmul.f32 %v9596_v28, %v10742_v6  ;;  %v4086_v20 = vld [vmem:[%s9805_s2 + $0x3d8] sm:$0xf0]  ;;  %v4320_v41 = vld [vmem:[%s9805_s2 + $0x38c] sm:$0xf] }
 0x200   :  { %v9609_v18 = vmul.f32 %v9605_v30, %v10742_v6  ;;  %v1927_v51 = vmul.f32 %v9244_v39, %v10761_v1  ;;  %v1928_v3 = vmul.f32 %v10727_v21, %v10761_v1  ;;  %v1850_v24 = vadd.f32 %v1848_v53, %v1846_v54  ;;  %v4342_v39 = vld [vmem:[%s9805_s2 + $0x434] sm:$0xf0]  ;;  %v4328_v21 = vld [vmem:[%s9805_s2 + $0x3cc] sm:$0xf]  ;;  %v4070_v31 = vld [vmem:[%s9805_s2 + $0x3b8] sm:$0xf0] }
 0x201   :  { %v1921_v9 = vadd.f32 %v1919_v50, %v1917_v16  ;;  %v1922_v10 = vadd.f32 %v1920_v2, %v1918_v4  ;;  %v4029_v17 = vor.u32 %v4317_v5, %v4028_v47  ;;  %v1931_v13 = vmul.f32 %v10729_v40, %v9000_v33  ;;  %v4338_v40 = vld [vmem:[%s9805_s2 + $0x414] sm:$0xf0]  ;;  %v4164_v1 = vld [vmem:[%s9805_s2 + $0x468] sm:$0xf] }
 0x202   :  { %v1932_v53 = vmul.f32 %v10730_v60, %v9000_v33  ;;  %v4133_v14 = vor.u32 %v4342_v39, %v4132_v35  ;;  %v4089_v43 = vor.u32 %v4328_v21, %v4086_v20  ;;  %v1853_v50 = vadd.f32 %v1851_v58, %v1849_v8  ;;  %v4324_v33 = vld [vmem:[%s9805_s2 + $0x3ac] sm:$0xf]  ;;  %v2248_v60 = vpop.f32.mrf.mxu0  ;;  %v2261_v58 = vpop.f32.mrf.mxu1  ;;  %v4350_v5 = vld [vmem:[%s9805_s2 + $0x474] sm:$0xf0]  ;;  %v4038_v21 = vld [vmem:[%s9805_s2 + $0x378] sm:$0xf0] }
 0x203   :  { %v1925_v54 = vadd.f32 %v1923_v56, %v1921_v9  ;;  %v1926_v63 = vadd.f32 %v1924_v26, %v1922_v10  ;;  %v1935_v25 = vmul.f32 %v9335_v32, %v9034_v15  ;;  %3187 = vmatpush.bf16.msra.mxu2 %v4029_v17  ;;  %v1936_v2 = vmul.f32 %v9344_v44, %v9034_v15  ;;  %v4334_v56 = vld [vmem:[%s9805_s2 + $0x3f4] sm:$0xf0]  ;;  %v4054_v26 = vld [vmem:[%s9805_s2 + $0x398] sm:$0xf0] }
 0x204   :  { %3233 = vmatpush.bf16.msra.mxu3 %v4133_v14  ;;  %3262 = vmatpush.bf16.msra.mxu1 %v4089_v43  ;;  %v4117_v32 = vor.u32 %v4338_v40, %v4116_v37  ;;  %v9659_v8 = vadd.f32 %v2261_v58, %v2248_v60  ;;  %v1854_v16 = vadd.f32 %v1852_v7, %v1850_v24  ;;  %v4568_v14 = vld [vmem:[%s9803_s0 + $0x228] sm:$0xff] }
 0x205   :  { %v1929_v4 = vadd.f32 %v1927_v51, %v1925_v54  ;;  %v1930_v15 = vadd.f32 %v1928_v3, %v1926_v63  ;;  %v4073_v44 = vor.u32 %v4324_v33, %v4070_v31  ;;  %v9672_v47 = vadd.f32 %v9514_v36, %v9549_v23  ;;  %v4348_v36 = vld [vmem:[%s9805_s2 + $0x46c] sm:$0xf]  ;;  %v4166_v23 = vld [vmem:[%s9805_s2 + $0x478] sm:$0xf0] }
 0x206   :  { %v1939_v7 = vmul.f32 %v10743_v55, %v9102_v57  ;;  %v1940_v51 = vmul.f32 %v10744_v42, %v9102_v57  ;;  %v1943_v3 = vmul.f32 %v9510_v45, %v9151_v29  ;;  %v1857_v35 = vadd.f32 %v1855_v19, %v1853_v50  ;;  %v4084_v45 = vld [vmem:[%s9805_s2 + $0x3c8] sm:$0xf] }
 0x207   :  { %v1933_v24 = vadd.f32 %v1931_v13, %v1929_v4  ;;  %v1934_v9 = vadd.f32 %v1932_v53, %v1930_v15  ;;  %v4165_v10 = vor.u32 %v4350_v5, %v4164_v1  ;;  %v1944_v55 = vmul.f32 %v9525_v22, %v9151_v29  ;;  %v4330_v29 = vld [vmem:[%s9805_s2 + $0x3d4] sm:$0xf0]  ;;  %v4316_v22 = vld [vmem:[%s9805_s2 + $0x36c] sm:$0xf]  ;;  %v2287_v1 = vpop.f32.mrf.mxu3 }
 0x208   :  { %3234 = vmatpush.bf16.msra.mxu3 %v4117_v32  ;;  %3263 = vmatpush.bf16.msra.mxu1 %v4073_v44  ;;  %v4101_v57 = vor.u32 %v4334_v56, %v4100_v48  ;;  %v4057_v42 = vor.u32 %v4320_v41, %v4054_v26  ;;  %v1858_v19 = vadd.f32 %v9585_v59, %v1854_v16  ;;  %v4567_v59 = vld [vmem:[%s9803_s0 + $0x220] sm:$0xff]  ;;  %v2274_v26 = vpop.f32.mrf.mxu2 }
 0x209   :  { %v1937_v17 = vadd.f32 %v1935_v25, %v1933_v24  ;;  %v1938_v39 = vadd.f32 %v1936_v2, %v1934_v9  ;;  %3252 = vmatpush.bf16.msrb.mxu2 %v4165_v10  ;;  %v4169_v20 = vor.u32 %v4348_v36, %v4166_v23  ;;  %v1766_v13 = vadd.f32 %v9529_v61, %v9569_v0  ;;  %v4322_v24 = vld [vmem:[%s9805_s2 + $0x394] sm:$0xf0] }
 0x20a   :  { %v1863_v53 = vmul.f32 %v4567_v59, %v10746_v27  ;;  %v1864_v43 = vmul.f32 %v4568_v14, %v10746_v27  ;;  %v1947_v50 = vmul.f32 %v9554_v11, %v10752_v62  ;;  %v1948_v61 = vmul.f32 %v9561_v49, %v10752_v62  ;;  %v2250_v25 = vpop.f32.mrf.mxu0  ;;  %v2263_v37 = vpop.f32.mrf.mxu1  ;;  %v10762_v62 = vld [vmem:[#allocation60_spill] sm:$0xff] }
 0x20b   :  { %v1941_v54 = vadd.f32 %v1939_v7, %v1937_v17  ;;  %v1942_v63 = vadd.f32 %v1940_v51, %v1938_v39  ;;  %v1951_v0 = vmul.f32 %v9574_v38, %v10755_v34  ;;  %3278 = vmatpush.bf16.msrb.mxu0 %v4169_v20  ;;  %v1861_v40 = vadd.f32 %v9600_v52, %v1857_v35  ;;  %v10763_v38 = vld [vmem:[#allocation52_spill] sm:$0xff]  ;;  %v4052_v35 = vld [vmem:[%s9805_s2 + $0x388] sm:$0xf] }
 0x20c   :  { %3235 = vmatpush.bf16.msra.mxu3 %v4101_v57  ;;  %3264 = vmatpush.bf16.msra.mxu1 %v4057_v42  ;;  %v4085_v33 = vor.u32 %v4330_v29, %v4084_v45  ;;  %v4041_v60 = vor.u32 %v4316_v22, %v4038_v21  ;;  %v1862_v58 = vadd.f32 %v9609_v18, %v1858_v19  ;;  %v4570_v51 = vld [vmem:[%s9803_s0 + $0x238] sm:$0xff]  ;;  %v1970_v39 = vstv %s9733_s1 }
 0x20d   :  { %v1945_v11 = vadd.f32 %v1943_v3, %v1941_v54  ;;  %v1946_v2 = vadd.f32 %v1944_v55, %v1942_v63  ;;  %v1952_v32 = vmul.f32 %v9581_v12, %v10755_v34  ;;  %v1767_v49 = vmax.f32 %v10762_v62, %v9672_v47  ;;  %v4068_v34 = vld [vmem:[%s9805_s2 + $0x3a8] sm:$0xf]  ;;  %v4326_v12 = vld [vmem:[%s9805_s2 + $0x3b4] sm:$0xf0] }
 0x20e   :  { %v1768_v31 = vmax.f32 %v10763_v38, %v1766_v13  ;;  %v1955_v52 = vmul.f32 %v9596_v28, %v10741_v46  ;;  %v1956_v16 = vmul.f32 %v9605_v30, %v10741_v46  ;;  %v1865_v4 = vadd.f32 %v1863_v53, %v1861_v40  ;;  %v4318_v23 = vld [vmem:[%s9805_s2 + $0x374] sm:$0xf0] }
 0x20f   :  { %v1949_v48 = vadd.f32 %v1947_v50, %v1945_v11  ;;  %v1950_v56 = vadd.f32 %v1948_v61, %v1946_v2  ;;  %v1959_v18 = vmul.f32 %v4567_v59, %v10742_v6  ;;  %v1960_v15 = vmul.f32 %v4568_v14, %v10742_v6  ;;  %v4569_v6 = vld [vmem:[%s9803_s0 + $0x230] sm:$0xff]  ;;  %v2289_v13 = vpop.f32.mrf.mxu3 }
 0x210   :  { %3236 = vmatpush.bf16.msra.mxu3 %v4085_v33  ;;  %3265 = vmatpush.bf16.msra.mxu1 %v4041_v60  ;;  %v1866_v28 = vadd.f32 %v1864_v43, %v1862_v58  ;;  %v4069_v30 = vor.u32 %v4326_v12, %v4068_v34  ;;  %v1963_v41 = vmul.f32 %v4569_v6, %v10746_v27  ;;  %v2276_v20 = vpop.f32.mrf.mxu2 }
 0x211   :  { %v1953_v44 = vadd.f32 %v1951_v0, %v1949_v48  ;;  %v1954_v46 = vadd.f32 %v1952_v32, %v1950_v56  ;;  %v1964_v3 = vmul.f32 %v4570_v51, %v10746_v27  ;;  %v2288_v5 = vadd.f32 %v2287_v1, %v2274_v26  ;;  %v4036_v27 = vld [vmem:[%s9805_s2 + $0x368] sm:$0xf] }
 0x212   :  { %v2300_v9 = vpop.f32.mrf.mxu1  ;;  %v2339_v10 = vpop.f32.mrf.mxu0  ;;  %v4053_v36 = vor.u32 %v4322_v24, %v4052_v35  ;;  %v1867_v55 = vmax.f32 %v1767_v49, %v1865_v4  ;;  %v1868_v57 = vmax.f32 %v1768_v31, %v1866_v28  ;;  %v4037_v29 = vor.u32 %v4318_v23, %v4036_v27 }
 0x213   :  { %v1957_v47 = vadd.f32 %v1955_v52, %v1953_v44  ;;  %v1958_v7 = vadd.f32 %v1956_v16, %v1954_v46 }
 0x214   :  { %3237 = vmatpush.bf16.msra.mxu3 %v4069_v30 }
 0x215   :  { %v1961_v42 = vadd.f32 %v1959_v18, %v1957_v47  ;;  %v1962_v45 = vadd.f32 %v1960_v15, %v1958_v7 }
 0x217   :  { %v1965_v19 = vadd.f32 %v1963_v41, %v1961_v42  ;;  %v1966_v17 = vadd.f32 %v1964_v3, %v1962_v45  ;;  %v2313_v40 = vpop.f32.mrf.mxu3 }
 0x218   :  { %3238 = vmatpush.bf16.msra.mxu3 %v4053_v36  ;;  %v2535_v37 = vpop.f32.mrf.mxu2  ;;  %v2314_v60 = vadd.f32 %v2313_v40, %v2300_v9 }
 0x219   :  { %v1967_v22 = vmax.f32 %v1867_v55, %v1965_v19  ;;  %v1968_v21 = vmax.f32 %v1868_v57, %v1966_v17  ;;  %v2536_v33 = vadd.f32 %v2535_v37, %v9659_v8 }
 0x21a   :  { %v2302_v14 = vpop.f32.mrf.mxu1  ;;  %v2341_v43 = vpop.f32.mrf.mxu0 }
 0x21b   :  { %v1971_v59 = vadd.f32 %v1970_v39, %v1967_v22  ;;  %v1972_v53 = vadd.f32 %v1970_v39, %v1968_v21  ;;  %v4356_v14 = vld [vmem:[%s9807_s4 + $0x28] sm:$0xff]  ;;  %v4355_v43 = vld [vmem:[%s9807_s4 + $0x20] sm:$0xff] }
 0x21c   :  { %3239 = vmatpush.bf16.msra.mxu3 %v4037_v29 }
 0x21d   :  { %vm1973_vm7 = vcmp.ge.f32.partialorder %v1971_v59, 0.0  ;;  %v1975_v50 = vmul.f32 0.01, %v1971_v59  ;;  %vm1974_vm8 = vcmp.ge.f32.partialorder %v1972_v53, 0.0  ;;  %v1976_v54 = vmul.f32 0.01, %v1972_v53 }
 0x21f   :  { %v1977_v63 = vsel %vm1973_vm7, %v1971_v59, %v1975_v50  ;;  %v1978_v61 = vsel %vm1974_vm8, %v1972_v53, %v1976_v54  ;;  %v2315_v62 = vpop.f32.mrf.mxu3  ;;  %v4358_v59 = vld [vmem:[%s9807_s4 + $0x38] sm:$0xff]  ;;  %v4357_v53 = vld [vmem:[%s9807_s4 + $0x30] sm:$0xff] }
 0x220   :  { %v2995_v0 = vpack.c.bf16 %v1977_v63, %v1977_v63  ;;  %v2996_v25 = vpack.c.bf16 %v1978_v61, %v1978_v61  ;;  %v2537_v49 = vpop.f32.mrf.mxu2  ;;  %v4354_v63 = vld [vmem:[%s9807_s4 + $0x18] sm:$0xff]  ;;  %v4353_v61 = vld [vmem:[%s9807_s4 + $0x10] sm:$0xff] }
 0x222   :  { %3214 = vmatmul.bf16.vlgmr.msra.gmra.mxu0 %v2995_v0  ;;  %4171 = vmatmul.msk.bf16.vlgmr.msrb.gmra.mxu1 %vm2235_vm1, %v2996_v25  ;;  %v2548_v58 = vpop.f32.mrf.mxu1  ;;  %v2561_v11 = vpop.f32.mrf.mxu0 }
 0x223   :  { %3188 = vmatmul.bf16.vlgmr.msra.gmra.mxu2 %v2995_v0  ;;  %4170 = vmatmul.msk.bf16.vlgmr.msrb.gmra.mxu3 %vm2235_vm1, %v2996_v25  ;;  %v2562_v2 = vadd.f32 %v2561_v11, %v2288_v5  ;;  %v2549_v32 = vadd.f32 %v2548_v58, %v2536_v33  ;;  %v4352_v33 = vld [vmem:[%s9807_s4 + $0x8] sm:$0xff] }
 0x224   :  { %3377 = vmatpush.bf16.msra.mxu2 %v4358_v59 }
 0x227   :  { %v2326_v48 = vpop.f32.mrf.mxu3 }
 0x228   :  { %v2340_v56 = vadd.f32 %v2339_v10, %v2326_v48  ;;  %3378 = vmatpush.bf16.msra.mxu2 %v4357_v53 }
 0x22a   :  { %v2550_v38 = vpop.f32.mrf.mxu1  ;;  %v2563_v31 = vpop.f32.mrf.mxu0 }
 0x22b   :  { %v4351_v38 = vld [vmem:[%s9807_s4] sm:$0xff] }
 0x22c   :  { %3379 = vmatpush.bf16.msra.mxu2 %v4356_v14 }
 0x22f   :  { %v2328_v4 = vpop.f32.mrf.mxu3  ;;  %v2860_v34 = vpop.f32.mrf.mxu2 }
 0x230   :  { %3380 = vmatpush.bf16.msra.mxu2 %v4355_v43 }
 0x232   :  { %3266 = vmatmul.bf16.vlgmr.msra.gmra.mxu1 %v2995_v0  ;;  %4173 = vmatmul.msk.bf16.vlgmr.msrb.gmra.mxu0 %vm2235_vm1, %v2996_v25  ;;  %v2574_v52 = vpop.f32.mrf.mxu1  ;;  %v2626_v16 = vpop.f32.mrf.mxu0 }
 0x233   :  { %4172 = vmatmul.msk.bf16.vlgmr.msrb.gmra.mxu2 %vm2235_vm1, %v2996_v25  ;;  %3240 = vmatmul.bf16.vlgmr.msra.gmra.mxu3 %v2995_v0  ;;  %v2575_v8 = vadd.f32 %v2574_v52, %v2562_v2  ;;  %v3288_v25 = vld [vmem:[%s9806_s3] sm:$0xf] }
 0x234   :  { %3381 = vmatpush.bf16.msra.mxu2 %v4354_v63  ;;  %v3291_v58 = vperm.slane %v3288_v25, 1  ;;  %v3290_v62 = vperm.slane %v3288_v25, 0 }
 0x237   :  { %v2587_v12 = vpop.f32.mrf.mxu3  ;;  %v2862_v6 = vpop.f32.mrf.mxu2 }
 0x238   :  { %v2588_v44 = vadd.f32 %v2587_v12, %v2314_v60  ;;  %3382 = vmatpush.bf16.msra.mxu2 %v4353_v61 }
 0x23a   :  { %v2576_v18 = vpop.f32.mrf.mxu1  ;;  %v2628_v15 = vpop.f32.mrf.mxu0 }
 0x23c   :  { %3383 = vmatpush.bf16.msra.mxu2 %v4352_v33 }
 0x23f   :  { %v2589_v26 = vpop.f32.mrf.mxu3 }
 0x240   :  { %v2925_v7 = vpop.f32.mrf.mxu2  ;;  %3384 = vmatpush.bf16.msra.mxu2 %v4351_v38 }
 0x242   :  { %v2613_v28 = vpop.f32.mrf.mxu1  ;;  %v2886_v46 = vpop.f32.mrf.mxu0 }
 0x243   :  { %v2614_v30 = vadd.f32 %v2613_v28, %v2340_v56  ;;  %v3293_v28 = vperm.slane %v3288_v25, 3 }
 0x245   :  { %v2627_v41 = vadd.f32 %v2626_v16, %v2614_v30 }
 0x247   :  { %v2600_v51 = vpop.f32.mrf.mxu3 }
 0x248   :  { %v2601_v5 = vadd.f32 %v2600_v51, %v2588_v44  ;;  %v2927_v9 = vpop.f32.mrf.mxu2 }
 0x249   :  { %v4360_v9 = vld [vmem:[%s9808_s5] ss:$0 sm:$0xff] }
 0x24a   :  { %v2615_v1 = vpop.f32.mrf.mxu1  ;;  %v2888_v47 = vpop.f32.mrf.mxu0 }
 0x24f   :  { %v2602_v36 = vpop.f32.mrf.mxu3 }
 0x252   :  { %v2899_v3 = vpop.f32.mrf.mxu1  ;;  %v2951_v35 = vpop.f32.mrf.mxu0 }
 0x253   :  { %v2900_v24 = vadd.f32 %v2899_v3, %v2886_v46  ;;  %v3292_v46 = vperm.slane %v3288_v25, 2 }
 0x255   :  { %v2956_v10 = vadd.f32 %v2900_v24, %v2575_v8 }
 0x257   :  { %v2873_v42 = vpop.f32.mrf.mxu3 }
 0x258   :  { %v2874_v27 = vadd.f32 %v2873_v42, %v2860_v34 }
 0x25a   :  { %v2901_v55 = vpop.f32.mrf.mxu1  ;;  %v2953_v57 = vpop.f32.mrf.mxu0  ;;  %v2955_v19 = vadd.f32 %v2874_v27, %v2549_v32 }
 0x25b   :  { %v4361_v55 = vld [vmem:[%s9809_s6] ss:$0 sm:$0xff] }
 0x25f   :  { %v2875_v39 = vpop.f32.mrf.mxu3 }
 0x262   :  { %v2938_v45 = vpop.f32.mrf.mxu1 }
 0x263   :  { %v2952_v23 = vadd.f32 %v2951_v35, %v2938_v45 }
 0x265   :  { %v2958_v17 = vadd.f32 %v2952_v23, %v2627_v41  ;;  %v3401_v23 = vstv %s4206_s18 }
 0x267   :  { %v2912_v22 = vpop.f32.mrf.mxu3 }
 0x268   :  { %v2926_v21 = vadd.f32 %v2925_v7, %v2912_v22 }
 0x26a   :  { %v2940_v29 = vpop.f32.mrf.mxu1  ;;  %v2957_v20 = vadd.f32 %v2926_v21, %v2601_v5 }
 0x26f   :  { %v2914_v13 = vpop.f32.mrf.mxu3 }
 0x29f   :  { %v3215_v50 = vpop.f32.mrf.mxu0  ;;  %v3228_v54 = vpop.f32.mrf.mxu1 }
 0x2a0   :  { %v3229_v0 = vadd.f32 %v3228_v54, %v3215_v50 }
 0x2a2   :  { %v3285_v60 = vadd.f32 %v3229_v0, %v2956_v10 }
 0x2a4   :  { %v3299_v31 = vadd.f32 %v3291_v58, %v3285_v60 }
 0x2a6   :  { %v3189_v37 = vpop.f32.mrf.mxu2  ;;  %v3202_v40 = vpop.f32.mrf.mxu3 }
 0x2a7   :  { %v3217_v11 = vpop.f32.mrf.mxu0  ;;  %v3230_v2 = vpop.f32.mrf.mxu1  ;;  %v3203_v32 = vadd.f32 %v3202_v40, %v3189_v37 }
 0x2a9   :  { %v3284_v49 = vadd.f32 %v3203_v32, %v2955_v19 }
 0x2ab   :  { %v3298_v48 = vadd.f32 %v3290_v62, %v3284_v49 }
 0x2ad   :  { %v3302_v56 = vmax.f32 %v3298_v48, %v3299_v31 }
 0x2ae   :  { %v3191_v52 = vpop.f32.mrf.mxu2  ;;  %v3204_v16 = vpop.f32.mrf.mxu3 }
 0x2af   :  { %v3267_v8 = vpop.f32.mrf.mxu1  ;;  %v3280_v4 = vpop.f32.mrf.mxu0 }
 0x2b0   :  { %v3281_v18 = vadd.f32 %v3280_v4, %v3267_v8 }
 0x2b2   :  { %v3287_v12 = vadd.f32 %v3281_v18, %v2958_v17 }
 0x2b4   :  { %v3301_v26 = vadd.f32 %v3293_v28, %v3287_v12 }
 0x2b6   :  { %v3254_v15 = vpop.f32.mrf.mxu2  ;;  %v3241_v34 = vpop.f32.mrf.mxu3 }
 0x2b7   :  { %v3255_v44 = vadd.f32 %v3254_v15, %v3241_v34  ;;  %v3269_v30 = vpop.f32.mrf.mxu1  ;;  %v3282_v6 = vpop.f32.mrf.mxu0 }
 0x2b9   :  { %v3286_v41 = vadd.f32 %v3255_v44, %v2957_v20 }
 0x2bb   :  { %v3300_v1 = vadd.f32 %v3292_v46, %v3286_v41 }
 0x2bd   :  { %v3303_v47 = vmax.f32 %v3300_v1, %v3301_v26 }
 0x2be   :  { %v3256_v7 = vpop.f32.mrf.mxu2  ;;  %v3243_v51 = vpop.f32.mrf.mxu3 }
 0x2bf   :  { %v3304_v3 = vmax.f32 %v3302_v56, %v3303_v47 }
 0x2c1   :  { %vm3305_vm9 = vcmp.ge.f32.partialorder %v3304_v3, 0.0  ;;  %v3306_v5 = vmul.f32 0.2, %v3304_v3 }
 0x2c3   :  { %v3307_v35 = vsel %vm3305_vm9, %v3304_v3, %v3306_v5 }
 0x2c4   :  { %v3308_v24 = vpack.c.bf16 %v3307_v35, %v3307_v35 }
 0x2c6   :  { %3385 = vmatmul.bf16.vlgmr.msra.gmra.mxu2 %v3308_v24 }
 0x349   :  { %v3386_v10 = vpop.f32.mrf.mxu2 }
 0x34a   :  { %v3387_v36 = vadd.f32 %v4360_v9, %v3386_v10 }
 0x34c   :  { %v3391_v57 = vmul.f32 0.2, %v3387_v36  ;;  %vm3390_vm10 = vcmp.ge.f32.partialorder %v3387_v36, 0.0 }
 0x34e   :  { %v3392_v42 = vsel %vm3390_vm10, %v3387_v36, %v3391_v57 }
 0x34f   :  { %v3397_v45 = vmul.f32 %v4361_v55, %v3392_v42 }
 0x351   :  { %v3388_v27 = vpop.f32.mrf.mxu2  ;;  %3398 = vadd.xlane.f32.xlu0 %v3397_v45 }
 0x3c4   :  { %v3399_v19 = vpop.xlane.xlu0 %3398 }
 0x3c5   :  { %v3402_v17 = vadd.f32 %v3401_v23, %v3399_v19 }
 0x3c7   :  { %3403 = vst [vmem:[%s9810_s7] sm:$0xff] %v3402_v17 }
 0x3c8   :  { %3408 = vsyncpa [#allocation3], 1 }

</bundles_post_ra>
